<compile_context>
chip_gen: v6e
topology: v6e:2x2x1
jax: 0.10.0
libtpu: 0.0.40
codegen_flags: <defaults>
</compile_context>

<pallas_src>
import math

import numpy as np
import jax
import jax.numpy as jnp
from jax.experimental import pallas as pl
from jax.experimental.pallas import tpu as pltpu  # noqa: F401  (TPU backend)

# ----------------------------- config -----------------------------------
B = 2
IMG = 64
PATCH = 16
FH = FW = IMG // PATCH            # 4x4 feature grid
HW = FH * FW                      # 16 image tokens
VIT_DIM = 64
VIT_DEPTH = 2
VIT_HEADS = 2
VIT_MLP = 4 * VIT_DIM
D = 32                            # prompt_embedding_dim / transformer_dim (scaled from 256)
DEC_HEADS = 2
DEC_MLP = 64                      # two-way transformer MLP dim (scaled from 2048)
TWOWAY_DEPTH = 2
NUM_MASK_TOKENS = 4               # num_multimask_outputs(3) + 1
FLOATING_POINT_PROMPTS = ("slice_position",)
C1 = D // 4                       # channels after first upscaling conv-transpose
C2 = D // 8                       # channels after second upscaling conv-transpose


# --------------------------- parameter packing ---------------------------
def _pack(tree, width):
    """Flatten a nested dict of float32 numpy arrays into a single lane-padded,
    sublane-aligned (rows, width) buffer.  2-D leaves become one unit; 3-D
    leaves (n, r, c) become n row-aligned units.  Returns (jnp buffer, index)
    with index[path] = (row_offset, unit_rows, unit_cols, unit_row_stride)."""
    names, arrays = [], []

    def walk(prefix, node):
        if isinstance(node, dict):
            for k in sorted(node):
                walk(prefix + (k,), node[k])
        else:
            names.append("/".join(prefix))
            arrays.append(np.asarray(node, np.float32))

    walk((), tree)
    chunks, index, off = [], {}, 0
    for name, arr in zip(names, arrays):
        if arr.ndim == 2:
            units = [arr]
        elif arr.ndim == 3:
            units = list(arr)
        else:
            raise ValueError(f"{name}: unsupported rank {arr.ndim}")
        r, c = units[0].shape
        if c > width:
            raise ValueError(f"{name}: {c} columns > pack width {width}")
        stride = -(-r // 8) * 8                       # 8-row (sublane) aligned units
        index[name] = (off, r, c, stride)
        for u in units:
            pad = np.zeros((stride, width), np.float32)
            pad[:r, :c] = u
            chunks.append(pad)
            off += stride
    return jnp.asarray(np.concatenate(chunks, axis=0)), index


def _getter(ref, index):
    """Static (trace-time) carve-out of one packed parameter unit."""
    def get(name, i=0):
        off, r, c, stride = index[name]
        start = off + i * stride
        return ref[start:start + r, 0:c]
    return get


# --------------- trace-time helpers (used inside the fused kernel) -------
def _dot(a, b):
    return jnp.dot(a, b, preferred_element_type=jnp.float32)


def _gelu(x):
    # TODO(synk): PyTorch nn.GELU is exact (erf); tanh-approx GELU used here (EUP-friendly).
    return jax.nn.gelu(x, approximate=True)


def _ln(x, g, b, eps):
    mu = jnp.mean(x, axis=-1, keepdims=True)
    var = jnp.mean(jnp.square(x - mu), axis=-1, keepdims=True)
    return (x - mu) * jax.lax.rsqrt(var + eps) * g + b


def _mha(q, k, v, o_w, heads, scale, add_mask):
    """softmax(q k^T * scale + mask) v over the whole batch-stacked row axis,
    with the per-head context folded straight into the matching row-block of
    the output projection (== concat(heads) @ o_w, no lane concatenation).
    `add_mask` is a packed block-diagonal additive mask (0 same batch, -1e9
    across batches), so both batch items run in a single matmul."""
    hd = q.shape[-1] // heads
    out = None
    for h in range(heads):
        sl = slice(h * hd, (h + 1) * hd)
        s = jax.lax.dot_general(q[:, sl], k[:, sl], (((1,), (1,)), ((), ())),
                                preferred_element_type=jnp.float32) * scale + add_mask
        s = s - jnp.max(s, axis=-1, keepdims=True)
        e = jnp.exp(s)
        p = e / jnp.sum(e, axis=-1, keepdims=True)
        ctx = _dot(p, v[:, sl])
        contrib = _dot(ctx, o_w[sl, :])
        out = contrib if out is None else out + contrib
    return out


# ----------------------------- fused kernel ------------------------------
def _make_fused_kernel(enc_index, dec_index, n_fp):
    """One pallas_call for the whole SliceTrackSam forward."""
    T = 1 + NUM_MASK_TOKENS + n_fp          # iou token + mask tokens + fp prompts
    fp_names = FLOATING_POINT_PROMPTS[:n_fp]

    def kernel(patches_ref, patch_w_ref, enc_ref, dec_ref, fpv_ref, masks_ref, iou_ref):
        ep = _getter(enc_ref, enc_index)
        dp = _getter(dec_ref, dec_index)
        rows = B * HW

        # ---------------- image encoder: patch embed + ViT + SAM neck --------------
        # patch embedding (16x16/s16 conv == per-patch matmul) + pre-tiled abs pos.
        x = _dot(patches_ref[...], patch_w_ref[...]) + ep("patch_b") + ep("pos_t")
        enc_mask = ep("attn_mask")
        vit_scale = (VIT_DIM // VIT_HEADS) ** -0.5
        # TODO(synk): full SAM ViT uses windowed attention + decomposed rel-pos; omitted.
        for i in range(VIT_DEPTH):
            h = _ln(x, ep("blocks/ln1_g", i), ep("blocks/ln1_b", i), 1e-6)
            qkv = _dot(h, ep("blocks/qkv_w", i)) + ep("blocks/qkv_b", i)
            attn = _mha(qkv[:, 0:VIT_DIM], qkv[:, VIT_DIM:2 * VIT_DIM],
                        qkv[:, 2 * VIT_DIM:3 * VIT_DIM],
                        ep("blocks/proj_w", i), VIT_HEADS, vit_scale, enc_mask)
            x = x + attn + ep("blocks/proj_b", i)
            h = _ln(x, ep("blocks/ln2_g", i), ep("blocks/ln2_b", i), 1e-6)
            h = _gelu(_dot(h, ep("blocks/mlp1_w", i)) + ep("blocks/mlp1_b", i))
            x = x + _dot(h, ep("blocks/mlp2_w", i)) + ep("blocks/mlp2_b", i)

        # SAM neck: 1x1 conv -> LN2d -> 3x3 conv (zero pad, shift-gather on the MXU)
        # -> LN2d.  TODO(synk): pltpu.roll (XLU) would also work here; a precomputed
        # 0/1 shift matrix is used instead to stay safe in interpret mode.
        x = _ln(_dot(x, ep("neck_c1")), ep("neck_ln1_g"), ep("neck_ln1_b"), 1e-6)
        shifted = _dot(ep("neck_shift"), x)                 # [9*rows, D] all 9 taps at once
        acc = _dot(shifted[0:rows], ep("neck_c2", 0))
        for tap in range(1, 9):
            acc = acc + _dot(shifted[tap * rows:(tap + 1) * rows], ep("neck_c2", tap))
        feats = _ln(acc, ep("neck_ln2_g"), ep("neck_ln2_b"), 1e-6)      # [B*HW, D]

        # ---------------- prompt encoder (fp prompts) + token assembly -------------
        pe_all = dp("pe_t")                                  # dense PE, pre-tiled [B*HW, D]
        keys = feats + dp("no_mask")                         # dense "no mask" embedding
        tok0 = dp("tok_base")                                # [B*T, D] (iou+mask tokens)
        if n_fp:
            per_prompt = []
            for j, name in enumerate(fp_names):
                h = jnp.maximum(fpv_ref[:, j:j + 1] * dp(f"fp/{name}/l1_w")
                                + dp(f"fp/{name}/l1_b"), 0.0)
                per_prompt.append(_dot(h, dp(f"fp/{name}/l2_w")) + dp(f"fp/{name}/l2_b"))
            if n_fp == 1:
                emb_all = per_prompt[0]                      # rows already batch-major
            else:
                emb_all = jnp.concatenate(
                    [per_prompt[j][b:b + 1] for b in range(B) for j in range(n_fp)], axis=0)
            tok0 = tok0 + _dot(dp("tok_sel"), emb_all)       # scatter prompt tokens

        # ---------------- two-way transformer ----------------
        m_tt, m_ti, m_it = dp("m_tt"), dp("m_ti"), dp("m_it")

        def dec_attn(prefix, idx, q_in, k_in, v_in, add_mask):
            q = _dot(q_in, dp(prefix + "/qw", idx)) + dp(prefix + "/qb", idx)
            k = _dot(k_in, dp(prefix + "/kw", idx)) + dp(prefix + "/kb", idx)
            v = _dot(v_in, dp(prefix + "/vw", idx)) + dp(prefix + "/vb", idx)
            hd = q.shape[-1] // DEC_HEADS
            return (_mha(q, k, v, dp(prefix + "/ow", idx), DEC_HEADS,
                         1.0 / math.sqrt(hd), add_mask) + dp(prefix + "/ob", idx))

        queries = tok0
        for i in range(TWOWAY_DEPTH):
            if i == 0:                                       # skip_first_layer_pe
                queries = dec_attn("twoway/self", i, queries, queries, queries, m_tt)
            else:
                qi = queries + tok0
                queries = queries + dec_attn("twoway/self", i, qi, qi, queries, m_tt)
            queries = _ln(queries, dp("twoway/ln1_g", i), dp("twoway/ln1_b", i), 1e-5)
            qi = queries + tok0
            ki = keys + pe_all
            queries = queries + dec_attn("twoway/ct2i", i, qi, ki, keys, m_ti)
            queries = _ln(queries, dp("twoway/ln2_g", i), dp("twoway/ln2_b", i), 1e-5)
            z = jnp.maximum(_dot(queries, dp("twoway/mlp1_w", i))
                            + dp("twoway/mlp1_b", i), 0.0)
            z = _dot(z, dp("twoway/mlp2_w", i)) + dp("twoway/mlp2_b", i)
            queries = _ln(queries + z, dp("twoway/ln3_g", i), dp("twoway/ln3_b", i), 1e-5)
            qi = queries + tok0
            ki = keys + pe_all
            keys = keys + dec_attn("twoway/ci2t", i, ki, qi, queries, m_it)
            keys = _ln(keys, dp("twoway/ln4_g", i), dp("twoway/ln4_b", i), 1e-5)

        qi = queries + tok0
        ki = keys + pe_all
        queries = queries + dec_attn("final", 0, qi, ki, keys, m_ti)
        queries = _ln(queries, dp("lnf_g"), dp("lnf_b"), 1e-5)

        # ---------------- IoU head (computed for faithfulness; caller discards) ----
        iou_in = jnp.concatenate([queries[b * T:b * T + 1] for b in range(B)], axis=0)
        z = jnp.maximum(_dot(iou_in, dp("iou/w1")) + dp("iou/b1"), 0.0)
        z = jnp.maximum(_dot(z, dp("iou/w2")) + dp("iou/b2"), 0.0)
        iou_ref[...] = _dot(z, dp("iou/w3")) + dp("iou/b3")

        # ---------------- per-mask-token hypernetwork MLPs --------------------------
        h_parts = []
        for i in range(NUM_MASK_TOKENS):
            xi = jnp.concatenate(
                [queries[b * T + 1 + i:b * T + 2 + i] for b in range(B)], axis=0)   # [B, D]
            z = jnp.maximum(_dot(xi, dp("hyper/w1", i)) + dp("hyper/b1", i), 0.0)
            z = jnp.maximum(_dot(z, dp("hyper/w2", i)) + dp("hyper/b2", i), 0.0)
            h_parts.append(_dot(z, dp("hyper/w3", i)) + dp("hyper/b3", i))           # [B, C2]
        hyper_rows = jnp.concatenate(h_parts, axis=1)        # [B, NUM_MASK_TOKENS*C2]

        # ---------------- collapsed sub-pixel upscaling + mask synthesis ------------
        # ConvT(2,2)->LN2d->GELU->ConvT(2,2)->GELU done with single matmuls against
        # block-diagonal weights prebuilt at init; grouped LN via a group-avg matmul.
        y = _dot(keys, dp("up1_w")) + dp("up1_b_t")          # [B*HW, 4*C1]
        mu = _dot(y, dp("upln_avg"))
        var = _dot(jnp.square(y - mu), dp("upln_avg"))
        y = (y - mu) * jax.lax.rsqrt(var + 1e-6) * dp("upln_g_t") + dp("upln_b_t")
        y = _gelu(y)
        u = _gelu(_dot(y, dp("up2_bd")) + dp("up2_b_t"))     # [B*HW, 16*C2]

        # Build the per-batch block-diagonal hyper weight from the lane-major
        # hypernetwork row with a broadcast-multiply and one matmul (no transposes).
        hyp_a, hyp_bt, hyp_bd = dp("hyp_a"), dp("hyp_bt"), dp("hyp_bd")
        mask_parts = []
        for b in range(B):
            w_b = _dot(hyp_a * hyper_rows[b:b + 1, :], hyp_bt) * hyp_bd   # [16*C2, 16*NT]
            mask_parts.append(_dot(u[b * HW:(b + 1) * HW], w_b))          # [HW, 16*NT]
        # Single lane-dense store: [HW, B*16*NUM_MASK_TOKENS] == [16, 128].
        masks_ref[...] = jnp.concatenate(mask_parts, axis=1)

    return kernel


# ----------------------------- wrapper -----------------------------------
def _extract_patches(image):
    bx = image.shape[0]
    x = image.reshape(bx, 3, FH, PATCH, FW, PATCH)
    x = jnp.transpose(x, (0, 2, 4, 1, 3, 5))
    return x.reshape(bx * FH * FW, 3 * PATCH * PATCH)


def slice_track_sam_forward(params, enc_index, dec_index, image, prev_mask=None,
                            return_prompt_embeddings=False, **prompts):
    """Mirrors SliceTrackSam.forward (use_prev_mask_prompt=False, no auto resize)."""
    # TODO(synk): auto_resize_image_to_native bicubic interpolation and the random
    # prev-mask-prompt dropout path (use_prev_mask_prompt=True) are not exercised.
    del prev_mask
    bx = image.shape[0]
    if bx != B:
        raise ValueError(f"packed parameter tables were built for batch={B}, got {bx}")
    for name in prompts:
        if name not in FLOATING_POINT_PROMPTS:
            raise ValueError(f"Unknown prompt: {name}")
    for name in FLOATING_POINT_PROMPTS:
        if name not in prompts:
            raise ValueError(f"Missing prompt: {name}")
    n_fp = len(FLOATING_POINT_PROMPTS)

    if n_fp:
        fp_vals = jnp.concatenate(
            [prompts[n].astype(jnp.float32).reshape(bx, 1) for n in FLOATING_POINT_PROMPTS],
            axis=1)
    else:
        fp_vals = jnp.zeros((bx, 1), jnp.float32)            # dummy (unused)

    patches = _extract_patches(image.astype(jnp.float32))

    # One fused pallas_call; no grid -> every operand/result is a single whole-array
    # VMEM block (total footprint ~4 MiB, far below any generation's VMEM).
    # TODO(synk): on v7x a (B,) "parallel" grid over the 2 TensorCores would ~halve
    # latency; kept single-core for v5e/v6e portability.
    # TODO(synk): on v6e/v7x the packed weights/activations could be bf16 at the MXU;
    # kept f32 everywhere (v5e has no bf16 VPU/EUP).
    masks_pk, _iou_pred = pl.pallas_call(
        _make_fused_kernel(enc_index, dec_index, n_fp),
        out_shape=(
            jax.ShapeDtypeStruct((HW, B * 16 * NUM_MASK_TOKENS), jnp.float32),
            jax.ShapeDtypeStruct((B, NUM_MASK_TOKENS), jnp.float32),
        ),
    )(patches, params["patch_w"], params["enc_pack"], params["dec_pack"], fp_vals)

    # Tiny XLA pixel-shuffle epilogue:
    # column = b*64 + (dy*2+dx)*16 + (dy2*2+dx2)*4 + t  ->  [B, tokens, 4*FH, 4*FW]
    m = masks_pk.reshape(FH, FW, B, 2, 2, 2, 2, NUM_MASK_TOKENS)
    m = jnp.transpose(m, (2, 7, 0, 3, 5, 1, 4, 6))
    masks = m.reshape(B, NUM_MASK_TOKENS, 4 * FH, 4 * FW)
    mask_logits = masks[:, 0:1]                              # multimask_output=False

    if return_prompt_embeddings:
        sparse = jnp.zeros((bx, 0, D), jnp.float32)
        for name in FLOATING_POINT_PROMPTS:
            fp = params["fp_raw"][name]
            v = prompts[name].astype(jnp.float32).reshape(bx, 1)
            emb = jnp.maximum(v @ fp["l1_w"] + fp["l1_b"], 0.0) @ fp["l2_w"] + fp["l2_b"]
            sparse = jnp.concatenate([sparse, emb[:, None, :]], axis=1)
        dense = jnp.broadcast_to(params["no_mask_raw"].reshape(1, D, 1, 1), (1, D, FH, FW))
        return mask_logits, sparse, dense
    return mask_logits


# ----------------------------- parameter init ---------------------------
def init_params(seed=42):
    rng = np.random.default_rng(seed)

    def w(*shape):
        return (0.02 * rng.standard_normal(shape)).astype(np.float32)

    def zeros(*shape):
        return np.zeros(shape, np.float32)

    def ones(*shape):
        return np.ones(shape, np.float32)

    n_fp = len(FLOATING_POINT_PROMPTS)
    T = 1 + NUM_MASK_TOKENS + n_fp
    NT = NUM_MASK_TOKENS
    rows = B * HW
    NEG = -1e9

    # ---- encoder structural constants ----
    pos_t = np.tile(w(HW, VIT_DIM), (B, 1))                  # abs-pos, pre-tiled over batch
    enc_attn_mask = np.full((rows, rows), NEG, np.float32)   # block-diag batch mask
    for b in range(B):
        enc_attn_mask[b * HW:(b + 1) * HW, b * HW:(b + 1) * HW] = 0.0
    # 3x3-conv shift-gather matrix: row tap*rows+r holds the zero-padded neighbour of r.
    neck_shift = np.zeros((9 * rows, rows), np.float32)
    taps = [(oy, ox) for oy in (-1, 0, 1) for ox in (-1, 0, 1)]
    for tap, (oy, ox) in enumerate(taps):
        for r in range(rows):
            bch, hw = divmod(r, HW)
            yy, xx = hw // FW + oy, hw % FW + ox
            if 0 <= yy < FH and 0 <= xx < FW:
                neck_shift[tap * rows + r, bch * HW + yy * FW + xx] = 1.0

    enc_tree = {
        "patch_b": zeros(1, VIT_DIM),
        "pos_t": pos_t,
        "attn_mask": enc_attn_mask,
        "blocks": {
            "ln1_g": ones(VIT_DEPTH, 1, VIT_DIM), "ln1_b": zeros(VIT_DEPTH, 1, VIT_DIM),
            "qkv_w": w(VIT_DEPTH, VIT_DIM, 3 * VIT_DIM),
            "qkv_b": zeros(VIT_DEPTH, 1, 3 * VIT_DIM),
            "proj_w": w(VIT_DEPTH, VIT_DIM, VIT_DIM), "proj_b": zeros(VIT_DEPTH, 1, VIT_DIM),
            "ln2_g": ones(VIT_DEPTH, 1, VIT_DIM), "ln2_b": zeros(VIT_DEPTH, 1, VIT_DIM),
            "mlp1_w": w(VIT_DEPTH, VIT_DIM, VIT_MLP), "mlp1_b": zeros(VIT_DEPTH, 1, VIT_MLP),
            "mlp2_w": w(VIT_DEPTH, VIT_MLP, VIT_DIM), "mlp2_b": zeros(VIT_DEPTH, 1, VIT_DIM),
        },
        "neck_c1": w(VIT_DIM, D),
        "neck_ln1_g": ones(1, D), "neck_ln1_b": zeros(1, D),
        "neck_shift": neck_shift,
        "neck_c2": w(9, D, D),                               # [(ky*3+kx), Cin, Cout]
        "neck_ln2_g": ones(1, D), "neck_ln2_b": zeros(1, D),
    }

    # ---- decoder / prompt-encoder structural constants ----
    pe_gauss = rng.standard_normal((2, D // 2)).astype(np.float32)
    ys = (np.arange(FH, dtype=np.float32) + 0.5) / FH
    xs = (np.arange(FW, dtype=np.float32) + 0.5) / FW
    gy, gx = np.meshgrid(ys, xs, indexing="ij")
    coords = 2.0 * np.stack([gx, gy], axis=-1).reshape(HW, 2) - 1.0      # (x, y) as in SAM
    proj = 2.0 * np.pi * coords @ pe_gauss
    pe_t = np.tile(np.concatenate([np.sin(proj), np.cos(proj)], axis=-1).astype(np.float32),
                   (B, 1))                                                # dense PE, pre-tiled

    iou_token, mask_tokens = w(1, D), w(NT, D)
    out_tok = np.concatenate([iou_token, mask_tokens], axis=0)
    tok_base = np.zeros((B * T, D), np.float32)
    tok_sel = np.zeros((B * T, max(B * n_fp, 1)), np.float32)
    for b in range(B):
        tok_base[b * T:b * T + 1 + NT] = out_tok
        for j in range(n_fp):
            tok_sel[b * T + 1 + NT + j, b * n_fp + j] = 1.0

    def blk_mask(lq, lk):
        m = np.full((B * lq, B * lk), NEG, np.float32)
        for b in range(B):
            m[b * lq:(b + 1) * lq, b * lk:(b + 1) * lk] = 0.0
        return m

    # ConvTranspose2d(k=2, s=2) x2 in collapsed sub-pixel form.
    # TODO(synk): permute from PyTorch's (Cin, Cout, kH, kW) layout when porting checkpoints.
    up1_w, up1_b = w(D, 4 * C1), zeros(1, C1)
    upln_g, upln_b = ones(1, C1), zeros(1, C1)
    up2_w, up2_b = w(C1, 4 * C2), zeros(1, C2)
    upln_avg = np.zeros((4 * C1, 4 * C1), np.float32)
    up2_bd = np.zeros((4 * C1, 16 * C2), np.float32)
    for s in range(4):
        upln_avg[s * C1:(s + 1) * C1, s * C1:(s + 1) * C1] = 1.0 / C1
        for s2 in range(4):
            sp = s * 4 + s2
            up2_bd[s * C1:(s + 1) * C1, sp * C2:(sp + 1) * C2] = up2_w[:, s2 * C2:(s2 + 1) * C2]

    # Expansion matrices: turn the [1, NT*C2] hypernetwork row into the per-batch
    # block-diagonal [(sp,c), (sp,t)] mask weight with one broadcast-mul + one matmul.
    hyp_a = np.zeros((16 * C2, NT * C2), np.float32)
    hyp_bt = np.zeros((NT * C2, 16 * NT), np.float32)
    hyp_bd = np.zeros((16 * C2, 16 * NT), np.float32)
    for sp in range(16):
        hyp_bd[sp * C2:(sp + 1) * C2, sp * NT:(sp + 1) * NT] = 1.0
        for c in range(C2):
            for t in range(NT):
                hyp_a[sp * C2 + c, t * C2 + c] = 1.0
                hyp_bt[t * C2 + c, sp * NT + t] = 1.0

    def attn_stack(idim, depth):
        return {"qw": w(depth, D, idim), "qb": zeros(depth, 1, idim),
                "kw": w(depth, D, idim), "kb": zeros(depth, 1, idim),
                "vw": w(depth, D, idim), "vb": zeros(depth, 1, idim),
                "ow": w(depth, idim, D), "ob": zeros(depth, 1, D)}

    fp_raw = {name: {"l1_w": w(1, 128), "l1_b": zeros(1, 128),
                     "l2_w": w(128, D), "l2_b": zeros(1, D)}
              for name in FLOATING_POINT_PROMPTS}
    no_mask = w(1, D)

    dec_tree = {
        "pe_t": pe_t,
        "no_mask": no_mask,
        "tok_base": tok_base,
        "tok_sel": tok_sel,
        "m_tt": blk_mask(T, T), "m_ti": blk_mask(T, HW), "m_it": blk_mask(HW, T),
        "fp": fp_raw,
        "twoway": {
            "self": attn_stack(D, TWOWAY_DEPTH),
            "ct2i": attn_stack(D // 2, TWOWAY_DEPTH),
            "ci2t": attn_stack(D // 2, TWOWAY_DEPTH),
            "ln1_g": ones(TWOWAY_DEPTH, 1, D), "ln1_b": zeros(TWOWAY_DEPTH, 1, D),
            "ln2_g": ones(TWOWAY_DEPTH, 1, D), "ln2_b": zeros(TWOWAY_DEPTH, 1, D),
            "ln3_g": ones(TWOWAY_DEPTH, 1, D), "ln3_b": zeros(TWOWAY_DEPTH, 1, D),
            "ln4_g": ones(TWOWAY_DEPTH, 1, D), "ln4_b": zeros(TWOWAY_DEPTH, 1, D),
            "mlp1_w": w(TWOWAY_DEPTH, D, DEC_MLP), "mlp1_b": zeros(TWOWAY_DEPTH, 1, DEC_MLP),
            "mlp2_w": w(TWOWAY_DEPTH, DEC_MLP, D), "mlp2_b": zeros(TWOWAY_DEPTH, 1, D),
        },
        "final": attn_stack(D // 2, 1),
        "lnf_g": ones(1, D), "lnf_b": zeros(1, D),
        "iou": {"w1": w(D, D), "b1": zeros(1, D), "w2": w(D, D), "b2": zeros(1, D),
                "w3": w(D, NT), "b3": zeros(1, NT)},
        "hyper": {"w1": w(NT, D, D), "b1": zeros(NT, 1, D),
                  "w2": w(NT, D, D), "b2": zeros(NT, 1, D),
                  "w3": w(NT, D, C2), "b3": zeros(NT, 1, C2)},
        "up1_w": up1_w, "up1_b_t": np.tile(up1_b, (1, 4)),
        "upln_g_t": np.tile(upln_g, (1, 4)), "upln_b_t": np.tile(upln_b, (1, 4)),
        "upln_avg": upln_avg,
        "up2_bd": up2_bd, "up2_b_t": np.tile(up2_b, (1, 16)),
        "hyp_a": hyp_a, "hyp_bt": hyp_bt, "hyp_bd": hyp_bd,
    }

    enc_pack, enc_index = _pack(enc_tree, 256)
    dec_pack, dec_index = _pack(dec_tree, 128)
    params = {
        "patch_w": jnp.asarray(w(3 * PATCH * PATCH, VIT_DIM)),
        "enc_pack": enc_pack,
        "dec_pack": dec_pack,
        "fp_raw": {k: {kk: jnp.asarray(vv) for kk, vv in v.items()} for k, v in fp_raw.items()},
        "no_mask_raw": jnp.asarray(no_mask),
    }
    return params, enc_index, dec_index


# ----------------------------- main -------------------------------------
if __name__ == "__main__":
    params, enc_idx, dec_idx = init_params(seed=42)

    ikey, skey = jax.random.split(jax.random.PRNGKey(0))
    image = jax.random.normal(ikey, (B, 3, IMG, IMG), jnp.float32)         # NCHW
    slice_position = jax.random.uniform(skey, (B, 1), jnp.float32)

    fwd = jax.jit(lambda pr, img, sp: slice_track_sam_forward(
        pr, enc_idx, dec_idx, img, slice_position=sp))
    mask_logits = jax.block_until_ready(fwd(params, image, slice_position))

    assert mask_logits.shape == (B, 1, 4 * FH, 4 * FW), mask_logits.shape
    assert bool(jnp.all(jnp.isfinite(mask_logits)))
    print("KERNEL_OK")
</pallas_src>

<mosaic_0001>
module attributes {stable_mosaic.version = 11 : i64} {
  func.func @kernel(%arg0: memref<32x768xf32, #tpu.memory_space<vmem>>, %arg1: memref<768x64xf32, #tpu.memory_space<vmem>>, %arg2: memref<1768x256xf32, #tpu.memory_space<vmem>>, %arg3: memref<2568x128xf32, #tpu.memory_space<vmem>>, %arg4: memref<2x1xf32, #tpu.memory_space<vmem>>, %arg5: memref<16x128xf32, #tpu.memory_space<vmem>>, %arg6: memref<2x4xf32, #tpu.memory_space<vmem>>) attributes {dimension_semantics = [], scalar_prefetch = 0 : i64, scratch_operands = 0 : i64, tpu.core_type = #tpu.core_type<tc>} {
    %c0 = arith.constant 0 : index
    %c0_0 = arith.constant 0 : index
    %0 = vector.load %arg0[%c0, %c0_0] : memref<32x768xf32, #tpu.memory_space<vmem>>, vector<32x768xf32>
    %c0_1 = arith.constant 0 : index
    %c0_2 = arith.constant 0 : index
    %1 = vector.load %arg1[%c0_1, %c0_2] : memref<768x64xf32, #tpu.memory_space<vmem>>, vector<768x64xf32>
    %cst = arith.constant dense<0.000000e+00> : vector<32x64xf32>
    %2 = tpu.matmul %0, %1, %cst {dimension_numbers = #tpu.dot_dimension_numbers<[1], [0], [0], [1], [0, 0, 1, 1], [], []>} : vector<32x768xf32>, vector<768x64xf32>, vector<32x64xf32> -> vector<32x64xf32>
    %c1728 = arith.constant 1728 : index
    %c0_3 = arith.constant 0 : index
    %3 = vector.load %arg2[%c1728, %c0_3] : memref<1768x256xf32, #tpu.memory_space<vmem>>, vector<1x64xf32>
    %4 = vector.broadcast %3 : vector<1x64xf32> to vector<32x64xf32>
    %5 = arith.addf %2, %4 : vector<32x64xf32>
    %c1736 = arith.constant 1736 : index
    %c0_4 = arith.constant 0 : index
    %6 = vector.load %arg2[%c1736, %c0_4] : memref<1768x256xf32, #tpu.memory_space<vmem>>, vector<32x64xf32>
    %7 = arith.addf %5, %6 : vector<32x64xf32>
    %c0_5 = arith.constant 0 : index
    %c0_6 = arith.constant 0 : index
    %8 = vector.load %arg2[%c0_5, %c0_6] : memref<1768x256xf32, #tpu.memory_space<vmem>>, vector<32x32xf32>
    %c48 = arith.constant 48 : index
    %c0_7 = arith.constant 0 : index
    %9 = vector.load %arg2[%c48, %c0_7] : memref<1768x256xf32, #tpu.memory_space<vmem>>, vector<1x64xf32>
    %c32 = arith.constant 32 : index
    %c0_8 = arith.constant 0 : index
    %10 = vector.load %arg2[%c32, %c0_8] : memref<1768x256xf32, #tpu.memory_space<vmem>>, vector<1x64xf32>
    %cst_9 = arith.constant dense<0.000000e+00> : vector<32xf32>
    %11 = vector.multi_reduction <add>, %7, %cst_9 [1] : vector<32x64xf32> to vector<32xf32>
    %12 = vector.shape_cast %11 : vector<32xf32> to vector<32x1xf32>
    %cst_10 = arith.constant 6.400000e+01 : f32
    %13 = vector.broadcast %cst_10 : f32 to vector<32x1xf32>
    %14 = arith.divf %12, %13 : vector<32x1xf32>
    %15 = vector.broadcast %14 : vector<32x1xf32> to vector<32x64xf32>
    %16 = arith.subf %7, %15 : vector<32x64xf32>
    %17 = arith.mulf %16, %16 : vector<32x64xf32>
    %cst_11 = arith.constant dense<0.000000e+00> : vector<32xf32>
    %18 = vector.multi_reduction <add>, %17, %cst_11 [1] : vector<32x64xf32> to vector<32xf32>
    %19 = vector.shape_cast %18 : vector<32xf32> to vector<32x1xf32>
    %cst_12 = arith.constant 6.400000e+01 : f32
    %20 = vector.broadcast %cst_12 : f32 to vector<32x1xf32>
    %21 = arith.divf %19, %20 : vector<32x1xf32>
    %22 = vector.broadcast %14 : vector<32x1xf32> to vector<32x64xf32>
    %23 = arith.subf %7, %22 : vector<32x64xf32>
    %cst_13 = arith.constant 9.99999997E-7 : f32
    %24 = vector.broadcast %cst_13 : f32 to vector<32x1xf32>
    %25 = arith.addf %21, %24 : vector<32x1xf32>
    %26 = math.rsqrt %25 : vector<32x1xf32>
    %27 = vector.broadcast %26 : vector<32x1xf32> to vector<32x64xf32>
    %28 = arith.mulf %23, %27 : vector<32x64xf32>
    %29 = vector.broadcast %9 : vector<1x64xf32> to vector<32x64xf32>
    %30 = arith.mulf %28, %29 : vector<32x64xf32>
    %31 = vector.broadcast %10 : vector<1x64xf32> to vector<32x64xf32>
    %32 = arith.addf %30, %31 : vector<32x64xf32>
    %c928 = arith.constant 928 : index
    %c0_14 = arith.constant 0 : index
    %33 = vector.load %arg2[%c928, %c0_14] : memref<1768x256xf32, #tpu.memory_space<vmem>>, vector<64x192xf32>
    %cst_15 = arith.constant dense<0.000000e+00> : vector<32x192xf32>
    %34 = tpu.matmul %32, %33, %cst_15 {dimension_numbers = #tpu.dot_dimension_numbers<[1], [0], [0], [1], [0, 0, 1, 1], [], []>} : vector<32x64xf32>, vector<64x192xf32>, vector<32x192xf32> -> vector<32x192xf32>
    %c912 = arith.constant 912 : index
    %c0_16 = arith.constant 0 : index
    %35 = vector.load %arg2[%c912, %c0_16] : memref<1768x256xf32, #tpu.memory_space<vmem>>, vector<1x192xf32>
    %36 = vector.broadcast %35 : vector<1x192xf32> to vector<32x192xf32>
    %37 = arith.addf %34, %36 : vector<32x192xf32>
    %38 = vector.extract_strided_slice %37 {offsets = [0, 0], sizes = [32, 64], strides = [1, 1]} : vector<32x192xf32> to vector<32x64xf32>
    %39 = vector.extract_strided_slice %37 {offsets = [0, 64], sizes = [32, 64], strides = [1, 1]} : vector<32x192xf32> to vector<32x64xf32>
    %40 = vector.extract_strided_slice %37 {offsets = [0, 128], sizes = [32, 64], strides = [1, 1]} : vector<32x192xf32> to vector<32x64xf32>
    %c784 = arith.constant 784 : index
    %c0_17 = arith.constant 0 : index
    %41 = vector.load %arg2[%c784, %c0_17] : memref<1768x256xf32, #tpu.memory_space<vmem>>, vector<64x64xf32>
    %42 = vector.extract_strided_slice %38 {offsets = [0, 0], sizes = [32, 32], strides = [1, 1]} : vector<32x64xf32> to vector<32x32xf32>
    %43 = vector.extract_strided_slice %39 {offsets = [0, 0], sizes = [32, 32], strides = [1, 1]} : vector<32x64xf32> to vector<32x32xf32>
    %cst_18 = arith.constant dense<0.000000e+00> : vector<32x32xf32>
    %44 = tpu.matmul %42, %43, %cst_18 {dimension_numbers = #tpu.dot_dimension_numbers<[1], [1], [0], [0], [0, 0, 1, 0], [], []>} : vector<32x32xf32>, vector<32x32xf32>, vector<32x32xf32> -> vector<32x32xf32>
    %cst_19 = arith.constant 0.176776692 : f32
    %45 = vector.broadcast %cst_19 : f32 to vector<32x32xf32>
    %46 = arith.mulf %44, %45 : vector<32x32xf32>
    %47 = arith.addf %46, %8 : vector<32x32xf32>
    %cst_20 = arith.constant dense<0xFF800000> : vector<32xf32>
    %48 = vector.multi_reduction <maximumf>, %47, %cst_20 [1] : vector<32x32xf32> to vector<32xf32>
    %49 = vector.shape_cast %48 : vector<32xf32> to vector<32x1xf32>
    %50 = vector.broadcast %49 : vector<32x1xf32> to vector<32x32xf32>
    %51 = arith.subf %47, %50 : vector<32x32xf32>
    %52 = math.exp %51 : vector<32x32xf32>
    %cst_21 = arith.constant dense<0.000000e+00> : vector<32xf32>
    %53 = vector.multi_reduction <add>, %52, %cst_21 [1] : vector<32x32xf32> to vector<32xf32>
    %54 = vector.shape_cast %53 : vector<32xf32> to vector<32x1xf32>
    %55 = vector.broadcast %54 : vector<32x1xf32> to vector<32x32xf32>
    %56 = arith.divf %52, %55 : vector<32x32xf32>
    %57 = vector.extract_strided_slice %40 {offsets = [0, 0], sizes = [32, 32], strides = [1, 1]} : vector<32x64xf32> to vector<32x32xf32>
    %cst_22 = arith.constant dense<0.000000e+00> : vector<32x32xf32>
    %58 = tpu.matmul %56, %57, %cst_22 {dimension_numbers = #tpu.dot_dimension_numbers<[1], [0], [0], [1], [0, 0, 1, 1], [], []>} : vector<32x32xf32>, vector<32x32xf32>, vector<32x32xf32> -> vector<32x32xf32>
    %59 = vector.extract_strided_slice %41 {offsets = [0, 0], sizes = [32, 64], strides = [1, 1]} : vector<64x64xf32> to vector<32x64xf32>
    %cst_23 = arith.constant dense<0.000000e+00> : vector<32x64xf32>
    %60 = tpu.matmul %58, %59, %cst_23 {dimension_numbers = #tpu.dot_dimension_numbers<[1], [0], [0], [1], [0, 0, 1, 1], [], []>} : vector<32x32xf32>, vector<32x64xf32>, vector<32x64xf32> -> vector<32x64xf32>
    %61 = vector.extract_strided_slice %38 {offsets = [0, 32], sizes = [32, 32], strides = [1, 1]} : vector<32x64xf32> to vector<32x32xf32>
    %62 = vector.extract_strided_slice %39 {offsets = [0, 32], sizes = [32, 32], strides = [1, 1]} : vector<32x64xf32> to vector<32x32xf32>
    %cst_24 = arith.constant dense<0.000000e+00> : vector<32x32xf32>
    %63 = tpu.matmul %61, %62, %cst_24 {dimension_numbers = #tpu.dot_dimension_numbers<[1], [1], [0], [0], [0, 0, 1, 0], [], []>} : vector<32x32xf32>, vector<32x32xf32>, vector<32x32xf32> -> vector<32x32xf32>
    %cst_25 = arith.constant 0.176776692 : f32
    %64 = vector.broadcast %cst_25 : f32 to vector<32x32xf32>
    %65 = arith.mulf %63, %64 : vector<32x32xf32>
    %66 = arith.addf %65, %8 : vector<32x32xf32>
    %cst_26 = arith.constant dense<0xFF800000> : vector<32xf32>
    %67 = vector.multi_reduction <maximumf>, %66, %cst_26 [1] : vector<32x32xf32> to vector<32xf32>
    %68 = vector.shape_cast %67 : vector<32xf32> to vector<32x1xf32>
    %69 = vector.broadcast %68 : vector<32x1xf32> to vector<32x32xf32>
    %70 = arith.subf %66, %69 : vector<32x32xf32>
    %71 = math.exp %70 : vector<32x32xf32>
    %cst_27 = arith.constant dense<0.000000e+00> : vector<32xf32>
    %72 = vector.multi_reduction <add>, %71, %cst_27 [1] : vector<32x32xf32> to vector<32xf32>
    %73 = vector.shape_cast %72 : vector<32xf32> to vector<32x1xf32>
    %74 = vector.broadcast %73 : vector<32x1xf32> to vector<32x32xf32>
    %75 = arith.divf %71, %74 : vector<32x32xf32>
    %76 = vector.extract_strided_slice %40 {offsets = [0, 32], sizes = [32, 32], strides = [1, 1]} : vector<32x64xf32> to vector<32x32xf32>
    %cst_28 = arith.constant dense<0.000000e+00> : vector<32x32xf32>
    %77 = tpu.matmul %75, %76, %cst_28 {dimension_numbers = #tpu.dot_dimension_numbers<[1], [0], [0], [1], [0, 0, 1, 1], [], []>} : vector<32x32xf32>, vector<32x32xf32>, vector<32x32xf32> -> vector<32x32xf32>
    %78 = vector.extract_strided_slice %41 {offsets = [32, 0], sizes = [32, 64], strides = [1, 1]} : vector<64x64xf32> to vector<32x64xf32>
    %cst_29 = arith.constant dense<0.000000e+00> : vector<32x64xf32>
    %79 = tpu.matmul %77, %78, %cst_29 {dimension_numbers = #tpu.dot_dimension_numbers<[1], [0], [0], [1], [0, 0, 1, 1], [], []>} : vector<32x32xf32>, vector<32x64xf32>, vector<32x64xf32> -> vector<32x64xf32>
    %80 = arith.addf %60, %79 : vector<32x64xf32>
    %81 = arith.addf %7, %80 : vector<32x64xf32>
    %c768 = arith.constant 768 : index
    %c0_30 = arith.constant 0 : index
    %82 = vector.load %arg2[%c768, %c0_30] : memref<1768x256xf32, #tpu.memory_space<vmem>>, vector<1x64xf32>
    %83 = vector.broadcast %82 : vector<1x64xf32> to vector<32x64xf32>
    %84 = arith.addf %81, %83 : vector<32x64xf32>
    %c80 = arith.constant 80 : index
    %c0_31 = arith.constant 0 : index
    %85 = vector.load %arg2[%c80, %c0_31] : memref<1768x256xf32, #tpu.memory_space<vmem>>, vector<1x64xf32>
    %c64 = arith.constant 64 : index
    %c0_32 = arith.constant 0 : index
    %86 = vector.load %arg2[%c64, %c0_32] : memref<1768x256xf32, #tpu.memory_space<vmem>>, vector<1x64xf32>
    %cst_33 = arith.constant dense<0.000000e+00> : vector<32xf32>
    %87 = vector.multi_reduction <add>, %84, %cst_33 [1] : vector<32x64xf32> to vector<32xf32>
    %88 = vector.shape_cast %87 : vector<32xf32> to vector<32x1xf32>
    %cst_34 = arith.constant 6.400000e+01 : f32
    %89 = vector.broadcast %cst_34 : f32 to vector<32x1xf32>
    %90 = arith.divf %88, %89 : vector<32x1xf32>
    %91 = vector.broadcast %90 : vector<32x1xf32> to vector<32x64xf32>
    %92 = arith.subf %84, %91 : vector<32x64xf32>
    %93 = arith.mulf %92, %92 : vector<32x64xf32>
    %cst_35 = arith.constant dense<0.000000e+00> : vector<32xf32>
    %94 = vector.multi_reduction <add>, %93, %cst_35 [1] : vector<32x64xf32> to vector<32xf32>
    %95 = vector.shape_cast %94 : vector<32xf32> to vector<32x1xf32>
    %cst_36 = arith.constant 6.400000e+01 : f32
    %96 = vector.broadcast %cst_36 : f32 to vector<32x1xf32>
    %97 = arith.divf %95, %96 : vector<32x1xf32>
    %98 = vector.broadcast %90 : vector<32x1xf32> to vector<32x64xf32>
    %99 = arith.subf %84, %98 : vector<32x64xf32>
    %cst_37 = arith.constant 9.99999997E-7 : f32
    %100 = vector.broadcast %cst_37 : f32 to vector<32x1xf32>
    %101 = arith.addf %97, %100 : vector<32x1xf32>
    %102 = math.rsqrt %101 : vector<32x1xf32>
    %103 = vector.broadcast %102 : vector<32x1xf32> to vector<32x64xf32>
    %104 = arith.mulf %99, %103 : vector<32x64xf32>
    %105 = vector.broadcast %85 : vector<1x64xf32> to vector<32x64xf32>
    %106 = arith.mulf %104, %105 : vector<32x64xf32>
    %107 = vector.broadcast %86 : vector<1x64xf32> to vector<32x64xf32>
    %108 = arith.addf %106, %107 : vector<32x64xf32>
    %c112 = arith.constant 112 : index
    %c0_38 = arith.constant 0 : index
    %109 = vector.load %arg2[%c112, %c0_38] : memref<1768x256xf32, #tpu.memory_space<vmem>>, vector<64x256xf32>
    %cst_39 = arith.constant dense<0.000000e+00> : vector<32x256xf32>
    %110 = tpu.matmul %108, %109, %cst_39 {dimension_numbers = #tpu.dot_dimension_numbers<[1], [0], [0], [1], [0, 0, 1, 1], [], []>} : vector<32x64xf32>, vector<64x256xf32>, vector<32x256xf32> -> vector<32x256xf32>
    %c96 = arith.constant 96 : index
    %c0_40 = arith.constant 0 : index
    %111 = vector.load %arg2[%c96, %c0_40] : memref<1768x256xf32, #tpu.memory_space<vmem>>, vector<1x256xf32>
    %112 = vector.broadcast %111 : vector<1x256xf32> to vector<32x256xf32>
    %113 = arith.addf %110, %112 : vector<32x256xf32>
    %114 = arith.mulf %113, %113 : vector<32x256xf32>
    %115 = arith.mulf %113, %114 : vector<32x256xf32>
    %cst_41 = arith.constant 4.471500e-02 : f32
    %116 = vector.broadcast %cst_41 : f32 to vector<32x256xf32>
    %117 = arith.mulf %116, %115 : vector<32x256xf32>
    %118 = arith.addf %113, %117 : vector<32x256xf32>
    %cst_42 = arith.constant 0.797884583 : f32
    %119 = vector.broadcast %cst_42 : f32 to vector<32x256xf32>
    %120 = arith.mulf %119, %118 : vector<32x256xf32>
    %121 = math.tanh %120 : vector<32x256xf32>
    %cst_43 = arith.constant 1.000000e+00 : f32
    %122 = vector.broadcast %cst_43 : f32 to vector<32x256xf32>
    %123 = arith.addf %122, %121 : vector<32x256xf32>
    %cst_44 = arith.constant 5.000000e-01 : f32
    %124 = vector.broadcast %cst_44 : f32 to vector<32x256xf32>
    %125 = arith.mulf %124, %123 : vector<32x256xf32>
    %126 = arith.mulf %113, %125 : vector<32x256xf32>
    %c256 = arith.constant 256 : index
    %c0_45 = arith.constant 0 : index
    %127 = vector.load %arg2[%c256, %c0_45] : memref<1768x256xf32, #tpu.memory_space<vmem>>, vector<256x64xf32>
    %cst_46 = arith.constant dense<0.000000e+00> : vector<32x64xf32>
    %128 = tpu.matmul %126, %127, %cst_46 {dimension_numbers = #tpu.dot_dimension_numbers<[1], [0], [0], [1], [0, 0, 1, 1], [], []>} : vector<32x256xf32>, vector<256x64xf32>, vector<32x64xf32> -> vector<32x64xf32>
    %129 = arith.addf %84, %128 : vector<32x64xf32>
    %c240 = arith.constant 240 : index
    %c0_47 = arith.constant 0 : index
    %130 = vector.load %arg2[%c240, %c0_47] : memref<1768x256xf32, #tpu.memory_space<vmem>>, vector<1x64xf32>
    %131 = vector.broadcast %130 : vector<1x64xf32> to vector<32x64xf32>
    %132 = arith.addf %129, %131 : vector<32x64xf32>
    %c56 = arith.constant 56 : index
    %c0_48 = arith.constant 0 : index
    %133 = vector.load %arg2[%c56, %c0_48] : memref<1768x256xf32, #tpu.memory_space<vmem>>, vector<1x64xf32>
    %c40 = arith.constant 40 : index
    %c0_49 = arith.constant 0 : index
    %134 = vector.load %arg2[%c40, %c0_49] : memref<1768x256xf32, #tpu.memory_space<vmem>>, vector<1x64xf32>
    %cst_50 = arith.constant dense<0.000000e+00> : vector<32xf32>
    %135 = vector.multi_reduction <add>, %132, %cst_50 [1] : vector<32x64xf32> to vector<32xf32>
    %136 = vector.shape_cast %135 : vector<32xf32> to vector<32x1xf32>
    %cst_51 = arith.constant 6.400000e+01 : f32
    %137 = vector.broadcast %cst_51 : f32 to vector<32x1xf32>
    %138 = arith.divf %136, %137 : vector<32x1xf32>
    %139 = vector.broadcast %138 : vector<32x1xf32> to vector<32x64xf32>
    %140 = arith.subf %132, %139 : vector<32x64xf32>
    %141 = arith.mulf %140, %140 : vector<32x64xf32>
    %cst_52 = arith.constant dense<0.000000e+00> : vector<32xf32>
    %142 = vector.multi_reduction <add>, %141, %cst_52 [1] : vector<32x64xf32> to vector<32xf32>
    %143 = vector.shape_cast %142 : vector<32xf32> to vector<32x1xf32>
    %cst_53 = arith.constant 6.400000e+01 : f32
    %144 = vector.broadcast %cst_53 : f32 to vector<32x1xf32>
    %145 = arith.divf %143, %144 : vector<32x1xf32>
    %146 = vector.broadcast %138 : vector<32x1xf32> to vector<32x64xf32>
    %147 = arith.subf %132, %146 : vector<32x64xf32>
    %cst_54 = arith.constant 9.99999997E-7 : f32
    %148 = vector.broadcast %cst_54 : f32 to vector<32x1xf32>
    %149 = arith.addf %145, %148 : vector<32x1xf32>
    %150 = math.rsqrt %149 : vector<32x1xf32>
    %151 = vector.broadcast %150 : vector<32x1xf32> to vector<32x64xf32>
    %152 = arith.mulf %147, %151 : vector<32x64xf32>
    %153 = vector.broadcast %133 : vector<1x64xf32> to vector<32x64xf32>
    %154 = arith.mulf %152, %153 : vector<32x64xf32>
    %155 = vector.broadcast %134 : vector<1x64xf32> to vector<32x64xf32>
    %156 = arith.addf %154, %155 : vector<32x64xf32>
    %c992 = arith.constant 992 : index
    %c0_55 = arith.constant 0 : index
    %157 = vector.load %arg2[%c992, %c0_55] : memref<1768x256xf32, #tpu.memory_space<vmem>>, vector<64x192xf32>
    %cst_56 = arith.constant dense<0.000000e+00> : vector<32x192xf32>
    %158 = tpu.matmul %156, %157, %cst_56 {dimension_numbers = #tpu.dot_dimension_numbers<[1], [0], [0], [1], [0, 0, 1, 1], [], []>} : vector<32x64xf32>, vector<64x192xf32>, vector<32x192xf32> -> vector<32x192xf32>
    %c920 = arith.constant 920 : index
    %c0_57 = arith.constant 0 : index
    %159 = vector.load %arg2[%c920, %c0_57] : memref<1768x256xf32, #tpu.memory_space<vmem>>, vector<1x192xf32>
    %160 = vector.broadcast %159 : vector<1x192xf32> to vector<32x192xf32>
    %161 = arith.addf %158, %160 : vector<32x192xf32>
    %162 = vector.extract_strided_slice %161 {offsets = [0, 0], sizes = [32, 64], strides = [1, 1]} : vector<32x192xf32> to vector<32x64xf32>
    %163 = vector.extract_strided_slice %161 {offsets = [0, 64], sizes = [32, 64], strides = [1, 1]} : vector<32x192xf32> to vector<32x64xf32>
    %164 = vector.extract_strided_slice %161 {offsets = [0, 128], sizes = [32, 64], strides = [1, 1]} : vector<32x192xf32> to vector<32x64xf32>
    %c848 = arith.constant 848 : index
    %c0_58 = arith.constant 0 : index
    %165 = vector.load %arg2[%c848, %c0_58] : memref<1768x256xf32, #tpu.memory_space<vmem>>, vector<64x64xf32>
    %166 = vector.extract_strided_slice %162 {offsets = [0, 0], sizes = [32, 32], strides = [1, 1]} : vector<32x64xf32> to vector<32x32xf32>
    %167 = vector.extract_strided_slice %163 {offsets = [0, 0], sizes = [32, 32], strides = [1, 1]} : vector<32x64xf32> to vector<32x32xf32>
    %cst_59 = arith.constant dense<0.000000e+00> : vector<32x32xf32>
    %168 = tpu.matmul %166, %167, %cst_59 {dimension_numbers = #tpu.dot_dimension_numbers<[1], [1], [0], [0], [0, 0, 1, 0], [], []>} : vector<32x32xf32>, vector<32x32xf32>, vector<32x32xf32> -> vector<32x32xf32>
    %cst_60 = arith.constant 0.176776692 : f32
    %169 = vector.broadcast %cst_60 : f32 to vector<32x32xf32>
    %170 = arith.mulf %168, %169 : vector<32x32xf32>
    %171 = arith.addf %170, %8 : vector<32x32xf32>
    %cst_61 = arith.constant dense<0xFF800000> : vector<32xf32>
    %172 = vector.multi_reduction <maximumf>, %171, %cst_61 [1] : vector<32x32xf32> to vector<32xf32>
    %173 = vector.shape_cast %172 : vector<32xf32> to vector<32x1xf32>
    %174 = vector.broadcast %173 : vector<32x1xf32> to vector<32x32xf32>
    %175 = arith.subf %171, %174 : vector<32x32xf32>
    %176 = math.exp %175 : vector<32x32xf32>
    %cst_62 = arith.constant dense<0.000000e+00> : vector<32xf32>
    %177 = vector.multi_reduction <add>, %176, %cst_62 [1] : vector<32x32xf32> to vector<32xf32>
    %178 = vector.shape_cast %177 : vector<32xf32> to vector<32x1xf32>
    %179 = vector.broadcast %178 : vector<32x1xf32> to vector<32x32xf32>
    %180 = arith.divf %176, %179 : vector<32x32xf32>
    %181 = vector.extract_strided_slice %164 {offsets = [0, 0], sizes = [32, 32], strides = [1, 1]} : vector<32x64xf32> to vector<32x32xf32>
    %cst_63 = arith.constant dense<0.000000e+00> : vector<32x32xf32>
    %182 = tpu.matmul %180, %181, %cst_63 {dimension_numbers = #tpu.dot_dimension_numbers<[1], [0], [0], [1], [0, 0, 1, 1], [], []>} : vector<32x32xf32>, vector<32x32xf32>, vector<32x32xf32> -> vector<32x32xf32>
    %183 = vector.extract_strided_slice %165 {offsets = [0, 0], sizes = [32, 64], strides = [1, 1]} : vector<64x64xf32> to vector<32x64xf32>
    %cst_64 = arith.constant dense<0.000000e+00> : vector<32x64xf32>
    %184 = tpu.matmul %182, %183, %cst_64 {dimension_numbers = #tpu.dot_dimension_numbers<[1], [0], [0], [1], [0, 0, 1, 1], [], []>} : vector<32x32xf32>, vector<32x64xf32>, vector<32x64xf32> -> vector<32x64xf32>
    %185 = vector.extract_strided_slice %162 {offsets = [0, 32], sizes = [32, 32], strides = [1, 1]} : vector<32x64xf32> to vector<32x32xf32>
    %186 = vector.extract_strided_slice %163 {offsets = [0, 32], sizes = [32, 32], strides = [1, 1]} : vector<32x64xf32> to vector<32x32xf32>
    %cst_65 = arith.constant dense<0.000000e+00> : vector<32x32xf32>
    %187 = tpu.matmul %185, %186, %cst_65 {dimension_numbers = #tpu.dot_dimension_numbers<[1], [1], [0], [0], [0, 0, 1, 0], [], []>} : vector<32x32xf32>, vector<32x32xf32>, vector<32x32xf32> -> vector<32x32xf32>
    %cst_66 = arith.constant 0.176776692 : f32
    %188 = vector.broadcast %cst_66 : f32 to vector<32x32xf32>
    %189 = arith.mulf %187, %188 : vector<32x32xf32>
    %190 = arith.addf %189, %8 : vector<32x32xf32>
    %cst_67 = arith.constant dense<0xFF800000> : vector<32xf32>
    %191 = vector.multi_reduction <maximumf>, %190, %cst_67 [1] : vector<32x32xf32> to vector<32xf32>
    %192 = vector.shape_cast %191 : vector<32xf32> to vector<32x1xf32>
    %193 = vector.broadcast %192 : vector<32x1xf32> to vector<32x32xf32>
    %194 = arith.subf %190, %193 : vector<32x32xf32>
    %195 = math.exp %194 : vector<32x32xf32>
    %cst_68 = arith.constant dense<0.000000e+00> : vector<32xf32>
    %196 = vector.multi_reduction <add>, %195, %cst_68 [1] : vector<32x32xf32> to vector<32xf32>
    %197 = vector.shape_cast %196 : vector<32xf32> to vector<32x1xf32>
    %198 = vector.broadcast %197 : vector<32x1xf32> to vector<32x32xf32>
    %199 = arith.divf %195, %198 : vector<32x32xf32>
    %200 = vector.extract_strided_slice %164 {offsets = [0, 32], sizes = [32, 32], strides = [1, 1]} : vector<32x64xf32> to vector<32x32xf32>
    %cst_69 = arith.constant dense<0.000000e+00> : vector<32x32xf32>
    %201 = tpu.matmul %199, %200, %cst_69 {dimension_numbers = #tpu.dot_dimension_numbers<[1], [0], [0], [1], [0, 0, 1, 1], [], []>} : vector<32x32xf32>, vector<32x32xf32>, vector<32x32xf32> -> vector<32x32xf32>
    %202 = vector.extract_strided_slice %165 {offsets = [32, 0], sizes = [32, 64], strides = [1, 1]} : vector<64x64xf32> to vector<32x64xf32>
    %cst_70 = arith.constant dense<0.000000e+00> : vector<32x64xf32>
    %203 = tpu.matmul %201, %202, %cst_70 {dimension_numbers = #tpu.dot_dimension_numbers<[1], [0], [0], [1], [0, 0, 1, 1], [], []>} : vector<32x32xf32>, vector<32x64xf32>, vector<32x64xf32> -> vector<32x64xf32>
    %204 = arith.addf %184, %203 : vector<32x64xf32>
    %205 = arith.addf %132, %204 : vector<32x64xf32>
    %c776 = arith.constant 776 : index
    %c0_71 = arith.constant 0 : index
    %206 = vector.load %arg2[%c776, %c0_71] : memref<1768x256xf32, #tpu.memory_space<vmem>>, vector<1x64xf32>
    %207 = vector.broadcast %206 : vector<1x64xf32> to vector<32x64xf32>
    %208 = arith.addf %205, %207 : vector<32x64xf32>
    %c88 = arith.constant 88 : index
    %c0_72 = arith.constant 0 : index
    %209 = vector.load %arg2[%c88, %c0_72] : memref<1768x256xf32, #tpu.memory_space<vmem>>, vector<1x64xf32>
    %c72 = arith.constant 72 : index
    %c0_73 = arith.constant 0 : index
    %210 = vector.load %arg2[%c72, %c0_73] : memref<1768x256xf32, #tpu.memory_space<vmem>>, vector<1x64xf32>
    %cst_74 = arith.constant dense<0.000000e+00> : vector<32xf32>
    %211 = vector.multi_reduction <add>, %208, %cst_74 [1] : vector<32x64xf32> to vector<32xf32>
    %212 = vector.shape_cast %211 : vector<32xf32> to vector<32x1xf32>
    %cst_75 = arith.constant 6.400000e+01 : f32
    %213 = vector.broadcast %cst_75 : f32 to vector<32x1xf32>
    %214 = arith.divf %212, %213 : vector<32x1xf32>
    %215 = vector.broadcast %214 : vector<32x1xf32> to vector<32x64xf32>
    %216 = arith.subf %208, %215 : vector<32x64xf32>
    %217 = arith.mulf %216, %216 : vector<32x64xf32>
    %cst_76 = arith.constant dense<0.000000e+00> : vector<32xf32>
    %218 = vector.multi_reduction <add>, %217, %cst_76 [1] : vector<32x64xf32> to vector<32xf32>
    %219 = vector.shape_cast %218 : vector<32xf32> to vector<32x1xf32>
    %cst_77 = arith.constant 6.400000e+01 : f32
    %220 = vector.broadcast %cst_77 : f32 to vector<32x1xf32>
    %221 = arith.divf %219, %220 : vector<32x1xf32>
    %222 = vector.broadcast %214 : vector<32x1xf32> to vector<32x64xf32>
    %223 = arith.subf %208, %222 : vector<32x64xf32>
    %cst_78 = arith.constant 9.99999997E-7 : f32
    %224 = vector.broadcast %cst_78 : f32 to vector<32x1xf32>
    %225 = arith.addf %221, %224 : vector<32x1xf32>
    %226 = math.rsqrt %225 : vector<32x1xf32>
    %227 = vector.broadcast %226 : vector<32x1xf32> to vector<32x64xf32>
    %228 = arith.mulf %223, %227 : vector<32x64xf32>
    %229 = vector.broadcast %209 : vector<1x64xf32> to vector<32x64xf32>
    %230 = arith.mulf %228, %229 : vector<32x64xf32>
    %231 = vector.broadcast %210 : vector<1x64xf32> to vector<32x64xf32>
    %232 = arith.addf %230, %231 : vector<32x64xf32>
    %c176 = arith.constant 176 : index
    %c0_79 = arith.constant 0 : index
    %233 = vector.load %arg2[%c176, %c0_79] : memref<1768x256xf32, #tpu.memory_space<vmem>>, vector<64x256xf32>
    %cst_80 = arith.constant dense<0.000000e+00> : vector<32x256xf32>
    %234 = tpu.matmul %232, %233, %cst_80 {dimension_numbers = #tpu.dot_dimension_numbers<[1], [0], [0], [1], [0, 0, 1, 1], [], []>} : vector<32x64xf32>, vector<64x256xf32>, vector<32x256xf32> -> vector<32x256xf32>
    %c104 = arith.constant 104 : index
    %c0_81 = arith.constant 0 : index
    %235 = vector.load %arg2[%c104, %c0_81] : memref<1768x256xf32, #tpu.memory_space<vmem>>, vector<1x256xf32>
    %236 = vector.broadcast %235 : vector<1x256xf32> to vector<32x256xf32>
    %237 = arith.addf %234, %236 : vector<32x256xf32>
    %238 = arith.mulf %237, %237 : vector<32x256xf32>
    %239 = arith.mulf %237, %238 : vector<32x256xf32>
    %cst_82 = arith.constant 4.471500e-02 : f32
    %240 = vector.broadcast %cst_82 : f32 to vector<32x256xf32>
    %241 = arith.mulf %240, %239 : vector<32x256xf32>
    %242 = arith.addf %237, %241 : vector<32x256xf32>
    %cst_83 = arith.constant 0.797884583 : f32
    %243 = vector.broadcast %cst_83 : f32 to vector<32x256xf32>
    %244 = arith.mulf %243, %242 : vector<32x256xf32>
    %245 = math.tanh %244 : vector<32x256xf32>
    %cst_84 = arith.constant 1.000000e+00 : f32
    %246 = vector.broadcast %cst_84 : f32 to vector<32x256xf32>
    %247 = arith.addf %246, %245 : vector<32x256xf32>
    %cst_85 = arith.constant 5.000000e-01 : f32
    %248 = vector.broadcast %cst_85 : f32 to vector<32x256xf32>
    %249 = arith.mulf %248, %247 : vector<32x256xf32>
    %250 = arith.mulf %237, %249 : vector<32x256xf32>
    %c512 = arith.constant 512 : index
    %c0_86 = arith.constant 0 : index
    %251 = vector.load %arg2[%c512, %c0_86] : memref<1768x256xf32, #tpu.memory_space<vmem>>, vector<256x64xf32>
    %cst_87 = arith.constant dense<0.000000e+00> : vector<32x64xf32>
    %252 = tpu.matmul %250, %251, %cst_87 {dimension_numbers = #tpu.dot_dimension_numbers<[1], [0], [0], [1], [0, 0, 1, 1], [], []>} : vector<32x256xf32>, vector<256x64xf32>, vector<32x64xf32> -> vector<32x64xf32>
    %253 = arith.addf %208, %252 : vector<32x64xf32>
    %c248 = arith.constant 248 : index
    %c0_88 = arith.constant 0 : index
    %254 = vector.load %arg2[%c248, %c0_88] : memref<1768x256xf32, #tpu.memory_space<vmem>>, vector<1x64xf32>
    %255 = vector.broadcast %254 : vector<1x64xf32> to vector<32x64xf32>
    %256 = arith.addf %253, %255 : vector<32x64xf32>
    %c1056 = arith.constant 1056 : index
    %c0_89 = arith.constant 0 : index
    %257 = vector.load %arg2[%c1056, %c0_89] : memref<1768x256xf32, #tpu.memory_space<vmem>>, vector<64x32xf32>
    %cst_90 = arith.constant dense<0.000000e+00> : vector<32x32xf32>
    %258 = tpu.matmul %256, %257, %cst_90 {dimension_numbers = #tpu.dot_dimension_numbers<[1], [0], [0], [1], [0, 0, 1, 1], [], []>} : vector<32x64xf32>, vector<64x32xf32>, vector<32x32xf32> -> vector<32x32xf32>
    %c1416 = arith.constant 1416 : index
    %c0_91 = arith.constant 0 : index
    %259 = vector.load %arg2[%c1416, %c0_91] : memref<1768x256xf32, #tpu.memory_space<vmem>>, vector<1x32xf32>
    %c1408 = arith.constant 1408 : index
    %c0_92 = arith.constant 0 : index
    %260 = vector.load %arg2[%c1408, %c0_92] : memref<1768x256xf32, #tpu.memory_space<vmem>>, vector<1x32xf32>
    %cst_93 = arith.constant dense<0.000000e+00> : vector<32xf32>
    %261 = vector.multi_reduction <add>, %258, %cst_93 [1] : vector<32x32xf32> to vector<32xf32>
    %262 = vector.shape_cast %261 : vector<32xf32> to vector<32x1xf32>
    %cst_94 = arith.constant 3.200000e+01 : f32
    %263 = vector.broadcast %cst_94 : f32 to vector<32x1xf32>
    %264 = arith.divf %262, %263 : vector<32x1xf32>
    %265 = vector.broadcast %264 : vector<32x1xf32> to vector<32x32xf32>
    %266 = arith.subf %258, %265 : vector<32x32xf32>
    %267 = arith.mulf %266, %266 : vector<32x32xf32>
    %cst_95 = arith.constant dense<0.000000e+00> : vector<32xf32>
    %268 = vector.multi_reduction <add>, %267, %cst_95 [1] : vector<32x32xf32> to vector<32xf32>
    %269 = vector.shape_cast %268 : vector<32xf32> to vector<32x1xf32>
    %cst_96 = arith.constant 3.200000e+01 : f32
    %270 = vector.broadcast %cst_96 : f32 to vector<32x1xf32>
    %271 = arith.divf %269, %270 : vector<32x1xf32>
    %272 = vector.broadcast %264 : vector<32x1xf32> to vector<32x32xf32>
    %273 = arith.subf %258, %272 : vector<32x32xf32>
    %cst_97 = arith.constant 9.99999997E-7 : f32
    %274 = vector.broadcast %cst_97 : f32 to vector<32x1xf32>
    %275 = arith.addf %271, %274 : vector<32x1xf32>
    %276 = math.rsqrt %275 : vector<32x1xf32>
    %277 = vector.broadcast %276 : vector<32x1xf32> to vector<32x32xf32>
    %278 = arith.mulf %273, %277 : vector<32x32xf32>
    %279 = vector.broadcast %259 : vector<1x32xf32> to vector<32x32xf32>
    %280 = arith.mulf %278, %279 : vector<32x32xf32>
    %281 = vector.broadcast %260 : vector<1x32xf32> to vector<32x32xf32>
    %282 = arith.addf %280, %281 : vector<32x32xf32>
    %c1440 = arith.constant 1440 : index
    %c0_98 = arith.constant 0 : index
    %283 = vector.load %arg2[%c1440, %c0_98] : memref<1768x256xf32, #tpu.memory_space<vmem>>, vector<288x32xf32>
    %cst_99 = arith.constant dense<0.000000e+00> : vector<288x32xf32>
    %284 = tpu.matmul %283, %282, %cst_99 {dimension_numbers = #tpu.dot_dimension_numbers<[1], [0], [0], [1], [0, 0, 1, 1], [], []>} : vector<288x32xf32>, vector<32x32xf32>, vector<288x32xf32> -> vector<288x32xf32>
    %285 = vector.extract_strided_slice %284 {offsets = [0, 0], sizes = [32, 32], strides = [1, 1]} : vector<288x32xf32> to vector<32x32xf32>
    %c1120 = arith.constant 1120 : index
    %c0_100 = arith.constant 0 : index
    %286 = vector.load %arg2[%c1120, %c0_100] : memref<1768x256xf32, #tpu.memory_space<vmem>>, vector<32x32xf32>
    %cst_101 = arith.constant dense<0.000000e+00> : vector<32x32xf32>
    %287 = tpu.matmul %285, %286, %cst_101 {dimension_numbers = #tpu.dot_dimension_numbers<[1], [0], [0], [1], [0, 0, 1, 1], [], []>} : vector<32x32xf32>, vector<32x32xf32>, vector<32x32xf32> -> vector<32x32xf32>
    %288 = vector.extract_strided_slice %284 {offsets = [32, 0], sizes = [32, 32], strides = [1, 1]} : vector<288x32xf32> to vector<32x32xf32>
    %c1152 = arith.constant 1152 : index
    %c0_102 = arith.constant 0 : index
    %289 = vector.load %arg2[%c1152, %c0_102] : memref<1768x256xf32, #tpu.memory_space<vmem>>, vector<32x32xf32>
    %cst_103 = arith.constant dense<0.000000e+00> : vector<32x32xf32>
    %290 = tpu.matmul %288, %289, %cst_103 {dimension_numbers = #tpu.dot_dimension_numbers<[1], [0], [0], [1], [0, 0, 1, 1], [], []>} : vector<32x32xf32>, vector<32x32xf32>, vector<32x32xf32> -> vector<32x32xf32>
    %291 = arith.addf %287, %290 : vector<32x32xf32>
    %292 = vector.extract_strided_slice %284 {offsets = [64, 0], sizes = [32, 32], strides = [1, 1]} : vector<288x32xf32> to vector<32x32xf32>
    %c1184 = arith.constant 1184 : index
    %c0_104 = arith.constant 0 : index
    %293 = vector.load %arg2[%c1184, %c0_104] : memref<1768x256xf32, #tpu.memory_space<vmem>>, vector<32x32xf32>
    %cst_105 = arith.constant dense<0.000000e+00> : vector<32x32xf32>
    %294 = tpu.matmul %292, %293, %cst_105 {dimension_numbers = #tpu.dot_dimension_numbers<[1], [0], [0], [1], [0, 0, 1, 1], [], []>} : vector<32x32xf32>, vector<32x32xf32>, vector<32x32xf32> -> vector<32x32xf32>
    %295 = arith.addf %291, %294 : vector<32x32xf32>
    %296 = vector.extract_strided_slice %284 {offsets = [96, 0], sizes = [32, 32], strides = [1, 1]} : vector<288x32xf32> to vector<32x32xf32>
    %c1216 = arith.constant 1216 : index
    %c0_106 = arith.constant 0 : index
    %297 = vector.load %arg2[%c1216, %c0_106] : memref<1768x256xf32, #tpu.memory_space<vmem>>, vector<32x32xf32>
    %cst_107 = arith.constant dense<0.000000e+00> : vector<32x32xf32>
    %298 = tpu.matmul %296, %297, %cst_107 {dimension_numbers = #tpu.dot_dimension_numbers<[1], [0], [0], [1], [0, 0, 1, 1], [], []>} : vector<32x32xf32>, vector<32x32xf32>, vector<32x32xf32> -> vector<32x32xf32>
    %299 = arith.addf %295, %298 : vector<32x32xf32>
    %300 = vector.extract_strided_slice %284 {offsets = [128, 0], sizes = [32, 32], strides = [1, 1]} : vector<288x32xf32> to vector<32x32xf32>
    %c1248 = arith.constant 1248 : index
    %c0_108 = arith.constant 0 : index
    %301 = vector.load %arg2[%c1248, %c0_108] : memref<1768x256xf32, #tpu.memory_space<vmem>>, vector<32x32xf32>
    %cst_109 = arith.constant dense<0.000000e+00> : vector<32x32xf32>
    %302 = tpu.matmul %300, %301, %cst_109 {dimension_numbers = #tpu.dot_dimension_numbers<[1], [0], [0], [1], [0, 0, 1, 1], [], []>} : vector<32x32xf32>, vector<32x32xf32>, vector<32x32xf32> -> vector<32x32xf32>
    %303 = arith.addf %299, %302 : vector<32x32xf32>
    %304 = vector.extract_strided_slice %284 {offsets = [160, 0], sizes = [32, 32], strides = [1, 1]} : vector<288x32xf32> to vector<32x32xf32>
    %c1280 = arith.constant 1280 : index
    %c0_110 = arith.constant 0 : index
    %305 = vector.load %arg2[%c1280, %c0_110] : memref<1768x256xf32, #tpu.memory_space<vmem>>, vector<32x32xf32>
    %cst_111 = arith.constant dense<0.000000e+00> : vector<32x32xf32>
    %306 = tpu.matmul %304, %305, %cst_111 {dimension_numbers = #tpu.dot_dimension_numbers<[1], [0], [0], [1], [0, 0, 1, 1], [], []>} : vector<32x32xf32>, vector<32x32xf32>, vector<32x32xf32> -> vector<32x32xf32>
    %307 = arith.addf %303, %306 : vector<32x32xf32>
    %308 = vector.extract_strided_slice %284 {offsets = [192, 0], sizes = [32, 32], strides = [1, 1]} : vector<288x32xf32> to vector<32x32xf32>
    %c1312 = arith.constant 1312 : index
    %c0_112 = arith.constant 0 : index
    %309 = vector.load %arg2[%c1312, %c0_112] : memref<1768x256xf32, #tpu.memory_space<vmem>>, vector<32x32xf32>
    %cst_113 = arith.constant dense<0.000000e+00> : vector<32x32xf32>
    %310 = tpu.matmul %308, %309, %cst_113 {dimension_numbers = #tpu.dot_dimension_numbers<[1], [0], [0], [1], [0, 0, 1, 1], [], []>} : vector<32x32xf32>, vector<32x32xf32>, vector<32x32xf32> -> vector<32x32xf32>
    %311 = arith.addf %307, %310 : vector<32x32xf32>
    %312 = vector.extract_strided_slice %284 {offsets = [224, 0], sizes = [32, 32], strides = [1, 1]} : vector<288x32xf32> to vector<32x32xf32>
    %c1344 = arith.constant 1344 : index
    %c0_114 = arith.constant 0 : index
    %313 = vector.load %arg2[%c1344, %c0_114] : memref<1768x256xf32, #tpu.memory_space<vmem>>, vector<32x32xf32>
    %cst_115 = arith.constant dense<0.000000e+00> : vector<32x32xf32>
    %314 = tpu.matmul %312, %313, %cst_115 {dimension_numbers = #tpu.dot_dimension_numbers<[1], [0], [0], [1], [0, 0, 1, 1], [], []>} : vector<32x32xf32>, vector<32x32xf32>, vector<32x32xf32> -> vector<32x32xf32>
    %315 = arith.addf %311, %314 : vector<32x32xf32>
    %316 = vector.extract_strided_slice %284 {offsets = [256, 0], sizes = [32, 32], strides = [1, 1]} : vector<288x32xf32> to vector<32x32xf32>
    %c1376 = arith.constant 1376 : index
    %c0_116 = arith.constant 0 : index
    %317 = vector.load %arg2[%c1376, %c0_116] : memref<1768x256xf32, #tpu.memory_space<vmem>>, vector<32x32xf32>
    %cst_117 = arith.constant dense<0.000000e+00> : vector<32x32xf32>
    %318 = tpu.matmul %316, %317, %cst_117 {dimension_numbers = #tpu.dot_dimension_numbers<[1], [0], [0], [1], [0, 0, 1, 1], [], []>} : vector<32x32xf32>, vector<32x32xf32>, vector<32x32xf32> -> vector<32x32xf32>
    %319 = arith.addf %315, %318 : vector<32x32xf32>
    %c1432 = arith.constant 1432 : index
    %c0_118 = arith.constant 0 : index
    %320 = vector.load %arg2[%c1432, %c0_118] : memref<1768x256xf32, #tpu.memory_space<vmem>>, vector<1x32xf32>
    %c1424 = arith.constant 1424 : index
    %c0_119 = arith.constant 0 : index
    %321 = vector.load %arg2[%c1424, %c0_119] : memref<1768x256xf32, #tpu.memory_space<vmem>>, vector<1x32xf32>
    %cst_120 = arith.constant dense<0.000000e+00> : vector<32xf32>
    %322 = vector.multi_reduction <add>, %319, %cst_120 [1] : vector<32x32xf32> to vector<32xf32>
    %323 = vector.shape_cast %322 : vector<32xf32> to vector<32x1xf32>
    %cst_121 = arith.constant 3.200000e+01 : f32
    %324 = vector.broadcast %cst_121 : f32 to vector<32x1xf32>
    %325 = arith.divf %323, %324 : vector<32x1xf32>
    %326 = vector.broadcast %325 : vector<32x1xf32> to vector<32x32xf32>
    %327 = arith.subf %319, %326 : vector<32x32xf32>
    %328 = arith.mulf %327, %327 : vector<32x32xf32>
    %cst_122 = arith.constant dense<0.000000e+00> : vector<32xf32>
    %329 = vector.multi_reduction <add>, %328, %cst_122 [1] : vector<32x32xf32> to vector<32xf32>
    %330 = vector.shape_cast %329 : vector<32xf32> to vector<32x1xf32>
    %cst_123 = arith.constant 3.200000e+01 : f32
    %331 = vector.broadcast %cst_123 : f32 to vector<32x1xf32>
    %332 = arith.divf %330, %331 : vector<32x1xf32>
    %333 = vector.broadcast %325 : vector<32x1xf32> to vector<32x32xf32>
    %334 = arith.subf %319, %333 : vector<32x32xf32>
    %cst_124 = arith.constant 9.99999997E-7 : f32
    %335 = vector.broadcast %cst_124 : f32 to vector<32x1xf32>
    %336 = arith.addf %332, %335 : vector<32x1xf32>
    %337 = math.rsqrt %336 : vector<32x1xf32>
    %338 = vector.broadcast %337 : vector<32x1xf32> to vector<32x32xf32>
    %339 = arith.mulf %334, %338 : vector<32x32xf32>
    %340 = vector.broadcast %320 : vector<1x32xf32> to vector<32x32xf32>
    %341 = arith.mulf %339, %340 : vector<32x32xf32>
    %342 = vector.broadcast %321 : vector<1x32xf32> to vector<32x32xf32>
    %343 = arith.addf %341, %342 : vector<32x32xf32>
    %c1128 = arith.constant 1128 : index
    %c0_125 = arith.constant 0 : index
    %344 = vector.load %arg3[%c1128, %c0_125] : memref<2568x128xf32, #tpu.memory_space<vmem>>, vector<32x32xf32>
    %c1120_126 = arith.constant 1120 : index
    %c0_127 = arith.constant 0 : index
    %345 = vector.load %arg3[%c1120_126, %c0_127] : memref<2568x128xf32, #tpu.memory_space<vmem>>, vector<1x32xf32>
    %346 = vector.broadcast %345 : vector<1x32xf32> to vector<32x32xf32>
    %347 = arith.addf %343, %346 : vector<32x32xf32>
    %c1160 = arith.constant 1160 : index
    %c0_128 = arith.constant 0 : index
    %348 = vector.load %arg3[%c1160, %c0_128] : memref<2568x128xf32, #tpu.memory_space<vmem>>, vector<12x32xf32>
    %c0_129 = arith.constant 0 : index
    %c0_130 = arith.constant 0 : index
    %349 = vector.load %arg4[%c0_129, %c0_130] : memref<2x1xf32, #tpu.memory_space<vmem>>, vector<2x1xf32>
    %c152 = arith.constant 152 : index
    %c0_131 = arith.constant 0 : index
    %350 = vector.load %arg3[%c152, %c0_131] : memref<2568x128xf32, #tpu.memory_space<vmem>>, vector<1x128xf32>
    %351 = vector.broadcast %349 : vector<2x1xf32> to vector<2x128xf32>
    %352 = vector.broadcast %350 : vector<1x128xf32> to vector<2x128xf32>
    %353 = arith.mulf %351, %352 : vector<2x128xf32>
    %c144 = arith.constant 144 : index
    %c0_132 = arith.constant 0 : index
    %354 = vector.load %arg3[%c144, %c0_132] : memref<2568x128xf32, #tpu.memory_space<vmem>>, vector<1x128xf32>
    %355 = vector.broadcast %354 : vector<1x128xf32> to vector<2x128xf32>
    %356 = arith.addf %353, %355 : vector<2x128xf32>
    %cst_133 = arith.constant 0.000000e+00 : f32
    %357 = vector.broadcast %cst_133 : f32 to vector<2x128xf32>
    %358 = arith.maximumf %356, %357 : vector<2x128xf32>
    %c168 = arith.constant 168 : index
    %c0_134 = arith.constant 0 : index
    %359 = vector.load %arg3[%c168, %c0_134] : memref<2568x128xf32, #tpu.memory_space<vmem>>, vector<128x32xf32>
    %cst_135 = arith.constant dense<0.000000e+00> : vector<2x32xf32>
    %360 = tpu.matmul %358, %359, %cst_135 {dimension_numbers = #tpu.dot_dimension_numbers<[1], [0], [0], [1], [0, 0, 1, 1], [], []>} : vector<2x128xf32>, vector<128x32xf32>, vector<2x32xf32> -> vector<2x32xf32>
    %c160 = arith.constant 160 : index
    %c0_136 = arith.constant 0 : index
    %361 = vector.load %arg3[%c160, %c0_136] : memref<2568x128xf32, #tpu.memory_space<vmem>>, vector<1x32xf32>
    %362 = vector.broadcast %361 : vector<1x32xf32> to vector<2x32xf32>
    %363 = arith.addf %360, %362 : vector<2x32xf32>
    %c1176 = arith.constant 1176 : index
    %c0_137 = arith.constant 0 : index
    %364 = vector.load %arg3[%c1176, %c0_137] : memref<2568x128xf32, #tpu.memory_space<vmem>>, vector<12x2xf32>
    %cst_138 = arith.constant dense<0.000000e+00> : vector<12x32xf32>
    %365 = tpu.matmul %364, %363, %cst_138 {dimension_numbers = #tpu.dot_dimension_numbers<[1], [0], [0], [1], [0, 0, 1, 1], [], []>} : vector<12x2xf32>, vector<2x32xf32>, vector<12x32xf32> -> vector<12x32xf32>
    %366 = arith.addf %348, %365 : vector<12x32xf32>
    %c1104 = arith.constant 1104 : index
    %c0_139 = arith.constant 0 : index
    %367 = vector.load %arg3[%c1104, %c0_139] : memref<2568x128xf32, #tpu.memory_space<vmem>>, vector<12x12xf32>
    %c1088 = arith.constant 1088 : index
    %c0_140 = arith.constant 0 : index
    %368 = vector.load %arg3[%c1088, %c0_140] : memref<2568x128xf32, #tpu.memory_space<vmem>>, vector<12x32xf32>
    %c1056_141 = arith.constant 1056 : index
    %c0_142 = arith.constant 0 : index
    %369 = vector.load %arg3[%c1056_141, %c0_142] : memref<2568x128xf32, #tpu.memory_space<vmem>>, vector<32x12xf32>
    %c2296 = arith.constant 2296 : index
    %c0_143 = arith.constant 0 : index
    %370 = vector.load %arg3[%c2296, %c0_143] : memref<2568x128xf32, #tpu.memory_space<vmem>>, vector<32x32xf32>
    %cst_144 = arith.constant dense<0.000000e+00> : vector<12x32xf32>
    %371 = tpu.matmul %366, %370, %cst_144 {dimension_numbers = #tpu.dot_dimension_numbers<[1], [0], [0], [1], [0, 0, 1, 1], [], []>} : vector<12x32xf32>, vector<32x32xf32>, vector<12x32xf32> -> vector<12x32xf32>
    %c2280 = arith.constant 2280 : index
    %c0_145 = arith.constant 0 : index
    %372 = vector.load %arg3[%c2280, %c0_145] : memref<2568x128xf32, #tpu.memory_space<vmem>>, vector<1x32xf32>
    %373 = vector.broadcast %372 : vector<1x32xf32> to vector<12x32xf32>
    %374 = arith.addf %371, %373 : vector<12x32xf32>
    %c2136 = arith.constant 2136 : index
    %c0_146 = arith.constant 0 : index
    %375 = vector.load %arg3[%c2136, %c0_146] : memref<2568x128xf32, #tpu.memory_space<vmem>>, vector<32x32xf32>
    %cst_147 = arith.constant dense<0.000000e+00> : vector<12x32xf32>
    %376 = tpu.matmul %366, %375, %cst_147 {dimension_numbers = #tpu.dot_dimension_numbers<[1], [0], [0], [1], [0, 0, 1, 1], [], []>} : vector<12x32xf32>, vector<32x32xf32>, vector<12x32xf32> -> vector<12x32xf32>
    %c2120 = arith.constant 2120 : index
    %c0_148 = arith.constant 0 : index
    %377 = vector.load %arg3[%c2120, %c0_148] : memref<2568x128xf32, #tpu.memory_space<vmem>>, vector<1x32xf32>
    %378 = vector.broadcast %377 : vector<1x32xf32> to vector<12x32xf32>
    %379 = arith.addf %376, %378 : vector<12x32xf32>
    %c2376 = arith.constant 2376 : index
    %c0_149 = arith.constant 0 : index
    %380 = vector.load %arg3[%c2376, %c0_149] : memref<2568x128xf32, #tpu.memory_space<vmem>>, vector<32x32xf32>
    %cst_150 = arith.constant dense<0.000000e+00> : vector<12x32xf32>
    %381 = tpu.matmul %366, %380, %cst_150 {dimension_numbers = #tpu.dot_dimension_numbers<[1], [0], [0], [1], [0, 0, 1, 1], [], []>} : vector<12x32xf32>, vector<32x32xf32>, vector<12x32xf32> -> vector<12x32xf32>
    %c2360 = arith.constant 2360 : index
    %c0_151 = arith.constant 0 : index
    %382 = vector.load %arg3[%c2360, %c0_151] : memref<2568x128xf32, #tpu.memory_space<vmem>>, vector<1x32xf32>
    %383 = vector.broadcast %382 : vector<1x32xf32> to vector<12x32xf32>
    %384 = arith.addf %381, %383 : vector<12x32xf32>
    %c2216 = arith.constant 2216 : index
    %c0_152 = arith.constant 0 : index
    %385 = vector.load %arg3[%c2216, %c0_152] : memref<2568x128xf32, #tpu.memory_space<vmem>>, vector<32x32xf32>
    %386 = vector.extract_strided_slice %374 {offsets = [0, 0], sizes = [12, 16], strides = [1, 1]} : vector<12x32xf32> to vector<12x16xf32>
    %387 = vector.extract_strided_slice %379 {offsets = [0, 0], sizes = [12, 16], strides = [1, 1]} : vector<12x32xf32> to vector<12x16xf32>
    %cst_153 = arith.constant dense<0.000000e+00> : vector<12x12xf32>
    %388 = tpu.matmul %386, %387, %cst_153 {dimension_numbers = #tpu.dot_dimension_numbers<[1], [1], [0], [0], [0, 0, 1, 0], [], []>} : vector<12x16xf32>, vector<12x16xf32>, vector<12x12xf32> -> vector<12x12xf32>
    %cst_154 = arith.constant 2.500000e-01 : f32
    %389 = vector.broadcast %cst_154 : f32 to vector<12x12xf32>
    %390 = arith.mulf %388, %389 : vector<12x12xf32>
    %391 = arith.addf %390, %367 : vector<12x12xf32>
    %cst_155 = arith.constant dense<0xFF800000> : vector<12xf32>
    %392 = vector.multi_reduction <maximumf>, %391, %cst_155 [1] : vector<12x12xf32> to vector<12xf32>
    %393 = vector.shape_cast %392 : vector<12xf32> to vector<12x1xf32>
    %394 = vector.broadcast %393 : vector<12x1xf32> to vector<12x12xf32>
    %395 = arith.subf %391, %394 : vector<12x12xf32>
    %396 = math.exp %395 : vector<12x12xf32>
    %cst_156 = arith.constant dense<0.000000e+00> : vector<12xf32>
    %397 = vector.multi_reduction <add>, %396, %cst_156 [1] : vector<12x12xf32> to vector<12xf32>
    %398 = vector.shape_cast %397 : vector<12xf32> to vector<12x1xf32>
    %399 = vector.broadcast %398 : vector<12x1xf32> to vector<12x12xf32>
    %400 = arith.divf %396, %399 : vector<12x12xf32>
    %401 = vector.extract_strided_slice %384 {offsets = [0, 0], sizes = [12, 16], strides = [1, 1]} : vector<12x32xf32> to vector<12x16xf32>
    %cst_157 = arith.constant dense<0.000000e+00> : vector<12x16xf32>
    %402 = tpu.matmul %400, %401, %cst_157 {dimension_numbers = #tpu.dot_dimension_numbers<[1], [0], [0], [1], [0, 0, 1, 1], [], []>} : vector<12x12xf32>, vector<12x16xf32>, vector<12x16xf32> -> vector<12x16xf32>
    %403 = vector.extract_strided_slice %385 {offsets = [0, 0], sizes = [16, 32], strides = [1, 1]} : vector<32x32xf32> to vector<16x32xf32>
    %cst_158 = arith.constant dense<0.000000e+00> : vector<12x32xf32>
    %404 = tpu.matmul %402, %403, %cst_158 {dimension_numbers = #tpu.dot_dimension_numbers<[1], [0], [0], [1], [0, 0, 1, 1], [], []>} : vector<12x16xf32>, vector<16x32xf32>, vector<12x32xf32> -> vector<12x32xf32>
    %405 = vector.extract_strided_slice %374 {offsets = [0, 16], sizes = [12, 16], strides = [1, 1]} : vector<12x32xf32> to vector<12x16xf32>
    %406 = vector.extract_strided_slice %379 {offsets = [0, 16], sizes = [12, 16], strides = [1, 1]} : vector<12x32xf32> to vector<12x16xf32>
    %cst_159 = arith.constant dense<0.000000e+00> : vector<12x12xf32>
    %407 = tpu.matmul %405, %406, %cst_159 {dimension_numbers = #tpu.dot_dimension_numbers<[1], [1], [0], [0], [0, 0, 1, 0], [], []>} : vector<12x16xf32>, vector<12x16xf32>, vector<12x12xf32> -> vector<12x12xf32>
    %cst_160 = arith.constant 2.500000e-01 : f32
    %408 = vector.broadcast %cst_160 : f32 to vector<12x12xf32>
    %409 = arith.mulf %407, %408 : vector<12x12xf32>
    %410 = arith.addf %409, %367 : vector<12x12xf32>
    %cst_161 = arith.constant dense<0xFF800000> : vector<12xf32>
    %411 = vector.multi_reduction <maximumf>, %410, %cst_161 [1] : vector<12x12xf32> to vector<12xf32>
    %412 = vector.shape_cast %411 : vector<12xf32> to vector<12x1xf32>
    %413 = vector.broadcast %412 : vector<12x1xf32> to vector<12x12xf32>
    %414 = arith.subf %410, %413 : vector<12x12xf32>
    %415 = math.exp %414 : vector<12x12xf32>
    %cst_162 = arith.constant dense<0.000000e+00> : vector<12xf32>
    %416 = vector.multi_reduction <add>, %415, %cst_162 [1] : vector<12x12xf32> to vector<12xf32>
    %417 = vector.shape_cast %416 : vector<12xf32> to vector<12x1xf32>
    %418 = vector.broadcast %417 : vector<12x1xf32> to vector<12x12xf32>
    %419 = arith.divf %415, %418 : vector<12x12xf32>
    %420 = vector.extract_strided_slice %384 {offsets = [0, 16], sizes = [12, 16], strides = [1, 1]} : vector<12x32xf32> to vector<12x16xf32>
    %cst_163 = arith.constant dense<0.000000e+00> : vector<12x16xf32>
    %421 = tpu.matmul %419, %420, %cst_163 {dimension_numbers = #tpu.dot_dimension_numbers<[1], [0], [0], [1], [0, 0, 1, 1], [], []>} : vector<12x12xf32>, vector<12x16xf32>, vector<12x16xf32> -> vector<12x16xf32>
    %422 = vector.extract_strided_slice %385 {offsets = [16, 0], sizes = [16, 32], strides = [1, 1]} : vector<32x32xf32> to vector<16x32xf32>
    %cst_164 = arith.constant dense<0.000000e+00> : vector<12x32xf32>
    %423 = tpu.matmul %421, %422, %cst_164 {dimension_numbers = #tpu.dot_dimension_numbers<[1], [0], [0], [1], [0, 0, 1, 1], [], []>} : vector<12x16xf32>, vector<16x32xf32>, vector<12x32xf32> -> vector<12x32xf32>
    %424 = arith.addf %404, %423 : vector<12x32xf32>
    %c2200 = arith.constant 2200 : index
    %c0_165 = arith.constant 0 : index
    %425 = vector.load %arg3[%c2200, %c0_165] : memref<2568x128xf32, #tpu.memory_space<vmem>>, vector<1x32xf32>
    %426 = vector.broadcast %425 : vector<1x32xf32> to vector<12x32xf32>
    %427 = arith.addf %424, %426 : vector<12x32xf32>
    %c1784 = arith.constant 1784 : index
    %c0_166 = arith.constant 0 : index
    %428 = vector.load %arg3[%c1784, %c0_166] : memref<2568x128xf32, #tpu.memory_space<vmem>>, vector<1x32xf32>
    %c1768 = arith.constant 1768 : index
    %c0_167 = arith.constant 0 : index
    %429 = vector.load %arg3[%c1768, %c0_167] : memref<2568x128xf32, #tpu.memory_space<vmem>>, vector<1x32xf32>
    %cst_168 = arith.constant dense<0.000000e+00> : vector<12xf32>
    %430 = vector.multi_reduction <add>, %427, %cst_168 [1] : vector<12x32xf32> to vector<12xf32>
    %431 = vector.shape_cast %430 : vector<12xf32> to vector<12x1xf32>
    %cst_169 = arith.constant 3.200000e+01 : f32
    %432 = vector.broadcast %cst_169 : f32 to vector<12x1xf32>
    %433 = arith.divf %431, %432 : vector<12x1xf32>
    %434 = vector.broadcast %433 : vector<12x1xf32> to vector<12x32xf32>
    %435 = arith.subf %427, %434 : vector<12x32xf32>
    %436 = arith.mulf %435, %435 : vector<12x32xf32>
    %cst_170 = arith.constant dense<0.000000e+00> : vector<12xf32>
    %437 = vector.multi_reduction <add>, %436, %cst_170 [1] : vector<12x32xf32> to vector<12xf32>
    %438 = vector.shape_cast %437 : vector<12xf32> to vector<12x1xf32>
    %cst_171 = arith.constant 3.200000e+01 : f32
    %439 = vector.broadcast %cst_171 : f32 to vector<12x1xf32>
    %440 = arith.divf %438, %439 : vector<12x1xf32>
    %441 = vector.broadcast %433 : vector<12x1xf32> to vector<12x32xf32>
    %442 = arith.subf %427, %441 : vector<12x32xf32>
    %cst_172 = arith.constant 9.99999974E-6 : f32
    %443 = vector.broadcast %cst_172 : f32 to vector<12x1xf32>
    %444 = arith.addf %440, %443 : vector<12x1xf32>
    %445 = math.rsqrt %444 : vector<12x1xf32>
    %446 = vector.broadcast %445 : vector<12x1xf32> to vector<12x32xf32>
    %447 = arith.mulf %442, %446 : vector<12x32xf32>
    %448 = vector.broadcast %428 : vector<1x32xf32> to vector<12x32xf32>
    %449 = arith.mulf %447, %448 : vector<12x32xf32>
    %450 = vector.broadcast %429 : vector<1x32xf32> to vector<12x32xf32>
    %451 = arith.addf %449, %450 : vector<12x32xf32>
    %452 = arith.addf %451, %366 : vector<12x32xf32>
    %453 = arith.addf %347, %344 : vector<32x32xf32>
    %c1624 = arith.constant 1624 : index
    %c0_173 = arith.constant 0 : index
    %454 = vector.load %arg3[%c1624, %c0_173] : memref<2568x128xf32, #tpu.memory_space<vmem>>, vector<32x16xf32>
    %cst_174 = arith.constant dense<0.000000e+00> : vector<12x16xf32>
    %455 = tpu.matmul %452, %454, %cst_174 {dimension_numbers = #tpu.dot_dimension_numbers<[1], [0], [0], [1], [0, 0, 1, 1], [], []>} : vector<12x32xf32>, vector<32x16xf32>, vector<12x16xf32> -> vector<12x16xf32>
    %c1608 = arith.constant 1608 : index
    %c0_175 = arith.constant 0 : index
    %456 = vector.load %arg3[%c1608, %c0_175] : memref<2568x128xf32, #tpu.memory_space<vmem>>, vector<1x16xf32>
    %457 = vector.broadcast %456 : vector<1x16xf32> to vector<12x16xf32>
    %458 = arith.addf %455, %457 : vector<12x16xf32>
    %c1496 = arith.constant 1496 : index
    %c0_176 = arith.constant 0 : index
    %459 = vector.load %arg3[%c1496, %c0_176] : memref<2568x128xf32, #tpu.memory_space<vmem>>, vector<32x16xf32>
    %cst_177 = arith.constant dense<0.000000e+00> : vector<32x16xf32>
    %460 = tpu.matmul %453, %459, %cst_177 {dimension_numbers = #tpu.dot_dimension_numbers<[1], [0], [0], [1], [0, 0, 1, 1], [], []>} : vector<32x32xf32>, vector<32x16xf32>, vector<32x16xf32> -> vector<32x16xf32>
    %c1480 = arith.constant 1480 : index
    %c0_178 = arith.constant 0 : index
    %461 = vector.load %arg3[%c1480, %c0_178] : memref<2568x128xf32, #tpu.memory_space<vmem>>, vector<1x16xf32>
    %462 = vector.broadcast %461 : vector<1x16xf32> to vector<32x16xf32>
    %463 = arith.addf %460, %462 : vector<32x16xf32>
    %c1704 = arith.constant 1704 : index
    %c0_179 = arith.constant 0 : index
    %464 = vector.load %arg3[%c1704, %c0_179] : memref<2568x128xf32, #tpu.memory_space<vmem>>, vector<32x16xf32>
    %cst_180 = arith.constant dense<0.000000e+00> : vector<32x16xf32>
    %465 = tpu.matmul %347, %464, %cst_180 {dimension_numbers = #tpu.dot_dimension_numbers<[1], [0], [0], [1], [0, 0, 1, 1], [], []>} : vector<32x32xf32>, vector<32x16xf32>, vector<32x16xf32> -> vector<32x16xf32>
    %c1688 = arith.constant 1688 : index
    %c0_181 = arith.constant 0 : index
    %466 = vector.load %arg3[%c1688, %c0_181] : memref<2568x128xf32, #tpu.memory_space<vmem>>, vector<1x16xf32>
    %467 = vector.broadcast %466 : vector<1x16xf32> to vector<32x16xf32>
    %468 = arith.addf %465, %467 : vector<32x16xf32>
    %c1576 = arith.constant 1576 : index
    %c0_182 = arith.constant 0 : index
    %469 = vector.load %arg3[%c1576, %c0_182] : memref<2568x128xf32, #tpu.memory_space<vmem>>, vector<16x32xf32>
    %470 = vector.extract_strided_slice %458 {offsets = [0, 0], sizes = [12, 8], strides = [1, 1]} : vector<12x16xf32> to vector<12x8xf32>
    %471 = vector.extract_strided_slice %463 {offsets = [0, 0], sizes = [32, 8], strides = [1, 1]} : vector<32x16xf32> to vector<32x8xf32>
    %cst_183 = arith.constant dense<0.000000e+00> : vector<12x32xf32>
    %472 = tpu.matmul %470, %471, %cst_183 {dimension_numbers = #tpu.dot_dimension_numbers<[1], [1], [0], [0], [0, 0, 1, 0], [], []>} : vector<12x8xf32>, vector<32x8xf32>, vector<12x32xf32> -> vector<12x32xf32>
    %cst_184 = arith.constant 0.353553385 : f32
    %473 = vector.broadcast %cst_184 : f32 to vector<12x32xf32>
    %474 = arith.mulf %472, %473 : vector<12x32xf32>
    %475 = arith.addf %474, %368 : vector<12x32xf32>
    %cst_185 = arith.constant dense<0xFF800000> : vector<12xf32>
    %476 = vector.multi_reduction <maximumf>, %475, %cst_185 [1] : vector<12x32xf32> to vector<12xf32>
    %477 = vector.shape_cast %476 : vector<12xf32> to vector<12x1xf32>
    %478 = vector.broadcast %477 : vector<12x1xf32> to vector<12x32xf32>
    %479 = arith.subf %475, %478 : vector<12x32xf32>
    %480 = math.exp %479 : vector<12x32xf32>
    %cst_186 = arith.constant dense<0.000000e+00> : vector<12xf32>
    %481 = vector.multi_reduction <add>, %480, %cst_186 [1] : vector<12x32xf32> to vector<12xf32>
    %482 = vector.shape_cast %481 : vector<12xf32> to vector<12x1xf32>
    %483 = vector.broadcast %482 : vector<12x1xf32> to vector<12x32xf32>
    %484 = arith.divf %480, %483 : vector<12x32xf32>
    %485 = vector.extract_strided_slice %468 {offsets = [0, 0], sizes = [32, 8], strides = [1, 1]} : vector<32x16xf32> to vector<32x8xf32>
    %cst_187 = arith.constant dense<0.000000e+00> : vector<12x8xf32>
    %486 = tpu.matmul %484, %485, %cst_187 {dimension_numbers = #tpu.dot_dimension_numbers<[1], [0], [0], [1], [0, 0, 1, 1], [], []>} : vector<12x32xf32>, vector<32x8xf32>, vector<12x8xf32> -> vector<12x8xf32>
    %487 = vector.extract_strided_slice %469 {offsets = [0, 0], sizes = [8, 32], strides = [1, 1]} : vector<16x32xf32> to vector<8x32xf32>
    %cst_188 = arith.constant dense<0.000000e+00> : vector<12x32xf32>
    %488 = tpu.matmul %486, %487, %cst_188 {dimension_numbers = #tpu.dot_dimension_numbers<[1], [0], [0], [1], [0, 0, 1, 1], [], []>} : vector<12x8xf32>, vector<8x32xf32>, vector<12x32xf32> -> vector<12x32xf32>
    %489 = vector.extract_strided_slice %458 {offsets = [0, 8], sizes = [12, 8], strides = [1, 1]} : vector<12x16xf32> to vector<12x8xf32>
    %490 = vector.extract_strided_slice %463 {offsets = [0, 8], sizes = [32, 8], strides = [1, 1]} : vector<32x16xf32> to vector<32x8xf32>
    %cst_189 = arith.constant dense<0.000000e+00> : vector<12x32xf32>
    %491 = tpu.matmul %489, %490, %cst_189 {dimension_numbers = #tpu.dot_dimension_numbers<[1], [1], [0], [0], [0, 0, 1, 0], [], []>} : vector<12x8xf32>, vector<32x8xf32>, vector<12x32xf32> -> vector<12x32xf32>
    %cst_190 = arith.constant 0.353553385 : f32
    %492 = vector.broadcast %cst_190 : f32 to vector<12x32xf32>
    %493 = arith.mulf %491, %492 : vector<12x32xf32>
    %494 = arith.addf %493, %368 : vector<12x32xf32>
    %cst_191 = arith.constant dense<0xFF800000> : vector<12xf32>
    %495 = vector.multi_reduction <maximumf>, %494, %cst_191 [1] : vector<12x32xf32> to vector<12xf32>
    %496 = vector.shape_cast %495 : vector<12xf32> to vector<12x1xf32>
    %497 = vector.broadcast %496 : vector<12x1xf32> to vector<12x32xf32>
    %498 = arith.subf %494, %497 : vector<12x32xf32>
    %499 = math.exp %498 : vector<12x32xf32>
    %cst_192 = arith.constant dense<0.000000e+00> : vector<12xf32>
    %500 = vector.multi_reduction <add>, %499, %cst_192 [1] : vector<12x32xf32> to vector<12xf32>
    %501 = vector.shape_cast %500 : vector<12xf32> to vector<12x1xf32>
    %502 = vector.broadcast %501 : vector<12x1xf32> to vector<12x32xf32>
    %503 = arith.divf %499, %502 : vector<12x32xf32>
    %504 = vector.extract_strided_slice %468 {offsets = [0, 8], sizes = [32, 8], strides = [1, 1]} : vector<32x16xf32> to vector<32x8xf32>
    %cst_193 = arith.constant dense<0.000000e+00> : vector<12x8xf32>
    %505 = tpu.matmul %503, %504, %cst_193 {dimension_numbers = #tpu.dot_dimension_numbers<[1], [0], [0], [1], [0, 0, 1, 1], [], []>} : vector<12x32xf32>, vector<32x8xf32>, vector<12x8xf32> -> vector<12x8xf32>
    %506 = vector.extract_strided_slice %469 {offsets = [8, 0], sizes = [8, 32], strides = [1, 1]} : vector<16x32xf32> to vector<8x32xf32>
    %cst_194 = arith.constant dense<0.000000e+00> : vector<12x32xf32>
    %507 = tpu.matmul %505, %506, %cst_194 {dimension_numbers = #tpu.dot_dimension_numbers<[1], [0], [0], [1], [0, 0, 1, 1], [], []>} : vector<12x8xf32>, vector<8x32xf32>, vector<12x32xf32> -> vector<12x32xf32>
    %508 = arith.addf %488, %507 : vector<12x32xf32>
    %c1560 = arith.constant 1560 : index
    %c0_195 = arith.constant 0 : index
    %509 = vector.load %arg3[%c1560, %c0_195] : memref<2568x128xf32, #tpu.memory_space<vmem>>, vector<1x32xf32>
    %510 = vector.broadcast %509 : vector<1x32xf32> to vector<12x32xf32>
    %511 = arith.addf %508, %510 : vector<12x32xf32>
    %512 = arith.addf %451, %511 : vector<12x32xf32>
    %c1816 = arith.constant 1816 : index
    %c0_196 = arith.constant 0 : index
    %513 = vector.load %arg3[%c1816, %c0_196] : memref<2568x128xf32, #tpu.memory_space<vmem>>, vector<1x32xf32>
    %c1800 = arith.constant 1800 : index
    %c0_197 = arith.constant 0 : index
    %514 = vector.load %arg3[%c1800, %c0_197] : memref<2568x128xf32, #tpu.memory_space<vmem>>, vector<1x32xf32>
    %cst_198 = arith.constant dense<0.000000e+00> : vector<12xf32>
    %515 = vector.multi_reduction <add>, %512, %cst_198 [1] : vector<12x32xf32> to vector<12xf32>
    %516 = vector.shape_cast %515 : vector<12xf32> to vector<12x1xf32>
    %cst_199 = arith.constant 3.200000e+01 : f32
    %517 = vector.broadcast %cst_199 : f32 to vector<12x1xf32>
    %518 = arith.divf %516, %517 : vector<12x1xf32>
    %519 = vector.broadcast %518 : vector<12x1xf32> to vector<12x32xf32>
    %520 = arith.subf %512, %519 : vector<12x32xf32>
    %521 = arith.mulf %520, %520 : vector<12x32xf32>
    %cst_200 = arith.constant dense<0.000000e+00> : vector<12xf32>
    %522 = vector.multi_reduction <add>, %521, %cst_200 [1] : vector<12x32xf32> to vector<12xf32>
    %523 = vector.shape_cast %522 : vector<12xf32> to vector<12x1xf32>
    %cst_201 = arith.constant 3.200000e+01 : f32
    %524 = vector.broadcast %cst_201 : f32 to vector<12x1xf32>
    %525 = arith.divf %523, %524 : vector<12x1xf32>
    %526 = vector.broadcast %518 : vector<12x1xf32> to vector<12x32xf32>
    %527 = arith.subf %512, %526 : vector<12x32xf32>
    %cst_202 = arith.constant 9.99999974E-6 : f32
    %528 = vector.broadcast %cst_202 : f32 to vector<12x1xf32>
    %529 = arith.addf %525, %528 : vector<12x1xf32>
    %530 = math.rsqrt %529 : vector<12x1xf32>
    %531 = vector.broadcast %530 : vector<12x1xf32> to vector<12x32xf32>
    %532 = arith.mulf %527, %531 : vector<12x32xf32>
    %533 = vector.broadcast %513 : vector<1x32xf32> to vector<12x32xf32>
    %534 = arith.mulf %532, %533 : vector<12x32xf32>
    %535 = vector.broadcast %514 : vector<1x32xf32> to vector<12x32xf32>
    %536 = arith.addf %534, %535 : vector<12x32xf32>
    %c1912 = arith.constant 1912 : index
    %c0_203 = arith.constant 0 : index
    %537 = vector.load %arg3[%c1912, %c0_203] : memref<2568x128xf32, #tpu.memory_space<vmem>>, vector<32x64xf32>
    %cst_204 = arith.constant dense<0.000000e+00> : vector<12x64xf32>
    %538 = tpu.matmul %536, %537, %cst_204 {dimension_numbers = #tpu.dot_dimension_numbers<[1], [0], [0], [1], [0, 0, 1, 1], [], []>} : vector<12x32xf32>, vector<32x64xf32>, vector<12x64xf32> -> vector<12x64xf32>
    %c1896 = arith.constant 1896 : index
    %c0_205 = arith.constant 0 : index
    %539 = vector.load %arg3[%c1896, %c0_205] : memref<2568x128xf32, #tpu.memory_space<vmem>>, vector<1x64xf32>
    %540 = vector.broadcast %539 : vector<1x64xf32> to vector<12x64xf32>
    %541 = arith.addf %538, %540 : vector<12x64xf32>
    %cst_206 = arith.constant 0.000000e+00 : f32
    %542 = vector.broadcast %cst_206 : f32 to vector<12x64xf32>
    %543 = arith.maximumf %541, %542 : vector<12x64xf32>
    %c1992 = arith.constant 1992 : index
    %c0_207 = arith.constant 0 : index
    %544 = vector.load %arg3[%c1992, %c0_207] : memref<2568x128xf32, #tpu.memory_space<vmem>>, vector<64x32xf32>
    %cst_208 = arith.constant dense<0.000000e+00> : vector<12x32xf32>
    %545 = tpu.matmul %543, %544, %cst_208 {dimension_numbers = #tpu.dot_dimension_numbers<[1], [0], [0], [1], [0, 0, 1, 1], [], []>} : vector<12x64xf32>, vector<64x32xf32>, vector<12x32xf32> -> vector<12x32xf32>
    %c1976 = arith.constant 1976 : index
    %c0_209 = arith.constant 0 : index
    %546 = vector.load %arg3[%c1976, %c0_209] : memref<2568x128xf32, #tpu.memory_space<vmem>>, vector<1x32xf32>
    %547 = vector.broadcast %546 : vector<1x32xf32> to vector<12x32xf32>
    %548 = arith.addf %545, %547 : vector<12x32xf32>
    %549 = arith.addf %536, %548 : vector<12x32xf32>
    %c1848 = arith.constant 1848 : index
    %c0_210 = arith.constant 0 : index
    %550 = vector.load %arg3[%c1848, %c0_210] : memref<2568x128xf32, #tpu.memory_space<vmem>>, vector<1x32xf32>
    %c1832 = arith.constant 1832 : index
    %c0_211 = arith.constant 0 : index
    %551 = vector.load %arg3[%c1832, %c0_211] : memref<2568x128xf32, #tpu.memory_space<vmem>>, vector<1x32xf32>
    %cst_212 = arith.constant dense<0.000000e+00> : vector<12xf32>
    %552 = vector.multi_reduction <add>, %549, %cst_212 [1] : vector<12x32xf32> to vector<12xf32>
    %553 = vector.shape_cast %552 : vector<12xf32> to vector<12x1xf32>
    %cst_213 = arith.constant 3.200000e+01 : f32
    %554 = vector.broadcast %cst_213 : f32 to vector<12x1xf32>
    %555 = arith.divf %553, %554 : vector<12x1xf32>
    %556 = vector.broadcast %555 : vector<12x1xf32> to vector<12x32xf32>
    %557 = arith.subf %549, %556 : vector<12x32xf32>
    %558 = arith.mulf %557, %557 : vector<12x32xf32>
    %cst_214 = arith.constant dense<0.000000e+00> : vector<12xf32>
    %559 = vector.multi_reduction <add>, %558, %cst_214 [1] : vector<12x32xf32> to vector<12xf32>
    %560 = vector.shape_cast %559 : vector<12xf32> to vector<12x1xf32>
    %cst_215 = arith.constant 3.200000e+01 : f32
    %561 = vector.broadcast %cst_215 : f32 to vector<12x1xf32>
    %562 = arith.divf %560, %561 : vector<12x1xf32>
    %563 = vector.broadcast %555 : vector<12x1xf32> to vector<12x32xf32>
    %564 = arith.subf %549, %563 : vector<12x32xf32>
    %cst_216 = arith.constant 9.99999974E-6 : f32
    %565 = vector.broadcast %cst_216 : f32 to vector<12x1xf32>
    %566 = arith.addf %562, %565 : vector<12x1xf32>
    %567 = math.rsqrt %566 : vector<12x1xf32>
    %568 = vector.broadcast %567 : vector<12x1xf32> to vector<12x32xf32>
    %569 = arith.mulf %564, %568 : vector<12x32xf32>
    %570 = vector.broadcast %550 : vector<1x32xf32> to vector<12x32xf32>
    %571 = arith.mulf %569, %570 : vector<12x32xf32>
    %572 = vector.broadcast %551 : vector<1x32xf32> to vector<12x32xf32>
    %573 = arith.addf %571, %572 : vector<12x32xf32>
    %574 = arith.addf %573, %366 : vector<12x32xf32>
    %575 = arith.addf %347, %344 : vector<32x32xf32>
    %c1336 = arith.constant 1336 : index
    %c0_217 = arith.constant 0 : index
    %576 = vector.load %arg3[%c1336, %c0_217] : memref<2568x128xf32, #tpu.memory_space<vmem>>, vector<32x16xf32>
    %cst_218 = arith.constant dense<0.000000e+00> : vector<32x16xf32>
    %577 = tpu.matmul %575, %576, %cst_218 {dimension_numbers = #tpu.dot_dimension_numbers<[1], [0], [0], [1], [0, 0, 1, 1], [], []>} : vector<32x32xf32>, vector<32x16xf32>, vector<32x16xf32> -> vector<32x16xf32>
    %c1320 = arith.constant 1320 : index
    %c0_219 = arith.constant 0 : index
    %578 = vector.load %arg3[%c1320, %c0_219] : memref<2568x128xf32, #tpu.memory_space<vmem>>, vector<1x16xf32>
    %579 = vector.broadcast %578 : vector<1x16xf32> to vector<32x16xf32>
    %580 = arith.addf %577, %579 : vector<32x16xf32>
    %c1208 = arith.constant 1208 : index
    %c0_220 = arith.constant 0 : index
    %581 = vector.load %arg3[%c1208, %c0_220] : memref<2568x128xf32, #tpu.memory_space<vmem>>, vector<32x16xf32>
    %cst_221 = arith.constant dense<0.000000e+00> : vector<12x16xf32>
    %582 = tpu.matmul %574, %581, %cst_221 {dimension_numbers = #tpu.dot_dimension_numbers<[1], [0], [0], [1], [0, 0, 1, 1], [], []>} : vector<12x32xf32>, vector<32x16xf32>, vector<12x16xf32> -> vector<12x16xf32>
    %c1192 = arith.constant 1192 : index
    %c0_222 = arith.constant 0 : index
    %583 = vector.load %arg3[%c1192, %c0_222] : memref<2568x128xf32, #tpu.memory_space<vmem>>, vector<1x16xf32>
    %584 = vector.broadcast %583 : vector<1x16xf32> to vector<12x16xf32>
    %585 = arith.addf %582, %584 : vector<12x16xf32>
    %c1416_223 = arith.constant 1416 : index
    %c0_224 = arith.constant 0 : index
    %586 = vector.load %arg3[%c1416_223, %c0_224] : memref<2568x128xf32, #tpu.memory_space<vmem>>, vector<32x16xf32>
    %cst_225 = arith.constant dense<0.000000e+00> : vector<12x16xf32>
    %587 = tpu.matmul %573, %586, %cst_225 {dimension_numbers = #tpu.dot_dimension_numbers<[1], [0], [0], [1], [0, 0, 1, 1], [], []>} : vector<12x32xf32>, vector<32x16xf32>, vector<12x16xf32> -> vector<12x16xf32>
    %c1400 = arith.constant 1400 : index
    %c0_226 = arith.constant 0 : index
    %588 = vector.load %arg3[%c1400, %c0_226] : memref<2568x128xf32, #tpu.memory_space<vmem>>, vector<1x16xf32>
    %589 = vector.broadcast %588 : vector<1x16xf32> to vector<12x16xf32>
    %590 = arith.addf %587, %589 : vector<12x16xf32>
    %c1288 = arith.constant 1288 : index
    %c0_227 = arith.constant 0 : index
    %591 = vector.load %arg3[%c1288, %c0_227] : memref<2568x128xf32, #tpu.memory_space<vmem>>, vector<16x32xf32>
    %592 = vector.extract_strided_slice %580 {offsets = [0, 0], sizes = [32, 8], strides = [1, 1]} : vector<32x16xf32> to vector<32x8xf32>
    %593 = vector.extract_strided_slice %585 {offsets = [0, 0], sizes = [12, 8], strides = [1, 1]} : vector<12x16xf32> to vector<12x8xf32>
    %cst_228 = arith.constant dense<0.000000e+00> : vector<32x12xf32>
    %594 = tpu.matmul %592, %593, %cst_228 {dimension_numbers = #tpu.dot_dimension_numbers<[1], [1], [0], [0], [0, 0, 1, 0], [], []>} : vector<32x8xf32>, vector<12x8xf32>, vector<32x12xf32> -> vector<32x12xf32>
    %cst_229 = arith.constant 0.353553385 : f32
    %595 = vector.broadcast %cst_229 : f32 to vector<32x12xf32>
    %596 = arith.mulf %594, %595 : vector<32x12xf32>
    %597 = arith.addf %596, %369 : vector<32x12xf32>
    %cst_230 = arith.constant dense<0xFF800000> : vector<32xf32>
    %598 = vector.multi_reduction <maximumf>, %597, %cst_230 [1] : vector<32x12xf32> to vector<32xf32>
    %599 = vector.shape_cast %598 : vector<32xf32> to vector<32x1xf32>
    %600 = vector.broadcast %599 : vector<32x1xf32> to vector<32x12xf32>
    %601 = arith.subf %597, %600 : vector<32x12xf32>
    %602 = math.exp %601 : vector<32x12xf32>
    %cst_231 = arith.constant dense<0.000000e+00> : vector<32xf32>
    %603 = vector.multi_reduction <add>, %602, %cst_231 [1] : vector<32x12xf32> to vector<32xf32>
    %604 = vector.shape_cast %603 : vector<32xf32> to vector<32x1xf32>
    %605 = vector.broadcast %604 : vector<32x1xf32> to vector<32x12xf32>
    %606 = arith.divf %602, %605 : vector<32x12xf32>
    %607 = vector.extract_strided_slice %590 {offsets = [0, 0], sizes = [12, 8], strides = [1, 1]} : vector<12x16xf32> to vector<12x8xf32>
    %cst_232 = arith.constant dense<0.000000e+00> : vector<32x8xf32>
    %608 = tpu.matmul %606, %607, %cst_232 {dimension_numbers = #tpu.dot_dimension_numbers<[1], [0], [0], [1], [0, 0, 1, 1], [], []>} : vector<32x12xf32>, vector<12x8xf32>, vector<32x8xf32> -> vector<32x8xf32>
    %609 = vector.extract_strided_slice %591 {offsets = [0, 0], sizes = [8, 32], strides = [1, 1]} : vector<16x32xf32> to vector<8x32xf32>
    %cst_233 = arith.constant dense<0.000000e+00> : vector<32x32xf32>
    %610 = tpu.matmul %608, %609, %cst_233 {dimension_numbers = #tpu.dot_dimension_numbers<[1], [0], [0], [1], [0, 0, 1, 1], [], []>} : vector<32x8xf32>, vector<8x32xf32>, vector<32x32xf32> -> vector<32x32xf32>
    %611 = vector.extract_strided_slice %580 {offsets = [0, 8], sizes = [32, 8], strides = [1, 1]} : vector<32x16xf32> to vector<32x8xf32>
    %612 = vector.extract_strided_slice %585 {offsets = [0, 8], sizes = [12, 8], strides = [1, 1]} : vector<12x16xf32> to vector<12x8xf32>
    %cst_234 = arith.constant dense<0.000000e+00> : vector<32x12xf32>
    %613 = tpu.matmul %611, %612, %cst_234 {dimension_numbers = #tpu.dot_dimension_numbers<[1], [1], [0], [0], [0, 0, 1, 0], [], []>} : vector<32x8xf32>, vector<12x8xf32>, vector<32x12xf32> -> vector<32x12xf32>
    %cst_235 = arith.constant 0.353553385 : f32
    %614 = vector.broadcast %cst_235 : f32 to vector<32x12xf32>
    %615 = arith.mulf %613, %614 : vector<32x12xf32>
    %616 = arith.addf %615, %369 : vector<32x12xf32>
    %cst_236 = arith.constant dense<0xFF800000> : vector<32xf32>
    %617 = vector.multi_reduction <maximumf>, %616, %cst_236 [1] : vector<32x12xf32> to vector<32xf32>
    %618 = vector.shape_cast %617 : vector<32xf32> to vector<32x1xf32>
    %619 = vector.broadcast %618 : vector<32x1xf32> to vector<32x12xf32>
    %620 = arith.subf %616, %619 : vector<32x12xf32>
    %621 = math.exp %620 : vector<32x12xf32>
    %cst_237 = arith.constant dense<0.000000e+00> : vector<32xf32>
    %622 = vector.multi_reduction <add>, %621, %cst_237 [1] : vector<32x12xf32> to vector<32xf32>
    %623 = vector.shape_cast %622 : vector<32xf32> to vector<32x1xf32>
    %624 = vector.broadcast %623 : vector<32x1xf32> to vector<32x12xf32>
    %625 = arith.divf %621, %624 : vector<32x12xf32>
    %626 = vector.extract_strided_slice %590 {offsets = [0, 8], sizes = [12, 8], strides = [1, 1]} : vector<12x16xf32> to vector<12x8xf32>
    %cst_238 = arith.constant dense<0.000000e+00> : vector<32x8xf32>
    %627 = tpu.matmul %625, %626, %cst_238 {dimension_numbers = #tpu.dot_dimension_numbers<[1], [0], [0], [1], [0, 0, 1, 1], [], []>} : vector<32x12xf32>, vector<12x8xf32>, vector<32x8xf32> -> vector<32x8xf32>
    %628 = vector.extract_strided_slice %591 {offsets = [8, 0], sizes = [8, 32], strides = [1, 1]} : vector<16x32xf32> to vector<8x32xf32>
    %cst_239 = arith.constant dense<0.000000e+00> : vector<32x32xf32>
    %629 = tpu.matmul %627, %628, %cst_239 {dimension_numbers = #tpu.dot_dimension_numbers<[1], [0], [0], [1], [0, 0, 1, 1], [], []>} : vector<32x8xf32>, vector<8x32xf32>, vector<32x32xf32> -> vector<32x32xf32>
    %630 = arith.addf %610, %629 : vector<32x32xf32>
    %c1272 = arith.constant 1272 : index
    %c0_240 = arith.constant 0 : index
    %631 = vector.load %arg3[%c1272, %c0_240] : memref<2568x128xf32, #tpu.memory_space<vmem>>, vector<1x32xf32>
    %632 = vector.broadcast %631 : vector<1x32xf32> to vector<32x32xf32>
    %633 = arith.addf %630, %632 : vector<32x32xf32>
    %634 = arith.addf %347, %633 : vector<32x32xf32>
    %c1880 = arith.constant 1880 : index
    %c0_241 = arith.constant 0 : index
    %635 = vector.load %arg3[%c1880, %c0_241] : memref<2568x128xf32, #tpu.memory_space<vmem>>, vector<1x32xf32>
    %c1864 = arith.constant 1864 : index
    %c0_242 = arith.constant 0 : index
    %636 = vector.load %arg3[%c1864, %c0_242] : memref<2568x128xf32, #tpu.memory_space<vmem>>, vector<1x32xf32>
    %cst_243 = arith.constant dense<0.000000e+00> : vector<32xf32>
    %637 = vector.multi_reduction <add>, %634, %cst_243 [1] : vector<32x32xf32> to vector<32xf32>
    %638 = vector.shape_cast %637 : vector<32xf32> to vector<32x1xf32>
    %cst_244 = arith.constant 3.200000e+01 : f32
    %639 = vector.broadcast %cst_244 : f32 to vector<32x1xf32>
    %640 = arith.divf %638, %639 : vector<32x1xf32>
    %641 = vector.broadcast %640 : vector<32x1xf32> to vector<32x32xf32>
    %642 = arith.subf %634, %641 : vector<32x32xf32>
    %643 = arith.mulf %642, %642 : vector<32x32xf32>
    %cst_245 = arith.constant dense<0.000000e+00> : vector<32xf32>
    %644 = vector.multi_reduction <add>, %643, %cst_245 [1] : vector<32x32xf32> to vector<32xf32>
    %645 = vector.shape_cast %644 : vector<32xf32> to vector<32x1xf32>
    %cst_246 = arith.constant 3.200000e+01 : f32
    %646 = vector.broadcast %cst_246 : f32 to vector<32x1xf32>
    %647 = arith.divf %645, %646 : vector<32x1xf32>
    %648 = vector.broadcast %640 : vector<32x1xf32> to vector<32x32xf32>
    %649 = arith.subf %634, %648 : vector<32x32xf32>
    %cst_247 = arith.constant 9.99999974E-6 : f32
    %650 = vector.broadcast %cst_247 : f32 to vector<32x1xf32>
    %651 = arith.addf %647, %650 : vector<32x1xf32>
    %652 = math.rsqrt %651 : vector<32x1xf32>
    %653 = vector.broadcast %652 : vector<32x1xf32> to vector<32x32xf32>
    %654 = arith.mulf %649, %653 : vector<32x32xf32>
    %655 = vector.broadcast %635 : vector<1x32xf32> to vector<32x32xf32>
    %656 = arith.mulf %654, %655 : vector<32x32xf32>
    %657 = vector.broadcast %636 : vector<1x32xf32> to vector<32x32xf32>
    %658 = arith.addf %656, %657 : vector<32x32xf32>
    %659 = arith.addf %573, %366 : vector<12x32xf32>
    %c2328 = arith.constant 2328 : index
    %c0_248 = arith.constant 0 : index
    %660 = vector.load %arg3[%c2328, %c0_248] : memref<2568x128xf32, #tpu.memory_space<vmem>>, vector<32x32xf32>
    %cst_249 = arith.constant dense<0.000000e+00> : vector<12x32xf32>
    %661 = tpu.matmul %659, %660, %cst_249 {dimension_numbers = #tpu.dot_dimension_numbers<[1], [0], [0], [1], [0, 0, 1, 1], [], []>} : vector<12x32xf32>, vector<32x32xf32>, vector<12x32xf32> -> vector<12x32xf32>
    %c2288 = arith.constant 2288 : index
    %c0_250 = arith.constant 0 : index
    %662 = vector.load %arg3[%c2288, %c0_250] : memref<2568x128xf32, #tpu.memory_space<vmem>>, vector<1x32xf32>
    %663 = vector.broadcast %662 : vector<1x32xf32> to vector<12x32xf32>
    %664 = arith.addf %661, %663 : vector<12x32xf32>
    %c2168 = arith.constant 2168 : index
    %c0_251 = arith.constant 0 : index
    %665 = vector.load %arg3[%c2168, %c0_251] : memref<2568x128xf32, #tpu.memory_space<vmem>>, vector<32x32xf32>
    %cst_252 = arith.constant dense<0.000000e+00> : vector<12x32xf32>
    %666 = tpu.matmul %659, %665, %cst_252 {dimension_numbers = #tpu.dot_dimension_numbers<[1], [0], [0], [1], [0, 0, 1, 1], [], []>} : vector<12x32xf32>, vector<32x32xf32>, vector<12x32xf32> -> vector<12x32xf32>
    %c2128 = arith.constant 2128 : index
    %c0_253 = arith.constant 0 : index
    %667 = vector.load %arg3[%c2128, %c0_253] : memref<2568x128xf32, #tpu.memory_space<vmem>>, vector<1x32xf32>
    %668 = vector.broadcast %667 : vector<1x32xf32> to vector<12x32xf32>
    %669 = arith.addf %666, %668 : vector<12x32xf32>
    %c2408 = arith.constant 2408 : index
    %c0_254 = arith.constant 0 : index
    %670 = vector.load %arg3[%c2408, %c0_254] : memref<2568x128xf32, #tpu.memory_space<vmem>>, vector<32x32xf32>
    %cst_255 = arith.constant dense<0.000000e+00> : vector<12x32xf32>
    %671 = tpu.matmul %573, %670, %cst_255 {dimension_numbers = #tpu.dot_dimension_numbers<[1], [0], [0], [1], [0, 0, 1, 1], [], []>} : vector<12x32xf32>, vector<32x32xf32>, vector<12x32xf32> -> vector<12x32xf32>
    %c2368 = arith.constant 2368 : index
    %c0_256 = arith.constant 0 : index
    %672 = vector.load %arg3[%c2368, %c0_256] : memref<2568x128xf32, #tpu.memory_space<vmem>>, vector<1x32xf32>
    %673 = vector.broadcast %672 : vector<1x32xf32> to vector<12x32xf32>
    %674 = arith.addf %671, %673 : vector<12x32xf32>
    %c2248 = arith.constant 2248 : index
    %c0_257 = arith.constant 0 : index
    %675 = vector.load %arg3[%c2248, %c0_257] : memref<2568x128xf32, #tpu.memory_space<vmem>>, vector<32x32xf32>
    %676 = vector.extract_strided_slice %664 {offsets = [0, 0], sizes = [12, 16], strides = [1, 1]} : vector<12x32xf32> to vector<12x16xf32>
    %677 = vector.extract_strided_slice %669 {offsets = [0, 0], sizes = [12, 16], strides = [1, 1]} : vector<12x32xf32> to vector<12x16xf32>
    %cst_258 = arith.constant dense<0.000000e+00> : vector<12x12xf32>
    %678 = tpu.matmul %676, %677, %cst_258 {dimension_numbers = #tpu.dot_dimension_numbers<[1], [1], [0], [0], [0, 0, 1, 0], [], []>} : vector<12x16xf32>, vector<12x16xf32>, vector<12x12xf32> -> vector<12x12xf32>
    %cst_259 = arith.constant 2.500000e-01 : f32
    %679 = vector.broadcast %cst_259 : f32 to vector<12x12xf32>
    %680 = arith.mulf %678, %679 : vector<12x12xf32>
    %681 = arith.addf %680, %367 : vector<12x12xf32>
    %cst_260 = arith.constant dense<0xFF800000> : vector<12xf32>
    %682 = vector.multi_reduction <maximumf>, %681, %cst_260 [1] : vector<12x12xf32> to vector<12xf32>
    %683 = vector.shape_cast %682 : vector<12xf32> to vector<12x1xf32>
    %684 = vector.broadcast %683 : vector<12x1xf32> to vector<12x12xf32>
    %685 = arith.subf %681, %684 : vector<12x12xf32>
    %686 = math.exp %685 : vector<12x12xf32>
    %cst_261 = arith.constant dense<0.000000e+00> : vector<12xf32>
    %687 = vector.multi_reduction <add>, %686, %cst_261 [1] : vector<12x12xf32> to vector<12xf32>
    %688 = vector.shape_cast %687 : vector<12xf32> to vector<12x1xf32>
    %689 = vector.broadcast %688 : vector<12x1xf32> to vector<12x12xf32>
    %690 = arith.divf %686, %689 : vector<12x12xf32>
    %691 = vector.extract_strided_slice %674 {offsets = [0, 0], sizes = [12, 16], strides = [1, 1]} : vector<12x32xf32> to vector<12x16xf32>
    %cst_262 = arith.constant dense<0.000000e+00> : vector<12x16xf32>
    %692 = tpu.matmul %690, %691, %cst_262 {dimension_numbers = #tpu.dot_dimension_numbers<[1], [0], [0], [1], [0, 0, 1, 1], [], []>} : vector<12x12xf32>, vector<12x16xf32>, vector<12x16xf32> -> vector<12x16xf32>
    %693 = vector.extract_strided_slice %675 {offsets = [0, 0], sizes = [16, 32], strides = [1, 1]} : vector<32x32xf32> to vector<16x32xf32>
    %cst_263 = arith.constant dense<0.000000e+00> : vector<12x32xf32>
    %694 = tpu.matmul %692, %693, %cst_263 {dimension_numbers = #tpu.dot_dimension_numbers<[1], [0], [0], [1], [0, 0, 1, 1], [], []>} : vector<12x16xf32>, vector<16x32xf32>, vector<12x32xf32> -> vector<12x32xf32>
    %695 = vector.extract_strided_slice %664 {offsets = [0, 16], sizes = [12, 16], strides = [1, 1]} : vector<12x32xf32> to vector<12x16xf32>
    %696 = vector.extract_strided_slice %669 {offsets = [0, 16], sizes = [12, 16], strides = [1, 1]} : vector<12x32xf32> to vector<12x16xf32>
    %cst_264 = arith.constant dense<0.000000e+00> : vector<12x12xf32>
    %697 = tpu.matmul %695, %696, %cst_264 {dimension_numbers = #tpu.dot_dimension_numbers<[1], [1], [0], [0], [0, 0, 1, 0], [], []>} : vector<12x16xf32>, vector<12x16xf32>, vector<12x12xf32> -> vector<12x12xf32>
    %cst_265 = arith.constant 2.500000e-01 : f32
    %698 = vector.broadcast %cst_265 : f32 to vector<12x12xf32>
    %699 = arith.mulf %697, %698 : vector<12x12xf32>
    %700 = arith.addf %699, %367 : vector<12x12xf32>
    %cst_266 = arith.constant dense<0xFF800000> : vector<12xf32>
    %701 = vector.multi_reduction <maximumf>, %700, %cst_266 [1] : vector<12x12xf32> to vector<12xf32>
    %702 = vector.shape_cast %701 : vector<12xf32> to vector<12x1xf32>
    %703 = vector.broadcast %702 : vector<12x1xf32> to vector<12x12xf32>
    %704 = arith.subf %700, %703 : vector<12x12xf32>
    %705 = math.exp %704 : vector<12x12xf32>
    %cst_267 = arith.constant dense<0.000000e+00> : vector<12xf32>
    %706 = vector.multi_reduction <add>, %705, %cst_267 [1] : vector<12x12xf32> to vector<12xf32>
    %707 = vector.shape_cast %706 : vector<12xf32> to vector<12x1xf32>
    %708 = vector.broadcast %707 : vector<12x1xf32> to vector<12x12xf32>
    %709 = arith.divf %705, %708 : vector<12x12xf32>
    %710 = vector.extract_strided_slice %674 {offsets = [0, 16], sizes = [12, 16], strides = [1, 1]} : vector<12x32xf32> to vector<12x16xf32>
    %cst_268 = arith.constant dense<0.000000e+00> : vector<12x16xf32>
    %711 = tpu.matmul %709, %710, %cst_268 {dimension_numbers = #tpu.dot_dimension_numbers<[1], [0], [0], [1], [0, 0, 1, 1], [], []>} : vector<12x12xf32>, vector<12x16xf32>, vector<12x16xf32> -> vector<12x16xf32>
    %712 = vector.extract_strided_slice %675 {offsets = [16, 0], sizes = [16, 32], strides = [1, 1]} : vector<32x32xf32> to vector<16x32xf32>
    %cst_269 = arith.constant dense<0.000000e+00> : vector<12x32xf32>
    %713 = tpu.matmul %711, %712, %cst_269 {dimension_numbers = #tpu.dot_dimension_numbers<[1], [0], [0], [1], [0, 0, 1, 1], [], []>} : vector<12x16xf32>, vector<16x32xf32>, vector<12x32xf32> -> vector<12x32xf32>
    %714 = arith.addf %694, %713 : vector<12x32xf32>
    %c2208 = arith.constant 2208 : index
    %c0_270 = arith.constant 0 : index
    %715 = vector.load %arg3[%c2208, %c0_270] : memref<2568x128xf32, #tpu.memory_space<vmem>>, vector<1x32xf32>
    %716 = vector.broadcast %715 : vector<1x32xf32> to vector<12x32xf32>
    %717 = arith.addf %714, %716 : vector<12x32xf32>
    %718 = arith.addf %573, %717 : vector<12x32xf32>
    %c1792 = arith.constant 1792 : index
    %c0_271 = arith.constant 0 : index
    %719 = vector.load %arg3[%c1792, %c0_271] : memref<2568x128xf32, #tpu.memory_space<vmem>>, vector<1x32xf32>
    %c1776 = arith.constant 1776 : index
    %c0_272 = arith.constant 0 : index
    %720 = vector.load %arg3[%c1776, %c0_272] : memref<2568x128xf32, #tpu.memory_space<vmem>>, vector<1x32xf32>
    %cst_273 = arith.constant dense<0.000000e+00> : vector<12xf32>
    %721 = vector.multi_reduction <add>, %718, %cst_273 [1] : vector<12x32xf32> to vector<12xf32>
    %722 = vector.shape_cast %721 : vector<12xf32> to vector<12x1xf32>
    %cst_274 = arith.constant 3.200000e+01 : f32
    %723 = vector.broadcast %cst_274 : f32 to vector<12x1xf32>
    %724 = arith.divf %722, %723 : vector<12x1xf32>
    %725 = vector.broadcast %724 : vector<12x1xf32> to vector<12x32xf32>
    %726 = arith.subf %718, %725 : vector<12x32xf32>
    %727 = arith.mulf %726, %726 : vector<12x32xf32>
    %cst_275 = arith.constant dense<0.000000e+00> : vector<12xf32>
    %728 = vector.multi_reduction <add>, %727, %cst_275 [1] : vector<12x32xf32> to vector<12xf32>
    %729 = vector.shape_cast %728 : vector<12xf32> to vector<12x1xf32>
    %cst_276 = arith.constant 3.200000e+01 : f32
    %730 = vector.broadcast %cst_276 : f32 to vector<12x1xf32>
    %731 = arith.divf %729, %730 : vector<12x1xf32>
    %732 = vector.broadcast %724 : vector<12x1xf32> to vector<12x32xf32>
    %733 = arith.subf %718, %732 : vector<12x32xf32>
    %cst_277 = arith.constant 9.99999974E-6 : f32
    %734 = vector.broadcast %cst_277 : f32 to vector<12x1xf32>
    %735 = arith.addf %731, %734 : vector<12x1xf32>
    %736 = math.rsqrt %735 : vector<12x1xf32>
    %737 = vector.broadcast %736 : vector<12x1xf32> to vector<12x32xf32>
    %738 = arith.mulf %733, %737 : vector<12x32xf32>
    %739 = vector.broadcast %719 : vector<1x32xf32> to vector<12x32xf32>
    %740 = arith.mulf %738, %739 : vector<12x32xf32>
    %741 = vector.broadcast %720 : vector<1x32xf32> to vector<12x32xf32>
    %742 = arith.addf %740, %741 : vector<12x32xf32>
    %743 = arith.addf %742, %366 : vector<12x32xf32>
    %744 = arith.addf %658, %344 : vector<32x32xf32>
    %c1656 = arith.constant 1656 : index
    %c0_278 = arith.constant 0 : index
    %745 = vector.load %arg3[%c1656, %c0_278] : memref<2568x128xf32, #tpu.memory_space<vmem>>, vector<32x16xf32>
    %cst_279 = arith.constant dense<0.000000e+00> : vector<12x16xf32>
    %746 = tpu.matmul %743, %745, %cst_279 {dimension_numbers = #tpu.dot_dimension_numbers<[1], [0], [0], [1], [0, 0, 1, 1], [], []>} : vector<12x32xf32>, vector<32x16xf32>, vector<12x16xf32> -> vector<12x16xf32>
    %c1616 = arith.constant 1616 : index
    %c0_280 = arith.constant 0 : index
    %747 = vector.load %arg3[%c1616, %c0_280] : memref<2568x128xf32, #tpu.memory_space<vmem>>, vector<1x16xf32>
    %748 = vector.broadcast %747 : vector<1x16xf32> to vector<12x16xf32>
    %749 = arith.addf %746, %748 : vector<12x16xf32>
    %c1528 = arith.constant 1528 : index
    %c0_281 = arith.constant 0 : index
    %750 = vector.load %arg3[%c1528, %c0_281] : memref<2568x128xf32, #tpu.memory_space<vmem>>, vector<32x16xf32>
    %cst_282 = arith.constant dense<0.000000e+00> : vector<32x16xf32>
    %751 = tpu.matmul %744, %750, %cst_282 {dimension_numbers = #tpu.dot_dimension_numbers<[1], [0], [0], [1], [0, 0, 1, 1], [], []>} : vector<32x32xf32>, vector<32x16xf32>, vector<32x16xf32> -> vector<32x16xf32>
    %c1488 = arith.constant 1488 : index
    %c0_283 = arith.constant 0 : index
    %752 = vector.load %arg3[%c1488, %c0_283] : memref<2568x128xf32, #tpu.memory_space<vmem>>, vector<1x16xf32>
    %753 = vector.broadcast %752 : vector<1x16xf32> to vector<32x16xf32>
    %754 = arith.addf %751, %753 : vector<32x16xf32>
    %c1736_284 = arith.constant 1736 : index
    %c0_285 = arith.constant 0 : index
    %755 = vector.load %arg3[%c1736_284, %c0_285] : memref<2568x128xf32, #tpu.memory_space<vmem>>, vector<32x16xf32>
    %cst_286 = arith.constant dense<0.000000e+00> : vector<32x16xf32>
    %756 = tpu.matmul %658, %755, %cst_286 {dimension_numbers = #tpu.dot_dimension_numbers<[1], [0], [0], [1], [0, 0, 1, 1], [], []>} : vector<32x32xf32>, vector<32x16xf32>, vector<32x16xf32> -> vector<32x16xf32>
    %c1696 = arith.constant 1696 : index
    %c0_287 = arith.constant 0 : index
    %757 = vector.load %arg3[%c1696, %c0_287] : memref<2568x128xf32, #tpu.memory_space<vmem>>, vector<1x16xf32>
    %758 = vector.broadcast %757 : vector<1x16xf32> to vector<32x16xf32>
    %759 = arith.addf %756, %758 : vector<32x16xf32>
    %c1592 = arith.constant 1592 : index
    %c0_288 = arith.constant 0 : index
    %760 = vector.load %arg3[%c1592, %c0_288] : memref<2568x128xf32, #tpu.memory_space<vmem>>, vector<16x32xf32>
    %761 = vector.extract_strided_slice %749 {offsets = [0, 0], sizes = [12, 8], strides = [1, 1]} : vector<12x16xf32> to vector<12x8xf32>
    %762 = vector.extract_strided_slice %754 {offsets = [0, 0], sizes = [32, 8], strides = [1, 1]} : vector<32x16xf32> to vector<32x8xf32>
    %cst_289 = arith.constant dense<0.000000e+00> : vector<12x32xf32>
    %763 = tpu.matmul %761, %762, %cst_289 {dimension_numbers = #tpu.dot_dimension_numbers<[1], [1], [0], [0], [0, 0, 1, 0], [], []>} : vector<12x8xf32>, vector<32x8xf32>, vector<12x32xf32> -> vector<12x32xf32>
    %cst_290 = arith.constant 0.353553385 : f32
    %764 = vector.broadcast %cst_290 : f32 to vector<12x32xf32>
    %765 = arith.mulf %763, %764 : vector<12x32xf32>
    %766 = arith.addf %765, %368 : vector<12x32xf32>
    %cst_291 = arith.constant dense<0xFF800000> : vector<12xf32>
    %767 = vector.multi_reduction <maximumf>, %766, %cst_291 [1] : vector<12x32xf32> to vector<12xf32>
    %768 = vector.shape_cast %767 : vector<12xf32> to vector<12x1xf32>
    %769 = vector.broadcast %768 : vector<12x1xf32> to vector<12x32xf32>
    %770 = arith.subf %766, %769 : vector<12x32xf32>
    %771 = math.exp %770 : vector<12x32xf32>
    %cst_292 = arith.constant dense<0.000000e+00> : vector<12xf32>
    %772 = vector.multi_reduction <add>, %771, %cst_292 [1] : vector<12x32xf32> to vector<12xf32>
    %773 = vector.shape_cast %772 : vector<12xf32> to vector<12x1xf32>
    %774 = vector.broadcast %773 : vector<12x1xf32> to vector<12x32xf32>
    %775 = arith.divf %771, %774 : vector<12x32xf32>
    %776 = vector.extract_strided_slice %759 {offsets = [0, 0], sizes = [32, 8], strides = [1, 1]} : vector<32x16xf32> to vector<32x8xf32>
    %cst_293 = arith.constant dense<0.000000e+00> : vector<12x8xf32>
    %777 = tpu.matmul %775, %776, %cst_293 {dimension_numbers = #tpu.dot_dimension_numbers<[1], [0], [0], [1], [0, 0, 1, 1], [], []>} : vector<12x32xf32>, vector<32x8xf32>, vector<12x8xf32> -> vector<12x8xf32>
    %778 = vector.extract_strided_slice %760 {offsets = [0, 0], sizes = [8, 32], strides = [1, 1]} : vector<16x32xf32> to vector<8x32xf32>
    %cst_294 = arith.constant dense<0.000000e+00> : vector<12x32xf32>
    %779 = tpu.matmul %777, %778, %cst_294 {dimension_numbers = #tpu.dot_dimension_numbers<[1], [0], [0], [1], [0, 0, 1, 1], [], []>} : vector<12x8xf32>, vector<8x32xf32>, vector<12x32xf32> -> vector<12x32xf32>
    %780 = vector.extract_strided_slice %749 {offsets = [0, 8], sizes = [12, 8], strides = [1, 1]} : vector<12x16xf32> to vector<12x8xf32>
    %781 = vector.extract_strided_slice %754 {offsets = [0, 8], sizes = [32, 8], strides = [1, 1]} : vector<32x16xf32> to vector<32x8xf32>
    %cst_295 = arith.constant dense<0.000000e+00> : vector<12x32xf32>
    %782 = tpu.matmul %780, %781, %cst_295 {dimension_numbers = #tpu.dot_dimension_numbers<[1], [1], [0], [0], [0, 0, 1, 0], [], []>} : vector<12x8xf32>, vector<32x8xf32>, vector<12x32xf32> -> vector<12x32xf32>
    %cst_296 = arith.constant 0.353553385 : f32
    %783 = vector.broadcast %cst_296 : f32 to vector<12x32xf32>
    %784 = arith.mulf %782, %783 : vector<12x32xf32>
    %785 = arith.addf %784, %368 : vector<12x32xf32>
    %cst_297 = arith.constant dense<0xFF800000> : vector<12xf32>
    %786 = vector.multi_reduction <maximumf>, %785, %cst_297 [1] : vector<12x32xf32> to vector<12xf32>
    %787 = vector.shape_cast %786 : vector<12xf32> to vector<12x1xf32>
    %788 = vector.broadcast %787 : vector<12x1xf32> to vector<12x32xf32>
    %789 = arith.subf %785, %788 : vector<12x32xf32>
    %790 = math.exp %789 : vector<12x32xf32>
    %cst_298 = arith.constant dense<0.000000e+00> : vector<12xf32>
    %791 = vector.multi_reduction <add>, %790, %cst_298 [1] : vector<12x32xf32> to vector<12xf32>
    %792 = vector.shape_cast %791 : vector<12xf32> to vector<12x1xf32>
    %793 = vector.broadcast %792 : vector<12x1xf32> to vector<12x32xf32>
    %794 = arith.divf %790, %793 : vector<12x32xf32>
    %795 = vector.extract_strided_slice %759 {offsets = [0, 8], sizes = [32, 8], strides = [1, 1]} : vector<32x16xf32> to vector<32x8xf32>
    %cst_299 = arith.constant dense<0.000000e+00> : vector<12x8xf32>
    %796 = tpu.matmul %794, %795, %cst_299 {dimension_numbers = #tpu.dot_dimension_numbers<[1], [0], [0], [1], [0, 0, 1, 1], [], []>} : vector<12x32xf32>, vector<32x8xf32>, vector<12x8xf32> -> vector<12x8xf32>
    %797 = vector.extract_strided_slice %760 {offsets = [8, 0], sizes = [8, 32], strides = [1, 1]} : vector<16x32xf32> to vector<8x32xf32>
    %cst_300 = arith.constant dense<0.000000e+00> : vector<12x32xf32>
    %798 = tpu.matmul %796, %797, %cst_300 {dimension_numbers = #tpu.dot_dimension_numbers<[1], [0], [0], [1], [0, 0, 1, 1], [], []>} : vector<12x8xf32>, vector<8x32xf32>, vector<12x32xf32> -> vector<12x32xf32>
    %799 = arith.addf %779, %798 : vector<12x32xf32>
    %c1568 = arith.constant 1568 : index
    %c0_301 = arith.constant 0 : index
    %800 = vector.load %arg3[%c1568, %c0_301] : memref<2568x128xf32, #tpu.memory_space<vmem>>, vector<1x32xf32>
    %801 = vector.broadcast %800 : vector<1x32xf32> to vector<12x32xf32>
    %802 = arith.addf %799, %801 : vector<12x32xf32>
    %803 = arith.addf %742, %802 : vector<12x32xf32>
    %c1824 = arith.constant 1824 : index
    %c0_302 = arith.constant 0 : index
    %804 = vector.load %arg3[%c1824, %c0_302] : memref<2568x128xf32, #tpu.memory_space<vmem>>, vector<1x32xf32>
    %c1808 = arith.constant 1808 : index
    %c0_303 = arith.constant 0 : index
    %805 = vector.load %arg3[%c1808, %c0_303] : memref<2568x128xf32, #tpu.memory_space<vmem>>, vector<1x32xf32>
    %cst_304 = arith.constant dense<0.000000e+00> : vector<12xf32>
    %806 = vector.multi_reduction <add>, %803, %cst_304 [1] : vector<12x32xf32> to vector<12xf32>
    %807 = vector.shape_cast %806 : vector<12xf32> to vector<12x1xf32>
    %cst_305 = arith.constant 3.200000e+01 : f32
    %808 = vector.broadcast %cst_305 : f32 to vector<12x1xf32>
    %809 = arith.divf %807, %808 : vector<12x1xf32>
    %810 = vector.broadcast %809 : vector<12x1xf32> to vector<12x32xf32>
    %811 = arith.subf %803, %810 : vector<12x32xf32>
    %812 = arith.mulf %811, %811 : vector<12x32xf32>
    %cst_306 = arith.constant dense<0.000000e+00> : vector<12xf32>
    %813 = vector.multi_reduction <add>, %812, %cst_306 [1] : vector<12x32xf32> to vector<12xf32>
    %814 = vector.shape_cast %813 : vector<12xf32> to vector<12x1xf32>
    %cst_307 = arith.constant 3.200000e+01 : f32
    %815 = vector.broadcast %cst_307 : f32 to vector<12x1xf32>
    %816 = arith.divf %814, %815 : vector<12x1xf32>
    %817 = vector.broadcast %809 : vector<12x1xf32> to vector<12x32xf32>
    %818 = arith.subf %803, %817 : vector<12x32xf32>
    %cst_308 = arith.constant 9.99999974E-6 : f32
    %819 = vector.broadcast %cst_308 : f32 to vector<12x1xf32>
    %820 = arith.addf %816, %819 : vector<12x1xf32>
    %821 = math.rsqrt %820 : vector<12x1xf32>
    %822 = vector.broadcast %821 : vector<12x1xf32> to vector<12x32xf32>
    %823 = arith.mulf %818, %822 : vector<12x32xf32>
    %824 = vector.broadcast %804 : vector<1x32xf32> to vector<12x32xf32>
    %825 = arith.mulf %823, %824 : vector<12x32xf32>
    %826 = vector.broadcast %805 : vector<1x32xf32> to vector<12x32xf32>
    %827 = arith.addf %825, %826 : vector<12x32xf32>
    %c1944 = arith.constant 1944 : index
    %c0_309 = arith.constant 0 : index
    %828 = vector.load %arg3[%c1944, %c0_309] : memref<2568x128xf32, #tpu.memory_space<vmem>>, vector<32x64xf32>
    %cst_310 = arith.constant dense<0.000000e+00> : vector<12x64xf32>
    %829 = tpu.matmul %827, %828, %cst_310 {dimension_numbers = #tpu.dot_dimension_numbers<[1], [0], [0], [1], [0, 0, 1, 1], [], []>} : vector<12x32xf32>, vector<32x64xf32>, vector<12x64xf32> -> vector<12x64xf32>
    %c1904 = arith.constant 1904 : index
    %c0_311 = arith.constant 0 : index
    %830 = vector.load %arg3[%c1904, %c0_311] : memref<2568x128xf32, #tpu.memory_space<vmem>>, vector<1x64xf32>
    %831 = vector.broadcast %830 : vector<1x64xf32> to vector<12x64xf32>
    %832 = arith.addf %829, %831 : vector<12x64xf32>
    %cst_312 = arith.constant 0.000000e+00 : f32
    %833 = vector.broadcast %cst_312 : f32 to vector<12x64xf32>
    %834 = arith.maximumf %832, %833 : vector<12x64xf32>
    %c2056 = arith.constant 2056 : index
    %c0_313 = arith.constant 0 : index
    %835 = vector.load %arg3[%c2056, %c0_313] : memref<2568x128xf32, #tpu.memory_space<vmem>>, vector<64x32xf32>
    %cst_314 = arith.constant dense<0.000000e+00> : vector<12x32xf32>
    %836 = tpu.matmul %834, %835, %cst_314 {dimension_numbers = #tpu.dot_dimension_numbers<[1], [0], [0], [1], [0, 0, 1, 1], [], []>} : vector<12x64xf32>, vector<64x32xf32>, vector<12x32xf32> -> vector<12x32xf32>
    %c1984 = arith.constant 1984 : index
    %c0_315 = arith.constant 0 : index
    %837 = vector.load %arg3[%c1984, %c0_315] : memref<2568x128xf32, #tpu.memory_space<vmem>>, vector<1x32xf32>
    %838 = vector.broadcast %837 : vector<1x32xf32> to vector<12x32xf32>
    %839 = arith.addf %836, %838 : vector<12x32xf32>
    %840 = arith.addf %827, %839 : vector<12x32xf32>
    %c1856 = arith.constant 1856 : index
    %c0_316 = arith.constant 0 : index
    %841 = vector.load %arg3[%c1856, %c0_316] : memref<2568x128xf32, #tpu.memory_space<vmem>>, vector<1x32xf32>
    %c1840 = arith.constant 1840 : index
    %c0_317 = arith.constant 0 : index
    %842 = vector.load %arg3[%c1840, %c0_317] : memref<2568x128xf32, #tpu.memory_space<vmem>>, vector<1x32xf32>
    %cst_318 = arith.constant dense<0.000000e+00> : vector<12xf32>
    %843 = vector.multi_reduction <add>, %840, %cst_318 [1] : vector<12x32xf32> to vector<12xf32>
    %844 = vector.shape_cast %843 : vector<12xf32> to vector<12x1xf32>
    %cst_319 = arith.constant 3.200000e+01 : f32
    %845 = vector.broadcast %cst_319 : f32 to vector<12x1xf32>
    %846 = arith.divf %844, %845 : vector<12x1xf32>
    %847 = vector.broadcast %846 : vector<12x1xf32> to vector<12x32xf32>
    %848 = arith.subf %840, %847 : vector<12x32xf32>
    %849 = arith.mulf %848, %848 : vector<12x32xf32>
    %cst_320 = arith.constant dense<0.000000e+00> : vector<12xf32>
    %850 = vector.multi_reduction <add>, %849, %cst_320 [1] : vector<12x32xf32> to vector<12xf32>
    %851 = vector.shape_cast %850 : vector<12xf32> to vector<12x1xf32>
    %cst_321 = arith.constant 3.200000e+01 : f32
    %852 = vector.broadcast %cst_321 : f32 to vector<12x1xf32>
    %853 = arith.divf %851, %852 : vector<12x1xf32>
    %854 = vector.broadcast %846 : vector<12x1xf32> to vector<12x32xf32>
    %855 = arith.subf %840, %854 : vector<12x32xf32>
    %cst_322 = arith.constant 9.99999974E-6 : f32
    %856 = vector.broadcast %cst_322 : f32 to vector<12x1xf32>
    %857 = arith.addf %853, %856 : vector<12x1xf32>
    %858 = math.rsqrt %857 : vector<12x1xf32>
    %859 = vector.broadcast %858 : vector<12x1xf32> to vector<12x32xf32>
    %860 = arith.mulf %855, %859 : vector<12x32xf32>
    %861 = vector.broadcast %841 : vector<1x32xf32> to vector<12x32xf32>
    %862 = arith.mulf %860, %861 : vector<12x32xf32>
    %863 = vector.broadcast %842 : vector<1x32xf32> to vector<12x32xf32>
    %864 = arith.addf %862, %863 : vector<12x32xf32>
    %865 = arith.addf %864, %366 : vector<12x32xf32>
    %866 = arith.addf %658, %344 : vector<32x32xf32>
    %c1368 = arith.constant 1368 : index
    %c0_323 = arith.constant 0 : index
    %867 = vector.load %arg3[%c1368, %c0_323] : memref<2568x128xf32, #tpu.memory_space<vmem>>, vector<32x16xf32>
    %cst_324 = arith.constant dense<0.000000e+00> : vector<32x16xf32>
    %868 = tpu.matmul %866, %867, %cst_324 {dimension_numbers = #tpu.dot_dimension_numbers<[1], [0], [0], [1], [0, 0, 1, 1], [], []>} : vector<32x32xf32>, vector<32x16xf32>, vector<32x16xf32> -> vector<32x16xf32>
    %c1328 = arith.constant 1328 : index
    %c0_325 = arith.constant 0 : index
    %869 = vector.load %arg3[%c1328, %c0_325] : memref<2568x128xf32, #tpu.memory_space<vmem>>, vector<1x16xf32>
    %870 = vector.broadcast %869 : vector<1x16xf32> to vector<32x16xf32>
    %871 = arith.addf %868, %870 : vector<32x16xf32>
    %c1240 = arith.constant 1240 : index
    %c0_326 = arith.constant 0 : index
    %872 = vector.load %arg3[%c1240, %c0_326] : memref<2568x128xf32, #tpu.memory_space<vmem>>, vector<32x16xf32>
    %cst_327 = arith.constant dense<0.000000e+00> : vector<12x16xf32>
    %873 = tpu.matmul %865, %872, %cst_327 {dimension_numbers = #tpu.dot_dimension_numbers<[1], [0], [0], [1], [0, 0, 1, 1], [], []>} : vector<12x32xf32>, vector<32x16xf32>, vector<12x16xf32> -> vector<12x16xf32>
    %c1200 = arith.constant 1200 : index
    %c0_328 = arith.constant 0 : index
    %874 = vector.load %arg3[%c1200, %c0_328] : memref<2568x128xf32, #tpu.memory_space<vmem>>, vector<1x16xf32>
    %875 = vector.broadcast %874 : vector<1x16xf32> to vector<12x16xf32>
    %876 = arith.addf %873, %875 : vector<12x16xf32>
    %c1448 = arith.constant 1448 : index
    %c0_329 = arith.constant 0 : index
    %877 = vector.load %arg3[%c1448, %c0_329] : memref<2568x128xf32, #tpu.memory_space<vmem>>, vector<32x16xf32>
    %cst_330 = arith.constant dense<0.000000e+00> : vector<12x16xf32>
    %878 = tpu.matmul %864, %877, %cst_330 {dimension_numbers = #tpu.dot_dimension_numbers<[1], [0], [0], [1], [0, 0, 1, 1], [], []>} : vector<12x32xf32>, vector<32x16xf32>, vector<12x16xf32> -> vector<12x16xf32>
    %c1408_331 = arith.constant 1408 : index
    %c0_332 = arith.constant 0 : index
    %879 = vector.load %arg3[%c1408_331, %c0_332] : memref<2568x128xf32, #tpu.memory_space<vmem>>, vector<1x16xf32>
    %880 = vector.broadcast %879 : vector<1x16xf32> to vector<12x16xf32>
    %881 = arith.addf %878, %880 : vector<12x16xf32>
    %c1304 = arith.constant 1304 : index
    %c0_333 = arith.constant 0 : index
    %882 = vector.load %arg3[%c1304, %c0_333] : memref<2568x128xf32, #tpu.memory_space<vmem>>, vector<16x32xf32>
    %883 = vector.extract_strided_slice %871 {offsets = [0, 0], sizes = [32, 8], strides = [1, 1]} : vector<32x16xf32> to vector<32x8xf32>
    %884 = vector.extract_strided_slice %876 {offsets = [0, 0], sizes = [12, 8], strides = [1, 1]} : vector<12x16xf32> to vector<12x8xf32>
    %cst_334 = arith.constant dense<0.000000e+00> : vector<32x12xf32>
    %885 = tpu.matmul %883, %884, %cst_334 {dimension_numbers = #tpu.dot_dimension_numbers<[1], [1], [0], [0], [0, 0, 1, 0], [], []>} : vector<32x8xf32>, vector<12x8xf32>, vector<32x12xf32> -> vector<32x12xf32>
    %cst_335 = arith.constant 0.353553385 : f32
    %886 = vector.broadcast %cst_335 : f32 to vector<32x12xf32>
    %887 = arith.mulf %885, %886 : vector<32x12xf32>
    %888 = arith.addf %887, %369 : vector<32x12xf32>
    %cst_336 = arith.constant dense<0xFF800000> : vector<32xf32>
    %889 = vector.multi_reduction <maximumf>, %888, %cst_336 [1] : vector<32x12xf32> to vector<32xf32>
    %890 = vector.shape_cast %889 : vector<32xf32> to vector<32x1xf32>
    %891 = vector.broadcast %890 : vector<32x1xf32> to vector<32x12xf32>
    %892 = arith.subf %888, %891 : vector<32x12xf32>
    %893 = math.exp %892 : vector<32x12xf32>
    %cst_337 = arith.constant dense<0.000000e+00> : vector<32xf32>
    %894 = vector.multi_reduction <add>, %893, %cst_337 [1] : vector<32x12xf32> to vector<32xf32>
    %895 = vector.shape_cast %894 : vector<32xf32> to vector<32x1xf32>
    %896 = vector.broadcast %895 : vector<32x1xf32> to vector<32x12xf32>
    %897 = arith.divf %893, %896 : vector<32x12xf32>
    %898 = vector.extract_strided_slice %881 {offsets = [0, 0], sizes = [12, 8], strides = [1, 1]} : vector<12x16xf32> to vector<12x8xf32>
    %cst_338 = arith.constant dense<0.000000e+00> : vector<32x8xf32>
    %899 = tpu.matmul %897, %898, %cst_338 {dimension_numbers = #tpu.dot_dimension_numbers<[1], [0], [0], [1], [0, 0, 1, 1], [], []>} : vector<32x12xf32>, vector<12x8xf32>, vector<32x8xf32> -> vector<32x8xf32>
    %900 = vector.extract_strided_slice %882 {offsets = [0, 0], sizes = [8, 32], strides = [1, 1]} : vector<16x32xf32> to vector<8x32xf32>
    %cst_339 = arith.constant dense<0.000000e+00> : vector<32x32xf32>
    %901 = tpu.matmul %899, %900, %cst_339 {dimension_numbers = #tpu.dot_dimension_numbers<[1], [0], [0], [1], [0, 0, 1, 1], [], []>} : vector<32x8xf32>, vector<8x32xf32>, vector<32x32xf32> -> vector<32x32xf32>
    %902 = vector.extract_strided_slice %871 {offsets = [0, 8], sizes = [32, 8], strides = [1, 1]} : vector<32x16xf32> to vector<32x8xf32>
    %903 = vector.extract_strided_slice %876 {offsets = [0, 8], sizes = [12, 8], strides = [1, 1]} : vector<12x16xf32> to vector<12x8xf32>
    %cst_340 = arith.constant dense<0.000000e+00> : vector<32x12xf32>
    %904 = tpu.matmul %902, %903, %cst_340 {dimension_numbers = #tpu.dot_dimension_numbers<[1], [1], [0], [0], [0, 0, 1, 0], [], []>} : vector<32x8xf32>, vector<12x8xf32>, vector<32x12xf32> -> vector<32x12xf32>
    %cst_341 = arith.constant 0.353553385 : f32
    %905 = vector.broadcast %cst_341 : f32 to vector<32x12xf32>
    %906 = arith.mulf %904, %905 : vector<32x12xf32>
    %907 = arith.addf %906, %369 : vector<32x12xf32>
    %cst_342 = arith.constant dense<0xFF800000> : vector<32xf32>
    %908 = vector.multi_reduction <maximumf>, %907, %cst_342 [1] : vector<32x12xf32> to vector<32xf32>
    %909 = vector.shape_cast %908 : vector<32xf32> to vector<32x1xf32>
    %910 = vector.broadcast %909 : vector<32x1xf32> to vector<32x12xf32>
    %911 = arith.subf %907, %910 : vector<32x12xf32>
    %912 = math.exp %911 : vector<32x12xf32>
    %cst_343 = arith.constant dense<0.000000e+00> : vector<32xf32>
    %913 = vector.multi_reduction <add>, %912, %cst_343 [1] : vector<32x12xf32> to vector<32xf32>
    %914 = vector.shape_cast %913 : vector<32xf32> to vector<32x1xf32>
    %915 = vector.broadcast %914 : vector<32x1xf32> to vector<32x12xf32>
    %916 = arith.divf %912, %915 : vector<32x12xf32>
    %917 = vector.extract_strided_slice %881 {offsets = [0, 8], sizes = [12, 8], strides = [1, 1]} : vector<12x16xf32> to vector<12x8xf32>
    %cst_344 = arith.constant dense<0.000000e+00> : vector<32x8xf32>
    %918 = tpu.matmul %916, %917, %cst_344 {dimension_numbers = #tpu.dot_dimension_numbers<[1], [0], [0], [1], [0, 0, 1, 1], [], []>} : vector<32x12xf32>, vector<12x8xf32>, vector<32x8xf32> -> vector<32x8xf32>
    %919 = vector.extract_strided_slice %882 {offsets = [8, 0], sizes = [8, 32], strides = [1, 1]} : vector<16x32xf32> to vector<8x32xf32>
    %cst_345 = arith.constant dense<0.000000e+00> : vector<32x32xf32>
    %920 = tpu.matmul %918, %919, %cst_345 {dimension_numbers = #tpu.dot_dimension_numbers<[1], [0], [0], [1], [0, 0, 1, 1], [], []>} : vector<32x8xf32>, vector<8x32xf32>, vector<32x32xf32> -> vector<32x32xf32>
    %921 = arith.addf %901, %920 : vector<32x32xf32>
    %c1280_346 = arith.constant 1280 : index
    %c0_347 = arith.constant 0 : index
    %922 = vector.load %arg3[%c1280_346, %c0_347] : memref<2568x128xf32, #tpu.memory_space<vmem>>, vector<1x32xf32>
    %923 = vector.broadcast %922 : vector<1x32xf32> to vector<32x32xf32>
    %924 = arith.addf %921, %923 : vector<32x32xf32>
    %925 = arith.addf %658, %924 : vector<32x32xf32>
    %c1888 = arith.constant 1888 : index
    %c0_348 = arith.constant 0 : index
    %926 = vector.load %arg3[%c1888, %c0_348] : memref<2568x128xf32, #tpu.memory_space<vmem>>, vector<1x32xf32>
    %c1872 = arith.constant 1872 : index
    %c0_349 = arith.constant 0 : index
    %927 = vector.load %arg3[%c1872, %c0_349] : memref<2568x128xf32, #tpu.memory_space<vmem>>, vector<1x32xf32>
    %cst_350 = arith.constant dense<0.000000e+00> : vector<32xf32>
    %928 = vector.multi_reduction <add>, %925, %cst_350 [1] : vector<32x32xf32> to vector<32xf32>
    %929 = vector.shape_cast %928 : vector<32xf32> to vector<32x1xf32>
    %cst_351 = arith.constant 3.200000e+01 : f32
    %930 = vector.broadcast %cst_351 : f32 to vector<32x1xf32>
    %931 = arith.divf %929, %930 : vector<32x1xf32>
    %932 = vector.broadcast %931 : vector<32x1xf32> to vector<32x32xf32>
    %933 = arith.subf %925, %932 : vector<32x32xf32>
    %934 = arith.mulf %933, %933 : vector<32x32xf32>
    %cst_352 = arith.constant dense<0.000000e+00> : vector<32xf32>
    %935 = vector.multi_reduction <add>, %934, %cst_352 [1] : vector<32x32xf32> to vector<32xf32>
    %936 = vector.shape_cast %935 : vector<32xf32> to vector<32x1xf32>
    %cst_353 = arith.constant 3.200000e+01 : f32
    %937 = vector.broadcast %cst_353 : f32 to vector<32x1xf32>
    %938 = arith.divf %936, %937 : vector<32x1xf32>
    %939 = vector.broadcast %931 : vector<32x1xf32> to vector<32x32xf32>
    %940 = arith.subf %925, %939 : vector<32x32xf32>
    %cst_354 = arith.constant 9.99999974E-6 : f32
    %941 = vector.broadcast %cst_354 : f32 to vector<32x1xf32>
    %942 = arith.addf %938, %941 : vector<32x1xf32>
    %943 = math.rsqrt %942 : vector<32x1xf32>
    %944 = vector.broadcast %943 : vector<32x1xf32> to vector<32x32xf32>
    %945 = arith.mulf %940, %944 : vector<32x32xf32>
    %946 = vector.broadcast %926 : vector<1x32xf32> to vector<32x32xf32>
    %947 = arith.mulf %945, %946 : vector<32x32xf32>
    %948 = vector.broadcast %927 : vector<1x32xf32> to vector<32x32xf32>
    %949 = arith.addf %947, %948 : vector<32x32xf32>
    %950 = arith.addf %864, %366 : vector<12x32xf32>
    %951 = arith.addf %949, %344 : vector<32x32xf32>
    %c72_355 = arith.constant 72 : index
    %c0_356 = arith.constant 0 : index
    %952 = vector.load %arg3[%c72_355, %c0_356] : memref<2568x128xf32, #tpu.memory_space<vmem>>, vector<32x16xf32>
    %cst_357 = arith.constant dense<0.000000e+00> : vector<12x16xf32>
    %953 = tpu.matmul %950, %952, %cst_357 {dimension_numbers = #tpu.dot_dimension_numbers<[1], [0], [0], [1], [0, 0, 1, 1], [], []>} : vector<12x32xf32>, vector<32x16xf32>, vector<12x16xf32> -> vector<12x16xf32>
    %c64_358 = arith.constant 64 : index
    %c0_359 = arith.constant 0 : index
    %954 = vector.load %arg3[%c64_358, %c0_359] : memref<2568x128xf32, #tpu.memory_space<vmem>>, vector<1x16xf32>
    %955 = vector.broadcast %954 : vector<1x16xf32> to vector<12x16xf32>
    %956 = arith.addf %953, %955 : vector<12x16xf32>
    %c8 = arith.constant 8 : index
    %c0_360 = arith.constant 0 : index
    %957 = vector.load %arg3[%c8, %c0_360] : memref<2568x128xf32, #tpu.memory_space<vmem>>, vector<32x16xf32>
    %cst_361 = arith.constant dense<0.000000e+00> : vector<32x16xf32>
    %958 = tpu.matmul %951, %957, %cst_361 {dimension_numbers = #tpu.dot_dimension_numbers<[1], [0], [0], [1], [0, 0, 1, 1], [], []>} : vector<32x32xf32>, vector<32x16xf32>, vector<32x16xf32> -> vector<32x16xf32>
    %c0_362 = arith.constant 0 : index
    %c0_363 = arith.constant 0 : index
    %959 = vector.load %arg3[%c0_362, %c0_363] : memref<2568x128xf32, #tpu.memory_space<vmem>>, vector<1x16xf32>
    %960 = vector.broadcast %959 : vector<1x16xf32> to vector<32x16xf32>
    %961 = arith.addf %958, %960 : vector<32x16xf32>
    %c112_364 = arith.constant 112 : index
    %c0_365 = arith.constant 0 : index
    %962 = vector.load %arg3[%c112_364, %c0_365] : memref<2568x128xf32, #tpu.memory_space<vmem>>, vector<32x16xf32>
    %cst_366 = arith.constant dense<0.000000e+00> : vector<32x16xf32>
    %963 = tpu.matmul %949, %962, %cst_366 {dimension_numbers = #tpu.dot_dimension_numbers<[1], [0], [0], [1], [0, 0, 1, 1], [], []>} : vector<32x32xf32>, vector<32x16xf32>, vector<32x16xf32> -> vector<32x16xf32>
    %c104_367 = arith.constant 104 : index
    %c0_368 = arith.constant 0 : index
    %964 = vector.load %arg3[%c104_367, %c0_368] : memref<2568x128xf32, #tpu.memory_space<vmem>>, vector<1x16xf32>
    %965 = vector.broadcast %964 : vector<1x16xf32> to vector<32x16xf32>
    %966 = arith.addf %963, %965 : vector<32x16xf32>
    %c48_369 = arith.constant 48 : index
    %c0_370 = arith.constant 0 : index
    %967 = vector.load %arg3[%c48_369, %c0_370] : memref<2568x128xf32, #tpu.memory_space<vmem>>, vector<16x32xf32>
    %968 = vector.extract_strided_slice %956 {offsets = [0, 0], sizes = [12, 8], strides = [1, 1]} : vector<12x16xf32> to vector<12x8xf32>
    %969 = vector.extract_strided_slice %961 {offsets = [0, 0], sizes = [32, 8], strides = [1, 1]} : vector<32x16xf32> to vector<32x8xf32>
    %cst_371 = arith.constant dense<0.000000e+00> : vector<12x32xf32>
    %970 = tpu.matmul %968, %969, %cst_371 {dimension_numbers = #tpu.dot_dimension_numbers<[1], [1], [0], [0], [0, 0, 1, 0], [], []>} : vector<12x8xf32>, vector<32x8xf32>, vector<12x32xf32> -> vector<12x32xf32>
    %cst_372 = arith.constant 0.353553385 : f32
    %971 = vector.broadcast %cst_372 : f32 to vector<12x32xf32>
    %972 = arith.mulf %970, %971 : vector<12x32xf32>
    %973 = arith.addf %972, %368 : vector<12x32xf32>
    %cst_373 = arith.constant dense<0xFF800000> : vector<12xf32>
    %974 = vector.multi_reduction <maximumf>, %973, %cst_373 [1] : vector<12x32xf32> to vector<12xf32>
    %975 = vector.shape_cast %974 : vector<12xf32> to vector<12x1xf32>
    %976 = vector.broadcast %975 : vector<12x1xf32> to vector<12x32xf32>
    %977 = arith.subf %973, %976 : vector<12x32xf32>
    %978 = math.exp %977 : vector<12x32xf32>
    %cst_374 = arith.constant dense<0.000000e+00> : vector<12xf32>
    %979 = vector.multi_reduction <add>, %978, %cst_374 [1] : vector<12x32xf32> to vector<12xf32>
    %980 = vector.shape_cast %979 : vector<12xf32> to vector<12x1xf32>
    %981 = vector.broadcast %980 : vector<12x1xf32> to vector<12x32xf32>
    %982 = arith.divf %978, %981 : vector<12x32xf32>
    %983 = vector.extract_strided_slice %966 {offsets = [0, 0], sizes = [32, 8], strides = [1, 1]} : vector<32x16xf32> to vector<32x8xf32>
    %cst_375 = arith.constant dense<0.000000e+00> : vector<12x8xf32>
    %984 = tpu.matmul %982, %983, %cst_375 {dimension_numbers = #tpu.dot_dimension_numbers<[1], [0], [0], [1], [0, 0, 1, 1], [], []>} : vector<12x32xf32>, vector<32x8xf32>, vector<12x8xf32> -> vector<12x8xf32>
    %985 = vector.extract_strided_slice %967 {offsets = [0, 0], sizes = [8, 32], strides = [1, 1]} : vector<16x32xf32> to vector<8x32xf32>
    %cst_376 = arith.constant dense<0.000000e+00> : vector<12x32xf32>
    %986 = tpu.matmul %984, %985, %cst_376 {dimension_numbers = #tpu.dot_dimension_numbers<[1], [0], [0], [1], [0, 0, 1, 1], [], []>} : vector<12x8xf32>, vector<8x32xf32>, vector<12x32xf32> -> vector<12x32xf32>
    %987 = vector.extract_strided_slice %956 {offsets = [0, 8], sizes = [12, 8], strides = [1, 1]} : vector<12x16xf32> to vector<12x8xf32>
    %988 = vector.extract_strided_slice %961 {offsets = [0, 8], sizes = [32, 8], strides = [1, 1]} : vector<32x16xf32> to vector<32x8xf32>
    %cst_377 = arith.constant dense<0.000000e+00> : vector<12x32xf32>
    %989 = tpu.matmul %987, %988, %cst_377 {dimension_numbers = #tpu.dot_dimension_numbers<[1], [1], [0], [0], [0, 0, 1, 0], [], []>} : vector<12x8xf32>, vector<32x8xf32>, vector<12x32xf32> -> vector<12x32xf32>
    %cst_378 = arith.constant 0.353553385 : f32
    %990 = vector.broadcast %cst_378 : f32 to vector<12x32xf32>
    %991 = arith.mulf %989, %990 : vector<12x32xf32>
    %992 = arith.addf %991, %368 : vector<12x32xf32>
    %cst_379 = arith.constant dense<0xFF800000> : vector<12xf32>
    %993 = vector.multi_reduction <maximumf>, %992, %cst_379 [1] : vector<12x32xf32> to vector<12xf32>
    %994 = vector.shape_cast %993 : vector<12xf32> to vector<12x1xf32>
    %995 = vector.broadcast %994 : vector<12x1xf32> to vector<12x32xf32>
    %996 = arith.subf %992, %995 : vector<12x32xf32>
    %997 = math.exp %996 : vector<12x32xf32>
    %cst_380 = arith.constant dense<0.000000e+00> : vector<12xf32>
    %998 = vector.multi_reduction <add>, %997, %cst_380 [1] : vector<12x32xf32> to vector<12xf32>
    %999 = vector.shape_cast %998 : vector<12xf32> to vector<12x1xf32>
    %1000 = vector.broadcast %999 : vector<12x1xf32> to vector<12x32xf32>
    %1001 = arith.divf %997, %1000 : vector<12x32xf32>
    %1002 = vector.extract_strided_slice %966 {offsets = [0, 8], sizes = [32, 8], strides = [1, 1]} : vector<32x16xf32> to vector<32x8xf32>
    %cst_381 = arith.constant dense<0.000000e+00> : vector<12x8xf32>
    %1003 = tpu.matmul %1001, %1002, %cst_381 {dimension_numbers = #tpu.dot_dimension_numbers<[1], [0], [0], [1], [0, 0, 1, 1], [], []>} : vector<12x32xf32>, vector<32x8xf32>, vector<12x8xf32> -> vector<12x8xf32>
    %1004 = vector.extract_strided_slice %967 {offsets = [8, 0], sizes = [8, 32], strides = [1, 1]} : vector<16x32xf32> to vector<8x32xf32>
    %cst_382 = arith.constant dense<0.000000e+00> : vector<12x32xf32>
    %1005 = tpu.matmul %1003, %1004, %cst_382 {dimension_numbers = #tpu.dot_dimension_numbers<[1], [0], [0], [1], [0, 0, 1, 1], [], []>} : vector<12x8xf32>, vector<8x32xf32>, vector<12x32xf32> -> vector<12x32xf32>
    %1006 = arith.addf %986, %1005 : vector<12x32xf32>
    %c40_383 = arith.constant 40 : index
    %c0_384 = arith.constant 0 : index
    %1007 = vector.load %arg3[%c40_383, %c0_384] : memref<2568x128xf32, #tpu.memory_space<vmem>>, vector<1x32xf32>
    %1008 = vector.broadcast %1007 : vector<1x32xf32> to vector<12x32xf32>
    %1009 = arith.addf %1006, %1008 : vector<12x32xf32>
    %1010 = arith.addf %864, %1009 : vector<12x32xf32>
    %c1048 = arith.constant 1048 : index
    %c0_385 = arith.constant 0 : index
    %1011 = vector.load %arg3[%c1048, %c0_385] : memref<2568x128xf32, #tpu.memory_space<vmem>>, vector<1x32xf32>
    %c1040 = arith.constant 1040 : index
    %c0_386 = arith.constant 0 : index
    %1012 = vector.load %arg3[%c1040, %c0_386] : memref<2568x128xf32, #tpu.memory_space<vmem>>, vector<1x32xf32>
    %cst_387 = arith.constant dense<0.000000e+00> : vector<12xf32>
    %1013 = vector.multi_reduction <add>, %1010, %cst_387 [1] : vector<12x32xf32> to vector<12xf32>
    %1014 = vector.shape_cast %1013 : vector<12xf32> to vector<12x1xf32>
    %cst_388 = arith.constant 3.200000e+01 : f32
    %1015 = vector.broadcast %cst_388 : f32 to vector<12x1xf32>
    %1016 = arith.divf %1014, %1015 : vector<12x1xf32>
    %1017 = vector.broadcast %1016 : vector<12x1xf32> to vector<12x32xf32>
    %1018 = arith.subf %1010, %1017 : vector<12x32xf32>
    %1019 = arith.mulf %1018, %1018 : vector<12x32xf32>
    %cst_389 = arith.constant dense<0.000000e+00> : vector<12xf32>
    %1020 = vector.multi_reduction <add>, %1019, %cst_389 [1] : vector<12x32xf32> to vector<12xf32>
    %1021 = vector.shape_cast %1020 : vector<12xf32> to vector<12x1xf32>
    %cst_390 = arith.constant 3.200000e+01 : f32
    %1022 = vector.broadcast %cst_390 : f32 to vector<12x1xf32>
    %1023 = arith.divf %1021, %1022 : vector<12x1xf32>
    %1024 = vector.broadcast %1016 : vector<12x1xf32> to vector<12x32xf32>
    %1025 = arith.subf %1010, %1024 : vector<12x32xf32>
    %cst_391 = arith.constant 9.99999974E-6 : f32
    %1026 = vector.broadcast %cst_391 : f32 to vector<12x1xf32>
    %1027 = arith.addf %1023, %1026 : vector<12x1xf32>
    %1028 = math.rsqrt %1027 : vector<12x1xf32>
    %1029 = vector.broadcast %1028 : vector<12x1xf32> to vector<12x32xf32>
    %1030 = arith.mulf %1025, %1029 : vector<12x32xf32>
    %1031 = vector.broadcast %1011 : vector<1x32xf32> to vector<12x32xf32>
    %1032 = arith.mulf %1030, %1031 : vector<12x32xf32>
    %1033 = vector.broadcast %1012 : vector<1x32xf32> to vector<12x32xf32>
    %1034 = arith.addf %1032, %1033 : vector<12x32xf32>
    %1035 = vector.extract_strided_slice %1034 {offsets = [0, 0], sizes = [1, 32], strides = [1, 1]} : vector<12x32xf32> to vector<1x32xf32>
    %1036 = vector.extract_strided_slice %1034 {offsets = [6, 0], sizes = [1, 32], strides = [1, 1]} : vector<12x32xf32> to vector<1x32xf32>
    %1037 = tpu.concatenate %1035, %1036 in 0 : vector<1x32xf32>, vector<1x32xf32> -> vector<2x32xf32>
    %c944 = arith.constant 944 : index
    %c0_392 = arith.constant 0 : index
    %1038 = vector.load %arg3[%c944, %c0_392] : memref<2568x128xf32, #tpu.memory_space<vmem>>, vector<32x32xf32>
    %cst_393 = arith.constant dense<0.000000e+00> : vector<2x32xf32>
    %1039 = tpu.matmul %1037, %1038, %cst_393 {dimension_numbers = #tpu.dot_dimension_numbers<[1], [0], [0], [1], [0, 0, 1, 1], [], []>} : vector<2x32xf32>, vector<32x32xf32>, vector<2x32xf32> -> vector<2x32xf32>
    %c920_394 = arith.constant 920 : index
    %c0_395 = arith.constant 0 : index
    %1040 = vector.load %arg3[%c920_394, %c0_395] : memref<2568x128xf32, #tpu.memory_space<vmem>>, vector<1x32xf32>
    %1041 = vector.broadcast %1040 : vector<1x32xf32> to vector<2x32xf32>
    %1042 = arith.addf %1039, %1041 : vector<2x32xf32>
    %cst_396 = arith.constant 0.000000e+00 : f32
    %1043 = vector.broadcast %cst_396 : f32 to vector<2x32xf32>
    %1044 = arith.maximumf %1042, %1043 : vector<2x32xf32>
    %c976 = arith.constant 976 : index
    %c0_397 = arith.constant 0 : index
    %1045 = vector.load %arg3[%c976, %c0_397] : memref<2568x128xf32, #tpu.memory_space<vmem>>, vector<32x32xf32>
    %cst_398 = arith.constant dense<0.000000e+00> : vector<2x32xf32>
    %1046 = tpu.matmul %1044, %1045, %cst_398 {dimension_numbers = #tpu.dot_dimension_numbers<[1], [0], [0], [1], [0, 0, 1, 1], [], []>} : vector<2x32xf32>, vector<32x32xf32>, vector<2x32xf32> -> vector<2x32xf32>
    %c928_399 = arith.constant 928 : index
    %c0_400 = arith.constant 0 : index
    %1047 = vector.load %arg3[%c928_399, %c0_400] : memref<2568x128xf32, #tpu.memory_space<vmem>>, vector<1x32xf32>
    %1048 = vector.broadcast %1047 : vector<1x32xf32> to vector<2x32xf32>
    %1049 = arith.addf %1046, %1048 : vector<2x32xf32>
    %cst_401 = arith.constant 0.000000e+00 : f32
    %1050 = vector.broadcast %cst_401 : f32 to vector<2x32xf32>
    %1051 = arith.maximumf %1049, %1050 : vector<2x32xf32>
    %c1008 = arith.constant 1008 : index
    %c0_402 = arith.constant 0 : index
    %1052 = vector.load %arg3[%c1008, %c0_402] : memref<2568x128xf32, #tpu.memory_space<vmem>>, vector<32x4xf32>
    %cst_403 = arith.constant dense<0.000000e+00> : vector<2x4xf32>
    %1053 = tpu.matmul %1051, %1052, %cst_403 {dimension_numbers = #tpu.dot_dimension_numbers<[1], [0], [0], [1], [0, 0, 1, 1], [], []>} : vector<2x32xf32>, vector<32x4xf32>, vector<2x4xf32> -> vector<2x4xf32>
    %c936 = arith.constant 936 : index
    %c0_404 = arith.constant 0 : index
    %1054 = vector.load %arg3[%c936, %c0_404] : memref<2568x128xf32, #tpu.memory_space<vmem>>, vector<1x4xf32>
    %1055 = vector.broadcast %1054 : vector<1x4xf32> to vector<2x4xf32>
    %1056 = arith.addf %1053, %1055 : vector<2x4xf32>
    %c0_405 = arith.constant 0 : index
    %c0_406 = arith.constant 0 : index
    %1057 = vector.load %arg6[%c0_405, %c0_406] : memref<2x4xf32, #tpu.memory_space<vmem>>, vector<2x4xf32>
    tpu.vector_store %arg6[%c0_405, %c0_406], %1056 {strides = array<i32>} : memref<2x4xf32, #tpu.memory_space<vmem>>, vector<2x4xf32>,
    %1058 = vector.extract_strided_slice %1034 {offsets = [1, 0], sizes = [1, 32], strides = [1, 1]} : vector<12x32xf32> to vector<1x32xf32>
    %1059 = vector.extract_strided_slice %1034 {offsets = [7, 0], sizes = [1, 32], strides = [1, 1]} : vector<12x32xf32> to vector<1x32xf32>
    %1060 = tpu.concatenate %1058, %1059 in 0 : vector<1x32xf32>, vector<1x32xf32> -> vector<2x32xf32>
    %c536 = arith.constant 536 : index
    %c0_407 = arith.constant 0 : index
    %1061 = vector.load %arg3[%c536, %c0_407] : memref<2568x128xf32, #tpu.memory_space<vmem>>, vector<32x32xf32>
    %cst_408 = arith.constant dense<0.000000e+00> : vector<2x32xf32>
    %1062 = tpu.matmul %1060, %1061, %cst_408 {dimension_numbers = #tpu.dot_dimension_numbers<[1], [0], [0], [1], [0, 0, 1, 1], [], []>} : vector<2x32xf32>, vector<32x32xf32>, vector<2x32xf32> -> vector<2x32xf32>
    %c440 = arith.constant 440 : index
    %c0_409 = arith.constant 0 : index
    %1063 = vector.load %arg3[%c440, %c0_409] : memref<2568x128xf32, #tpu.memory_space<vmem>>, vector<1x32xf32>
    %1064 = vector.broadcast %1063 : vector<1x32xf32> to vector<2x32xf32>
    %1065 = arith.addf %1062, %1064 : vector<2x32xf32>
    %cst_410 = arith.constant 0.000000e+00 : f32
    %1066 = vector.broadcast %cst_410 : f32 to vector<2x32xf32>
    %1067 = arith.maximumf %1065, %1066 : vector<2x32xf32>
    %c664 = arith.constant 664 : index
    %c0_411 = arith.constant 0 : index
    %1068 = vector.load %arg3[%c664, %c0_411] : memref<2568x128xf32, #tpu.memory_space<vmem>>, vector<32x32xf32>
    %cst_412 = arith.constant dense<0.000000e+00> : vector<2x32xf32>
    %1069 = tpu.matmul %1067, %1068, %cst_412 {dimension_numbers = #tpu.dot_dimension_numbers<[1], [0], [0], [1], [0, 0, 1, 1], [], []>} : vector<2x32xf32>, vector<32x32xf32>, vector<2x32xf32> -> vector<2x32xf32>
    %c472 = arith.constant 472 : index
    %c0_413 = arith.constant 0 : index
    %1070 = vector.load %arg3[%c472, %c0_413] : memref<2568x128xf32, #tpu.memory_space<vmem>>, vector<1x32xf32>
    %1071 = vector.broadcast %1070 : vector<1x32xf32> to vector<2x32xf32>
    %1072 = arith.addf %1069, %1071 : vector<2x32xf32>
    %cst_414 = arith.constant 0.000000e+00 : f32
    %1073 = vector.broadcast %cst_414 : f32 to vector<2x32xf32>
    %1074 = arith.maximumf %1072, %1073 : vector<2x32xf32>
    %c792 = arith.constant 792 : index
    %c0_415 = arith.constant 0 : index
    %1075 = vector.load %arg3[%c792, %c0_415] : memref<2568x128xf32, #tpu.memory_space<vmem>>, vector<32x4xf32>
    %cst_416 = arith.constant dense<0.000000e+00> : vector<2x4xf32>
    %1076 = tpu.matmul %1074, %1075, %cst_416 {dimension_numbers = #tpu.dot_dimension_numbers<[1], [0], [0], [1], [0, 0, 1, 1], [], []>} : vector<2x32xf32>, vector<32x4xf32>, vector<2x4xf32> -> vector<2x4xf32>
    %c504 = arith.constant 504 : index
    %c0_417 = arith.constant 0 : index
    %1077 = vector.load %arg3[%c504, %c0_417] : memref<2568x128xf32, #tpu.memory_space<vmem>>, vector<1x4xf32>
    %1078 = vector.broadcast %1077 : vector<1x4xf32> to vector<2x4xf32>
    %1079 = arith.addf %1076, %1078 : vector<2x4xf32>
    %1080 = vector.extract_strided_slice %1034 {offsets = [2, 0], sizes = [1, 32], strides = [1, 1]} : vector<12x32xf32> to vector<1x32xf32>
    %1081 = vector.extract_strided_slice %1034 {offsets = [8, 0], sizes = [1, 32], strides = [1, 1]} : vector<12x32xf32> to vector<1x32xf32>
    %1082 = tpu.concatenate %1080, %1081 in 0 : vector<1x32xf32>, vector<1x32xf32> -> vector<2x32xf32>
    %c568 = arith.constant 568 : index
    %c0_418 = arith.constant 0 : index
    %1083 = vector.load %arg3[%c568, %c0_418] : memref<2568x128xf32, #tpu.memory_space<vmem>>, vector<32x32xf32>
    %cst_419 = arith.constant dense<0.000000e+00> : vector<2x32xf32>
    %1084 = tpu.matmul %1082, %1083, %cst_419 {dimension_numbers = #tpu.dot_dimension_numbers<[1], [0], [0], [1], [0, 0, 1, 1], [], []>} : vector<2x32xf32>, vector<32x32xf32>, vector<2x32xf32> -> vector<2x32xf32>
    %c448 = arith.constant 448 : index
    %c0_420 = arith.constant 0 : index
    %1085 = vector.load %arg3[%c448, %c0_420] : memref<2568x128xf32, #tpu.memory_space<vmem>>, vector<1x32xf32>
    %1086 = vector.broadcast %1085 : vector<1x32xf32> to vector<2x32xf32>
    %1087 = arith.addf %1084, %1086 : vector<2x32xf32>
    %cst_421 = arith.constant 0.000000e+00 : f32
    %1088 = vector.broadcast %cst_421 : f32 to vector<2x32xf32>
    %1089 = arith.maximumf %1087, %1088 : vector<2x32xf32>
    %c696 = arith.constant 696 : index
    %c0_422 = arith.constant 0 : index
    %1090 = vector.load %arg3[%c696, %c0_422] : memref<2568x128xf32, #tpu.memory_space<vmem>>, vector<32x32xf32>
    %cst_423 = arith.constant dense<0.000000e+00> : vector<2x32xf32>
    %1091 = tpu.matmul %1089, %1090, %cst_423 {dimension_numbers = #tpu.dot_dimension_numbers<[1], [0], [0], [1], [0, 0, 1, 1], [], []>} : vector<2x32xf32>, vector<32x32xf32>, vector<2x32xf32> -> vector<2x32xf32>
    %c480 = arith.constant 480 : index
    %c0_424 = arith.constant 0 : index
    %1092 = vector.load %arg3[%c480, %c0_424] : memref<2568x128xf32, #tpu.memory_space<vmem>>, vector<1x32xf32>
    %1093 = vector.broadcast %1092 : vector<1x32xf32> to vector<2x32xf32>
    %1094 = arith.addf %1091, %1093 : vector<2x32xf32>
    %cst_425 = arith.constant 0.000000e+00 : f32
    %1095 = vector.broadcast %cst_425 : f32 to vector<2x32xf32>
    %1096 = arith.maximumf %1094, %1095 : vector<2x32xf32>
    %c824 = arith.constant 824 : index
    %c0_426 = arith.constant 0 : index
    %1097 = vector.load %arg3[%c824, %c0_426] : memref<2568x128xf32, #tpu.memory_space<vmem>>, vector<32x4xf32>
    %cst_427 = arith.constant dense<0.000000e+00> : vector<2x4xf32>
    %1098 = tpu.matmul %1096, %1097, %cst_427 {dimension_numbers = #tpu.dot_dimension_numbers<[1], [0], [0], [1], [0, 0, 1, 1], [], []>} : vector<2x32xf32>, vector<32x4xf32>, vector<2x4xf32> -> vector<2x4xf32>
    %c512_428 = arith.constant 512 : index
    %c0_429 = arith.constant 0 : index
    %1099 = vector.load %arg3[%c512_428, %c0_429] : memref<2568x128xf32, #tpu.memory_space<vmem>>, vector<1x4xf32>
    %1100 = vector.broadcast %1099 : vector<1x4xf32> to vector<2x4xf32>
    %1101 = arith.addf %1098, %1100 : vector<2x4xf32>
    %1102 = vector.extract_strided_slice %1034 {offsets = [3, 0], sizes = [1, 32], strides = [1, 1]} : vector<12x32xf32> to vector<1x32xf32>
    %1103 = vector.extract_strided_slice %1034 {offsets = [9, 0], sizes = [1, 32], strides = [1, 1]} : vector<12x32xf32> to vector<1x32xf32>
    %1104 = tpu.concatenate %1102, %1103 in 0 : vector<1x32xf32>, vector<1x32xf32> -> vector<2x32xf32>
    %c600 = arith.constant 600 : index
    %c0_430 = arith.constant 0 : index
    %1105 = vector.load %arg3[%c600, %c0_430] : memref<2568x128xf32, #tpu.memory_space<vmem>>, vector<32x32xf32>
    %cst_431 = arith.constant dense<0.000000e+00> : vector<2x32xf32>
    %1106 = tpu.matmul %1104, %1105, %cst_431 {dimension_numbers = #tpu.dot_dimension_numbers<[1], [0], [0], [1], [0, 0, 1, 1], [], []>} : vector<2x32xf32>, vector<32x32xf32>, vector<2x32xf32> -> vector<2x32xf32>
    %c456 = arith.constant 456 : index
    %c0_432 = arith.constant 0 : index
    %1107 = vector.load %arg3[%c456, %c0_432] : memref<2568x128xf32, #tpu.memory_space<vmem>>, vector<1x32xf32>
    %1108 = vector.broadcast %1107 : vector<1x32xf32> to vector<2x32xf32>
    %1109 = arith.addf %1106, %1108 : vector<2x32xf32>
    %cst_433 = arith.constant 0.000000e+00 : f32
    %1110 = vector.broadcast %cst_433 : f32 to vector<2x32xf32>
    %1111 = arith.maximumf %1109, %1110 : vector<2x32xf32>
    %c728 = arith.constant 728 : index
    %c0_434 = arith.constant 0 : index
    %1112 = vector.load %arg3[%c728, %c0_434] : memref<2568x128xf32, #tpu.memory_space<vmem>>, vector<32x32xf32>
    %cst_435 = arith.constant dense<0.000000e+00> : vector<2x32xf32>
    %1113 = tpu.matmul %1111, %1112, %cst_435 {dimension_numbers = #tpu.dot_dimension_numbers<[1], [0], [0], [1], [0, 0, 1, 1], [], []>} : vector<2x32xf32>, vector<32x32xf32>, vector<2x32xf32> -> vector<2x32xf32>
    %c488 = arith.constant 488 : index
    %c0_436 = arith.constant 0 : index
    %1114 = vector.load %arg3[%c488, %c0_436] : memref<2568x128xf32, #tpu.memory_space<vmem>>, vector<1x32xf32>
    %1115 = vector.broadcast %1114 : vector<1x32xf32> to vector<2x32xf32>
    %1116 = arith.addf %1113, %1115 : vector<2x32xf32>
    %cst_437 = arith.constant 0.000000e+00 : f32
    %1117 = vector.broadcast %cst_437 : f32 to vector<2x32xf32>
    %1118 = arith.maximumf %1116, %1117 : vector<2x32xf32>
    %c856 = arith.constant 856 : index
    %c0_438 = arith.constant 0 : index
    %1119 = vector.load %arg3[%c856, %c0_438] : memref<2568x128xf32, #tpu.memory_space<vmem>>, vector<32x4xf32>
    %cst_439 = arith.constant dense<0.000000e+00> : vector<2x4xf32>
    %1120 = tpu.matmul %1118, %1119, %cst_439 {dimension_numbers = #tpu.dot_dimension_numbers<[1], [0], [0], [1], [0, 0, 1, 1], [], []>} : vector<2x32xf32>, vector<32x4xf32>, vector<2x4xf32> -> vector<2x4xf32>
    %c520 = arith.constant 520 : index
    %c0_440 = arith.constant 0 : index
    %1121 = vector.load %arg3[%c520, %c0_440] : memref<2568x128xf32, #tpu.memory_space<vmem>>, vector<1x4xf32>
    %1122 = vector.broadcast %1121 : vector<1x4xf32> to vector<2x4xf32>
    %1123 = arith.addf %1120, %1122 : vector<2x4xf32>
    %1124 = vector.extract_strided_slice %1034 {offsets = [4, 0], sizes = [1, 32], strides = [1, 1]} : vector<12x32xf32> to vector<1x32xf32>
    %1125 = vector.extract_strided_slice %1034 {offsets = [10, 0], sizes = [1, 32], strides = [1, 1]} : vector<12x32xf32> to vector<1x32xf32>
    %1126 = tpu.concatenate %1124, %1125 in 0 : vector<1x32xf32>, vector<1x32xf32> -> vector<2x32xf32>
    %c632 = arith.constant 632 : index
    %c0_441 = arith.constant 0 : index
    %1127 = vector.load %arg3[%c632, %c0_441] : memref<2568x128xf32, #tpu.memory_space<vmem>>, vector<32x32xf32>
    %cst_442 = arith.constant dense<0.000000e+00> : vector<2x32xf32>
    %1128 = tpu.matmul %1126, %1127, %cst_442 {dimension_numbers = #tpu.dot_dimension_numbers<[1], [0], [0], [1], [0, 0, 1, 1], [], []>} : vector<2x32xf32>, vector<32x32xf32>, vector<2x32xf32> -> vector<2x32xf32>
    %c464 = arith.constant 464 : index
    %c0_443 = arith.constant 0 : index
    %1129 = vector.load %arg3[%c464, %c0_443] : memref<2568x128xf32, #tpu.memory_space<vmem>>, vector<1x32xf32>
    %1130 = vector.broadcast %1129 : vector<1x32xf32> to vector<2x32xf32>
    %1131 = arith.addf %1128, %1130 : vector<2x32xf32>
    %cst_444 = arith.constant 0.000000e+00 : f32
    %1132 = vector.broadcast %cst_444 : f32 to vector<2x32xf32>
    %1133 = arith.maximumf %1131, %1132 : vector<2x32xf32>
    %c760 = arith.constant 760 : index
    %c0_445 = arith.constant 0 : index
    %1134 = vector.load %arg3[%c760, %c0_445] : memref<2568x128xf32, #tpu.memory_space<vmem>>, vector<32x32xf32>
    %cst_446 = arith.constant dense<0.000000e+00> : vector<2x32xf32>
    %1135 = tpu.matmul %1133, %1134, %cst_446 {dimension_numbers = #tpu.dot_dimension_numbers<[1], [0], [0], [1], [0, 0, 1, 1], [], []>} : vector<2x32xf32>, vector<32x32xf32>, vector<2x32xf32> -> vector<2x32xf32>
    %c496 = arith.constant 496 : index
    %c0_447 = arith.constant 0 : index
    %1136 = vector.load %arg3[%c496, %c0_447] : memref<2568x128xf32, #tpu.memory_space<vmem>>, vector<1x32xf32>
    %1137 = vector.broadcast %1136 : vector<1x32xf32> to vector<2x32xf32>
    %1138 = arith.addf %1135, %1137 : vector<2x32xf32>
    %cst_448 = arith.constant 0.000000e+00 : f32
    %1139 = vector.broadcast %cst_448 : f32 to vector<2x32xf32>
    %1140 = arith.maximumf %1138, %1139 : vector<2x32xf32>
    %c888 = arith.constant 888 : index
    %c0_449 = arith.constant 0 : index
    %1141 = vector.load %arg3[%c888, %c0_449] : memref<2568x128xf32, #tpu.memory_space<vmem>>, vector<32x4xf32>
    %cst_450 = arith.constant dense<0.000000e+00> : vector<2x4xf32>
    %1142 = tpu.matmul %1140, %1141, %cst_450 {dimension_numbers = #tpu.dot_dimension_numbers<[1], [0], [0], [1], [0, 0, 1, 1], [], []>} : vector<2x32xf32>, vector<32x4xf32>, vector<2x4xf32> -> vector<2x4xf32>
    %c528 = arith.constant 528 : index
    %c0_451 = arith.constant 0 : index
    %1143 = vector.load %arg3[%c528, %c0_451] : memref<2568x128xf32, #tpu.memory_space<vmem>>, vector<1x4xf32>
    %1144 = vector.broadcast %1143 : vector<1x4xf32> to vector<2x4xf32>
    %1145 = arith.addf %1142, %1144 : vector<2x4xf32>
    %1146 = tpu.concatenate %1079, %1101, %1123, %1145 in 1 : vector<2x4xf32>, vector<2x4xf32>, vector<2x4xf32>, vector<2x4xf32> -> vector<2x16xf32>
    %c2448 = arith.constant 2448 : index
    %c0_452 = arith.constant 0 : index
    %1147 = vector.load %arg3[%c2448, %c0_452] : memref<2568x128xf32, #tpu.memory_space<vmem>>, vector<32x32xf32>
    %cst_453 = arith.constant dense<0.000000e+00> : vector<32x32xf32>
    %1148 = tpu.matmul %949, %1147, %cst_453 {dimension_numbers = #tpu.dot_dimension_numbers<[1], [0], [0], [1], [0, 0, 1, 1], [], []>} : vector<32x32xf32>, vector<32x32xf32>, vector<32x32xf32> -> vector<32x32xf32>
    %c2440 = arith.constant 2440 : index
    %c0_454 = arith.constant 0 : index
    %1149 = vector.load %arg3[%c2440, %c0_454] : memref<2568x128xf32, #tpu.memory_space<vmem>>, vector<1x32xf32>
    %1150 = vector.broadcast %1149 : vector<1x32xf32> to vector<32x32xf32>
    %1151 = arith.addf %1148, %1150 : vector<32x32xf32>
    %c2520 = arith.constant 2520 : index
    %c0_455 = arith.constant 0 : index
    %1152 = vector.load %arg3[%c2520, %c0_455] : memref<2568x128xf32, #tpu.memory_space<vmem>>, vector<32x32xf32>
    %cst_456 = arith.constant dense<0.000000e+00> : vector<32x32xf32>
    %1153 = tpu.matmul %1151, %1152, %cst_456 {dimension_numbers = #tpu.dot_dimension_numbers<[1], [0], [0], [1], [0, 0, 1, 1], [], []>} : vector<32x32xf32>, vector<32x32xf32>, vector<32x32xf32> -> vector<32x32xf32>
    %1154 = arith.subf %1151, %1153 : vector<32x32xf32>
    %1155 = arith.mulf %1154, %1154 : vector<32x32xf32>
    %c2520_457 = arith.constant 2520 : index
    %c0_458 = arith.constant 0 : index
    %1156 = vector.load %arg3[%c2520_457, %c0_458] : memref<2568x128xf32, #tpu.memory_space<vmem>>, vector<32x32xf32>
    %cst_459 = arith.constant dense<0.000000e+00> : vector<32x32xf32>
    %1157 = tpu.matmul %1155, %1156, %cst_459 {dimension_numbers = #tpu.dot_dimension_numbers<[1], [0], [0], [1], [0, 0, 1, 1], [], []>} : vector<32x32xf32>, vector<32x32xf32>, vector<32x32xf32> -> vector<32x32xf32>
    %1158 = arith.subf %1151, %1153 : vector<32x32xf32>
    %cst_460 = arith.constant 9.99999997E-7 : f32
    %1159 = vector.broadcast %cst_460 : f32 to vector<32x32xf32>
    %1160 = arith.addf %1157, %1159 : vector<32x32xf32>
    %1161 = math.rsqrt %1160 : vector<32x32xf32>
    %1162 = arith.mulf %1158, %1161 : vector<32x32xf32>
    %c2560 = arith.constant 2560 : index
    %c0_461 = arith.constant 0 : index
    %1163 = vector.load %arg3[%c2560, %c0_461] : memref<2568x128xf32, #tpu.memory_space<vmem>>, vector<1x32xf32>
    %1164 = vector.broadcast %1163 : vector<1x32xf32> to vector<32x32xf32>
    %1165 = arith.mulf %1162, %1164 : vector<32x32xf32>
    %c2552 = arith.constant 2552 : index
    %c0_462 = arith.constant 0 : index
    %1166 = vector.load %arg3[%c2552, %c0_462] : memref<2568x128xf32, #tpu.memory_space<vmem>>, vector<1x32xf32>
    %1167 = vector.broadcast %1166 : vector<1x32xf32> to vector<32x32xf32>
    %1168 = arith.addf %1165, %1167 : vector<32x32xf32>
    %1169 = arith.mulf %1168, %1168 : vector<32x32xf32>
    %1170 = arith.mulf %1168, %1169 : vector<32x32xf32>
    %cst_463 = arith.constant 4.471500e-02 : f32
    %1171 = vector.broadcast %cst_463 : f32 to vector<32x32xf32>
    %1172 = arith.mulf %1171, %1170 : vector<32x32xf32>
    %1173 = arith.addf %1168, %1172 : vector<32x32xf32>
    %cst_464 = arith.constant 0.797884583 : f32
    %1174 = vector.broadcast %cst_464 : f32 to vector<32x32xf32>
    %1175 = arith.mulf %1174, %1173 : vector<32x32xf32>
    %1176 = math.tanh %1175 : vector<32x32xf32>
    %cst_465 = arith.constant 1.000000e+00 : f32
    %1177 = vector.broadcast %cst_465 : f32 to vector<32x32xf32>
    %1178 = arith.addf %1177, %1176 : vector<32x32xf32>
    %cst_466 = arith.constant 5.000000e-01 : f32
    %1179 = vector.broadcast %cst_466 : f32 to vector<32x32xf32>
    %1180 = arith.mulf %1179, %1178 : vector<32x32xf32>
    %1181 = arith.mulf %1168, %1180 : vector<32x32xf32>
    %c2488 = arith.constant 2488 : index
    %c0_467 = arith.constant 0 : index
    %1182 = vector.load %arg3[%c2488, %c0_467] : memref<2568x128xf32, #tpu.memory_space<vmem>>, vector<32x64xf32>
    %cst_468 = arith.constant dense<0.000000e+00> : vector<32x64xf32>
    %1183 = tpu.matmul %1181, %1182, %cst_468 {dimension_numbers = #tpu.dot_dimension_numbers<[1], [0], [0], [1], [0, 0, 1, 1], [], []>} : vector<32x32xf32>, vector<32x64xf32>, vector<32x64xf32> -> vector<32x64xf32>
    %c2480 = arith.constant 2480 : index
    %c0_469 = arith.constant 0 : index
    %1184 = vector.load %arg3[%c2480, %c0_469] : memref<2568x128xf32, #tpu.memory_space<vmem>>, vector<1x64xf32>
    %1185 = vector.broadcast %1184 : vector<1x64xf32> to vector<32x64xf32>
    %1186 = arith.addf %1183, %1185 : vector<32x64xf32>
    %1187 = arith.mulf %1186, %1186 : vector<32x64xf32>
    %1188 = arith.mulf %1186, %1187 : vector<32x64xf32>
    %cst_470 = arith.constant 4.471500e-02 : f32
    %1189 = vector.broadcast %cst_470 : f32 to vector<32x64xf32>
    %1190 = arith.mulf %1189, %1188 : vector<32x64xf32>
    %1191 = arith.addf %1186, %1190 : vector<32x64xf32>
    %cst_471 = arith.constant 0.797884583 : f32
    %1192 = vector.broadcast %cst_471 : f32 to vector<32x64xf32>
    %1193 = arith.mulf %1192, %1191 : vector<32x64xf32>
    %1194 = math.tanh %1193 : vector<32x64xf32>
    %cst_472 = arith.constant 1.000000e+00 : f32
    %1195 = vector.broadcast %cst_472 : f32 to vector<32x64xf32>
    %1196 = arith.addf %1195, %1194 : vector<32x64xf32>
    %cst_473 = arith.constant 5.000000e-01 : f32
    %1197 = vector.broadcast %cst_473 : f32 to vector<32x64xf32>
    %1198 = arith.mulf %1197, %1196 : vector<32x64xf32>
    %1199 = arith.mulf %1186, %1198 : vector<32x64xf32>
    %c296 = arith.constant 296 : index
    %c0_474 = arith.constant 0 : index
    %1200 = vector.load %arg3[%c296, %c0_474] : memref<2568x128xf32, #tpu.memory_space<vmem>>, vector<64x16xf32>
    %c424 = arith.constant 424 : index
    %c0_475 = arith.constant 0 : index
    %1201 = vector.load %arg3[%c424, %c0_475] : memref<2568x128xf32, #tpu.memory_space<vmem>>, vector<16x64xf32>
    %c360 = arith.constant 360 : index
    %c0_476 = arith.constant 0 : index
    %1202 = vector.load %arg3[%c360, %c0_476] : memref<2568x128xf32, #tpu.memory_space<vmem>>, vector<64x64xf32>
    %1203 = vector.extract_strided_slice %1146 {offsets = [0, 0], sizes = [1, 16], strides = [1, 1]} : vector<2x16xf32> to vector<1x16xf32>
    %1204 = vector.broadcast %1203 : vector<1x16xf32> to vector<64x16xf32>
    %1205 = arith.mulf %1200, %1204 : vector<64x16xf32>
    %cst_477 = arith.constant dense<0.000000e+00> : vector<64x64xf32>
    %1206 = tpu.matmul %1205, %1201, %cst_477 {dimension_numbers = #tpu.dot_dimension_numbers<[1], [0], [0], [1], [0, 0, 1, 1], [], []>} : vector<64x16xf32>, vector<16x64xf32>, vector<64x64xf32> -> vector<64x64xf32>
    %1207 = arith.mulf %1206, %1202 : vector<64x64xf32>
    %1208 = vector.extract_strided_slice %1199 {offsets = [0, 0], sizes = [16, 64], strides = [1, 1]} : vector<32x64xf32> to vector<16x64xf32>
    %cst_478 = arith.constant dense<0.000000e+00> : vector<16x64xf32>
    %1209 = tpu.matmul %1208, %1207, %cst_478 {dimension_numbers = #tpu.dot_dimension_numbers<[1], [0], [0], [1], [0, 0, 1, 1], [], []>} : vector<16x64xf32>, vector<64x64xf32>, vector<16x64xf32> -> vector<16x64xf32>
    %1210 = vector.extract_strided_slice %1146 {offsets = [1, 0], sizes = [1, 16], strides = [1, 1]} : vector<2x16xf32> to vector<1x16xf32>
    %1211 = vector.broadcast %1210 : vector<1x16xf32> to vector<64x16xf32>
    %1212 = arith.mulf %1200, %1211 : vector<64x16xf32>
    %cst_479 = arith.constant dense<0.000000e+00> : vector<64x64xf32>
    %1213 = tpu.matmul %1212, %1201, %cst_479 {dimension_numbers = #tpu.dot_dimension_numbers<[1], [0], [0], [1], [0, 0, 1, 1], [], []>} : vector<64x16xf32>, vector<16x64xf32>, vector<64x64xf32> -> vector<64x64xf32>
    %1214 = arith.mulf %1213, %1202 : vector<64x64xf32>
    %1215 = vector.extract_strided_slice %1199 {offsets = [16, 0], sizes = [16, 64], strides = [1, 1]} : vector<32x64xf32> to vector<16x64xf32>
    %cst_480 = arith.constant dense<0.000000e+00> : vector<16x64xf32>
    %1216 = tpu.matmul %1215, %1214, %cst_480 {dimension_numbers = #tpu.dot_dimension_numbers<[1], [0], [0], [1], [0, 0, 1, 1], [], []>} : vector<16x64xf32>, vector<64x64xf32>, vector<16x64xf32> -> vector<16x64xf32>
    %1217 = tpu.concatenate %1209, %1216 in 1 : vector<16x64xf32>, vector<16x64xf32> -> vector<16x128xf32>
    %c0_481 = arith.constant 0 : index
    %c0_482 = arith.constant 0 : index
    %1218 = vector.load %arg5[%c0_481, %c0_482] : memref<16x128xf32, #tpu.memory_space<vmem>>, vector<16x128xf32>
    tpu.vector_store %arg5[%c0_481, %c0_482], %1217 {strides = array<i32>} : memref<16x128xf32, #tpu.memory_space<vmem>>, vector<16x128xf32>,
    return
  }
}

</mosaic_0001>

<bundles_post_ra>
// kernel: _lambda_.1
= control target key start
LH: loop header
LB: loop body
LE: loop exit
PB: predicated region body
PF: predicated region fallthrough
CT: control target
= control target key end

     0   :  { %s21706_s0 = inlined_call_operand.vmem [shape: f32[32,768], index: 0, kind: input, shape index: {}]   ;;  %s21707_s1 = inlined_call_operand.vmem [shape: f32[768,64], index: 1, kind: input, shape index: {}]   ;;  %s21708_s2 = inlined_call_operand.vmem [shape: f32[1768,256], index: 2, kind: input, shape index: {}]   ;;  %s21709_s3 = inlined_call_operand.vmem [shape: f32[2568,128], index: 3, kind: input, shape index: {}]   ;;  %s21710_s4 = inlined_call_operand.vmem [shape: f32[2,1], index: 4, kind: input, shape index: {}]   ;;  %s21711_s5 = inlined_call_operand.vmem [shape: f32[16,128], index: 5, kind: output, shape index: {0}]   ;;  %s21712_s6 = inlined_call_operand.hbm [shape: f32[2,4], index: 6, kind: output, shape index: {1}]  }
   0x1   :  { %v78_v0 = vld [vmem:[%s21707_s1 + $0xf8] sm:$0xff]  ;;  %v77_v2 = vld [vmem:[%s21707_s1 + $0xf0] sm:$0xff]  ;;  %v76_v6 = vld [vmem:[%s21707_s1 + $0xe8] sm:$0xff] }
   0x2   :  { %v62_v1 = vld [vmem:[%s21707_s1 + $0x78] sm:$0xff]  ;;  %14849 = vmatprep.subr.mxu0 %v78_v0  ;;  %v61_v4 = vld [vmem:[%s21707_s1 + $0x70] sm:$0xff]  ;;  %v60_v8 = vld [vmem:[%s21707_s1 + $0x68] sm:$0xff] }
   0x3   :  { %v110_v3 = vld [vmem:[%s21707_s1 + $0x1f8] sm:$0xff]  ;;  %14850 = vmatpush3.msra.mxu0 %v62_v1  ;;  %v109_v7 = vld [vmem:[%s21707_s1 + $0x1f0] sm:$0xff]  ;;  %v108_v10 = vld [vmem:[%s21707_s1 + $0x1e8] sm:$0xff] }
   0x4   :  { %v94_v5 = vld [vmem:[%s21707_s1 + $0x178] sm:$0xff]  ;;  %14893 = vmatprep.subr.mxu1 %v110_v3  ;;  %14851 = vmatprep.subr.mxu0 %v77_v2  ;;  %v93_v9 = vld [vmem:[%s21707_s1 + $0x170] sm:$0xff]  ;;  %v75_v11 = vld [vmem:[%s21707_s1 + $0xe0] sm:$0xff] }
   0x5   :  { %14894 = vmatpush3.msra.mxu1 %v94_v5  ;;  %14852 = vmatpush3.msra.mxu0 %v61_v4  ;;  %v92_v12 = vld [vmem:[%s21707_s1 + $0x168] sm:$0xff]  ;;  %v59_v13 = vld [vmem:[%s21707_s1 + $0x60] sm:$0xff]  ;;  %v74_v15 = vld [vmem:[%s21707_s1 + $0xd8] sm:$0xff] }
   0x6   :  { %14895 = vmatprep.subr.mxu1 %v109_v7  ;;  %14853 = vmatprep.subr.mxu0 %v76_v6  ;;  %v107_v14 = vld [vmem:[%s21707_s1 + $0x1e0] sm:$0xff]  ;;  %v58_v17 = vld [vmem:[%s21707_s1 + $0x58] sm:$0xff]  ;;  %v73_v19 = vld [vmem:[%s21707_s1 + $0xd0] sm:$0xff] }
   0x7   :  { %14896 = vmatpush3.msra.mxu1 %v93_v9  ;;  %14854 = vmatpush3.msra.mxu0 %v60_v8  ;;  %v91_v16 = vld [vmem:[%s21707_s1 + $0x160] sm:$0xff]  ;;  %v106_v18 = vld [vmem:[%s21707_s1 + $0x1d8] sm:$0xff]  ;;  %v57_v21 = vld [vmem:[%s21707_s1 + $0x50] sm:$0xff] }
   0x8   :  { %14897 = vmatprep.subr.mxu1 %v108_v10  ;;  %14855 = vmatprep.subr.mxu0 %v75_v11  ;;  %v90_v20 = vld [vmem:[%s21707_s1 + $0x158] sm:$0xff]  ;;  %v105_v22 = vld [vmem:[%s21707_s1 + $0x1d0] sm:$0xff]  ;;  %v72_v23 = vld [vmem:[%s21707_s1 + $0xc8] sm:$0xff] }
   0x9   :  { %14898 = vmatpush3.msra.mxu1 %v92_v12  ;;  %14856 = vmatpush3.msra.mxu0 %v59_v13  ;;  %v89_v24 = vld [vmem:[%s21707_s1 + $0x150] sm:$0xff]  ;;  %v56_v25 = vld [vmem:[%s21707_s1 + $0x48] sm:$0xff]  ;;  %v71_v27 = vld [vmem:[%s21707_s1 + $0xc0] sm:$0xff] }
   0xa   :  { %14899 = vmatprep.subr.mxu1 %v107_v14  ;;  %14857 = vmatprep.subr.mxu0 %v74_v15  ;;  %v104_v26 = vld [vmem:[%s21707_s1 + $0x1c8] sm:$0xff]  ;;  %v55_v29 = vld [vmem:[%s21707_s1 + $0x40] sm:$0xff]  ;;  %v70_v31 = vld [vmem:[%s21707_s1 + $0xb8] sm:$0xff] }
   0xb   :  { %14900 = vmatpush3.msra.mxu1 %v91_v16  ;;  %14858 = vmatpush3.msra.mxu0 %v58_v17  ;;  %v88_v28 = vld [vmem:[%s21707_s1 + $0x148] sm:$0xff]  ;;  %v103_v30 = vld [vmem:[%s21707_s1 + $0x1c0] sm:$0xff]  ;;  %v54_v33 = vld [vmem:[%s21707_s1 + $0x38] sm:$0xff] }
   0xc   :  { %14901 = vmatprep.subr.mxu1 %v106_v18  ;;  %14859 = vmatprep.subr.mxu0 %v73_v19  ;;  %v87_v32 = vld [vmem:[%s21707_s1 + $0x140] sm:$0xff]  ;;  %v102_v34 = vld [vmem:[%s21707_s1 + $0x1b8] sm:$0xff]  ;;  %v69_v35 = vld [vmem:[%s21707_s1 + $0xb0] sm:$0xff] }
   0xd   :  { %14902 = vmatpush3.msra.mxu1 %v90_v20  ;;  %14860 = vmatpush3.msra.mxu0 %v57_v21  ;;  %v86_v36 = vld [vmem:[%s21707_s1 + $0x138] sm:$0xff]  ;;  %v53_v37 = vld [vmem:[%s21707_s1 + $0x30] sm:$0xff]  ;;  %v68_v39 = vld [vmem:[%s21707_s1 + $0xa8] sm:$0xff] }
   0xe   :  { %14903 = vmatprep.subr.mxu1 %v105_v22  ;;  %14861 = vmatprep.subr.mxu0 %v72_v23  ;;  %v101_v38 = vld [vmem:[%s21707_s1 + $0x1b0] sm:$0xff]  ;;  %v52_v41 = vld [vmem:[%s21707_s1 + $0x28] sm:$0xff]  ;;  %v67_v43 = vld [vmem:[%s21707_s1 + $0xa0] sm:$0xff] }
   0xf   :  { %14904 = vmatpush3.msra.mxu1 %v89_v24  ;;  %14862 = vmatpush3.msra.mxu0 %v56_v25  ;;  %v85_v40 = vld [vmem:[%s21707_s1 + $0x130] sm:$0xff]  ;;  %v100_v42 = vld [vmem:[%s21707_s1 + $0x1a8] sm:$0xff]  ;;  %v51_v45 = vld [vmem:[%s21707_s1 + $0x20] sm:$0xff] }
  0x10   :  { %14905 = vmatprep.subr.mxu1 %v104_v26  ;;  %14863 = vmatprep.subr.mxu0 %v71_v27  ;;  %v84_v44 = vld [vmem:[%s21707_s1 + $0x128] sm:$0xff]  ;;  %v99_v46 = vld [vmem:[%s21707_s1 + $0x1a0] sm:$0xff]  ;;  %v66_v47 = vld [vmem:[%s21707_s1 + $0x98] sm:$0xff] }
  0x11   :  { %14906 = vmatpush3.msra.mxu1 %v88_v28  ;;  %14864 = vmatpush3.msra.mxu0 %v55_v29  ;;  %v83_v48 = vld [vmem:[%s21707_s1 + $0x120] sm:$0xff]  ;;  %v50_v49 = vld [vmem:[%s21707_s1 + $0x18] sm:$0xff]  ;;  %v65_v51 = vld [vmem:[%s21707_s1 + $0x90] sm:$0xff] }
  0x12   :  { %14907 = vmatprep.subr.mxu1 %v103_v30  ;;  %14865 = vmatprep.subr.mxu0 %v70_v31  ;;  %v98_v50 = vld [vmem:[%s21707_s1 + $0x198] sm:$0xff]  ;;  %v49_v53 = vld [vmem:[%s21707_s1 + $0x10] sm:$0xff]  ;;  %v64_v55 = vld [vmem:[%s21707_s1 + $0x88] sm:$0xff] }
  0x13   :  { %14908 = vmatpush3.msra.mxu1 %v87_v32  ;;  %14866 = vmatpush3.msra.mxu0 %v54_v33  ;;  %v82_v52 = vld [vmem:[%s21707_s1 + $0x118] sm:$0xff]  ;;  %v97_v54 = vld [vmem:[%s21707_s1 + $0x190] sm:$0xff]  ;;  %v48_v57 = vld [vmem:[%s21707_s1 + $0x8] sm:$0xff] }
  0x14   :  { %14909 = vmatprep.subr.mxu1 %v102_v34  ;;  %14867 = vmatprep.subr.mxu0 %v69_v35  ;;  %v81_v56 = vld [vmem:[%s21707_s1 + $0x110] sm:$0xff]  ;;  %v96_v58 = vld [vmem:[%s21707_s1 + $0x188] sm:$0xff]  ;;  %v63_v59 = vld [vmem:[%s21707_s1 + $0x80] sm:$0xff] }
  0x15   :  { %14910 = vmatpush3.msra.mxu1 %v86_v36  ;;  %14868 = vmatpush3.msra.mxu0 %v53_v37  ;;  %v24_v60 = vld [vmem:[%s21706_s0 + $0x8] sm:$0xff]  ;;  %v47_v61 = vld [vmem:[%s21707_s1] sm:$0xff]  ;;  %v142_v1 = vld [vmem:[%s21707_s1 + $0x2f8] sm:$0xff] }
  0x16   :  { %14911 = vmatprep.subr.mxu1 %v101_v38  ;;  %14869 = vmatprep.subr.mxu0 %v68_v39  ;;  %v80_v62 = vld [vmem:[%s21707_s1 + $0x108] sm:$0xff]  ;;  %v23_v63 = vld [vmem:[%s21706_s0] sm:$0xff]  ;;  %v26_v3 = vld [vmem:[%s21706_s0 + $0x18] sm:$0xff] }
  0x17   :  { %14912 = vmatpush3.msra.mxu1 %v85_v40  ;;  %14870 = vmatpush3.msra.mxu0 %v52_v41  ;;  %v95_v0 = vld [vmem:[%s21707_s1 + $0x180] sm:$0xff]  ;;  %v126_v4 = vld [vmem:[%s21707_s1 + $0x278] sm:$0xff]  ;;  %v25_v5 = vld [vmem:[%s21706_s0 + $0x10] sm:$0xff] }
  0x18   :  { %14913 = vmatprep.subr.mxu1 %v100_v42  ;;  %14871 = vmatprep.subr.mxu0 %v67_v43  ;;  %v79_v2 = vld [vmem:[%s21707_s1 + $0x100] sm:$0xff]  ;;  %v141_v6 = vld [vmem:[%s21707_s1 + $0x2f0] sm:$0xff]  ;;  %v30_v8 = vld [vmem:[%s21706_s0 + $0x38] sm:$0xff] }
  0x19   :  { %14914 = vmatpush3.msra.mxu1 %v84_v44  ;;  %14872 = vmatpush3.msra.mxu0 %v51_v45  ;;  %v125_v7 = vld [vmem:[%s21707_s1 + $0x270] sm:$0xff]  ;;  %v140_v9 = vld [vmem:[%s21707_s1 + $0x2e8] sm:$0xff]  ;;  %v139_v13 = vld [vmem:[%s21707_s1 + $0x2e0] sm:$0xff] }
  0x1a   :  { %14915 = vmatprep.subr.mxu1 %v99_v46  ;;  %14873 = vmatprep.subr.mxu0 %v66_v47  ;;  %v29_v10 = vld [vmem:[%s21706_s0 + $0x30] sm:$0xff]  ;;  %v124_v11 = vld [vmem:[%s21707_s1 + $0x268] sm:$0xff]  ;;  %v31_v14 = vld [vmem:[%s21706_s0 + $0x40] sm:$0xff] }
  0x1b   :  { %14916 = vmatpush3.msra.mxu1 %v83_v48  ;;  %14874 = vmatpush3.msra.mxu0 %v50_v49  ;;  %v32_v12 = vld [vmem:[%s21706_s0 + $0x48] sm:$0xff]  ;;  %v123_v15 = vld [vmem:[%s21707_s1 + $0x260] sm:$0xff]  ;;  %v138_v17 = vld [vmem:[%s21707_s1 + $0x2d8] sm:$0xff] }
  0x1c   :  { %14917 = vmatprep.subr.mxu1 %v98_v50  ;;  %14875 = vmatprep.subr.mxu0 %v65_v51  ;;  %v36_v16 = vld [vmem:[%s21706_s0 + $0x68] sm:$0xff]  ;;  %v35_v18 = vld [vmem:[%s21706_s0 + $0x60] sm:$0xff]  ;;  %v122_v19 = vld [vmem:[%s21707_s1 + $0x258] sm:$0xff] }
  0x1d   :  { %14918 = vmatpush3.msra.mxu1 %v82_v52  ;;  %14876 = vmatpush3.msra.mxu0 %v49_v53  ;;  %v38_v20 = vld [vmem:[%s21706_s0 + $0x78] sm:$0xff] }
  0x1e   :  { %14919 = vmatprep.subr.mxu1 %v97_v54  ;;  %14877 = vmatprep.subr.mxu0 %v64_v55 }
  0x1f   :  { %14920 = vmatpush3.msra.mxu1 %v81_v56  ;;  %14878 = vmatpush3.msra.mxu0 %v48_v57 }
  0x20   :  { %14921 = vmatprep.subr.mxu1 %v96_v58  ;;  %14879 = vmatprep.subr.mxu0 %v63_v59 }
  0x21   :  { %208 = vmatprep.mubr.f32.mxu0 %v24_v60  ;;  %14880 = vmatpush3.msra.mxu0 %v47_v61 }
  0x22   :  { %14922 = vmatpush3.msra.mxu1 %v80_v62  ;;  %209 = vmatmul.mubr.f32.vlgmr.msra.gmra.mxu0 %v23_v63 }
  0x23   :  { %14923 = vmatprep.subr.mxu1 %v95_v0  ;;  %14937 = vmatprep.subr.mxu0 %v142_v1 }
  0x24   :  { %14924 = vmatpush3.msra.mxu1 %v79_v2  ;;  %293 = vmatprep.mubr.f32.mxu1 %v26_v3 }
  0x25   :  { %14938 = vmatpush3.msra.mxu0 %v126_v4  ;;  %294 = vmatmul.mubr.f32.vlgmr.msra.gmra.mxu1 %v25_v5 }
  0x26   :  { %14939 = vmatprep.subr.mxu0 %v141_v6  ;;  %213 = vmatprep.mubr.f32.mxu0 %v30_v8 }
  0x27   :  { %14940 = vmatpush3.msra.mxu0 %v125_v7  ;;  %298 = vmatprep.mubr.f32.mxu1 %v32_v12 }
  0x28   :  { %14941 = vmatprep.subr.mxu0 %v140_v9  ;;  %214 = vmatmul.mubr.f32.gmra.mxu0 %v29_v10 }
  0x29   :  { %14942 = vmatpush3.msra.mxu0 %v124_v11  ;;  %299 = vmatmul.mubr.f32.gmra.mxu1 %v31_v14 }
  0x2a   :  { %14943 = vmatprep.subr.mxu0 %v139_v13 }
  0x2b   :  { %12 = vsyncpa [#allocation3], 0  ;;  %14944 = vmatpush3.msra.mxu0 %v123_v15  ;;  %v137_v21 = vld [vmem:[%s21707_s1 + $0x2d0] sm:$0xff]  ;;  %218 = vmatprep.mubr.f32.mxu0 %v36_v16  ;;  %v42_v24 = vld [vmem:[%s21706_s0 + $0x98] sm:$0xff]  ;;  %vm413_vm0 = vcmask 523264   ;;  %vm625_vm1 = vcmask 261120  }
  0x2c   :  { %v37_v22 = vld [vmem:[%s21706_s0 + $0x70] sm:$0xff]  ;;  %14945 = vmatprep.subr.mxu0 %v138_v17  ;;  %219 = vmatmul.mubr.f32.gmra.mxu0 %v35_v18  ;;  %v136_v25 = vld [vmem:[%s21707_s1 + $0x2c8] sm:$0xff]  ;;  %v135_v29 = vld [vmem:[%s21707_s1 + $0x2c0] sm:$0xff]  ;;  %s17632_s16 = smov 64   ;;  %s17633_s17 = smov 32   ;;  %vm17636_vm2 = vmmov 0  }
  0x2d   :  { %v121_v23 = vld [vmem:[%s21707_s1 + $0x250] sm:$0xff]  ;;  %14946 = vmatpush3.msra.mxu0 %v122_v19  ;;  %303 = vmatprep.mubr.f32.mxu1 %v38_v20  ;;  %v120_v27 = vld [vmem:[%s21707_s1 + $0x248] sm:$0xff]  ;;  %v43_v30 = vld [vmem:[%s21706_s0 + $0xa0] sm:$0xff]  ;;  %s17634_s18 = smov 96   ;;  %vm4771_vm3 = vcmask 15360   ;;  %vm4778_vm4 = vcmask 1041408  }
  0x2e   :  { %v41_v26 = vld [vmem:[%s21706_s0 + $0x90] sm:$0xff]  ;;  %14947 = vmatprep.subr.mxu0 %v137_v21  ;;  %304 = vmatmul.mubr.f32.gmra.mxu1 %v37_v22  ;;  %v44_v28 = vld [vmem:[%s21706_s0 + $0xa8] sm:$0xff]  ;;  %v119_v31 = vld [vmem:[%s21707_s1 + $0x240] sm:$0xff]  ;;  %vm5129_vm5 = vcmask 130048   ;;  %vm5251_vm6 = vcmask 1043456   ;;  %vm5221_vm7 = vcmask 97280  }
  0x2f   :  { %14948 = vmatpush3.msra.mxu0 %v121_v23  ;;  %223 = vmatprep.mubr.f32.mxu0 %v42_v24  ;;  %v28_v32 = vld [vmem:[%s21706_s0 + $0x28] sm:$0xff]  ;;  %v134_v33 = vld [vmem:[%s21707_s1 + $0x2b8] sm:$0xff]  ;;  %v133_v35 = vld [vmem:[%s21707_s1 + $0x2b0] sm:$0xff]  ;;  %vm5225_vm8 = vcmask 93184   ;;  %s17637_s15 = smov 112   ;;  %vm5710_vm9 = vcmask 257024  }
  0x30   :  { %14949 = vmatprep.subr.mxu0 %v136_v25  ;;  %224 = vmatmul.mubr.f32.gmra.mxu0 %v41_v26  ;;  %v118_v34 = vld [vmem:[%s21707_s1 + $0x238] sm:$0xff]  ;;  %v117_v36 = vld [vmem:[%s21707_s1 + $0x230] sm:$0xff]  ;;  %v132_v37 = vld [vmem:[%s21707_s1 + $0x2a8] sm:$0xff]  ;;  %vm6056_vm10 = vcmask 64512   ;;  %s17638_s26 = smov 120   ;;  %vm12049_vm11 = vcmask 1040384  }
  0x31   :  { %14950 = vmatpush3.msra.mxu0 %v120_v27  ;;  %308 = vmatprep.mubr.f32.mxu1 %v44_v28  ;;  %v116_v38 = vld [vmem:[%s21707_s1 + $0x228] sm:$0xff]  ;;  %v131_v39 = vld [vmem:[%s21707_s1 + $0x2a0] sm:$0xff]  ;;  %v130_v41 = vld [vmem:[%s21707_s1 + $0x298] sm:$0xff]  ;;  %vm12299_vm12 = vcmask 25600   ;;  %s17639_s28 = smov 4   ;;  %s17640_s14 = smov 8  }
  0x32   :  { %14951 = vmatprep.subr.mxu0 %v135_v29  ;;  %309 = vmatmul.mubr.f32.gmra.mxu1 %v43_v30  ;;  %v115_v40 = vld [vmem:[%s21707_s1 + $0x220] sm:$0xff]  ;;  %v114_v42 = vld [vmem:[%s21707_s1 + $0x218] sm:$0xff]  ;;  %v129_v43 = vld [vmem:[%s21707_s1 + $0x290] sm:$0xff]  ;;  %s17641_s23 = smov 12   ;;  %vm13324_vm13 = vcmask 31744  }
  0x33   :  { %14952 = vmatpush3.msra.mxu0 %v119_v31  ;;  %378 = vmatprep.mubr.f32.mxu0 %v28_v32  ;;  %v113_v44 = vld [vmem:[%s21707_s1 + $0x210] sm:$0xff]  ;;  %v128_v45 = vld [vmem:[%s21707_s1 + $0x288] sm:$0xff]  ;;  %v127_v47 = vld [vmem:[%s21707_s1 + $0x280] sm:$0xff] }
  0x34   :  { %14953 = vmatprep.subr.mxu0 %v134_v33  ;;  %v112_v46 = vld [vmem:[%s21707_s1 + $0x208] sm:$0xff]  ;;  %v111_v48 = vld [vmem:[%s21707_s1 + $0x200] sm:$0xff]  ;;  %v34_v50 = vld [vmem:[%s21706_s0 + $0x58] sm:$0xff] }
  0x35   :  { %14954 = vmatpush3.msra.mxu0 %v118_v34  ;;  %v27_v49 = vld [vmem:[%s21706_s0 + $0x20] sm:$0xff]  ;;  %v33_v51 = vld [vmem:[%s21706_s0 + $0x50] sm:$0xff]  ;;  %v40_v52 = vld [vmem:[%s21706_s0 + $0x88] sm:$0xff] }
  0x36   :  { %14955 = vmatprep.subr.mxu0 %v133_v35  ;;  %v39_v53 = vld [vmem:[%s21706_s0 + $0x80] sm:$0xff]  ;;  %v46_v54 = vld [vmem:[%s21706_s0 + $0xb8] sm:$0xff]  ;;  %v45_v55 = vld [vmem:[%s21706_s0 + $0xb0] sm:$0xff] }
  0x37   :  { %14956 = vmatpush3.msra.mxu0 %v117_v36  ;;  %v143_v4 = vld [vmem:[%s21708_s2 + $0xd80] ss:$0 sm:$0xff]  ;;  %v399_v20 = vld [vmem:[%s21708_s2 + $0xd90] sm:$0xff] }
  0x38   :  { %14957 = vmatprep.subr.mxu0 %v132_v37  ;;  %v400_v31 = vld [vmem:[%s21708_s2 + $0xda0] sm:$0xff] }
  0x39   :  { %14958 = vmatpush3.msra.mxu0 %v116_v38 }
  0x3a   :  { %14959 = vmatprep.subr.mxu0 %v131_v39 }
  0x3b   :  { %14960 = vmatpush3.msra.mxu0 %v115_v40 }
  0x3c   :  { %14961 = vmatprep.subr.mxu0 %v130_v41  ;;  %v401_v41 = vld [vmem:[%s21708_s2 + $0xdb0] sm:$0xff] }
  0x3d   :  { %14962 = vmatpush3.msra.mxu0 %v114_v42 }
  0x3e   :  { %14963 = vmatprep.subr.mxu0 %v129_v43 }
  0x3f   :  { %14964 = vmatpush3.msra.mxu0 %v113_v44 }
  0x40   :  { %14965 = vmatprep.subr.mxu0 %v128_v45 }
  0x41   :  { %14966 = vmatpush3.msra.mxu0 %v112_v46 }
  0x42   :  { %14967 = vmatprep.subr.mxu0 %v127_v47 }
  0x43   :  { %14968 = vmatpush3.msra.mxu0 %v111_v48  ;;  %v402_v48 = vld [vmem:[%s21708_s2 + $0xdc0] sm:$0xff] }
  0x44   :  { %379 = vmatmul.mubr.f32.vlgmr.msra.gmra.mxu0 %v27_v49 }
  0x45   :  { %383 = vmatprep.mubr.f32.mxu0 %v34_v50 }
  0x48   :  { %384 = vmatmul.mubr.f32.gmra.mxu0 %v33_v51 }
  0x49   :  { %388 = vmatprep.mubr.f32.mxu0 %v40_v52 }
  0x4c   :  { %389 = vmatmul.mubr.f32.gmra.mxu0 %v39_v53 }
  0x4d   :  { %393 = vmatprep.mubr.f32.mxu0 %v46_v54 }
  0x50   :  { %394 = vmatmul.mubr.f32.gmra.mxu0 %v45_v55 }
  0xe2   :  { %v14881_v56 = vpop.f32.mrf.mxu0 }
  0xe4   :  { %v14882_v57 = vpop.f32.mrf.mxu0 }
  0xe5   :  { %v14925_v59 = vpop.f32.mrf.mxu1  ;;  %v14883_v3 = vadd.f32 %v14882_v57, %v14881_v56 }
  0xe7   :  { %v14926_v61 = vpop.f32.mrf.mxu1  ;;  %v211_v7 = vadd.f32 %v14883_v3, %v143_v4 }
  0xe8   :  { %v14884_v58 = vpop.f32.mrf.mxu0  ;;  %v14927_v8 = vadd.f32 %v14926_v61, %v14925_v59 }
  0xe9   :  { %v14928_v63 = vpop.f32.mrf.mxu1 }
  0xea   :  { %v14885_v60 = vpop.f32.mrf.mxu0  ;;  %v296_v14 = vadd.f32 %v14927_v8, %v211_v7 }
  0xeb   :  { %v14929_v1 = vpop.f32.mrf.mxu1  ;;  %v14886_v9 = vadd.f32 %v14885_v60, %v14884_v58 }
  0xec   :  { %v14887_v62 = vpop.f32.mrf.mxu0  ;;  %v14930_v16 = vadd.f32 %v14929_v1, %v14928_v63 }
  0xed   :  { %v216_v15 = vadd.f32 %v14886_v9, %v143_v4  ;;  %v490_v9 = vld [vmem:[%s21708_s2 + $0x7b8] sm:$0xff] }
  0xee   :  { %v14888_v0 = vpop.f32.mrf.mxu0  ;;  %v14931_v5 = vpop.f32.mrf.mxu1  ;;  %532 = vmatprep.subr.mxu1 %v490_v9 }
  0xef   :  { %v14889_v12 = vadd.f32 %v14888_v0, %v14887_v62  ;;  %v301_v25 = vadd.f32 %v14930_v16, %v216_v15  ;;  %v484_v15 = vld [vmem:[%s21708_s2 + $0x788] sm:$0xff]  ;;  %v483_v16 = vld [vmem:[%s21708_s2 + $0x780] sm:$0xff] }
  0xf0   :  { %v14890_v2 = vpop.f32.mrf.mxu0  ;;  %v14932_v10 = vpop.f32.mrf.mxu1 }
  0xf1   :  { %v221_v22 = vadd.f32 %v14889_v12, %v143_v4  ;;  %v14933_v23 = vadd.f32 %v14932_v10, %v14931_v5  ;;  %v489_v10 = vld [vmem:[%s21708_s2 + $0x7b0] sm:$0xff]  ;;  %v487_v12 = vld [vmem:[%s21708_s2 + $0x7a0] sm:$0xff] }
  0xf2   :  { %v14891_v6 = vpop.f32.mrf.mxu0  ;;  %v14934_v18 = vpop.f32.mrf.mxu1  ;;  %533 = vmatpush1.msra.mxu1 %v489_v10 }
  0xf3   :  { %v14892_v26 = vadd.f32 %v14891_v6, %v14890_v2  ;;  %v306_v34 = vadd.f32 %v14933_v23, %v221_v22  ;;  %v477_v22 = vld [vmem:[%s21708_s2 + $0x750] sm:$0xff]  ;;  %v476_v23 = vld [vmem:[%s21708_s2 + $0x748] sm:$0xff] }
  0xf4   :  { %v14935_v29 = vpop.f32.mrf.mxu1 }
  0xf5   :  { %v226_v36 = vadd.f32 %v14892_v26, %v143_v4  ;;  %v14936_v37 = vadd.f32 %v14935_v29, %v14934_v18  ;;  %v481_v18 = vld [vmem:[%s21708_s2 + $0x770] sm:$0xff] }
  0xf7   :  { %v311_v45 = vadd.f32 %v14936_v37, %v226_v36 }
 0x104   :  { %v14969_v11 = vpop.f32.mrf.mxu0 }
 0x106   :  { %v14970_v13 = vpop.f32.mrf.mxu0 }
 0x107   :  { %v14971_v17 = vadd.f32 %v14970_v13, %v14969_v11  ;;  %v488_v11 = vld [vmem:[%s21708_s2 + $0x7a8] sm:$0xff]  ;;  %v486_v13 = vld [vmem:[%s21708_s2 + $0x798] sm:$0xff] }
 0x108   :  { %v14972_v19 = vpop.f32.mrf.mxu0  ;;  %534 = vmatprep.subr.mxu1 %v488_v11 }
 0x109   :  { %v381_v21 = vadd.f32 %v14971_v17, %v296_v14  ;;  %535 = vmatpush1.msra.mxu1 %v487_v12  ;;  %v485_v14 = vld [vmem:[%s21708_s2 + $0x790] sm:$0xff]  ;;  %v482_v17 = vld [vmem:[%s21708_s2 + $0x778] sm:$0xff] }
 0x10a   :  { %v14973_v24 = vpop.f32.mrf.mxu0  ;;  %536 = vmatprep.subr.mxu1 %v486_v13 }
 0x10b   :  { %v14974_v27 = vadd.f32 %v14973_v24, %v14972_v19  ;;  %v18044_v28 = vadd.f32 %v399_v20, %v381_v21  ;;  %537 = vmatpush1.msra.mxu1 %v485_v14  ;;  %v480_v19 = vld [vmem:[%s21708_s2 + $0x768] sm:$0xff]  ;;  %v479_v20 = vld [vmem:[%s21708_s2 + $0x760] sm:$0xff]  ;;  %v478_v21 = vld [vmem:[%s21708_s2 + $0x758] sm:$0xff] }
 0x10c   :  { %v14975_v30 = vpop.f32.mrf.mxu0  ;;  %538 = vmatprep.subr.mxu1 %v484_v15  ;;  %v475_v24 = vld [vmem:[%s21708_s2 + $0x740] sm:$0xff] }
 0x10d   :  { %v386_v32 = vadd.f32 %v14974_v27, %v301_v25  ;;  %v414_v33 = vsel %vm413_vm0, %v18044_v28, 0.0  ;;  %539 = vmatpush1.msra.mxu1 %v483_v16  ;;  %v17631_v25 = vmov 0.0  }
 0x10e   :  { %v14976_v35 = vpop.f32.mrf.mxu0  ;;  %415 = vadd.xlane.f32.xlu0 %v414_v33  ;;  %540 = vmatprep.subr.mxu1 %v482_v17 }
 0x10f   :  { %v14977_v38 = vadd.f32 %v14976_v35, %v14975_v30  ;;  %v18051_v39 = vadd.f32 %v400_v31, %v386_v32  ;;  %541 = vmatpush1.msra.mxu1 %v481_v18  ;;  %580 = vmatprep.mubr.f32.mxu1 %v17631_v25 }
 0x110   :  { %v14978_v40 = vpop.f32.mrf.mxu0  ;;  %542 = vmatprep.subr.mxu1 %v480_v19 }
 0x111   :  { %v391_v42 = vadd.f32 %v14977_v38, %v306_v34  ;;  %v417_v43 = vsel %vm413_vm0, %v18051_v39, 0.0  ;;  %543 = vmatpush1.msra.mxu1 %v479_v20 }
 0x112   :  { %v14979_v44 = vpop.f32.mrf.mxu0  ;;  %418 = vadd.xlane.f32.xlu0 %v417_v43  ;;  %544 = vmatprep.subr.mxu1 %v478_v21  ;;  %v412_v43 = vld [vmem:[%s21708_s2 + $0x40] ss:$0 sm:$0xff] }
 0x113   :  { %v14980_v46 = vadd.f32 %v14979_v44, %v14978_v40  ;;  %v18058_v47 = vadd.f32 %v401_v41, %v391_v42  ;;  %545 = vmatpush1.msra.mxu1 %v477_v22  ;;  %v411_v41 = vld [vmem:[%s21708_s2 + $0x60] ss:$0 sm:$0xff] }
 0x114   :  { %546 = vmatprep.subr.mxu1 %v476_v23 }
 0x115   :  { %v396_v49 = vadd.f32 %v14980_v46, %v311_v45  ;;  %v420_v50 = vsel %vm413_vm0, %v18058_v47, 0.0  ;;  %547 = vmatpush1.msra.mxu1 %v475_v24 }
 0x116   :  { %421 = vadd.xlane.f32.xlu1 %v420_v50 }
 0x117   :  { %v18065_v51 = vadd.f32 %v402_v48, %v396_v49 }
 0x119   :  { %v423_v52 = vsel %vm413_vm0, %v18065_v51, 0.0 }
 0x11a   :  { %424 = vadd.xlane.f32.xlu1 %v423_v52 }
 0x197   :  { %v416_v53 = vpop.xlane.xlu0 %415 }
 0x198   :  { %v427_v54 = vmul.f32 0.015625, %v416_v53 }
 0x19a   :  { %v18070_v55 = vsub.f32 %v18044_v28, %v427_v54 }
 0x19b   :  { %v419_v56 = vpop.xlane.xlu0 %418 }
 0x19c   :  { %v428_v57 = vmul.f32 0.015625, %v419_v56  ;;  %v435_v58 = vmul.f32 %v18070_v55, %v18070_v55 }
 0x19e   :  { %v18075_v59 = vsub.f32 %v18051_v39, %v428_v57  ;;  %v439_v60 = vsel %vm413_vm0, %v435_v58, 0.0 }
 0x19f   :  { %v422_v61 = vpop.xlane.xlu1 %421  ;;  %440 = vadd.xlane.f32.xlu0 %v439_v60  ;;  %v494_v60 = vlaneseq }
 0x1a0   :  { %v429_v62 = vmul.f32 0.015625, %v422_v61  ;;  %v436_v63 = vmul.f32 %v18075_v59, %v18075_v59 }
 0x1a1   :  { %v495_v61 = vshrl.u32 %v494_v60, 7 }
 0x1a2   :  { %v18081_v0 = vsub.f32 %v18058_v47, %v429_v62  ;;  %v442_v1 = vsel %vm413_vm0, %v436_v63, 0.0  ;;  %v14340_v63 = vld [vmem:[%s21708_s2 + $0x720] ss:$8 sm:$0x3] }
 0x1a3   :  { %v425_v2 = vpop.xlane.xlu1 %424  ;;  %443 = vadd.xlane.f32.xlu1 %v442_v1  ;;  %v18159_v62 = vsub.s32 0, %v495_v61  ;;  %v18186_v17 = vsub.s32 1, %v495_v61 }
 0x1a4   :  { %v430_v3 = vmul.f32 0.015625, %v425_v2  ;;  %v437_v4 = vmul.f32 %v18081_v0, %v18081_v0 }
 0x1a5   :  { %v501_v21 = vrot.slane %v14340_v63, %v18186_v17 }
 0x1a6   :  { %v18087_v5 = vsub.f32 %v18065_v51, %v430_v3  ;;  %v445_v6 = vsel %vm413_vm0, %v437_v4, 0.0 }
 0x1a7   :  { %446 = vadd.xlane.f32.xlu0 %v445_v6 }
 0x1a8   :  { %v438_v7 = vmul.f32 %v18087_v5, %v18087_v5 }
 0x1aa   :  { %v448_v8 = vsel %vm413_vm0, %v438_v7, 0.0 }
 0x1ab   :  { %449 = vadd.xlane.f32.xlu1 %v448_v8 }
 0x228   :  { %v441_v26 = vpop.xlane.xlu0 %440 }
 0x229   :  { %v451_v27 = vmul.f32 0.015625, %v441_v26 }
 0x22b   :  { %v455_v29 = vadd.f32 1e-06, %v451_v27 }
 0x22c   :  { %v444_v30 = vpop.xlane.xlu1 %443 }
 0x22d   :  { %17231 = vrsqrt.f32 %v455_v29  ;;  %v452_v31 = vmul.f32 0.015625, %v444_v30 }
 0x22f   :  { %v456_v32 = vadd.f32 1e-06, %v452_v31 }
 0x230   :  { %v447_v33 = vpop.xlane.xlu0 %446 }
 0x231   :  { %17233 = vrsqrt.f32 %v456_v32  ;;  %v453_v34 = vmul.f32 0.015625, %v447_v33 }
 0x233   :  { %v457_v35 = vadd.f32 1e-06, %v453_v34  ;;  %v408_v34 = vld [vmem:[%s21708_s2 + $0x10] sm:$0xff] }
 0x234   :  { %v450_v36 = vpop.xlane.xlu1 %449 }
 0x235   :  { %17235 = vrsqrt.f32 %v457_v35  ;;  %v454_v37 = vmul.f32 0.015625, %v450_v36 }
 0x237   :  { %v458_v38 = vadd.f32 1e-06, %v454_v37  ;;  %v407_v37 = vld [vmem:[%s21708_s2] sm:$0xff] }
 0x239   :  { %17237 = vrsqrt.f32 %v458_v38 }
 0x23a   :  { %v17232_v40 = vpop.eup %17231 }
 0x23b   :  { %v463_v42 = vmul.f32 %v17232_v40, %v18070_v55 }
 0x23d   :  { %v467_v44 = vmul.f32 %v463_v42, %v411_v41  ;;  %v410_v42 = vld [vmem:[%s21708_s2 + $0x30] sm:$0xff] }
 0x23e   :  { %v17234_v45 = vpop.eup %17233 }
 0x23f   :  { %v471_v46 = vadd.f32 %v467_v44, %v412_v43  ;;  %v464_v48 = vmul.f32 %v17234_v45, %v18075_v59 }
 0x241   :  { %14341 = vmatmul.mubr.msk.f32.vlgmr.msra.gmra.mxu1 %vm413_vm0, %v471_v46  ;;  %v468_v49 = vmul.f32 %v464_v48, %v411_v41 }
 0x242   :  { %v17236_v50 = vpop.eup %17235  ;;  %586 = vmatprep.mubr.f32.mxu1 %v17631_v25 }
 0x243   :  { %v472_v52 = vadd.f32 %v468_v49, %v412_v43  ;;  %v465_v53 = vmul.f32 %v17236_v50, %v18081_v0  ;;  %v497_v0 = vrot.slane %v14340_v63, %v18159_v62 }
 0x245   :  { %14342 = vmatmul.mubr.msk.f32.gmra.mxu1 %vm413_vm0, %v472_v52  ;;  %v469_v54 = vmul.f32 %v465_v53, %v411_v41 }
 0x246   :  { %v17238_v55 = vpop.eup %17237  ;;  %592 = vmatprep.mubr.f32.mxu1 %v17631_v25 }
 0x247   :  { %v473_v56 = vadd.f32 %v469_v54, %v412_v43  ;;  %v466_v57 = vmul.f32 %v17238_v55, %v18087_v5 }
 0x249   :  { %14343 = vmatmul.mubr.msk.f32.gmra.mxu1 %vm413_vm0, %v473_v56  ;;  %v470_v58 = vmul.f32 %v466_v57, %v411_v41  ;;  %v409_v56 = vld [vmem:[%s21708_s2 + $0x20] sm:$0xff] }
 0x24a   :  { %598 = vmatprep.mubr.f32.mxu1 %v17631_v25 }
 0x24b   :  { %v474_v59 = vadd.f32 %v470_v58, %v412_v43 }
 0x24d   :  { %14344 = vmatmul.mubr.msk.f32.gmra.mxu1 %vm413_vm0, %v474_v59 }
 0x301   :  { %v582_v1 = vpop.f32.mrf.mxu1 }
 0x302   :  { %v583_v2 = vadd.f32 %v582_v1, %v497_v0 }
 0x303   :  { %v18165_v3 = vpop.f32.mrf.mxu1 }
 0x304   :  { %15844 = vmatprep.mubr.msk.f32.mxu1 %vm625_vm1, %v583_v2  ;;  %v18213_v30 = vadd.f32 %v18165_v3, %v501_v21 }
 0x305   :  { %v588_v4 = vpop.f32.mrf.mxu1 }
 0x306   :  { %v589_v10 = vadd.f32 %v588_v4, %v497_v0 }
 0x307   :  { %v590_v5 = vpop.f32.mrf.mxu1 }
 0x308   :  { %v18207_v27 = vadd.f32 %v590_v5, %v501_v21 }
 0x309   :  { %v594_v6 = vpop.f32.mrf.mxu1 }
 0x30a   :  { %v595_v7 = vadd.f32 %v594_v6, %v497_v0 }
 0x30b   :  { %v596_v8 = vpop.f32.mrf.mxu1 }
 0x30c   :  { %621 = vrot.lane.b32.xlu1 %v595_v7, %s17632_s16  ;;  %v18202_v26 = vadd.f32 %v596_v8, %v501_v21 }
 0x30d   :  { %v600_v9 = vpop.f32.mrf.mxu1 }
 0x30e   :  { %v601_v11 = vadd.f32 %v600_v9, %v497_v0 }
 0x30f   :  { %v602_v20 = vpop.f32.mrf.mxu1 }
 0x310   :  { %623 = vrot.lane.b32.xlu0 %v601_v11, %s17632_s16  ;;  %619 = vrot.lane.b32.xlu1 %v589_v10, %s17632_s16  ;;  %v18195_v23 = vadd.f32 %v602_v20, %v501_v21 }
 0x314   :  { %617 = vrot.lane.b32.xlu0 %v583_v2, %s17632_s16  ;;  %890 = vrot.lane.b32.xlu1 %v601_v11, %s17633_s17 }
 0x318   :  { %886 = vrot.lane.b32.xlu0 %v589_v10, %s17633_s17  ;;  %888 = vrot.lane.b32.xlu1 %v595_v7, %s17633_s17 }
 0x31c   :  { %876 = vrot.lane.b32.xlu0 %v583_v2, %s17634_s18  ;;  %884 = vrot.lane.b32.xlu1 %v583_v2, %s17633_s17 }
 0x320   :  { %880 = vrot.lane.b32.xlu0 %v595_v7, %s17634_s18  ;;  %878 = vrot.lane.b32.xlu1 %v589_v10, %s17634_s18 }
 0x324   :  { %882 = vrot.lane.b32.xlu1 %v601_v11, %s17634_s18 }
 0x37e   :  { %v622_v12 = vpop.permute.xlu1 %621 }
 0x382   :  { %v624_v13 = vpop.permute.xlu0 %623  ;;  %v620_v14 = vpop.permute.xlu1 %619 }
 0x383   :  { %15836 = vmatprep.subr.msk.mxu1 %vm625_vm1, %v624_v13 }
 0x384   :  { %15837 = vmatpush3.xpose.msk.msra.mxu1 %vm625_vm1, %v624_v13 }
 0x385   :  { %15838 = vmatprep.subr.msk.mxu1 %vm625_vm1, %v622_v12 }
 0x386   :  { %v618_v15 = vpop.permute.xlu0 %617  ;;  %v891_v16 = vpop.permute.xlu1 %890 }
 0x387   :  { %15864 = vmatprep.subr.msk.mxu0 %vm625_vm1, %v891_v16 }
 0x388   :  { %15839 = vmatpush3.xpose.msk.msra.mxu1 %vm625_vm1, %v622_v12  ;;  %15865 = vmatpush3.xpose.msk.msra.mxu0 %vm625_vm1, %v891_v16 }
 0x389   :  { %15840 = vmatprep.subr.msk.mxu1 %vm625_vm1, %v620_v14 }
 0x38a   :  { %v887_v18 = vpop.permute.xlu0 %886  ;;  %v889_v19 = vpop.permute.xlu1 %888 }
 0x38b   :  { %15866 = vmatprep.subr.msk.mxu0 %vm625_vm1, %v889_v19 }
 0x38c   :  { %15841 = vmatpush3.xpose.msk.msra.mxu1 %vm625_vm1, %v620_v14  ;;  %15867 = vmatpush3.xpose.msk.msra.mxu0 %vm625_vm1, %v889_v19 }
 0x38d   :  { %15842 = vmatprep.subr.msk.mxu1 %vm625_vm1, %v618_v15  ;;  %15868 = vmatprep.subr.msk.mxu0 %vm625_vm1, %v887_v18 }
 0x38e   :  { %v877_v22 = vpop.permute.xlu0 %876  ;;  %v885_v24 = vpop.permute.xlu1 %884 }
 0x38f   :  { %15872 = vmatprep.mubr.msk.f32.mxu0 %vm625_vm1, %v877_v22 }
 0x390   :  { %15843 = vmatpush3.xpose.msk.msra.mxu1 %vm625_vm1, %v618_v15  ;;  %15869 = vmatpush3.xpose.msk.msra.mxu0 %vm625_vm1, %v887_v18 }
 0x391   :  { %15850 = vmatprep.subr.mxu1 %v18195_v23  ;;  %15870 = vmatprep.subr.msk.mxu0 %vm625_vm1, %v885_v24 }
 0x392   :  { %v879_v29 = vpop.permute.xlu1 %878  ;;  %v881_v31 = vpop.permute.xlu0 %880 }
 0x393   :  { %15845 = vmatmul.mubr.msk.f32.vlgmr.msra.gmra.mxu1 %vm625_vm1, %v589_v10 }
 0x394   :  { %15847 = vmatprep.mubr.msk.f32.mxu1 %vm625_vm1, %v595_v7  ;;  %15851 = vmatpush3.msra.mxu1 %v18195_v23 }
 0x395   :  { %15871 = vmatpush3.xpose.msk.msra.mxu0 %vm625_vm1, %v885_v24  ;;  %15852 = vmatprep.subr.mxu1 %v18202_v26 }
 0x396   :  { %15853 = vmatpush3.msra.mxu1 %v18202_v26  ;;  %v883_v32 = vpop.permute.xlu1 %882 }
 0x397   :  { %15848 = vmatmul.mubr.msk.f32.gmra.mxu1 %vm625_vm1, %v601_v11  ;;  %15854 = vmatprep.subr.mxu1 %v18207_v27 }
 0x398   :  { %15873 = vmatmul.mubr.msk.f32.vlgmr.msra.gmra.mxu0 %vm625_vm1, %v879_v29  ;;  %15855 = vmatpush3.msra.mxu1 %v18207_v27 }
 0x399   :  { %15875 = vmatprep.mubr.msk.f32.mxu0 %vm625_vm1, %v881_v31  ;;  %15856 = vmatprep.subr.mxu1 %v18213_v30 }
 0x39a   :  { %15857 = vmatpush3.msra.mxu1 %v18213_v30 }
 0x39c   :  { %15876 = vmatmul.mubr.msk.f32.gmra.mxu0 %vm625_vm1, %v883_v32 }
 0x453   :  { %v15846_v33 = vpop.f32.mrf.mxu1 }
 0x454   :  { %v728_v35 = vmul.f32 0.17677669, %v15846_v33 }
 0x455   :  { %v708_v36 = vpop.f32.mrf.mxu1 }
 0x456   :  { %v727_v38 = vmul.f32 0.17677669, %v708_v36  ;;  %v732_v40 = vadd.f32 %v728_v35, %v408_v34 }
 0x457   :  { %v15849_v41 = vpop.f32.mrf.mxu1 }
 0x458   :  { %v730_v43 = vmul.f32 0.17677669, %v15849_v41  ;;  %v15874_v44 = vpop.f32.mrf.mxu0  ;;  %v738_v45 = vsel %vm625_vm1, %v732_v40, -inf  ;;  %v731_v46 = vadd.f32 %v727_v38, %v407_v37 }
 0x459   :  { %v994_v48 = vmul.f32 0.17677669, %v15874_v44  ;;  %739 = vmax.xlane.f32.xlu1 %v738_v45  ;;  %v718_v49 = vpop.f32.mrf.mxu1 }
 0x45a   :  { %v729_v50 = vmul.f32 0.17677669, %v718_v49  ;;  %v974_v52 = vpop.f32.mrf.mxu0  ;;  %v735_v53 = vsel %vm625_vm1, %v731_v46, -inf  ;;  %v734_v54 = vadd.f32 %v730_v43, %v410_v42 }
 0x45b   :  { %736 = vmax.xlane.f32.xlu0 %v735_v53  ;;  %v998_v55 = vadd.f32 %v994_v48, %v408_v34  ;;  %v993_v60 = vmul.f32 0.17677669, %v974_v52 }
 0x45c   :  { %v15877_v57 = vpop.f32.mrf.mxu0  ;;  %v744_v61 = vsel %vm625_vm1, %v734_v54, -inf  ;;  %v733_v63 = vadd.f32 %v729_v50, %v409_v56 }
 0x45d   :  { %v996_v58 = vmul.f32 0.17677669, %v15877_v57  ;;  %v1004_v59 = vsel %vm625_vm1, %v998_v55, -inf  ;;  %v997_v5 = vadd.f32 %v993_v60, %v407_v37 }
 0x45e   :  { %1005 = vmax.xlane.f32.xlu1 %v1004_v59  ;;  %v984_v0 = vpop.f32.mrf.mxu0  ;;  %v741_v4 = vsel %vm625_vm1, %v733_v63, -inf }
 0x45f   :  { %745 = vmax.xlane.f32.xlu0 %v744_v61  ;;  %v1000_v1 = vadd.f32 %v996_v58, %v410_v42  ;;  %v995_v3 = vmul.f32 0.17677669, %v984_v0  ;;  %v1001_v6 = vsel %vm625_vm1, %v997_v5, -inf }
 0x461   :  { %v1010_v2 = vsel %vm625_vm1, %v1000_v1, -inf  ;;  %v999_v7 = vadd.f32 %v995_v3, %v409_v56 }
 0x462   :  { %1011 = vmax.xlane.f32.xlu1 %v1010_v2 }
 0x463   :  { %742 = vmax.xlane.f32.xlu0 %v741_v4  ;;  %v1007_v8 = vsel %vm625_vm1, %v999_v7, -inf }
 0x467   :  { %1002 = vmax.xlane.f32.xlu0 %v1001_v6 }
 0x46b   :  { %1008 = vmax.xlane.f32.xlu0 %v1007_v8 }
 0x4e2   :  { %v740_v9 = vpop.xlane.xlu1 %739 }
 0x4e3   :  { %v748_v10 = vsub.f32 %v732_v40, %v740_v9 }
 0x4e4   :  { %v737_v11 = vpop.xlane.xlu0 %736 }
 0x4e5   :  { %v753_v12 = vmul.f32 1.442695, %v748_v10  ;;  %v747_v13 = vsub.f32 %v731_v46, %v737_v11  ;;  %v608_v11 = vld [vmem:[%s21708_s2 + $0x650] sm:$0xff] }
 0x4e7   :  { %17239 = vpow2.f32 %v753_v12  ;;  %v751_v14 = vmul.f32 1.442695, %v747_v13  ;;  %v1006_v15 = vpop.xlane.xlu1 %1005 }
 0x4e8   :  { %v1014_v16 = vsub.f32 %v998_v55, %v1006_v15  ;;  %v746_v18 = vpop.xlane.xlu0 %745 }
 0x4e9   :  { %17241 = vpow2.f32 %v751_v14  ;;  %v750_v19 = vsub.f32 %v734_v54, %v746_v18 }
 0x4ea   :  { %v1019_v20 = vmul.f32 1.442695, %v1014_v16 }
 0x4eb   :  { %v757_v21 = vmul.f32 1.442695, %v750_v19  ;;  %v1012_v22 = vpop.xlane.xlu1 %1011 }
 0x4ec   :  { %17243 = vpow2.f32 %v1019_v20  ;;  %v1016_v24 = vsub.f32 %v1000_v1, %v1012_v22  ;;  %v743_v29 = vpop.xlane.xlu0 %742 }
 0x4ed   :  { %17245 = vpow2.f32 %v757_v21  ;;  %v749_v32 = vsub.f32 %v733_v63, %v743_v29  ;;  %v607_v21 = vld [vmem:[%s21708_s2 + $0x640] sm:$0xff] }
 0x4ee   :  { %v1023_v31 = vmul.f32 1.442695, %v1016_v24  ;;  %v606_v24 = vld [vmem:[%s21708_s2 + $0x630] sm:$0xff]  ;;  %v605_v29 = vld [vmem:[%s21708_s2 + $0x620] sm:$0xff] }
 0x4ef   :  { %v755_v35 = vmul.f32 1.442695, %v749_v32  ;;  %v611_v32 = vld [vmem:[%s21708_s2 + $0x680] sm:$0xff] }
 0x4f0   :  { %v1003_v33 = vpop.xlane.xlu0 %1002  ;;  %17247 = vpow2.f32 %v1023_v31  ;;  %v612_v31 = vld [vmem:[%s21708_s2 + $0x690] sm:$0xff] }
 0x4f1   :  { %v1013_v34 = vsub.f32 %v997_v5, %v1003_v33  ;;  %15892 = vmatprep.subr.mxu0 %v612_v31  ;;  %v610_v33 = vld [vmem:[%s21708_s2 + $0x670] sm:$0xff] }
 0x4f2   :  { %15893 = vmatpush3.msra.mxu0 %v612_v31  ;;  %v1434_v31 = vld [vmem:[%s21708_s2 + $0x138] sm:$0xff] }
 0x4f3   :  { %v1017_v36 = vmul.f32 1.442695, %v1013_v34  ;;  %15894 = vmatprep.subr.mxu0 %v611_v32  ;;  %v609_v34 = vld [vmem:[%s21708_s2 + $0x660] sm:$0xff] }
 0x4f4   :  { %v17240_v37 = vpop.eup %17239  ;;  %v1009_v38 = vpop.xlane.xlu0 %1008  ;;  %15895 = vmatpush3.msra.mxu0 %v611_v32  ;;  %v1433_v32 = vld [vmem:[%s21708_s2 + $0x130] sm:$0xff] }
 0x4f5   :  { %17249 = vpow2.f32 %v1017_v36  ;;  %v1015_v40 = vsub.f32 %v999_v7, %v1009_v38  ;;  %v762_v41 = vsel %vm625_vm1, %v17240_v37, 0.0  ;;  %15896 = vmatprep.subr.mxu0 %v610_v33 }
 0x4f6   :  { %v17242_v42 = vpop.eup %17241  ;;  %763 = vadd.xlane.f32.xlu1 %v762_v41  ;;  %17251 = vpow2.f32 %v755_v35  ;;  %15897 = vmatpush3.msra.mxu0 %v610_v33  ;;  %v1432_v33 = vld [vmem:[%s21708_s2 + $0x128] sm:$0xff] }
 0x4f7   :  { %v1021_v43 = vmul.f32 1.442695, %v1015_v40  ;;  %v759_v44 = vsel %vm625_vm1, %v17242_v42, 0.0  ;;  %15898 = vmatprep.subr.mxu0 %v609_v34 }
 0x4f8   :  { %760 = vadd.xlane.f32.xlu0 %v759_v44  ;;  %15899 = vmatpush3.msra.mxu0 %v609_v34  ;;  %v1431_v34 = vld [vmem:[%s21708_s2 + $0x120] sm:$0xff] }
 0x4f9   :  { %v18245_v45 = vpop.eup %17243  ;;  %17253 = vpow2.f32 %v1021_v43 }
 0x4fa   :  { %v1028_v46 = vsel %vm625_vm1, %v18245_v45, 0.0  ;;  %v17246_v48 = vpop.eup %17245 }
 0x4fb   :  { %1029 = vadd.xlane.f32.xlu1 %v1028_v46  ;;  %v768_v49 = vsel %vm625_vm1, %v17246_v48, 0.0 }
 0x4fd   :  { %v18250_v50 = vpop.eup %17247 }
 0x4fe   :  { %v1034_v53 = vsel %vm625_vm1, %v18250_v50, 0.0 }
 0x4ff   :  { %769 = vadd.xlane.f32.xlu1 %v768_v49 }
 0x502   :  { %v17250_v52 = vpop.eup %17249 }
 0x503   :  { %1035 = vadd.xlane.f32.xlu1 %v1034_v53  ;;  %v1025_v54 = vsel %vm625_vm1, %v17250_v52, 0.0  ;;  %v17252_v55 = vpop.eup %17251 }
 0x504   :  { %1026 = vadd.xlane.f32.xlu0 %v1025_v54  ;;  %v765_v56 = vsel %vm625_vm1, %v17252_v55, 0.0 }
 0x506   :  { %v17254_v57 = vpop.eup %17253 }
 0x507   :  { %v1031_v58 = vsel %vm625_vm1, %v17254_v57, 0.0 }
 0x508   :  { %766 = vadd.xlane.f32.xlu0 %v765_v56 }
 0x50c   :  { %1032 = vadd.xlane.f32.xlu0 %v1031_v58 }
 0x514   :  { %1053 = vrot.lane.b32.xlu1 %v18202_v26, %s17634_s18 }
 0x518   :  { %1051 = vrot.lane.b32.xlu1 %v18207_v27, %s17634_s18 }
 0x51c   :  { %1049 = vrot.lane.b32.xlu1 %v18213_v30, %s17634_s18 }
 0x522   :  { %1055 = vrot.lane.b32.xlu0 %v18195_v23, %s17634_s18 }
 0x57f   :  { %v764_v59 = vpop.xlane.xlu1 %763 }
 0x580   :  { %17255 = vrcp.f32 %v764_v59 }
 0x581   :  { %v761_v60 = vpop.xlane.xlu0 %760 }
 0x582   :  { %17257 = vrcp.f32 %v761_v60 }
 0x584   :  { %v1030_v61 = vpop.xlane.xlu1 %1029 }
 0x588   :  { %v770_v63 = vpop.xlane.xlu1 %769 }
 0x589   :  { %17259 = vrcp.f32 %v770_v63 }
 0x58c   :  { %v1036_v0 = vpop.xlane.xlu1 %1035 }
 0x58d   :  { %v1027_v1 = vpop.xlane.xlu0 %1026  ;;  %v17256_v2 = vpop.eup %17255 }
 0x58e   :  { %v774_v4 = vmul.f32 %v17256_v2, %v17240_v37  ;;  %17261 = vrcp.f32 %v1027_v1 }
 0x58f   :  { %v17258_v3 = vpop.eup %17257 }
 0x590   :  { %v772_v26 = vmul.f32 %v17258_v3, %v17242_v42  ;;  %v1054_v30 = vpop.permute.xlu1 %1053 }
 0x591   :  { %v767_v27 = vpop.xlane.xlu0 %766 }
 0x592   :  { %17263 = vrcp.f32 %v767_v27  ;;  %15858 = vmatprep.mubr.msk.f32.mxu1 %vm625_vm1, %v772_v26 }
 0x593   :  { %15859 = vmatmul.mubr.msk.f32.vlgmr.msra.gmra.mxu1 %vm625_vm1, %v774_v4  ;;  %17265 = vrcp.f32 %v1030_v61 }
 0x594   :  { %v1052_v5 = vpop.permute.xlu1 %1051 }
 0x595   :  { %v1033_v23 = vpop.xlane.xlu0 %1032 }
 0x596   :  { %17267 = vrcp.f32 %v1033_v23  ;;  %v17260_v7 = vpop.eup %17259 }
 0x597   :  { %17269 = vrcp.f32 %v1036_v0  ;;  %v778_v13 = vmul.f32 %v17260_v7, %v17246_v48 }
 0x598   :  { %v1050_v10 = vpop.permute.xlu1 %1049 }
 0x599   :  { %v1056_v6 = vpop.permute.xlu0 %1055 }
 0x59a   :  { %15878 = vmatprep.subr.mxu1 %v1056_v6 }
 0x59b   :  { %15879 = vmatpush3.msra.mxu1 %v1056_v6  ;;  %v17262_v8 = vpop.eup %17261 }
 0x59c   :  { %15880 = vmatprep.subr.mxu1 %v1054_v30  ;;  %v1038_v15 = vmul.f32 %v17262_v8, %v17250_v52 }
 0x59d   :  { %15881 = vmatpush3.msra.mxu1 %v1054_v30 }
 0x59e   :  { %15882 = vmatprep.subr.mxu1 %v1052_v5 }
 0x59f   :  { %v17264_v9 = vpop.eup %17263  ;;  %15883 = vmatpush3.msra.mxu1 %v1052_v5 }
 0x5a0   :  { %15884 = vmatprep.subr.mxu1 %v1050_v10  ;;  %v776_v12 = vmul.f32 %v17264_v9, %v17252_v55  ;;  %v17266_v14 = vpop.eup %17265 }
 0x5a1   :  { %15885 = vmatpush3.msra.mxu1 %v1050_v10  ;;  %v1040_v18 = vmul.f32 %v17266_v14, %v18245_v45 }
 0x5a2   :  { %15861 = vmatprep.mubr.msk.f32.mxu1 %vm625_vm1, %v776_v12  ;;  %15906 = vmatprep.subr.mxu1 %v608_v11 }
 0x5a3   :  { %v17268_v16 = vpop.eup %17267  ;;  %15862 = vmatmul.mubr.msk.f32.gmra.mxu1 %vm625_vm1, %v778_v13 }
 0x5a4   :  { %15886 = vmatprep.mubr.msk.f32.mxu1 %vm625_vm1, %v1038_v15  ;;  %v17270_v19 = vpop.eup %17269  ;;  %v1042_v20 = vmul.f32 %v17268_v16, %v17254_v57 }
 0x5a5   :  { %v1044_v22 = vmul.f32 %v17270_v19, %v18250_v50  ;;  %v1356_v50 = vld [vmem:[%s21708_s2 + $0x600] ss:$0 sm:$0xff] }
 0x5a7   :  { %15887 = vmatmul.mubr.msk.f32.vlgmr.msra.gmra.mxu1 %vm625_vm1, %v1040_v18 }
 0x5a8   :  { %15889 = vmatprep.mubr.msk.f32.mxu1 %vm625_vm1, %v1042_v20  ;;  %15907 = vmatpush3.msra.mxu1 %v608_v11 }
 0x5a9   :  { %15908 = vmatprep.subr.mxu1 %v607_v21 }
 0x5aa   :  { %15909 = vmatpush3.msra.mxu1 %v607_v21  ;;  %v1438_v21 = vld [vmem:[%s21708_s2 + $0x158] sm:$0xff] }
 0x5ab   :  { %15890 = vmatmul.mubr.msk.f32.gmra.mxu1 %vm625_vm1, %v1044_v22  ;;  %15910 = vmatprep.subr.mxu1 %v606_v24  ;;  %v1437_v22 = vld [vmem:[%s21708_s2 + $0x150] sm:$0xff] }
 0x5ac   :  { %15911 = vmatpush3.msra.mxu1 %v606_v24  ;;  %1480 = vmatprep.subr.mxu0 %v1438_v21  ;;  %v1436_v24 = vld [vmem:[%s21708_s2 + $0x148] sm:$0xff]  ;;  %v1635_v21 = vld [vmem:[%s21708_s2 + $0x2a0] sm:$0xff] }
 0x5ad   :  { %15912 = vmatprep.subr.mxu1 %v605_v29 }
 0x5ae   :  { %15913 = vmatpush3.msra.mxu1 %v605_v29  ;;  %v1435_v29 = vld [vmem:[%s21708_s2 + $0x140] sm:$0xff] }
 0x653   :  { %v15860_v35 = vpop.f32.mrf.mxu1 }
 0x655   :  { %v857_v36 = vpop.f32.mrf.mxu1 }
 0x656   :  { %15914 = vmatprep.mubr.msk.f32.mxu1 %vm625_vm1, %v857_v36  ;;  %v1429_v36 = vld [vmem:[%s21708_s2 + $0x110] sm:$0xff] }
 0x657   :  { %15915 = vmatmul.mubr.msk.f32.vlgmr.msra.gmra.mxu1 %vm625_vm1, %v15860_v35  ;;  %v1430_v35 = vld [vmem:[%s21708_s2 + $0x118] sm:$0xff] }
 0x663   :  { %v15863_v37 = vpop.f32.mrf.mxu1 }
 0x665   :  { %v867_v38 = vpop.f32.mrf.mxu1 }
 0x666   :  { %15917 = vmatprep.mubr.msk.f32.mxu1 %vm625_vm1, %v867_v38  ;;  %v1427_v38 = vld [vmem:[%s21708_s2 + $0x100] sm:$0xff] }
 0x667   :  { %v15888_v40 = vpop.f32.mrf.mxu1  ;;  %15918 = vmatmul.mubr.msk.f32.gmra.mxu1 %vm625_vm1, %v15863_v37  ;;  %v1428_v37 = vld [vmem:[%s21708_s2 + $0x108] sm:$0xff] }
 0x669   :  { %v1139_v41 = vpop.f32.mrf.mxu1 }
 0x66a   :  { %15900 = vmatprep.mubr.msk.f32.mxu0 %vm625_vm1, %v1139_v41  ;;  %v1425_v41 = vld [vmem:[%s21708_s2 + $0xf0] sm:$0xff] }
 0x66b   :  { %v15891_v42 = vpop.f32.mrf.mxu1  ;;  %15901 = vmatmul.mubr.msk.f32.vlgmr.msra.gmra.mxu0 %vm625_vm1, %v15888_v40  ;;  %v1426_v40 = vld [vmem:[%s21708_s2 + $0xf8] sm:$0xff] }
 0x66c   :  { %1481 = vmatpush1.msra.mxu0 %v1437_v22  ;;  %v1650_v22 = vld [vmem:[%s21708_s2 + $0x390] sm:$0xff] }
 0x66d   :  { %v1149_v43 = vpop.f32.mrf.mxu1  ;;  %1482 = vmatprep.subr.mxu0 %v1436_v24  ;;  %v1634_v24 = vld [vmem:[%s21708_s2 + $0x290] sm:$0xff] }
 0x66e   :  { %15903 = vmatprep.mubr.msk.f32.mxu0 %vm625_vm1, %v1149_v43  ;;  %1483 = vmatpush1.msra.mxu0 %v1435_v29  ;;  %v1423_v43 = vld [vmem:[%s21708_s2 + $0xe0] sm:$0xff] }
 0x66f   :  { %15904 = vmatmul.mubr.msk.f32.gmra.mxu0 %vm625_vm1, %v15891_v42  ;;  %1484 = vmatprep.subr.mxu0 %v1434_v31  ;;  %v1424_v42 = vld [vmem:[%s21708_s2 + $0xe8] sm:$0xff]  ;;  %v1649_v29 = vld [vmem:[%s21708_s2 + $0x380] sm:$0xff] }
 0x670   :  { %1528 = vmatprep.mubr.f32.mxu0 %v17631_v25  ;;  %1485 = vmatpush1.msra.mxu0 %v1433_v32  ;;  %v1633_v31 = vld [vmem:[%s21708_s2 + $0x280] sm:$0xff]  ;;  %v1648_v32 = vld [vmem:[%s21708_s2 + $0x370] sm:$0xff] }
 0x671   :  { %1486 = vmatprep.subr.mxu0 %v1432_v33  ;;  %v1632_v33 = vld [vmem:[%s21708_s2 + $0x270] sm:$0xff] }
 0x672   :  { %1487 = vmatpush1.msra.mxu0 %v1431_v34  ;;  %v1647_v34 = vld [vmem:[%s21708_s2 + $0x360] sm:$0xff] }
 0x673   :  { %1488 = vmatprep.subr.mxu0 %v1430_v35  ;;  %v1631_v35 = vld [vmem:[%s21708_s2 + $0x260] sm:$0xff] }
 0x674   :  { %1489 = vmatpush1.msra.mxu0 %v1429_v36  ;;  %v1646_v36 = vld [vmem:[%s21708_s2 + $0x350] sm:$0xff] }
 0x675   :  { %1490 = vmatprep.subr.mxu0 %v1428_v37  ;;  %v1630_v37 = vld [vmem:[%s21708_s2 + $0x250] sm:$0xff] }
 0x676   :  { %1491 = vmatpush1.msra.mxu0 %v1427_v38  ;;  %v1645_v38 = vld [vmem:[%s21708_s2 + $0x340] sm:$0xff] }
 0x677   :  { %1492 = vmatprep.subr.mxu0 %v1426_v40  ;;  %v1629_v40 = vld [vmem:[%s21708_s2 + $0x240] sm:$0xff] }
 0x678   :  { %1493 = vmatpush1.msra.mxu0 %v1425_v41  ;;  %v1644_v41 = vld [vmem:[%s21708_s2 + $0x330] sm:$0xff] }
 0x679   :  { %1494 = vmatprep.subr.mxu0 %v1424_v42  ;;  %v1628_v42 = vld [vmem:[%s21708_s2 + $0x230] sm:$0xff] }
 0x67a   :  { %1495 = vmatpush1.msra.mxu0 %v1423_v43  ;;  %v1643_v43 = vld [vmem:[%s21708_s2 + $0x320] sm:$0xff] }
 0x717   :  { %v15916_v44 = vpop.f32.mrf.mxu1 }
 0x719   :  { %v1333_v45 = vpop.f32.mrf.mxu1 }
 0x727   :  { %v15919_v49 = vpop.f32.mrf.mxu1 }
 0x729   :  { %v1343_v59 = vpop.f32.mrf.mxu1 }
 0x72b   :  { %v15902_v46 = vpop.f32.mrf.mxu0 }
 0x72c   :  { %v1339_v48 = vadd.f32 %v15916_v44, %v15902_v46 }
 0x72d   :  { %v1236_v52 = vpop.f32.mrf.mxu0 }
 0x72e   :  { %v1353_v53 = vadd.f32 %v1339_v48, %v18051_v39  ;;  %v1334_v54 = vadd.f32 %v1333_v45, %v1236_v52 }
 0x72f   :  { %v15905_v55 = vpop.f32.mrf.mxu0 }
 0x730   :  { %v18312_v56 = vadd.f32 %v1356_v50, %v1353_v53  ;;  %v1352_v57 = vadd.f32 %v1334_v54, %v18044_v28  ;;  %v1349_v58 = vadd.f32 %v15919_v49, %v15905_v55 }
 0x731   :  { %v1246_v60 = vpop.f32.mrf.mxu0 }
 0x732   :  { %v1344_v61 = vadd.f32 %v1343_v59, %v1246_v60  ;;  %v1366_v63 = vsel %vm413_vm0, %v18312_v56, 0.0  ;;  %v18317_v0 = vadd.f32 %v1356_v50, %v1352_v57  ;;  %v1355_v1 = vadd.f32 %v1349_v58, %v18065_v51 }
 0x733   :  { %1367 = vadd.xlane.f32.xlu1 %v1366_v63 }
 0x734   :  { %v1354_v39 = vadd.f32 %v1344_v61, %v18058_v47  ;;  %v1363_v2 = vsel %vm413_vm0, %v18317_v0, 0.0  ;;  %v18325_v28 = vadd.f32 %v1356_v50, %v1355_v1  ;;  %v1361_v1 = vld [vmem:[%s21708_s2 + $0xa0] ss:$0 sm:$0xff] }
 0x735   :  { %1364 = vadd.xlane.f32.xlu0 %v1363_v2 }
 0x736   :  { %v18323_v3 = vadd.f32 %v1356_v50, %v1354_v39  ;;  %v1372_v4 = vsel %vm413_vm0, %v18325_v28, 0.0 }
 0x738   :  { %v1369_v26 = vsel %vm413_vm0, %v18323_v3, 0.0 }
 0x739   :  { %1370 = vadd.xlane.f32.xlu0 %v1369_v26  ;;  %v1362_v26 = vld [vmem:[%s21708_s2 + $0x80] ss:$0 sm:$0xff] }
 0x73d   :  { %1373 = vadd.xlane.f32.xlu0 %v1372_v4 }
 0x7bc   :  { %v1368_v27 = vpop.xlane.xlu1 %1367 }
 0x7bd   :  { %v1376_v51 = vmul.f32 0.015625, %v1368_v27 }
 0x7be   :  { %v1365_v30 = vpop.xlane.xlu0 %1364 }
 0x7bf   :  { %v18332_v47 = vsub.f32 %v18312_v56, %v1376_v51  ;;  %v1375_v23 = vmul.f32 0.015625, %v1365_v30 }
 0x7c1   :  { %v18335_v5 = vsub.f32 %v18317_v0, %v1375_v23  ;;  %v1384_v6 = vmul.f32 %v18332_v47, %v18332_v47 }
 0x7c2   :  { %v1371_v7 = vpop.xlane.xlu0 %1370 }
 0x7c3   :  { %v1377_v8 = vmul.f32 0.015625, %v1371_v7  ;;  %v1390_v9 = vsel %vm413_vm0, %v1384_v6, 0.0  ;;  %v1383_v10 = vmul.f32 %v18335_v5, %v18335_v5 }
 0x7c4   :  { %1391 = vadd.xlane.f32.xlu1 %v1390_v9  ;;  %v1656_v9 = vld [vmem:[%s21708_s2 + $0x3f0] sm:$0xff] }
 0x7c5   :  { %v18343_v11 = vsub.f32 %v18323_v3, %v1377_v8  ;;  %v1387_v12 = vsel %vm413_vm0, %v1383_v10, 0.0  ;;  %15029 = vmatprep.subr.mxu1 %v1656_v9  ;;  %v1640_v10 = vld [vmem:[%s21708_s2 + $0x2f0] sm:$0xff] }
 0x7c6   :  { %1388 = vadd.xlane.f32.xlu0 %v1387_v12  ;;  %v1374_v13 = vpop.xlane.xlu0 %1373  ;;  %15030 = vmatpush3.msra.mxu1 %v1640_v10  ;;  %v1639_v12 = vld [vmem:[%s21708_s2 + $0x2e0] sm:$0xff] }
 0x7c7   :  { %v1378_v14 = vmul.f32 0.015625, %v1374_v13  ;;  %v1385_v15 = vmul.f32 %v18343_v11, %v18343_v11  ;;  %v1654_v13 = vld [vmem:[%s21708_s2 + $0x3d0] sm:$0xff] }
 0x7c9   :  { %v18349_v16 = vsub.f32 %v18325_v28, %v1378_v14  ;;  %v1393_v18 = vsel %vm413_vm0, %v1385_v15, 0.0  ;;  %v1638_v14 = vld [vmem:[%s21708_s2 + $0x2d0] sm:$0xff]  ;;  %v1653_v15 = vld [vmem:[%s21708_s2 + $0x3c0] sm:$0xff] }
 0x7ca   :  { %1394 = vadd.xlane.f32.xlu0 %v1393_v18  ;;  %v1652_v18 = vld [vmem:[%s21708_s2 + $0x3b0] sm:$0xff] }
 0x7cb   :  { %v1386_v19 = vmul.f32 %v18349_v16, %v18349_v16 }
 0x7cd   :  { %v1396_v20 = vsel %vm413_vm0, %v1386_v19, 0.0  ;;  %v1636_v19 = vld [vmem:[%s21708_s2 + $0x2b0] sm:$0xff] }
 0x7ce   :  { %1397 = vadd.xlane.f32.xlu1 %v1396_v20  ;;  %v1651_v20 = vld [vmem:[%s21708_s2 + $0x3a0] sm:$0xff] }
 0x84d   :  { %v1392_v44 = vpop.xlane.xlu1 %1391 }
 0x84e   :  { %v1400_v45 = vmul.f32 0.015625, %v1392_v44  ;;  %v1627_v44 = vld [vmem:[%s21708_s2 + $0x220] sm:$0xff] }
 0x84f   :  { %v1389_v46 = vpop.xlane.xlu0 %1388 }
 0x850   :  { %v1404_v48 = vadd.f32 1e-06, %v1400_v45  ;;  %v1399_v49 = vmul.f32 0.015625, %v1389_v46  ;;  %v1642_v45 = vld [vmem:[%s21708_s2 + $0x310] sm:$0xff] }
 0x851   :  { %v1626_v46 = vld [vmem:[%s21708_s2 + $0x210] sm:$0xff] }
 0x852   :  { %17271 = vrsqrt.f32 %v1404_v48  ;;  %v1403_v50 = vadd.f32 1e-06, %v1399_v49  ;;  %v1641_v48 = vld [vmem:[%s21708_s2 + $0x300] sm:$0xff] }
 0x853   :  { %v1395_v52 = vpop.xlane.xlu0 %1394  ;;  %v1625_v49 = vld [vmem:[%s21708_s2 + $0x200] sm:$0xff] }
 0x854   :  { %17273 = vrsqrt.f32 %v1403_v50  ;;  %v1401_v53 = vmul.f32 0.015625, %v1395_v52  ;;  %v14377_v50 = vld [vmem:[%s21708_s2 + $0xc0] ss:$8 sm:$0x3] }
 0x855   :  { %v1445_v52 = vrot.slane %v14377_v50, %v18159_v62 }
 0x856   :  { %v1405_v54 = vadd.f32 1e-06, %v1401_v53  ;;  %v1449_v53 = vrot.slane %v14377_v50, %v18186_v17 }
 0x857   :  { %v1398_v55 = vpop.xlane.xlu1 %1397 }
 0x858   :  { %17275 = vrsqrt.f32 %v1405_v54  ;;  %v1402_v57 = vmul.f32 0.015625, %v1398_v55 }
 0x85a   :  { %v1406_v58 = vadd.f32 1e-06, %v1402_v57 }
 0x85c   :  { %17277 = vrsqrt.f32 %v1406_v58 }
 0x85f   :  { %v17272_v59 = vpop.eup %17271 }
 0x860   :  { %v1412_v63 = vmul.f32 %v17272_v59, %v18332_v47 }
 0x861   :  { %v17274_v60 = vpop.eup %17273 }
 0x862   :  { %v1411_v61 = vmul.f32 %v17274_v60, %v18335_v5  ;;  %v1416_v27 = vmul.f32 %v1412_v63, %v1361_v1 }
 0x864   :  { %v1415_v39 = vmul.f32 %v1411_v61, %v1361_v1  ;;  %v1420_v47 = vadd.f32 %v1416_v27, %v1362_v26 }
 0x865   :  { %v17276_v2 = vpop.eup %17275 }
 0x866   :  { %v1419_v4 = vadd.f32 %v1415_v39, %v1362_v26  ;;  %v1413_v51 = vmul.f32 %v17276_v2, %v18343_v11  ;;  %v1655_v11 = vld [vmem:[%s21708_s2 + $0x3e0] sm:$0xff] }
 0x867   :  { %15031 = vmatprep.subr.mxu1 %v1655_v11 }
 0x868   :  { %14378 = vmatmul.mubr.msk.f32.vlgmr.msra.gmra.mxu0 %vm413_vm0, %v1419_v4  ;;  %v1417_v23 = vmul.f32 %v1413_v51, %v1361_v1  ;;  %15032 = vmatpush3.msra.mxu1 %v1639_v12 }
 0x869   :  { %v17278_v30 = vpop.eup %17277  ;;  %1534 = vmatprep.mubr.f32.mxu0 %v17631_v25  ;;  %15033 = vmatprep.subr.mxu1 %v1654_v13 }
 0x86a   :  { %v1414_v5 = vmul.f32 %v17278_v30, %v18349_v16  ;;  %v1421_v6 = vadd.f32 %v1417_v23, %v1362_v26  ;;  %15034 = vmatpush3.msra.mxu1 %v1638_v14  ;;  %v1637_v16 = vld [vmem:[%s21708_s2 + $0x2c0] sm:$0xff] }
 0x86b   :  { %15035 = vmatprep.subr.mxu1 %v1653_v15 }
 0x86c   :  { %14379 = vmatmul.mubr.msk.f32.gmra.mxu0 %vm413_vm0, %v1420_v47  ;;  %v1418_v7 = vmul.f32 %v1414_v5, %v1361_v1  ;;  %15036 = vmatpush3.msra.mxu1 %v1637_v16 }
 0x86d   :  { %1540 = vmatprep.mubr.f32.mxu0 %v17631_v25  ;;  %15037 = vmatprep.subr.mxu1 %v1652_v18 }
 0x86e   :  { %v1422_v8 = vadd.f32 %v1418_v7, %v1362_v26  ;;  %15038 = vmatpush3.msra.mxu1 %v1636_v19 }
 0x86f   :  { %15039 = vmatprep.subr.mxu1 %v1651_v20 }
 0x870   :  { %14380 = vmatmul.mubr.msk.f32.gmra.mxu0 %vm413_vm0, %v1421_v6  ;;  %15040 = vmatpush3.msra.mxu1 %v1635_v21 }
 0x871   :  { %1546 = vmatprep.mubr.f32.mxu0 %v17631_v25  ;;  %15041 = vmatprep.subr.mxu1 %v1650_v22 }
 0x872   :  { %15042 = vmatpush3.msra.mxu1 %v1634_v24 }
 0x873   :  { %15043 = vmatprep.subr.mxu1 %v1649_v29 }
 0x874   :  { %14381 = vmatmul.mubr.msk.f32.gmra.mxu0 %vm413_vm0, %v1422_v8  ;;  %15044 = vmatpush3.msra.mxu1 %v1633_v31 }
 0x875   :  { %1918 = vmatprep.mubr.f32.mxu0 %v17631_v25  ;;  %15045 = vmatprep.subr.mxu1 %v1648_v32 }
 0x876   :  { %15046 = vmatpush3.msra.mxu1 %v1632_v33 }
 0x877   :  { %15047 = vmatprep.subr.mxu1 %v1647_v34 }
 0x878   :  { %15048 = vmatpush3.msra.mxu1 %v1631_v35 }
 0x879   :  { %15049 = vmatprep.subr.mxu1 %v1646_v36 }
 0x87a   :  { %15050 = vmatpush3.msra.mxu1 %v1630_v37 }
 0x87b   :  { %15051 = vmatprep.subr.mxu1 %v1645_v38 }
 0x87c   :  { %15052 = vmatpush3.msra.mxu1 %v1629_v40 }
 0x87d   :  { %15053 = vmatprep.subr.mxu1 %v1644_v41 }
 0x87e   :  { %15054 = vmatpush3.msra.mxu1 %v1628_v42 }
 0x87f   :  { %15055 = vmatprep.subr.mxu1 %v1643_v43 }
 0x880   :  { %15056 = vmatpush3.msra.mxu1 %v1627_v44 }
 0x881   :  { %15057 = vmatprep.subr.mxu1 %v1642_v45 }
 0x882   :  { %15058 = vmatpush3.msra.mxu1 %v1626_v46 }
 0x883   :  { %15059 = vmatprep.subr.mxu1 %v1641_v48 }
 0x884   :  { %15060 = vmatpush3.msra.mxu1 %v1625_v49 }
 0x928   :  { %v1530_v54 = vpop.f32.mrf.mxu0 }
 0x929   :  { %v18522_v55 = vadd.f32 %v1530_v54, %v1445_v52 }
 0x92a   :  { %v1532_v57 = vpop.f32.mrf.mxu0 }
 0x92b   :  { %v1553_v58 = vmul.f32 %v18522_v55, %v18522_v55  ;;  %v18526_v59 = vadd.f32 %v1532_v57, %v1449_v53 }
 0x92c   :  { %v1536_v60 = vpop.f32.mrf.mxu0 }
 0x92d   :  { %v1561_v61 = vmul.f32 %v1553_v58, %v18522_v55  ;;  %v1554_v63 = vmul.f32 %v18526_v59, %v18526_v59  ;;  %v18531_v1 = vadd.f32 %v1536_v60, %v1445_v52 }
 0x92e   :  { %v1538_v39 = vpop.f32.mrf.mxu0 }
 0x92f   :  { %v1569_v2 = vmul.f32 0.044715, %v1561_v61  ;;  %v1562_v26 = vmul.f32 %v1554_v63, %v18526_v59  ;;  %v1555_v4 = vmul.f32 %v18531_v1, %v18531_v1  ;;  %v18536_v27 = vadd.f32 %v1538_v39, %v1449_v53 }
 0x930   :  { %v1542_v51 = vpop.f32.mrf.mxu0 }
 0x931   :  { %v1577_v30 = vadd.f32 %v1569_v2, %v18522_v55  ;;  %v1570_v47 = vmul.f32 0.044715, %v1562_v26  ;;  %v1563_v23 = vmul.f32 %v1555_v4, %v18531_v1  ;;  %v1556_v5 = vmul.f32 %v18536_v27, %v18536_v27 }
 0x932   :  { %v18542_v6 = vadd.f32 %v1542_v51, %v1445_v52  ;;  %v1544_v7 = vpop.f32.mrf.mxu0 }
 0x933   :  { %v1585_v8 = vmul.f32 0.7978846, %v1577_v30  ;;  %v1578_v9 = vadd.f32 %v1570_v47, %v18526_v59  ;;  %v1571_v10 = vmul.f32 0.044715, %v1563_v23  ;;  %v1564_v11 = vmul.f32 %v1556_v5, %v18536_v27 }
 0x934   :  { %v1557_v12 = vmul.f32 %v18542_v6, %v18542_v6  ;;  %v18548_v13 = vadd.f32 %v1544_v7, %v1449_v53  ;;  %v1548_v14 = vpop.f32.mrf.mxu0 }
 0x935   :  { %17279 = vtanh.f32 %v1585_v8  ;;  %v1586_v15 = vmul.f32 0.7978846, %v1578_v9  ;;  %v1579_v16 = vadd.f32 %v1571_v10, %v18531_v1  ;;  %v1572_v18 = vmul.f32 0.044715, %v1564_v11 }
 0x936   :  { %v1565_v19 = vmul.f32 %v1557_v12, %v18542_v6  ;;  %v1558_v20 = vmul.f32 %v18548_v13, %v18548_v13  ;;  %v18554_v21 = vadd.f32 %v1548_v14, %v1445_v52  ;;  %v1550_v22 = vpop.f32.mrf.mxu0 }
 0x937   :  { %v1587_v24 = vmul.f32 0.7978846, %v1579_v16  ;;  %v1580_v29 = vadd.f32 %v1572_v18, %v18536_v27  ;;  %v1551_v31 = vadd.f32 %v1550_v22, %v1449_v53  ;;  %17281 = vtanh.f32 %v1586_v15 }
 0x938   :  { %v1573_v32 = vmul.f32 0.044715, %v1565_v19  ;;  %v1566_v33 = vmul.f32 %v1558_v20, %v18548_v13  ;;  %v1559_v34 = vmul.f32 %v18554_v21, %v18554_v21 }
 0x939   :  { %17283 = vtanh.f32 %v1587_v24  ;;  %v1588_v35 = vmul.f32 0.7978846, %v1580_v29  ;;  %v1560_v36 = vmul.f32 %v1551_v31, %v1551_v31 }
 0x93a   :  { %v1581_v37 = vadd.f32 %v1573_v32, %v18542_v6  ;;  %v1574_v38 = vmul.f32 0.044715, %v1566_v33  ;;  %v1567_v40 = vmul.f32 %v1559_v34, %v18554_v21  ;;  %v1746_v33 = vld [vmem:[%s21708_s2 + $0x1e0] ss:$0 sm:$0xff] }
 0x93b   :  { %v1568_v41 = vmul.f32 %v1560_v36, %v1551_v31  ;;  %17285 = vtanh.f32 %v1588_v35 }
 0x93c   :  { %v1589_v42 = vmul.f32 0.7978846, %v1581_v37  ;;  %v1582_v43 = vadd.f32 %v1574_v38, %v18548_v13  ;;  %v1575_v44 = vmul.f32 0.044715, %v1567_v40 }
 0x93d   :  { %v1576_v45 = vmul.f32 0.044715, %v1568_v41 }
 0x93e   :  { %17287 = vtanh.f32 %v1589_v42  ;;  %v1590_v46 = vmul.f32 0.7978846, %v1582_v43  ;;  %v1583_v48 = vadd.f32 %v1575_v44, %v18554_v21 }
 0x93f   :  { %v1584_v49 = vadd.f32 %v1576_v45, %v1551_v31 }
 0x940   :  { %v1591_v50 = vmul.f32 0.7978846, %v1583_v48  ;;  %17289 = vtanh.f32 %v1590_v46 }
 0x941   :  { %v1592_v52 = vmul.f32 0.7978846, %v1584_v49 }
 0x942   :  { %v17280_v53 = vpop.eup %17279  ;;  %17291 = vtanh.f32 %v1591_v50 }
 0x943   :  { %v1601_v54 = vadd.f32 1.0, %v17280_v53  ;;  %17293 = vtanh.f32 %v1592_v52 }
 0x944   :  { %v17282_v57 = vpop.eup %17281 }
 0x945   :  { %v1602_v58 = vadd.f32 1.0, %v17282_v57  ;;  %v1609_v61 = vmul.f32 0.5, %v1601_v54 }
 0x946   :  { %v17284_v60 = vpop.eup %17283 }
 0x947   :  { %v1610_v63 = vmul.f32 0.5, %v1602_v58  ;;  %v1603_v39 = vadd.f32 1.0, %v17284_v60  ;;  %v1617_v51 = vmul.f32 %v1609_v61, %v18522_v55 }
 0x948   :  { %v17286_v2 = vpop.eup %17285 }
 0x949   :  { %v1618_v26 = vmul.f32 %v1610_v63, %v18526_v59  ;;  %v1604_v4 = vadd.f32 1.0, %v17286_v2  ;;  %v1611_v30 = vmul.f32 0.5, %v1603_v39 }
 0x94b   :  { %v17288_v47 = vpop.eup %17287  ;;  %1721 = vmatprep.mubr.f32.mxu1 %v1618_v26  ;;  %v1612_v23 = vmul.f32 0.5, %v1604_v4  ;;  %v1619_v9 = vmul.f32 %v1611_v30, %v18531_v1 }
 0x94c   :  { %1722 = vmatmul.mubr.f32.vlgmr.msra.gmra.mxu1 %v1617_v51  ;;  %v1605_v5 = vadd.f32 1.0, %v17288_v47 }
 0x94d   :  { %v17290_v7 = vpop.eup %17289  ;;  %v1620_v8 = vmul.f32 %v1612_v23, %v18536_v27 }
 0x94e   :  { %v1606_v10 = vadd.f32 1.0, %v17290_v7  ;;  %v1613_v12 = vmul.f32 0.5, %v1605_v5  ;;  %v1828_v7 = vld [vmem:[%s21708_s2 + $0x838] sm:$0xff] }
 0x94f   :  { %v17292_v11 = vpop.eup %17291  ;;  %1726 = vmatprep.mubr.f32.mxu1 %v1620_v8  ;;  %1870 = vmatprep.subr.mxu0 %v1828_v7  ;;  %v1827_v8 = vld [vmem:[%s21708_s2 + $0x830] sm:$0xff] }
 0x950   :  { %v17294_v14 = vpop.eup %17293  ;;  %1727 = vmatmul.mubr.f32.gmra.mxu1 %v1619_v9  ;;  %v1614_v59 = vmul.f32 0.5, %v1606_v10  ;;  %v1607_v15 = vadd.f32 1.0, %v17292_v11  ;;  %v1621_v18 = vmul.f32 %v1613_v12, %v18542_v6  ;;  %1871 = vmatpush1.msra.mxu0 %v1827_v8  ;;  %v1826_v9 = vld [vmem:[%s21708_s2 + $0x828] sm:$0xff]  ;;  %v1825_v10 = vld [vmem:[%s21708_s2 + $0x820] sm:$0xff]  ;;  %v1824_v11 = vld [vmem:[%s21708_s2 + $0x818] sm:$0xff] }
 0x951   :  { %v1608_v55 = vadd.f32 1.0, %v17294_v14  ;;  %1872 = vmatprep.subr.mxu0 %v1826_v9  ;;  %v1823_v12 = vld [vmem:[%s21708_s2 + $0x810] sm:$0xff]  ;;  %v1822_v14 = vld [vmem:[%s21708_s2 + $0x808] sm:$0xff] }
 0x952   :  { %v1622_v16 = vmul.f32 %v1614_v59, %v18548_v13  ;;  %v1615_v20 = vmul.f32 0.5, %v1607_v15  ;;  %1873 = vmatpush1.msra.mxu0 %v1825_v10  ;;  %v1821_v59 = vld [vmem:[%s21708_s2 + $0x800] sm:$0xff]  ;;  %v1820_v15 = vld [vmem:[%s21708_s2 + $0x7f8] sm:$0xff] }
 0x953   :  { %v1616_v19 = vmul.f32 0.5, %v1608_v55  ;;  %1874 = vmatprep.subr.mxu0 %v1824_v11  ;;  %v1819_v55 = vld [vmem:[%s21708_s2 + $0x7f0] sm:$0xff] }
 0x954   :  { %1731 = vmatprep.mubr.f32.mxu1 %v1622_v16  ;;  %v1623_v1 = vmul.f32 %v1615_v20, %v18554_v21  ;;  %1875 = vmatpush1.msra.mxu0 %v1823_v12  ;;  %v1818_v16 = vld [vmem:[%s21708_s2 + $0x7e8] sm:$0xff]  ;;  %v1815_v20 = vld [vmem:[%s21708_s2 + $0x7d0] sm:$0xff] }
 0x955   :  { %1732 = vmatmul.mubr.f32.gmra.mxu1 %v1621_v18  ;;  %v1624_v27 = vmul.f32 %v1616_v19, %v1551_v31  ;;  %1876 = vmatprep.subr.mxu0 %v1822_v14  ;;  %v1817_v18 = vld [vmem:[%s21708_s2 + $0x7e0] sm:$0xff]  ;;  %v1816_v19 = vld [vmem:[%s21708_s2 + $0x7d8] sm:$0xff] }
 0x956   :  { %1877 = vmatpush1.msra.mxu0 %v1821_v59 }
 0x957   :  { %1736 = vmatprep.mubr.f32.mxu1 %v1624_v27  ;;  %1878 = vmatprep.subr.mxu0 %v1820_v15  ;;  %v1814_v27 = vld [vmem:[%s21708_s2 + $0x7c8] sm:$0xff] }
 0x958   :  { %1879 = vmatpush1.msra.mxu0 %v1819_v55 }
 0x959   :  { %1737 = vmatmul.mubr.f32.gmra.mxu1 %v1623_v1  ;;  %1880 = vmatprep.subr.mxu0 %v1818_v16  ;;  %v1813_v1 = vld [vmem:[%s21708_s2 + $0x7c0] sm:$0xff] }
 0x95a   :  { %1881 = vmatpush1.msra.mxu0 %v1817_v18 }
 0x95b   :  { %1882 = vmatprep.subr.mxu0 %v1816_v19 }
 0x95c   :  { %1883 = vmatpush1.msra.mxu0 %v1815_v20 }
 0x95d   :  { %1884 = vmatprep.subr.mxu0 %v1814_v27 }
 0x95e   :  { %1885 = vmatpush1.msra.mxu0 %v1813_v1 }
 0xa0c   :  { %v15061_v22 = vpop.f32.mrf.mxu1 }
 0xa0e   :  { %v15062_v24 = vpop.f32.mrf.mxu1 }
 0xa0f   :  { %v15063_v29 = vadd.f32 %v15062_v24, %v15061_v22 }
 0xa10   :  { %v15064_v32 = vpop.f32.mrf.mxu1 }
 0xa11   :  { %v1742_v13 = vadd.f32 %v15063_v29, %v18317_v0 }
 0xa12   :  { %v15065_v6 = vpop.f32.mrf.mxu1 }
 0xa13   :  { %v15066_v34 = vadd.f32 %v15065_v6, %v15064_v32  ;;  %v18575_v35 = vadd.f32 %v1746_v33, %v1742_v13 }
 0xa15   :  { %v1743_v31 = vadd.f32 %v15066_v34, %v18312_v56  ;;  %v15067_v36 = vpop.f32.mrf.mxu1  ;;  %v1753_v21 = vsel %vm413_vm0, %v18575_v35, 0.0 }
 0xa16   :  { %1754 = vadd.xlane.f32.xlu0 %v1753_v21 }
 0xa17   :  { %v15068_v37 = vpop.f32.mrf.mxu1  ;;  %v18580_v38 = vadd.f32 %v1746_v33, %v1743_v31 }
 0xa18   :  { %v15069_v40 = vadd.f32 %v15068_v37, %v15067_v36 }
 0xa19   :  { %v15070_v41 = vpop.f32.mrf.mxu1  ;;  %v1756_v42 = vsel %vm413_vm0, %v18580_v38, 0.0 }
 0xa1a   :  { %v1744_v0 = vadd.f32 %v15069_v40, %v18323_v3  ;;  %1757 = vadd.xlane.f32.xlu1 %v1756_v42 }
 0xa1b   :  { %v15071_v43 = vpop.f32.mrf.mxu1 }
 0xa1c   :  { %v15072_v44 = vadd.f32 %v15071_v43, %v15070_v41  ;;  %v18585_v45 = vadd.f32 %v1746_v33, %v1744_v0  ;;  %v1751_v41 = vld [vmem:[%s21708_s2 + $0x70] ss:$0 sm:$0xff] }
 0xa1d   :  { %v1752_v0 = vld [vmem:[%s21708_s2 + $0x50] ss:$0 sm:$0xff] }
 0xa1e   :  { %v1745_v56 = vadd.f32 %v15072_v44, %v18325_v28  ;;  %v1759_v46 = vsel %vm413_vm0, %v18585_v45, 0.0 }
 0xa1f   :  { %1760 = vadd.xlane.f32.xlu0 %v1759_v46 }
 0xa20   :  { %v18590_v48 = vadd.f32 %v1746_v33, %v1745_v56 }
 0xa22   :  { %v1762_v49 = vsel %vm413_vm0, %v18590_v48, 0.0 }
 0xa23   :  { %1763 = vadd.xlane.f32.xlu1 %v1762_v49 }
 0xa9f   :  { %v1755_v50 = vpop.xlane.xlu0 %1754 }
 0xaa0   :  { %v1765_v52 = vmul.f32 0.015625, %v1755_v50 }
 0xaa2   :  { %v18595_v3 = vsub.f32 %v18575_v35, %v1765_v52 }
 0xaa3   :  { %v1758_v53 = vpop.xlane.xlu1 %1757 }
 0xaa4   :  { %v1766_v54 = vmul.f32 0.015625, %v1758_v53  ;;  %v1773_v28 = vmul.f32 %v18595_v3, %v18595_v3 }
 0xaa6   :  { %v18600_v57 = vsub.f32 %v18580_v38, %v1766_v54  ;;  %v1777_v58 = vsel %vm413_vm0, %v1773_v28, 0.0 }
 0xaa7   :  { %1778 = vadd.xlane.f32.xlu0 %v1777_v58 }
 0xaa8   :  { %v1761_v60 = vpop.xlane.xlu0 %1760  ;;  %v1774_v61 = vmul.f32 %v18600_v57, %v18600_v57 }
 0xaa9   :  { %v1767_v63 = vmul.f32 0.015625, %v1761_v60 }
 0xaaa   :  { %v1780_v39 = vsel %vm413_vm0, %v1774_v61, 0.0  ;;  %v14382_v61 = vld [vmem:[%s21708_s2 + $0x730] ss:$8 sm:$0x3] }
 0xaab   :  { %v18607_v2 = vsub.f32 %v18585_v45, %v1767_v63  ;;  %1781 = vadd.xlane.f32.xlu1 %v1780_v39  ;;  %v1835_v63 = vrot.slane %v14382_v61, %v18159_v62  ;;  %v1839_v7 = vrot.slane %v14382_v61, %v18186_v17 }
 0xaac   :  { %v1764_v26 = vpop.xlane.xlu1 %1763 }
 0xaad   :  { %v1768_v4 = vmul.f32 0.015625, %v1764_v26  ;;  %v1775_v51 = vmul.f32 %v18607_v2, %v18607_v2 }
 0xaaf   :  { %v18612_v30 = vsub.f32 %v18590_v48, %v1768_v4  ;;  %v1783_v47 = vsel %vm413_vm0, %v1775_v51, 0.0 }
 0xab0   :  { %1784 = vadd.xlane.f32.xlu0 %v1783_v47 }
 0xab1   :  { %v1776_v23 = vmul.f32 %v18612_v30, %v18612_v30 }
 0xab3   :  { %v1786_v5 = vsel %vm413_vm0, %v1776_v23, 0.0 }
 0xab4   :  { %1787 = vadd.xlane.f32.xlu1 %v1786_v5 }
 0xb30   :  { %v1779_v22 = vpop.xlane.xlu0 %1778 }
 0xb31   :  { %v1789_v24 = vmul.f32 0.015625, %v1779_v22 }
 0xb33   :  { %v1793_v29 = vadd.f32 1e-06, %v1789_v24 }
 0xb34   :  { %v1782_v32 = vpop.xlane.xlu1 %1781 }
 0xb35   :  { %17295 = vrsqrt.f32 %v1793_v29  ;;  %v1790_v33 = vmul.f32 0.015625, %v1782_v32 }
 0xb37   :  { %v1794_v13 = vadd.f32 1e-06, %v1790_v33 }
 0xb39   :  { %17297 = vrsqrt.f32 %v1794_v13  ;;  %v1785_v6 = vpop.xlane.xlu0 %1784 }
 0xb3a   :  { %v1791_v34 = vmul.f32 0.015625, %v1785_v6 }
 0xb3c   :  { %v1795_v31 = vadd.f32 1e-06, %v1791_v34 }
 0xb3d   :  { %v1788_v36 = vpop.xlane.xlu1 %1787 }
 0xb3e   :  { %17299 = vrsqrt.f32 %v1795_v31  ;;  %v1792_v21 = vmul.f32 0.015625, %v1788_v36  ;;  %v17587_v31 = vld [vmem:[%s21708_s2 + $0x10] sm:$0xff] }
 0xb40   :  { %v1796_v37 = vadd.f32 1e-06, %v1792_v21 }
 0xb42   :  { %v17296_v40 = vpop.eup %17295  ;;  %17301 = vrsqrt.f32 %v1796_v37 }
 0xb43   :  { %v1801_v42 = vmul.f32 %v17296_v40, %v18595_v3 }
 0xb45   :  { %v1805_v43 = vmul.f32 %v1801_v42, %v1751_v41 }
 0xb46   :  { %v17298_v44 = vpop.eup %17297 }
 0xb47   :  { %v1809_v56 = vadd.f32 %v1805_v43, %v1752_v0  ;;  %v1802_v46 = vmul.f32 %v17298_v44, %v18600_v57 }
 0xb49   :  { %14383 = vmatmul.mubr.msk.f32.vlgmr.msra.gmra.mxu0 %vm413_vm0, %v1809_v56  ;;  %v1806_v49 = vmul.f32 %v1802_v46, %v1751_v41  ;;  %v17589_v56 = vld [vmem:[%s21708_s2 + $0x30] sm:$0xff] }
 0xb4a   :  { %1924 = vmatprep.mubr.f32.mxu0 %v17631_v25 }
 0xb4b   :  { %v17300_v50 = vpop.eup %17299  ;;  %v1810_v52 = vadd.f32 %v1806_v49, %v1752_v0 }
 0xb4c   :  { %v1803_v53 = vmul.f32 %v17300_v50, %v18607_v2  ;;  %v17590_v50 = vld [vmem:[%s21708_s2 + $0x20] sm:$0xff] }
 0xb4d   :  { %14384 = vmatmul.mubr.msk.f32.gmra.mxu0 %vm413_vm0, %v1810_v52 }
 0xb4e   :  { %1930 = vmatprep.mubr.f32.mxu0 %v17631_v25  ;;  %v1807_v3 = vmul.f32 %v1803_v53, %v1751_v41 }
 0xb4f   :  { %v17302_v54 = vpop.eup %17301 }
 0xb50   :  { %v1811_v28 = vadd.f32 %v1807_v3, %v1752_v0  ;;  %v1804_v58 = vmul.f32 %v17302_v54, %v18612_v30 }
 0xb52   :  { %14385 = vmatmul.mubr.msk.f32.gmra.mxu0 %vm413_vm0, %v1811_v28  ;;  %v1808_v57 = vmul.f32 %v1804_v58, %v1751_v41  ;;  %v17588_v41 = vld [vmem:[%s21708_s2] sm:$0xff] }
 0xb53   :  { %1936 = vmatprep.mubr.f32.mxu0 %v17631_v25 }
 0xb54   :  { %v1812_v60 = vadd.f32 %v1808_v57, %v1752_v0 }
 0xb56   :  { %14386 = vmatmul.mubr.msk.f32.gmra.mxu0 %vm413_vm0, %v1812_v60 }
 0xc09   :  { %v1920_v39 = vpop.f32.mrf.mxu0 }
 0xc0a   :  { %v1921_v2 = vadd.f32 %v1920_v39, %v1835_v63 }
 0xc0b   :  { %v1922_v26 = vpop.f32.mrf.mxu0 }
 0xc0c   :  { %15928 = vmatprep.mubr.msk.f32.mxu0 %vm625_vm1, %v1921_v2  ;;  %v18704_v59 = vadd.f32 %v1922_v26, %v1839_v7 }
 0xc0d   :  { %v1926_v4 = vpop.f32.mrf.mxu0 }
 0xc0e   :  { %v1927_v8 = vadd.f32 %v1926_v4, %v1835_v63 }
 0xc0f   :  { %v1928_v51 = vpop.f32.mrf.mxu0 }
 0xc10   :  { %v18698_v14 = vadd.f32 %v1928_v51, %v1839_v7 }
 0xc12   :  { %v1932_v30 = vpop.f32.mrf.mxu0 }
 0xc13   :  { %v1933_v47 = vadd.f32 %v1932_v30, %v1835_v63 }
 0xc14   :  { %v1934_v23 = vpop.f32.mrf.mxu0 }
 0xc15   :  { %1959 = vrot.lane.b32.xlu1 %v1933_v47, %s17632_s16  ;;  %v18694_v12 = vadd.f32 %v1934_v23, %v1839_v7 }
 0xc16   :  { %v1938_v5 = vpop.f32.mrf.mxu0 }
 0xc17   :  { %v1939_v9 = vadd.f32 %v1938_v5, %v1835_v63 }
 0xc18   :  { %v1940_v10 = vpop.f32.mrf.mxu0 }
 0xc19   :  { %v18690_v11 = vadd.f32 %v1940_v10, %v1839_v7  ;;  %1961 = vrot.lane.b32.xlu0 %v1939_v9, %s17632_s16  ;;  %1957 = vrot.lane.b32.xlu1 %v1927_v8, %s17632_s16 }
 0xc1b   :  { %15934 = vmatprep.subr.mxu1 %v18690_v11 }
 0xc1c   :  { %15935 = vmatpush3.msra.mxu1 %v18690_v11 }
 0xc1d   :  { %2227 = vrot.lane.b32.xlu0 %v1939_v9, %s17633_s17  ;;  %15936 = vmatprep.subr.mxu1 %v18694_v12 }
 0xc1e   :  { %1955 = vrot.lane.b32.xlu1 %v1921_v2, %s17632_s16  ;;  %15937 = vmatpush3.msra.mxu1 %v18694_v12 }
 0xc1f   :  { %15938 = vmatprep.subr.mxu1 %v18698_v14 }
 0xc20   :  { %15939 = vmatpush3.msra.mxu1 %v18698_v14 }
 0xc21   :  { %2223 = vrot.lane.b32.xlu0 %v1927_v8, %s17633_s17  ;;  %15940 = vmatprep.subr.mxu1 %v18704_v59 }
 0xc22   :  { %2225 = vrot.lane.b32.xlu1 %v1933_v47, %s17633_s17  ;;  %15941 = vmatpush3.msra.mxu1 %v18704_v59 }
 0xc25   :  { %2213 = vrot.lane.b32.xlu0 %v1921_v2, %s17634_s18 }
 0xc26   :  { %2221 = vrot.lane.b32.xlu1 %v1921_v2, %s17633_s17 }
 0xc29   :  { %2217 = vrot.lane.b32.xlu0 %v1933_v47, %s17634_s18 }
 0xc2a   :  { %2215 = vrot.lane.b32.xlu1 %v1927_v8, %s17634_s18 }
 0xc2e   :  { %2219 = vrot.lane.b32.xlu1 %v1939_v9, %s17634_s18 }
 0xc87   :  { %v1960_v15 = vpop.permute.xlu1 %1959 }
 0xc8b   :  { %v1962_v55 = vpop.permute.xlu0 %1961  ;;  %v1958_v16 = vpop.permute.xlu1 %1957 }
 0xc8c   :  { %15920 = vmatprep.subr.msk.mxu0 %vm625_vm1, %v1962_v55 }
 0xc8d   :  { %15921 = vmatpush3.xpose.msk.msra.mxu0 %vm625_vm1, %v1962_v55 }
 0xc8e   :  { %15922 = vmatprep.subr.msk.mxu0 %vm625_vm1, %v1960_v15 }
 0xc8f   :  { %v2228_v18 = vpop.permute.xlu0 %2227 }
 0xc90   :  { %v1956_v19 = vpop.permute.xlu1 %1955 }
 0xc91   :  { %15923 = vmatpush3.xpose.msk.msra.mxu0 %vm625_vm1, %v1960_v15 }
 0xc92   :  { %15924 = vmatprep.subr.msk.mxu0 %vm625_vm1, %v1958_v16 }
 0xc93   :  { %v2224_v20 = vpop.permute.xlu0 %2223 }
 0xc94   :  { %v2226_v27 = vpop.permute.xlu1 %2225 }
 0xc95   :  { %15925 = vmatpush3.xpose.msk.msra.mxu0 %vm625_vm1, %v1958_v16 }
 0xc96   :  { %15926 = vmatprep.subr.msk.mxu0 %vm625_vm1, %v1956_v19 }
 0xc97   :  { %v2214_v1 = vpop.permute.xlu0 %2213 }
 0xc98   :  { %v2222_v22 = vpop.permute.xlu1 %2221 }
 0xc99   :  { %15927 = vmatpush3.xpose.msk.msra.mxu0 %vm625_vm1, %v1956_v19 }
 0xc9a   :  { %15948 = vmatprep.subr.msk.mxu0 %vm625_vm1, %v2228_v18 }
 0xc9b   :  { %v2218_v29 = vpop.permute.xlu0 %2217 }
 0xc9c   :  { %15929 = vmatmul.mubr.msk.f32.vlgmr.msra.gmra.mxu0 %vm625_vm1, %v1927_v8  ;;  %v2216_v24 = vpop.permute.xlu1 %2215 }
 0xc9d   :  { %15931 = vmatprep.mubr.msk.f32.mxu0 %vm625_vm1, %v1933_v47  ;;  %15949 = vmatpush3.xpose.msk.msra.mxu0 %vm625_vm1, %v2228_v18 }
 0xc9e   :  { %15950 = vmatprep.subr.msk.mxu0 %vm625_vm1, %v2226_v27 }
 0xca0   :  { %15932 = vmatmul.mubr.msk.f32.gmra.mxu0 %vm625_vm1, %v1939_v9  ;;  %v2220_v32 = vpop.permute.xlu1 %2219 }
 0xca1   :  { %15951 = vmatpush3.xpose.msk.msra.mxu0 %vm625_vm1, %v2226_v27  ;;  %15956 = vmatprep.mubr.msk.f32.mxu0 %vm625_vm1, %v2214_v1 }
 0xca2   :  { %15952 = vmatprep.subr.msk.mxu0 %vm625_vm1, %v2224_v20 }
 0xca5   :  { %15953 = vmatpush3.xpose.msk.msra.mxu0 %vm625_vm1, %v2224_v20 }
 0xca6   :  { %15954 = vmatprep.subr.msk.mxu0 %vm625_vm1, %v2222_v22 }
 0xca9   :  { %15955 = vmatpush3.xpose.msk.msra.mxu0 %vm625_vm1, %v2222_v22 }
 0xcac   :  { %15957 = vmatmul.mubr.msk.f32.vlgmr.msra.gmra.mxu0 %vm625_vm1, %v2216_v24 }
 0xcad   :  { %15959 = vmatprep.mubr.msk.f32.mxu0 %vm625_vm1, %v2218_v29 }
 0xcb0   :  { %15960 = vmatmul.mubr.msk.f32.gmra.mxu0 %vm625_vm1, %v2220_v32 }
 0xd5c   :  { %v15930_v33 = vpop.f32.mrf.mxu0 }
 0xd5d   :  { %v2065_v13 = vmul.f32 0.17677669, %v15930_v33 }
 0xd5e   :  { %v2045_v6 = vpop.f32.mrf.mxu0 }
 0xd5f   :  { %v2064_v34 = vmul.f32 0.17677669, %v2045_v6  ;;  %v2069_v36 = vadd.f32 %v17587_v31, %v2065_v13 }
 0xd60   :  { %v15933_v21 = vpop.f32.mrf.mxu0 }
 0xd61   :  { %v2067_v37 = vmul.f32 0.17677669, %v15933_v21  ;;  %v2075_v40 = vsel %vm625_vm1, %v2069_v36, -inf  ;;  %v2068_v42 = vadd.f32 %v17588_v41, %v2064_v34 }
 0xd62   :  { %2076 = vmax.xlane.f32.xlu1 %v2075_v40  ;;  %v2055_v0 = vpop.f32.mrf.mxu0 }
 0xd63   :  { %v2066_v43 = vmul.f32 0.17677669, %v2055_v0  ;;  %v2072_v44 = vsel %vm625_vm1, %v2068_v42, -inf  ;;  %v2071_v46 = vadd.f32 %v17589_v56, %v2067_v37 }
 0xd64   :  { %2073 = vmax.xlane.f32.xlu0 %v2072_v44 }
 0xd65   :  { %v2081_v49 = vsel %vm625_vm1, %v2071_v46, -inf  ;;  %v2070_v52 = vadd.f32 %v17590_v50, %v2066_v43 }
 0xd67   :  { %v2078_v53 = vsel %vm625_vm1, %v2070_v52, -inf }
 0xd68   :  { %2082 = vmax.xlane.f32.xlu0 %v2081_v49 }
 0xd6c   :  { %2079 = vmax.xlane.f32.xlu0 %v2078_v53  ;;  %v15958_v3 = vpop.f32.mrf.mxu0 }
 0xd6d   :  { %v2331_v54 = vmul.f32 0.17677669, %v15958_v3 }
 0xd6e   :  { %v2311_v28 = vpop.f32.mrf.mxu0 }
 0xd6f   :  { %v2330_v58 = vmul.f32 0.17677669, %v2311_v28  ;;  %v2335_v57 = vadd.f32 %v17587_v31, %v2331_v54 }
 0xd70   :  { %v15961_v60 = vpop.f32.mrf.mxu0 }
 0xd71   :  { %v2333_v61 = vmul.f32 0.17677669, %v15961_v60  ;;  %v2341_v63 = vsel %vm625_vm1, %v2335_v57, -inf  ;;  %v2334_v39 = vadd.f32 %v17588_v41, %v2330_v58  ;;  %v1946_v58 = vld [vmem:[%s21708_s2 + $0x6d0] sm:$0xff] }
 0xd72   :  { %2342 = vmax.xlane.f32.xlu1 %v2341_v63  ;;  %v2321_v2 = vpop.f32.mrf.mxu0  ;;  %15990 = vmatprep.subr.mxu0 %v1946_v58 }
 0xd73   :  { %v2332_v26 = vmul.f32 0.17677669, %v2321_v2  ;;  %v2338_v4 = vsel %vm625_vm1, %v2334_v39, -inf  ;;  %v2337_v51 = vadd.f32 %v17589_v56, %v2333_v61  ;;  %15991 = vmatpush3.msra.mxu0 %v1946_v58 }
 0xd74   :  { %2339 = vmax.xlane.f32.xlu0 %v2338_v4 }
 0xd75   :  { %v2347_v30 = vsel %vm625_vm1, %v2337_v51, -inf  ;;  %v2336_v47 = vadd.f32 %v17590_v50, %v2332_v26 }
 0xd76   :  { %2348 = vmax.xlane.f32.xlu1 %v2347_v30 }
 0xd77   :  { %v2344_v23 = vsel %vm625_vm1, %v2336_v47, -inf }
 0xd78   :  { %2345 = vmax.xlane.f32.xlu0 %v2344_v23 }
 0xdeb   :  { %v2077_v5 = vpop.xlane.xlu1 %2076 }
 0xdec   :  { %v2085_v7 = vsub.f32 %v2069_v36, %v2077_v5 }
 0xded   :  { %v2074_v8 = vpop.xlane.xlu0 %2073 }
 0xdee   :  { %v2090_v9 = vmul.f32 1.442695, %v2085_v7  ;;  %v2084_v10 = vsub.f32 %v2068_v42, %v2074_v8 }
 0xdf0   :  { %17303 = vpow2.f32 %v2090_v9  ;;  %v2088_v15 = vmul.f32 1.442695, %v2084_v10 }
 0xdf1   :  { %v2083_v55 = vpop.xlane.xlu0 %2082 }
 0xdf2   :  { %17305 = vpow2.f32 %v2088_v15  ;;  %v2087_v16 = vsub.f32 %v2071_v46, %v2083_v55 }
 0xdf4   :  { %v2094_v18 = vmul.f32 1.442695, %v2087_v16 }
 0xdf5   :  { %v2080_v19 = vpop.xlane.xlu0 %2079 }
 0xdf6   :  { %17307 = vpow2.f32 %v2094_v18  ;;  %v2086_v20 = vsub.f32 %v2070_v52, %v2080_v19 }
 0xdf8   :  { %v2092_v27 = vmul.f32 1.442695, %v2086_v20 }
 0xdfa   :  { %17309 = vpow2.f32 %v2092_v27 }
 0xdfb   :  { %v2343_v1 = vpop.xlane.xlu1 %2342 }
 0xdfc   :  { %v2351_v22 = vsub.f32 %v2335_v57, %v2343_v1  ;;  %v1945_v57 = vld [vmem:[%s21708_s2 + $0x6c0] sm:$0xff] }
 0xdfd   :  { %v17304_v24 = vpop.eup %17303  ;;  %v2340_v29 = vpop.xlane.xlu0 %2339  ;;  %15992 = vmatprep.subr.mxu0 %v1945_v57 }
 0xdfe   :  { %v2356_v32 = vmul.f32 1.442695, %v2351_v22  ;;  %v2350_v33 = vsub.f32 %v2334_v39, %v2340_v29  ;;  %v2099_v13 = vsel %vm625_vm1, %v17304_v24, 0.0  ;;  %15993 = vmatpush3.msra.mxu0 %v1945_v57  ;;  %v1944_v22 = vld [vmem:[%s21708_s2 + $0x6b0] sm:$0xff] }
 0xdff   :  { %v17306_v6 = vpop.eup %17305  ;;  %2100 = vadd.xlane.f32.xlu1 %v2099_v13  ;;  %v2349_v34 = vpop.xlane.xlu1 %2348  ;;  %15994 = vmatprep.subr.mxu0 %v1944_v22  ;;  %v1950_v29 = vld [vmem:[%s21708_s2 + $0x710] sm:$0xff]  ;;  %v1947_v13 = vld [vmem:[%s21708_s2 + $0x6e0] sm:$0xff] }
 0xe00   :  { %17311 = vpow2.f32 %v2356_v32  ;;  %v2354_v31 = vmul.f32 1.442695, %v2350_v33  ;;  %v2353_v36 = vsub.f32 %v2337_v51, %v2349_v34  ;;  %v2096_v21 = vsel %vm625_vm1, %v17306_v6, 0.0  ;;  %15995 = vmatpush3.msra.mxu0 %v1944_v22  ;;  %v1949_v32 = vld [vmem:[%s21708_s2 + $0x700] sm:$0xff]  ;;  %v1948_v33 = vld [vmem:[%s21708_s2 + $0x6f0] sm:$0xff]  ;;  %v2773_v22 = vld [vmem:[%s21708_s2 + $0x1c8] sm:$0xff] }
 0xe01   :  { %2097 = vadd.xlane.f32.xlu0 %v2096_v21  ;;  %v2346_v37 = vpop.xlane.xlu0 %2345 }
 0xe02   :  { %17313 = vpow2.f32 %v2354_v31  ;;  %v2360_v40 = vmul.f32 1.442695, %v2353_v36  ;;  %v2352_v41 = vsub.f32 %v2336_v47, %v2346_v37 }
 0xe03   :  { %v17308_v42 = vpop.eup %17307 }
 0xe04   :  { %17315 = vpow2.f32 %v2360_v40  ;;  %v2358_v0 = vmul.f32 1.442695, %v2352_v41  ;;  %v2105_v43 = vsel %vm625_vm1, %v17308_v42, 0.0 }
 0xe05   :  { %2106 = vadd.xlane.f32.xlu1 %v2105_v43 }
 0xe06   :  { %17317 = vpow2.f32 %v2358_v0 }
 0xe07   :  { %v17310_v44 = vpop.eup %17309 }
 0xe08   :  { %v2102_v56 = vsel %vm625_vm1, %v17310_v44, 0.0 }
 0xe09   :  { %2103 = vadd.xlane.f32.xlu0 %v2102_v56 }
 0xe0d   :  { %v18764_v46 = vpop.eup %17311 }
 0xe0e   :  { %v2365_v49 = vsel %vm625_vm1, %v18764_v46, 0.0 }
 0xe0f   :  { %v17314_v50 = vpop.eup %17313  ;;  %2366 = vadd.xlane.f32.xlu1 %v2365_v49 }
 0xe10   :  { %v2362_v52 = vsel %vm625_vm1, %v17314_v50, 0.0 }
 0xe11   :  { %v18769_v53 = vpop.eup %17315  ;;  %2363 = vadd.xlane.f32.xlu0 %v2362_v52 }
 0xe12   :  { %v2371_v3 = vsel %vm625_vm1, %v18769_v53, 0.0 }
 0xe13   :  { %v17318_v54 = vpop.eup %17317  ;;  %2372 = vadd.xlane.f32.xlu1 %v2371_v3 }
 0xe14   :  { %v2368_v28 = vsel %vm625_vm1, %v17318_v54, 0.0 }
 0xe15   :  { %2369 = vadd.xlane.f32.xlu0 %v2368_v28 }
 0xe24   :  { %2390 = vrot.lane.b32.xlu1 %v18694_v12, %s17634_s18 }
 0xe28   :  { %2388 = vrot.lane.b32.xlu1 %v18698_v14, %s17634_s18 }
 0xe2b   :  { %2392 = vrot.lane.b32.xlu0 %v18690_v11, %s17634_s18 }
 0xe2c   :  { %2386 = vrot.lane.b32.xlu1 %v18704_v59, %s17634_s18 }
 0xe88   :  { %v2101_v12 = vpop.xlane.xlu1 %2100 }
 0xe89   :  { %17319 = vrcp.f32 %v2101_v12 }
 0xe8a   :  { %v2098_v14 = vpop.xlane.xlu0 %2097 }
 0xe8b   :  { %17321 = vrcp.f32 %v2098_v14 }
 0xe8e   :  { %v2107_v11 = vpop.xlane.xlu1 %2106 }
 0xe8f   :  { %17323 = vrcp.f32 %v2107_v11 }
 0xe92   :  { %v2104_v60 = vpop.xlane.xlu0 %2103 }
 0xe93   :  { %17325 = vrcp.f32 %v2104_v60 }
 0xe96   :  { %v17320_v59 = vpop.eup %17319 }
 0xe97   :  { %v2111_v2 = vmul.f32 %v17320_v59, %v17304_v24  ;;  %v1943_v24 = vld [vmem:[%s21708_s2 + $0x6a0] sm:$0xff] }
 0xe98   :  { %v17322_v61 = vpop.eup %17321  ;;  %v2367_v63 = vpop.xlane.xlu1 %2366  ;;  %15996 = vmatprep.subr.mxu0 %v1943_v24 }
 0xe99   :  { %v2109_v39 = vmul.f32 %v17322_v61, %v17306_v6  ;;  %17327 = vrcp.f32 %v2367_v63  ;;  %15997 = vmatpush3.msra.mxu0 %v1943_v24  ;;  %v2772_v24 = vld [vmem:[%s21708_s2 + $0x1c0] sm:$0xff] }
 0xe9a   :  { %v2364_v26 = vpop.xlane.xlu0 %2363 }
 0xe9b   :  { %17329 = vrcp.f32 %v2364_v26  ;;  %15942 = vmatprep.mubr.msk.f32.mxu1 %vm625_vm1, %v2109_v39 }
 0xe9c   :  { %15943 = vmatmul.mubr.msk.f32.vlgmr.msra.gmra.mxu1 %vm625_vm1, %v2111_v2  ;;  %v2373_v4 = vpop.xlane.xlu1 %2372  ;;  %v17324_v30 = vpop.eup %17323 }
 0xe9d   :  { %17331 = vrcp.f32 %v2373_v4  ;;  %v2115_v8 = vmul.f32 %v17324_v30, %v17308_v42 }
 0xe9e   :  { %v2370_v51 = vpop.xlane.xlu0 %2369 }
 0xe9f   :  { %17333 = vrcp.f32 %v2370_v51 }
 0xea0   :  { %v17326_v47 = vpop.eup %17325  ;;  %v2391_v23 = vpop.permute.xlu1 %2390 }
 0xea1   :  { %v2113_v5 = vmul.f32 %v17326_v47, %v17310_v44 }
 0xea2   :  { %v2393_v7 = vpop.permute.xlu0 %2392 }
 0xea3   :  { %15945 = vmatprep.mubr.msk.f32.mxu1 %vm625_vm1, %v2113_v5  ;;  %15962 = vmatprep.subr.mxu1 %v2393_v7 }
 0xea4   :  { %15946 = vmatmul.mubr.msk.f32.gmra.mxu1 %vm625_vm1, %v2115_v8  ;;  %v2389_v9 = vpop.permute.xlu1 %2388 }
 0xea5   :  { %15963 = vmatpush3.msra.mxu1 %v2393_v7 }
 0xea6   :  { %15964 = vmatprep.subr.mxu1 %v2391_v23  ;;  %v17328_v10 = vpop.eup %17327 }
 0xea7   :  { %15965 = vmatpush3.msra.mxu1 %v2391_v23  ;;  %v2377_v18 = vmul.f32 %v17328_v10, %v18764_v46  ;;  %v2693_v46 = vld [vmem:[%s21708_s2 + $0x610] ss:$0 sm:$0xff] }
 0xea8   :  { %v17330_v15 = vpop.eup %17329  ;;  %15966 = vmatprep.subr.mxu1 %v2389_v9  ;;  %v2387_v55 = vpop.permute.xlu1 %2386 }
 0xea9   :  { %15967 = vmatpush3.msra.mxu1 %v2389_v9  ;;  %v2375_v16 = vmul.f32 %v17330_v15, %v17314_v50 }
 0xeaa   :  { %15968 = vmatprep.subr.mxu1 %v2387_v55  ;;  %v17332_v19 = vpop.eup %17331 }
 0xeab   :  { %15969 = vmatpush3.msra.mxu1 %v2387_v55  ;;  %15970 = vmatprep.mubr.msk.f32.mxu1 %vm625_vm1, %v2375_v16  ;;  %v2381_v1 = vmul.f32 %v17332_v19, %v18769_v53 }
 0xeac   :  { %v17334_v20 = vpop.eup %17333  ;;  %15971 = vmatmul.mubr.msk.f32.vlgmr.msra.gmra.mxu1 %vm625_vm1, %v2377_v18  ;;  %15976 = vmatprep.subr.mxu1 %v1950_v29 }
 0xead   :  { %v2379_v27 = vmul.f32 %v17334_v20, %v17318_v54  ;;  %15977 = vmatpush3.msra.mxu1 %v1950_v29  ;;  %v2771_v29 = vld [vmem:[%s21708_s2 + $0x1b8] sm:$0xff] }
 0xeae   :  { %15978 = vmatprep.subr.mxu1 %v1949_v32 }
 0xeaf   :  { %15973 = vmatprep.mubr.msk.f32.mxu1 %vm625_vm1, %v2379_v27  ;;  %15979 = vmatpush3.msra.mxu1 %v1949_v32  ;;  %v2775_v27 = vld [vmem:[%s21708_s2 + $0x1d8] sm:$0xff]  ;;  %v2770_v32 = vld [vmem:[%s21708_s2 + $0x1b0] sm:$0xff] }
 0xeb0   :  { %15974 = vmatmul.mubr.msk.f32.gmra.mxu1 %vm625_vm1, %v2381_v1  ;;  %15980 = vmatprep.subr.mxu1 %v1948_v33  ;;  %v2774_v1 = vld [vmem:[%s21708_s2 + $0x1d0] sm:$0xff] }
 0xeb1   :  { %15981 = vmatpush3.msra.mxu1 %v1948_v33  ;;  %v2769_v33 = vld [vmem:[%s21708_s2 + $0x1a8] sm:$0xff] }
 0xeb2   :  { %15982 = vmatprep.subr.mxu1 %v1947_v13 }
 0xeb3   :  { %15983 = vmatpush3.msra.mxu1 %v1947_v13  ;;  %v2768_v13 = vld [vmem:[%s21708_s2 + $0x1a0] sm:$0xff] }
 0xeb4   :  { %2817 = vmatprep.subr.mxu1 %v2775_v27  ;;  %v2972_v27 = vld [vmem:[%s21708_s2 + $0x4a0] sm:$0xff] }
 0xf5c   :  { %v15944_v6 = vpop.f32.mrf.mxu1 }
 0xf5e   :  { %v2194_v34 = vpop.f32.mrf.mxu1 }
 0xf5f   :  { %15998 = vmatprep.mubr.msk.f32.mxu0 %vm625_vm1, %v2194_v34  ;;  %v2766_v34 = vld [vmem:[%s21708_s2 + $0x190] sm:$0xff] }
 0xf60   :  { %15999 = vmatmul.mubr.msk.f32.vlgmr.msra.gmra.mxu0 %vm625_vm1, %v15944_v6  ;;  %v2767_v6 = vld [vmem:[%s21708_s2 + $0x198] sm:$0xff] }
 0xf64   :  { %v15947_v31 = vpop.f32.mrf.mxu1 }
 0xf66   :  { %v2204_v36 = vpop.f32.mrf.mxu1 }
 0xf67   :  { %16001 = vmatprep.mubr.msk.f32.mxu0 %vm625_vm1, %v2204_v36  ;;  %v2764_v36 = vld [vmem:[%s21708_s2 + $0x180] sm:$0xff] }
 0xf68   :  { %16002 = vmatmul.mubr.msk.f32.gmra.mxu0 %vm625_vm1, %v15947_v31  ;;  %v2765_v31 = vld [vmem:[%s21708_s2 + $0x188] sm:$0xff] }
 0xf6c   :  { %v15972_v21 = vpop.f32.mrf.mxu1 }
 0xf6e   :  { %v2476_v37 = vpop.f32.mrf.mxu1 }
 0xf6f   :  { %15984 = vmatprep.mubr.msk.f32.mxu1 %vm625_vm1, %v2476_v37  ;;  %v2762_v37 = vld [vmem:[%s21708_s2 + $0x170] sm:$0xff] }
 0xf70   :  { %v15975_v40 = vpop.f32.mrf.mxu1  ;;  %15985 = vmatmul.mubr.msk.f32.vlgmr.msra.gmra.mxu1 %vm625_vm1, %v15972_v21  ;;  %v2763_v21 = vld [vmem:[%s21708_s2 + $0x178] sm:$0xff] }
 0xf71   :  { %2818 = vmatpush1.msra.mxu1 %v2774_v1  ;;  %v2987_v1 = vld [vmem:[%s21708_s2 + $0x590] sm:$0xff] }
 0xf72   :  { %v2486_v41 = vpop.f32.mrf.mxu1  ;;  %2819 = vmatprep.subr.mxu1 %v2773_v22  ;;  %v2971_v22 = vld [vmem:[%s21708_s2 + $0x490] sm:$0xff] }
 0xf73   :  { %15987 = vmatprep.mubr.msk.f32.mxu1 %vm625_vm1, %v2486_v41  ;;  %2820 = vmatpush1.msra.mxu1 %v2772_v24  ;;  %v2760_v41 = vld [vmem:[%s21708_s2 + $0x160] sm:$0xff] }
 0xf74   :  { %15988 = vmatmul.mubr.msk.f32.gmra.mxu1 %vm625_vm1, %v15975_v40  ;;  %2821 = vmatprep.subr.mxu1 %v2771_v29  ;;  %v2761_v40 = vld [vmem:[%s21708_s2 + $0x168] sm:$0xff]  ;;  %v2986_v24 = vld [vmem:[%s21708_s2 + $0x580] sm:$0xff] }
 0xf75   :  { %2865 = vmatprep.mubr.f32.mxu1 %v17631_v25  ;;  %2822 = vmatpush1.msra.mxu1 %v2770_v32  ;;  %v2970_v29 = vld [vmem:[%s21708_s2 + $0x480] sm:$0xff]  ;;  %v2985_v32 = vld [vmem:[%s21708_s2 + $0x570] sm:$0xff] }
 0xf76   :  { %2823 = vmatprep.subr.mxu1 %v2769_v33  ;;  %v2969_v33 = vld [vmem:[%s21708_s2 + $0x470] sm:$0xff] }
 0xf77   :  { %2824 = vmatpush1.msra.mxu1 %v2768_v13  ;;  %v2984_v13 = vld [vmem:[%s21708_s2 + $0x560] sm:$0xff] }
 0xf78   :  { %2825 = vmatprep.subr.mxu1 %v2767_v6  ;;  %v2968_v6 = vld [vmem:[%s21708_s2 + $0x460] sm:$0xff] }
 0xf79   :  { %2826 = vmatpush1.msra.mxu1 %v2766_v34  ;;  %v2983_v34 = vld [vmem:[%s21708_s2 + $0x550] sm:$0xff] }
 0xf7a   :  { %2827 = vmatprep.subr.mxu1 %v2765_v31  ;;  %v2967_v31 = vld [vmem:[%s21708_s2 + $0x450] sm:$0xff] }
 0xf7b   :  { %2828 = vmatpush1.msra.mxu1 %v2764_v36  ;;  %v2982_v36 = vld [vmem:[%s21708_s2 + $0x540] sm:$0xff] }
 0xf7c   :  { %2829 = vmatprep.subr.mxu1 %v2763_v21  ;;  %v2966_v21 = vld [vmem:[%s21708_s2 + $0x440] sm:$0xff] }
 0xf7d   :  { %2830 = vmatpush1.msra.mxu1 %v2762_v37  ;;  %v2981_v37 = vld [vmem:[%s21708_s2 + $0x530] sm:$0xff] }
 0xf7e   :  { %2831 = vmatprep.subr.mxu1 %v2761_v40  ;;  %v2965_v40 = vld [vmem:[%s21708_s2 + $0x430] sm:$0xff] }
 0xf7f   :  { %2832 = vmatpush1.msra.mxu1 %v2760_v41  ;;  %v2980_v41 = vld [vmem:[%s21708_s2 + $0x520] sm:$0xff] }
0x1020   :  { %v16000_v42 = vpop.f32.mrf.mxu0 }
0x1022   :  { %v2670_v0 = vpop.f32.mrf.mxu0 }
0x1028   :  { %v16003_v56 = vpop.f32.mrf.mxu0 }
0x102a   :  { %v2680_v58 = vpop.f32.mrf.mxu0 }
0x1030   :  { %v15986_v43 = vpop.f32.mrf.mxu1 }
0x1031   :  { %v2676_v44 = vadd.f32 %v16000_v42, %v15986_v43 }
0x1032   :  { %v2573_v49 = vpop.f32.mrf.mxu1 }
0x1033   :  { %v2690_v50 = vadd.f32 %v2676_v44, %v18580_v38  ;;  %v2671_v52 = vadd.f32 %v2670_v0, %v2573_v49 }
0x1034   :  { %v15989_v53 = vpop.f32.mrf.mxu1 }
0x1035   :  { %v18829_v3 = vadd.f32 %v2693_v46, %v2690_v50  ;;  %v2689_v54 = vadd.f32 %v2671_v52, %v18575_v35  ;;  %v2686_v28 = vadd.f32 %v16003_v56, %v15989_v53 }
0x1036   :  { %v2583_v57 = vpop.f32.mrf.mxu1 }
0x1037   :  { %v2681_v12 = vadd.f32 %v2680_v58, %v2583_v57  ;;  %v2703_v14 = vsel %vm413_vm0, %v18829_v3, 0.0  ;;  %v18834_v11 = vadd.f32 %v2693_v46, %v2689_v54  ;;  %v2692_v60 = vadd.f32 %v2686_v28, %v18590_v48 }
0x1038   :  { %2704 = vadd.xlane.f32.xlu1 %v2703_v14 }
0x1039   :  { %v2691_v38 = vadd.f32 %v2681_v12, %v18585_v45  ;;  %v2700_v59 = vsel %vm413_vm0, %v18834_v11, 0.0  ;;  %v18842_v35 = vadd.f32 %v2693_v46, %v2692_v60  ;;  %v2698_v60 = vld [vmem:[%s21708_s2 + $0xb0] ss:$0 sm:$0xff] }
0x103a   :  { %2701 = vadd.xlane.f32.xlu0 %v2700_v59 }
0x103b   :  { %v18840_v61 = vadd.f32 %v2693_v46, %v2691_v38  ;;  %v2709_v39 = vsel %vm413_vm0, %v18842_v35, 0.0 }
0x103d   :  { %v2706_v63 = vsel %vm413_vm0, %v18840_v61, 0.0 }
0x103e   :  { %2707 = vadd.xlane.f32.xlu0 %v2706_v63  ;;  %v2699_v63 = vld [vmem:[%s21708_s2 + $0x90] ss:$0 sm:$0xff] }
0x1042   :  { %2710 = vadd.xlane.f32.xlu0 %v2709_v39 }
0x10c1   :  { %v2705_v2 = vpop.xlane.xlu1 %2704 }
0x10c2   :  { %v2713_v48 = vmul.f32 0.015625, %v2705_v2 }
0x10c3   :  { %v2702_v26 = vpop.xlane.xlu0 %2701 }
0x10c4   :  { %v18849_v45 = vsub.f32 %v18829_v3, %v2713_v48  ;;  %v2712_v4 = vmul.f32 0.015625, %v2702_v26 }
0x10c6   :  { %v18852_v51 = vsub.f32 %v18834_v11, %v2712_v4  ;;  %v2721_v30 = vmul.f32 %v18849_v45, %v18849_v45 }
0x10c7   :  { %v2708_v47 = vpop.xlane.xlu0 %2707 }
0x10c8   :  { %v2714_v23 = vmul.f32 0.015625, %v2708_v47  ;;  %v2727_v5 = vsel %vm413_vm0, %v2721_v30, 0.0  ;;  %v2720_v7 = vmul.f32 %v18852_v51, %v18852_v51 }
0x10c9   :  { %2728 = vadd.xlane.f32.xlu1 %v2727_v5  ;;  %v2993_v5 = vld [vmem:[%s21708_s2 + $0x5f0] sm:$0xff] }
0x10ca   :  { %v18860_v8 = vsub.f32 %v18840_v61, %v2714_v23  ;;  %v2724_v9 = vsel %vm413_vm0, %v2720_v7, 0.0  ;;  %15121 = vmatprep.subr.mxu0 %v2993_v5  ;;  %v2977_v7 = vld [vmem:[%s21708_s2 + $0x4f0] sm:$0xff] }
0x10cb   :  { %2725 = vadd.xlane.f32.xlu0 %v2724_v9  ;;  %v2711_v10 = vpop.xlane.xlu0 %2710  ;;  %15122 = vmatpush3.msra.mxu0 %v2977_v7  ;;  %v2976_v9 = vld [vmem:[%s21708_s2 + $0x4e0] sm:$0xff] }
0x10cc   :  { %v2715_v15 = vmul.f32 0.015625, %v2711_v10  ;;  %v2722_v55 = vmul.f32 %v18860_v8, %v18860_v8  ;;  %v2991_v10 = vld [vmem:[%s21708_s2 + $0x5d0] sm:$0xff] }
0x10ce   :  { %v18866_v16 = vsub.f32 %v18842_v35, %v2715_v15  ;;  %v2730_v18 = vsel %vm413_vm0, %v2722_v55, 0.0  ;;  %v2975_v15 = vld [vmem:[%s21708_s2 + $0x4d0] sm:$0xff]  ;;  %v2990_v55 = vld [vmem:[%s21708_s2 + $0x5c0] sm:$0xff] }
0x10cf   :  { %2731 = vadd.xlane.f32.xlu0 %v2730_v18  ;;  %v2989_v18 = vld [vmem:[%s21708_s2 + $0x5b0] sm:$0xff] }
0x10d0   :  { %v2723_v19 = vmul.f32 %v18866_v16, %v18866_v16 }
0x10d2   :  { %v2733_v20 = vsel %vm413_vm0, %v2723_v19, 0.0  ;;  %v2973_v19 = vld [vmem:[%s21708_s2 + $0x4b0] sm:$0xff] }
0x10d3   :  { %2734 = vadd.xlane.f32.xlu1 %v2733_v20  ;;  %v2988_v20 = vld [vmem:[%s21708_s2 + $0x5a0] sm:$0xff] }
0x1152   :  { %v2729_v42 = vpop.xlane.xlu1 %2728 }
0x1153   :  { %v2737_v0 = vmul.f32 0.015625, %v2729_v42  ;;  %v2964_v42 = vld [vmem:[%s21708_s2 + $0x420] sm:$0xff] }
0x1154   :  { %v2726_v43 = vpop.xlane.xlu0 %2725 }
0x1155   :  { %v2741_v44 = vadd.f32 1e-06, %v2737_v0  ;;  %v2736_v56 = vmul.f32 0.015625, %v2726_v43  ;;  %v2979_v0 = vld [vmem:[%s21708_s2 + $0x510] sm:$0xff] }
0x1156   :  { %v2963_v43 = vld [vmem:[%s21708_s2 + $0x410] sm:$0xff] }
0x1157   :  { %17335 = vrsqrt.f32 %v2741_v44  ;;  %v2740_v46 = vadd.f32 1e-06, %v2736_v56  ;;  %v2978_v44 = vld [vmem:[%s21708_s2 + $0x500] sm:$0xff] }
0x1158   :  { %v2732_v49 = vpop.xlane.xlu0 %2731  ;;  %v2962_v56 = vld [vmem:[%s21708_s2 + $0x400] sm:$0xff] }
0x1159   :  { %17337 = vrsqrt.f32 %v2740_v46  ;;  %v2738_v50 = vmul.f32 0.015625, %v2732_v49  ;;  %v3095_v46 = vld [vmem:[%s21708_s2 + $0x8b0] sm:$0xff]  ;;  %v3094_v49 = vld [vmem:[%s21708_s2 + $0x8a0] sm:$0xff] }
0x115a   :  { %16004 = vmatprep.subr.mxu1 %v3095_v46 }
0x115b   :  { %v2742_v52 = vadd.f32 1e-06, %v2738_v50  ;;  %v14419_v50 = vld [vmem:[%s21708_s2 + $0xd0] ss:$8 sm:$0x3] }
0x115c   :  { %v2735_v53 = vpop.xlane.xlu1 %2734 }
0x115d   :  { %17339 = vrsqrt.f32 %v2742_v52  ;;  %v2739_v54 = vmul.f32 0.015625, %v2735_v53  ;;  %v2782_v52 = vrot.slane %v14419_v50, %v18159_v62  ;;  %v2786_v53 = vrot.slane %v14419_v50, %v18186_v17 }
0x115f   :  { %v2743_v28 = vadd.f32 1e-06, %v2739_v54 }
0x1161   :  { %17341 = vrsqrt.f32 %v2743_v28 }
0x1164   :  { %v17336_v58 = vpop.eup %17335 }
0x1165   :  { %v2749_v14 = vmul.f32 %v17336_v58, %v18849_v45 }
0x1166   :  { %v17338_v57 = vpop.eup %17337 }
0x1167   :  { %v2748_v12 = vmul.f32 %v17338_v57, %v18852_v51  ;;  %v2753_v2 = vmul.f32 %v2749_v14, %v2698_v60 }
0x1169   :  { %v2752_v38 = vmul.f32 %v2748_v12, %v2698_v60  ;;  %v2757_v45 = vadd.f32 %v2753_v2, %v2699_v63 }
0x116a   :  { %v17340_v59 = vpop.eup %17339 }
0x116b   :  { %v2756_v39 = vadd.f32 %v2752_v38, %v2699_v63  ;;  %v2750_v48 = vmul.f32 %v17340_v59, %v18860_v8  ;;  %v2992_v8 = vld [vmem:[%s21708_s2 + $0x5e0] sm:$0xff] }
0x116c   :  { %15123 = vmatprep.subr.mxu0 %v2992_v8 }
0x116d   :  { %14420 = vmatmul.mubr.msk.f32.vlgmr.msra.gmra.mxu1 %vm413_vm0, %v2756_v39  ;;  %v2754_v4 = vmul.f32 %v2750_v48, %v2698_v60  ;;  %15124 = vmatpush3.msra.mxu0 %v2976_v9 }
0x116e   :  { %v17342_v26 = vpop.eup %17341  ;;  %2871 = vmatprep.mubr.f32.mxu1 %v17631_v25  ;;  %15125 = vmatprep.subr.mxu0 %v2991_v10 }
0x116f   :  { %v2751_v51 = vmul.f32 %v17342_v26, %v18866_v16  ;;  %v2758_v30 = vadd.f32 %v2754_v4, %v2699_v63  ;;  %15126 = vmatpush3.msra.mxu0 %v2975_v15  ;;  %v2974_v16 = vld [vmem:[%s21708_s2 + $0x4c0] sm:$0xff]  ;;  %16005 = vmatpush3.msra.mxu1 %v3095_v46 }
0x1170   :  { %15127 = vmatprep.subr.mxu0 %v2990_v55  ;;  %16006 = vmatprep.subr.mxu1 %v3094_v49 }
0x1171   :  { %14421 = vmatmul.mubr.msk.f32.gmra.mxu1 %vm413_vm0, %v2757_v45  ;;  %v2755_v47 = vmul.f32 %v2751_v51, %v2698_v60  ;;  %15128 = vmatpush3.msra.mxu0 %v2974_v16 }
0x1172   :  { %2877 = vmatprep.mubr.f32.mxu1 %v17631_v25  ;;  %15129 = vmatprep.subr.mxu0 %v2989_v18 }
0x1173   :  { %v2759_v23 = vadd.f32 %v2755_v47, %v2699_v63  ;;  %15130 = vmatpush3.msra.mxu0 %v2973_v19  ;;  %16007 = vmatpush3.msra.mxu1 %v3094_v49 }
0x1174   :  { %15131 = vmatprep.subr.mxu0 %v2988_v20 }
0x1175   :  { %14422 = vmatmul.mubr.msk.f32.gmra.mxu1 %vm413_vm0, %v2758_v30  ;;  %15132 = vmatpush3.msra.mxu0 %v2972_v27 }
0x1176   :  { %2883 = vmatprep.mubr.f32.mxu1 %v17631_v25  ;;  %15133 = vmatprep.subr.mxu0 %v2987_v1 }
0x1177   :  { %15134 = vmatpush3.msra.mxu0 %v2971_v22 }
0x1178   :  { %15135 = vmatprep.subr.mxu0 %v2986_v24 }
0x1179   :  { %14423 = vmatmul.mubr.msk.f32.gmra.mxu1 %vm413_vm0, %v2759_v23  ;;  %15136 = vmatpush3.msra.mxu0 %v2970_v29 }
0x117a   :  { %15137 = vmatprep.subr.mxu0 %v2985_v32 }
0x117b   :  { %15138 = vmatpush3.msra.mxu0 %v2969_v33 }
0x117c   :  { %15139 = vmatprep.subr.mxu0 %v2984_v13 }
0x117d   :  { %15140 = vmatpush3.msra.mxu0 %v2968_v6 }
0x117e   :  { %15141 = vmatprep.subr.mxu0 %v2983_v34 }
0x117f   :  { %15142 = vmatpush3.msra.mxu0 %v2967_v31 }
0x1180   :  { %15143 = vmatprep.subr.mxu0 %v2982_v36 }
0x1181   :  { %15144 = vmatpush3.msra.mxu0 %v2966_v21 }
0x1182   :  { %15145 = vmatprep.subr.mxu0 %v2981_v37 }
0x1183   :  { %15146 = vmatpush3.msra.mxu0 %v2965_v40 }
0x1184   :  { %15147 = vmatprep.subr.mxu0 %v2980_v41 }
0x1185   :  { %15148 = vmatpush3.msra.mxu0 %v2964_v42 }
0x1186   :  { %15149 = vmatprep.subr.mxu0 %v2979_v0 }
0x1187   :  { %15150 = vmatpush3.msra.mxu0 %v2963_v43 }
0x1188   :  { %15151 = vmatprep.subr.mxu0 %v2978_v44 }
0x1189   :  { %15152 = vmatpush3.msra.mxu0 %v2962_v56 }
0x122d   :  { %v2867_v54 = vpop.f32.mrf.mxu1 }
0x122e   :  { %v19044_v28 = vadd.f32 %v2867_v54, %v2782_v52 }
0x122f   :  { %v2869_v58 = vpop.f32.mrf.mxu1 }
0x1230   :  { %v2890_v57 = vmul.f32 %v19044_v28, %v19044_v28  ;;  %v19048_v12 = vadd.f32 %v2869_v58, %v2786_v53 }
0x1231   :  { %v2873_v14 = vpop.f32.mrf.mxu1 }
0x1232   :  { %v2898_v60 = vmul.f32 %v2890_v57, %v19044_v28  ;;  %v2891_v38 = vmul.f32 %v19048_v12, %v19048_v12  ;;  %v19053_v59 = vadd.f32 %v2873_v14, %v2782_v52 }
0x1233   :  { %v2875_v63 = vpop.f32.mrf.mxu1 }
0x1234   :  { %v2906_v39 = vmul.f32 0.044715, %v2898_v60  ;;  %v2899_v2 = vmul.f32 %v2891_v38, %v19048_v12  ;;  %v2892_v48 = vmul.f32 %v19053_v59, %v19053_v59  ;;  %v19058_v26 = vadd.f32 %v2875_v63, %v2786_v53 }
0x1235   :  { %v2879_v45 = vpop.f32.mrf.mxu1 }
0x1236   :  { %v2914_v4 = vadd.f32 %v2906_v39, %v19044_v28  ;;  %v2907_v51 = vmul.f32 0.044715, %v2899_v2  ;;  %v2900_v30 = vmul.f32 %v2892_v48, %v19053_v59  ;;  %v2893_v47 = vmul.f32 %v19058_v26, %v19058_v26 }
0x1237   :  { %v19064_v23 = vadd.f32 %v2879_v45, %v2782_v52  ;;  %v2881_v5 = vpop.f32.mrf.mxu1 }
0x1238   :  { %v2922_v7 = vmul.f32 0.7978846, %v2914_v4  ;;  %v2915_v8 = vadd.f32 %v2907_v51, %v19048_v12  ;;  %v2908_v9 = vmul.f32 0.044715, %v2900_v30  ;;  %v2901_v10 = vmul.f32 %v2893_v47, %v19058_v26 }
0x1239   :  { %v2894_v15 = vmul.f32 %v19064_v23, %v19064_v23  ;;  %v19070_v55 = vadd.f32 %v2881_v5, %v2786_v53  ;;  %v2885_v16 = vpop.f32.mrf.mxu1 }
0x123a   :  { %17343 = vtanh.f32 %v2922_v7  ;;  %v2923_v18 = vmul.f32 0.7978846, %v2915_v8  ;;  %v2916_v19 = vadd.f32 %v2908_v9, %v19053_v59  ;;  %v2909_v20 = vmul.f32 0.044715, %v2901_v10 }
0x123b   :  { %v2902_v27 = vmul.f32 %v2894_v15, %v19064_v23  ;;  %v2895_v1 = vmul.f32 %v19070_v55, %v19070_v55  ;;  %v19076_v22 = vadd.f32 %v2885_v16, %v2782_v52  ;;  %v2887_v24 = vpop.f32.mrf.mxu1 }
0x123c   :  { %v2924_v29 = vmul.f32 0.7978846, %v2916_v19  ;;  %v2917_v32 = vadd.f32 %v2909_v20, %v19058_v26  ;;  %v2888_v33 = vadd.f32 %v2887_v24, %v2786_v53  ;;  %17345 = vtanh.f32 %v2923_v18  ;;  %v3093_v24 = vld [vmem:[%s21708_s2 + $0x890] sm:$0xff] }
0x123d   :  { %v2910_v13 = vmul.f32 0.044715, %v2902_v27  ;;  %v2903_v6 = vmul.f32 %v2895_v1, %v19070_v55  ;;  %v2896_v34 = vmul.f32 %v19076_v22, %v19076_v22  ;;  %16008 = vmatprep.subr.mxu1 %v3093_v24 }
0x123e   :  { %17347 = vtanh.f32 %v2924_v29  ;;  %v2925_v31 = vmul.f32 0.7978846, %v2917_v32  ;;  %v2897_v36 = vmul.f32 %v2888_v33, %v2888_v33  ;;  %16009 = vmatpush3.msra.mxu1 %v3093_v24  ;;  %v3089_v29 = vld [vmem:[%s21708_s2 + $0x850] sm:$0xff]  ;;  %v3088_v32 = vld [vmem:[%s21708_s2 + $0x840] sm:$0xff] }
0x123f   :  { %v2918_v21 = vadd.f32 %v2910_v13, %v19064_v23  ;;  %v2911_v37 = vmul.f32 0.044715, %v2903_v6  ;;  %v2904_v40 = vmul.f32 %v2896_v34, %v19076_v22  ;;  %v3083_v34 = vld [vmem:[%s21708_s2 + $0x1f0] ss:$0 sm:$0xff] }
0x1240   :  { %v2905_v41 = vmul.f32 %v2897_v36, %v2888_v33  ;;  %17349 = vtanh.f32 %v2925_v31 }
0x1241   :  { %v2926_v42 = vmul.f32 0.7978846, %v2918_v21  ;;  %v2919_v0 = vadd.f32 %v2911_v37, %v19070_v55  ;;  %v2912_v43 = vmul.f32 0.044715, %v2904_v40 }
0x1242   :  { %v2913_v44 = vmul.f32 0.044715, %v2905_v41 }
0x1243   :  { %17351 = vtanh.f32 %v2926_v42  ;;  %v2927_v56 = vmul.f32 0.7978846, %v2919_v0  ;;  %v2920_v46 = vadd.f32 %v2912_v43, %v19076_v22 }
0x1244   :  { %v2921_v49 = vadd.f32 %v2913_v44, %v2888_v33 }
0x1245   :  { %v2928_v50 = vmul.f32 0.7978846, %v2920_v46  ;;  %17353 = vtanh.f32 %v2927_v56 }
0x1246   :  { %v2929_v52 = vmul.f32 0.7978846, %v2921_v49 }
0x1247   :  { %v17344_v53 = vpop.eup %17343  ;;  %17355 = vtanh.f32 %v2928_v50 }
0x1248   :  { %v2938_v54 = vadd.f32 1.0, %v17344_v53  ;;  %17357 = vtanh.f32 %v2929_v52 }
0x1249   :  { %v17346_v58 = vpop.eup %17345 }
0x124a   :  { %v2939_v57 = vadd.f32 1.0, %v17346_v58  ;;  %v2946_v60 = vmul.f32 0.5, %v2938_v54 }
0x124b   :  { %v17348_v14 = vpop.eup %17347 }
0x124c   :  { %v2947_v38 = vmul.f32 0.5, %v2939_v57  ;;  %v2940_v63 = vadd.f32 1.0, %v17348_v14  ;;  %v2954_v45 = vmul.f32 %v2946_v60, %v19044_v28 }
0x124d   :  { %v17350_v39 = vpop.eup %17349 }
0x124e   :  { %v2955_v2 = vmul.f32 %v2947_v38, %v19048_v12  ;;  %v2941_v48 = vadd.f32 1.0, %v17350_v39  ;;  %v2948_v4 = vmul.f32 0.5, %v2940_v63 }
0x1250   :  { %v17352_v51 = vpop.eup %17351  ;;  %3058 = vmatprep.mubr.f32.mxu0 %v2955_v2  ;;  %v2949_v30 = vmul.f32 0.5, %v2941_v48  ;;  %v2956_v8 = vmul.f32 %v2948_v4, %v19053_v59 }
0x1251   :  { %3059 = vmatmul.mubr.f32.vlgmr.msra.gmra.mxu0 %v2954_v45  ;;  %v2942_v47 = vadd.f32 1.0, %v17352_v51 }
0x1252   :  { %v17354_v5 = vpop.eup %17353  ;;  %v2957_v7 = vmul.f32 %v2949_v30, %v19058_v26 }
0x1253   :  { %v2943_v9 = vadd.f32 1.0, %v17354_v5  ;;  %v2950_v15 = vmul.f32 0.5, %v2942_v47 }
0x1254   :  { %v17356_v10 = vpop.eup %17355  ;;  %3063 = vmatprep.mubr.f32.mxu0 %v2957_v7 }
0x1255   :  { %v17358_v16 = vpop.eup %17357  ;;  %3064 = vmatmul.mubr.f32.gmra.mxu0 %v2956_v8  ;;  %v2951_v12 = vmul.f32 0.5, %v2943_v9  ;;  %v2944_v18 = vadd.f32 1.0, %v17356_v10  ;;  %v2958_v20 = vmul.f32 %v2950_v15, %v19064_v23  ;;  %v3091_v23 = vld [vmem:[%s21708_s2 + $0x870] sm:$0xff] }
0x1256   :  { %v2945_v28 = vadd.f32 1.0, %v17358_v16 }
0x1257   :  { %v2959_v19 = vmul.f32 %v2951_v12, %v19070_v55  ;;  %v2952_v1 = vmul.f32 0.5, %v2944_v18  ;;  %v3092_v55 = vld [vmem:[%s21708_s2 + $0x880] sm:$0xff] }
0x1258   :  { %v2953_v27 = vmul.f32 0.5, %v2945_v28  ;;  %16010 = vmatprep.subr.mxu1 %v3092_v55 }
0x1259   :  { %3068 = vmatprep.mubr.f32.mxu0 %v2959_v19  ;;  %v2960_v59 = vmul.f32 %v2952_v1, %v19076_v22  ;;  %16011 = vmatpush3.msra.mxu1 %v3092_v55  ;;  %v3090_v22 = vld [vmem:[%s21708_s2 + $0x860] sm:$0xff] }
0x125a   :  { %3069 = vmatmul.mubr.f32.gmra.mxu0 %v2958_v20  ;;  %v2961_v26 = vmul.f32 %v2953_v27, %v2888_v33  ;;  %16012 = vmatprep.subr.mxu1 %v3091_v23  ;;  %v3256_v19 = vld [vmem:[%s21708_s2 + $0xb40] sm:$0xff]  ;;  %v17635_v27 = vmov 0  }
0x125b   :  { %16013 = vmatpush3.msra.mxu1 %v3091_v23  ;;  %v4659_v20 = vld [vmem:[%s21710_s4] sm:$0x3]  ;;  %17230 = vset.pattern.permute.xlu0 %v17635_v27  ;;  %v3287_v27 = vld [vmem:[%s21708_s2 + $0xd30] sm:$0xff] }
0x125c   :  { %3073 = vmatprep.mubr.f32.mxu0 %v2961_v26  ;;  %16014 = vmatprep.subr.mxu1 %v3090_v22 }
0x125d   :  { %16015 = vmatpush3.msra.mxu1 %v3090_v22 }
0x125e   :  { %3074 = vmatmul.mubr.f32.gmra.mxu0 %v2960_v59  ;;  %16016 = vmatprep.subr.mxu1 %v3089_v29 }
0x125f   :  { %16017 = vmatpush3.msra.mxu1 %v3089_v29 }
0x1260   :  { %16018 = vmatprep.subr.mxu1 %v3088_v32 }
0x1261   :  { %16019 = vmatpush3.msra.mxu1 %v3088_v32 }
0x1311   :  { %v15153_v33 = vpop.f32.mrf.mxu0 }
0x1313   :  { %v15154_v13 = vpop.f32.mrf.mxu0 }
0x1314   :  { %v15155_v6 = vadd.f32 %v15154_v13, %v15153_v33 }
0x1315   :  { %v15156_v31 = vpop.f32.mrf.mxu0 }
0x1316   :  { %v3079_v36 = vadd.f32 %v15155_v6, %v18834_v11 }
0x1317   :  { %v15157_v21 = vpop.f32.mrf.mxu0 }
0x1318   :  { %v3084_v37 = vadd.f32 %v3083_v34, %v3079_v36  ;;  %v15158_v40 = vadd.f32 %v15157_v21, %v15156_v31  ;;  %v3193_v31 = vld [vmem:[%s21708_s2 + $0xb10] ss:$0 sm:$0xff] }
0x131a   :  { %v3080_v41 = vadd.f32 %v15158_v40, %v18829_v3  ;;  %v15159_v42 = vpop.f32.mrf.mxu0  ;;  %16020 = vmatprep.mubr.msk.f32.mxu1 %vm413_vm0, %v3084_v37  ;;  %v3194_v37 = vld [vmem:[%s21708_s2 + $0xb00] ss:$0 sm:$0xff] }
0x131c   :  { %v3085_v0 = vadd.f32 %v3083_v34, %v3080_v41  ;;  %v15160_v43 = vpop.f32.mrf.mxu0 }
0x131d   :  { %v15161_v44 = vadd.f32 %v15160_v43, %v15159_v42 }
0x131e   :  { %v15162_v56 = vpop.f32.mrf.mxu0  ;;  %16021 = vmatmul.mubr.msk.f32.vlgmr.msra.gmra.mxu1 %vm413_vm0, %v3085_v0 }
0x131f   :  { %v3081_v46 = vadd.f32 %v15161_v44, %v18840_v61 }
0x1320   :  { %v15163_v49 = vpop.f32.mrf.mxu0 }
0x1321   :  { %v3086_v50 = vadd.f32 %v3083_v34, %v3081_v46  ;;  %v15164_v52 = vadd.f32 %v15163_v49, %v15162_v56 }
0x1323   :  { %v3082_v11 = vadd.f32 %v15164_v52, %v18842_v35  ;;  %16023 = vmatprep.mubr.msk.f32.mxu1 %vm413_vm0, %v3086_v50 }
0x1325   :  { %v3087_v53 = vadd.f32 %v3083_v34, %v3082_v11 }
0x1327   :  { %16024 = vmatmul.mubr.msk.f32.gmra.mxu1 %vm413_vm0, %v3087_v53 }
0x1328   :  { %16034 = vmatprep.mubr.msk.f32.mxu1 %vm625_vm1, %v3256_v19  ;;  %v3285_v19 = vld [vmem:[%s21708_s2 + $0xd10] sm:$0xff] }
0x13de   :  { %v16022_v3 = vpop.f32.mrf.mxu1 }
0x13df   :  { %v3198_v61 = vsel %vm625_vm1, %v16022_v3, 0.0 }
0x13e0   :  { %v3174_v54 = vpop.f32.mrf.mxu1 }
0x13e1   :  { %v3195_v35 = vsel %vm625_vm1, %v3174_v54, 0.0 }
0x13e7   :  { %v16025_v58 = vpop.f32.mrf.mxu1 }
0x13e8   :  { %v3204_v57 = vsel %vm625_vm1, %v16025_v58, 0.0 }
0x13e9   :  { %3205 = vadd.xlane.f32.xlu0 %v3204_v57  ;;  %v3184_v14 = vpop.f32.mrf.mxu1  ;;  %v3260_v57 = vld [vmem:[%s21708_s2 + $0xb80] sm:$0xff] }
0x13ea   :  { %v3201_v60 = vsel %vm625_vm1, %v3184_v14, 0.0 }
0x13eb   :  { %3202 = vadd.xlane.f32.xlu1 %v3201_v60  ;;  %v3262_v60 = vld [vmem:[%s21708_s2 + $0xba0] sm:$0xff] }
0x13ed   :  { %3199 = vadd.xlane.f32.xlu0 %v3198_v61  ;;  %v3263_v61 = vld [vmem:[%s21708_s2 + $0xbb0] sm:$0xff] }
0x13ef   :  { %3196 = vadd.xlane.f32.xlu1 %v3195_v35  ;;  %v3264_v35 = vld [vmem:[%s21708_s2 + $0xbc0] sm:$0xff] }
0x1472   :  { %v3206_v38 = vpop.xlane.xlu0 %3205 }
0x1473   :  { %v3211_v63 = vmul.f32 0.03125, %v3206_v38  ;;  %v3265_v38 = vld [vmem:[%s21708_s2 + $0xbd0] sm:$0xff] }
0x1474   :  { %v3203_v39 = vpop.xlane.xlu1 %3202 }
0x1475   :  { %v3215_v2 = vsub.f32 %v16025_v58, %v3211_v63  ;;  %v3210_v48 = vmul.f32 0.03125, %v3203_v39  ;;  %v3259_v58 = vld [vmem:[%s21708_s2 + $0xb70] sm:$0xff]  ;;  %v3266_v63 = vld [vmem:[%s21708_s2 + $0xbe0] sm:$0xff] }
0x1476   :  { %v3200_v45 = vpop.xlane.xlu0 %3199  ;;  %v3267_v39 = vld [vmem:[%s21708_s2 + $0xbf0] sm:$0xff] }
0x1477   :  { %v3214_v4 = vsub.f32 %v3184_v14, %v3210_v48  ;;  %v3209_v51 = vmul.f32 0.03125, %v3200_v45  ;;  %v3219_v30 = vmul.f32 %v3215_v2, %v3215_v2  ;;  %v3261_v14 = vld [vmem:[%s21708_s2 + $0xb90] sm:$0xff]  ;;  %v3270_v45 = vld [vmem:[%s21708_s2 + $0xc20] sm:$0xff] }
0x1478   :  { %v3197_v47 = vpop.xlane.xlu1 %3196  ;;  %v3269_v48 = vld [vmem:[%s21708_s2 + $0xc10] sm:$0xff] }
0x1479   :  { %v3213_v5 = vsub.f32 %v16022_v3, %v3209_v51  ;;  %v3208_v7 = vmul.f32 0.03125, %v3197_v47  ;;  %v3229_v8 = vsel %vm625_vm1, %v3219_v30, 0.0  ;;  %v3218_v9 = vmul.f32 %v3214_v4, %v3214_v4  ;;  %v3257_v3 = vld [vmem:[%s21708_s2 + $0xb50] sm:$0xff]  ;;  %v3272_v51 = vld [vmem:[%s21708_s2 + $0xc40] sm:$0xff] }
0x147a   :  { %3230 = vadd.xlane.f32.xlu0 %v3229_v8  ;;  %v3273_v30 = vld [vmem:[%s21708_s2 + $0xc50] sm:$0xff]  ;;  %v3274_v47 = vld [vmem:[%s21708_s2 + $0xc60] sm:$0xff] }
0x147b   :  { %v3212_v10 = vsub.f32 %v3174_v54, %v3208_v7  ;;  %v3226_v15 = vsel %vm625_vm1, %v3218_v9, 0.0  ;;  %v3217_v16 = vmul.f32 %v3213_v5, %v3213_v5  ;;  %v3258_v54 = vld [vmem:[%s21708_s2 + $0xb60] sm:$0xff]  ;;  %v3277_v8 = vld [vmem:[%s21708_s2 + $0xc90] sm:$0xff] }
0x147c   :  { %3227 = vadd.xlane.f32.xlu1 %v3226_v15  ;;  %v3276_v7 = vld [vmem:[%s21708_s2 + $0xc80] sm:$0xff] }
0x147d   :  { %v3223_v12 = vsel %vm625_vm1, %v3217_v16, 0.0  ;;  %v3216_v18 = vmul.f32 %v3212_v10, %v3212_v10  ;;  %v3278_v9 = vld [vmem:[%s21708_s2 + $0xca0] sm:$0xff]  ;;  %v3281_v16 = vld [vmem:[%s21708_s2 + $0xcd0] sm:$0xff] }
0x147e   :  { %3224 = vadd.xlane.f32.xlu0 %v3223_v12  ;;  %v3280_v15 = vld [vmem:[%s21708_s2 + $0xcc0] sm:$0xff] }
0x147f   :  { %v3220_v28 = vsel %vm625_vm1, %v3216_v18, 0.0  ;;  %v3282_v12 = vld [vmem:[%s21708_s2 + $0xce0] sm:$0xff]  ;;  %v3283_v18 = vld [vmem:[%s21708_s2 + $0xcf0] sm:$0xff] }
0x1480   :  { %3221 = vadd.xlane.f32.xlu1 %v3220_v28  ;;  %v3284_v28 = vld [vmem:[%s21708_s2 + $0xd00] sm:$0xff] }
0x1494   :  { %4663 = vperm.xlu0 %17230, %v4659_v20   ;;  %v3286_v20 = vld [vmem:[%s21708_s2 + $0xd20] sm:$0xff] }
0x1503   :  { %v3231_v1 = vpop.xlane.xlu0 %3230 }
0x1504   :  { %v3235_v26 = vmul.f32 0.03125, %v3231_v1  ;;  %v3288_v1 = vld [vmem:[%s21708_s2 + $0xd40] sm:$0xff] }
0x1505   :  { %v3228_v59 = vpop.xlane.xlu1 %3227 }
0x1506   :  { %v3239_v24 = vadd.f32 1e-06, %v3235_v26  ;;  %v3234_v55 = vmul.f32 0.03125, %v3228_v59  ;;  %v3289_v26 = vld [vmem:[%s21708_s2 + $0xd50] sm:$0xff]  ;;  %v3290_v59 = vld [vmem:[%s21708_s2 + $0xd60] sm:$0xff] }
0x1507   :  { %v3225_v23 = vpop.xlane.xlu0 %3224 }
0x1508   :  { %17359 = vrsqrt.f32 %v3239_v24  ;;  %v3238_v22 = vadd.f32 1e-06, %v3234_v55  ;;  %v3233_v29 = vmul.f32 0.03125, %v3225_v23  ;;  %v3291_v24 = vld [vmem:[%s21708_s2 + $0xd70] sm:$0xff]  ;;  %v3651_v23 = vld [vmem:[%s21708_s2 + $0x920] sm:$0xff] }
0x1509   :  { %v3222_v32 = vpop.xlane.xlu1 %3221  ;;  %v3652_v55 = vld [vmem:[%s21708_s2 + $0x930] sm:$0xff] }
0x150a   :  { %17361 = vrsqrt.f32 %v3238_v22  ;;  %v3237_v33 = vadd.f32 1e-06, %v3233_v29  ;;  %v3232_v13 = vmul.f32 0.03125, %v3222_v32  ;;  %16088 = vmatprep.subr.mxu0 %v3652_v55  ;;  %v3650_v22 = vld [vmem:[%s21708_s2 + $0x910] sm:$0xff]  ;;  %v3649_v29 = vld [vmem:[%s21708_s2 + $0x900] sm:$0xff] }
0x150b   :  { %16089 = vmatpush3.msra.mxu0 %v3652_v55  ;;  %v3648_v32 = vld [vmem:[%s21708_s2 + $0x8f0] sm:$0xff] }
0x150c   :  { %17363 = vrsqrt.f32 %v3237_v33  ;;  %v3236_v6 = vadd.f32 1e-06, %v3232_v13  ;;  %16090 = vmatprep.subr.mxu0 %v3651_v23  ;;  %v4480_v33 = vld [vmem:[%s21708_s2 + $0xaf0] sm:$0xff]  ;;  %v4479_v13 = vld [vmem:[%s21708_s2 + $0xae0] sm:$0xff] }
0x150d   :  { %16091 = vmatpush3.msra.mxu0 %v3651_v23  ;;  %v4375_v55 = vld [vmem:[%s21708_s2 + $0xab0] sm:$0xff] }
0x150e   :  { %17365 = vrsqrt.f32 %v3236_v6  ;;  %16092 = vmatprep.subr.mxu0 %v3650_v22  ;;  %v4478_v6 = vld [vmem:[%s21708_s2 + $0xad0] sm:$0xff] }
0x150f   :  { %16093 = vmatpush3.msra.mxu0 %v3650_v22  ;;  %v4374_v22 = vld [vmem:[%s21708_s2 + $0xaa0] sm:$0xff] }
0x1510   :  { %16094 = vmatprep.subr.mxu0 %v3649_v29 }
0x1511   :  { %16095 = vmatpush3.msra.mxu0 %v3649_v29 }
0x1512   :  { %16102 = vmatprep.subr.mxu0 %v3648_v32 }
0x1515   :  { %v17360_v34 = vpop.eup %17359 }
0x1516   :  { %v3247_v36 = vmul.f32 %v17360_v34, %v3215_v2  ;;  %v3268_v2 = vld [vmem:[%s21708_s2 + $0xc00] sm:$0xff] }
0x1517   :  { %v17362_v21 = vpop.eup %17361  ;;  %v4477_v34 = vld [vmem:[%s21708_s2 + $0xac0] sm:$0xff] }
0x1518   :  { %v3251_v40 = vmul.f32 %v3247_v36, %v3193_v31  ;;  %v3246_v41 = vmul.f32 %v17362_v21, %v3214_v4  ;;  %v3271_v4 = vld [vmem:[%s21708_s2 + $0xc30] sm:$0xff] }
0x1519   :  { %v17364_v42 = vpop.eup %17363 }
0x151a   :  { %v3255_v0 = vadd.f32 %v3251_v40, %v3194_v37  ;;  %v3250_v43 = vmul.f32 %v3246_v41, %v3193_v31  ;;  %v3245_v44 = vmul.f32 %v17364_v42, %v3213_v5  ;;  %v3275_v5 = vld [vmem:[%s21708_s2 + $0xc70] sm:$0xff]  ;;  %v3647_v42 = vld [vmem:[%s21708_s2 + $0x8e0] sm:$0xff] }
0x151b   :  { %v17366_v56 = vpop.eup %17365 }
0x151c   :  { %16026 = vmatprep.subr.mxu1 %v3255_v0  ;;  %v3254_v46 = vadd.f32 %v3250_v43, %v3194_v37  ;;  %v3249_v49 = vmul.f32 %v3245_v44, %v3193_v31  ;;  %v3244_v50 = vmul.f32 %v17366_v56, %v3212_v10  ;;  %v3279_v10 = vld [vmem:[%s21708_s2 + $0xcb0] sm:$0xff]  ;;  %v3645_v56 = vld [vmem:[%s21708_s2 + $0x8c0] sm:$0xff] }
0x151d   :  { %16027 = vmatpush3.msra.mxu1 %v3255_v0  ;;  %v3646_v43 = vld [vmem:[%s21708_s2 + $0x8d0] sm:$0xff] }
0x151e   :  { %16028 = vmatprep.subr.mxu1 %v3254_v46  ;;  %v3253_v52 = vadd.f32 %v3249_v49, %v3194_v37  ;;  %v3248_v11 = vmul.f32 %v3244_v50, %v3193_v31  ;;  %v3850_v49 = vld [vmem:[%s21708_s2 + $0x970] sm:$0xff] }
0x151f   :  { %16029 = vmatpush3.msra.mxu1 %v3254_v46 }
0x1520   :  { %16030 = vmatprep.subr.mxu1 %v3253_v52  ;;  %v3252_v53 = vadd.f32 %v3248_v11, %v3194_v37 }
0x1521   :  { %16031 = vmatpush3.msra.mxu1 %v3253_v52  ;;  %v3849_v52 = vld [vmem:[%s21708_s2 + $0x960] sm:$0xff] }
0x1522   :  { %16032 = vmatprep.subr.mxu1 %v3252_v53 }
0x1523   :  { %16033 = vmatpush3.msra.mxu1 %v3252_v53  ;;  %v3848_v53 = vld [vmem:[%s21708_s2 + $0x950] sm:$0xff] }
0x1524   :  { %16035 = vmatmul.mubr.msk.f32.vlgmr.msra.gmra.mxu1 %vm625_vm1, %v3257_v3  ;;  %16200 = vmatprep.subr.mxu1 %v4480_v33 }
0x1525   :  { %16037 = vmatprep.mubr.msk.f32.mxu1 %vm625_vm1, %v3258_v54  ;;  %16201 = vmatpush3.msra.mxu1 %v4480_v33  ;;  %v3847_v54 = vld [vmem:[%s21708_s2 + $0x940] sm:$0xff] }
0x1526   :  { %16202 = vmatprep.subr.mxu1 %v4479_v13 }
0x1527   :  { %16203 = vmatpush3.msra.mxu1 %v4479_v13  ;;  %v4372_v13 = vld [vmem:[%s21708_s2 + $0xa80] sm:$0xff] }
0x1528   :  { %16038 = vmatmul.mubr.msk.f32.gmra.mxu1 %vm625_vm1, %v3259_v58  ;;  %16204 = vmatprep.subr.mxu1 %v4478_v6 }
0x1529   :  { %16040 = vmatprep.mubr.msk.f32.mxu1 %vm625_vm1, %v3260_v57  ;;  %16205 = vmatpush3.msra.mxu1 %v4478_v6  ;;  %v3955_v57 = vld [vmem:[%s21708_s2 + $0x9b0] sm:$0xff] }
0x152a   :  { %16206 = vmatprep.subr.mxu1 %v4477_v34 }
0x152b   :  { %16207 = vmatpush3.msra.mxu1 %v4477_v34 }
0x152c   :  { %16041 = vmatmul.mubr.msk.f32.gmra.mxu1 %vm625_vm1, %v3261_v14 }
0x152d   :  { %16043 = vmatprep.mubr.msk.f32.mxu1 %vm625_vm1, %v3262_v60  ;;  %v3954_v60 = vld [vmem:[%s21708_s2 + $0x9a0] sm:$0xff] }
0x1530   :  { %16044 = vmatmul.mubr.msk.f32.gmra.mxu1 %vm625_vm1, %v3263_v61 }
0x1531   :  { %16046 = vmatprep.mubr.msk.f32.mxu1 %vm625_vm1, %v3264_v35  ;;  %v3953_v35 = vld [vmem:[%s21708_s2 + $0x990] sm:$0xff] }
0x1534   :  { %16047 = vmatmul.mubr.msk.f32.gmra.mxu1 %vm625_vm1, %v3265_v38 }
0x1535   :  { %16049 = vmatprep.mubr.msk.f32.mxu1 %vm625_vm1, %v3266_v63  ;;  %v3952_v63 = vld [vmem:[%s21708_s2 + $0x980] sm:$0xff] }
0x1538   :  { %16050 = vmatmul.mubr.msk.f32.gmra.mxu1 %vm625_vm1, %v3267_v39 }
0x1539   :  { %16052 = vmatprep.mubr.msk.f32.mxu1 %vm625_vm1, %v3268_v2  ;;  %v4060_v2 = vld [vmem:[%s21708_s2 + $0x9f0] sm:$0xff] }
0x153c   :  { %16053 = vmatmul.mubr.msk.f32.gmra.mxu1 %vm625_vm1, %v3269_v48 }
0x153d   :  { %16055 = vmatprep.mubr.msk.f32.mxu1 %vm625_vm1, %v3270_v45  ;;  %v4059_v45 = vld [vmem:[%s21708_s2 + $0x9e0] sm:$0xff] }
0x1540   :  { %16056 = vmatmul.mubr.msk.f32.gmra.mxu1 %vm625_vm1, %v3271_v4 }
0x1541   :  { %16058 = vmatprep.mubr.msk.f32.mxu1 %vm625_vm1, %v3272_v51  ;;  %v4058_v51 = vld [vmem:[%s21708_s2 + $0x9d0] sm:$0xff] }
0x1544   :  { %16059 = vmatmul.mubr.msk.f32.gmra.mxu1 %vm625_vm1, %v3273_v30 }
0x1545   :  { %16061 = vmatprep.mubr.msk.f32.mxu1 %vm625_vm1, %v3274_v47  ;;  %v4057_v47 = vld [vmem:[%s21708_s2 + $0x9c0] sm:$0xff] }
0x1548   :  { %16062 = vmatmul.mubr.msk.f32.gmra.mxu1 %vm625_vm1, %v3275_v5 }
0x1549   :  { %16064 = vmatprep.mubr.msk.f32.mxu1 %vm625_vm1, %v3276_v7  ;;  %v4165_v7 = vld [vmem:[%s21708_s2 + $0xa30] sm:$0xff] }
0x154c   :  { %16065 = vmatmul.mubr.msk.f32.gmra.mxu1 %vm625_vm1, %v3277_v8 }
0x154d   :  { %16067 = vmatprep.mubr.msk.f32.mxu1 %vm625_vm1, %v3278_v9  ;;  %v4164_v9 = vld [vmem:[%s21708_s2 + $0xa20] sm:$0xff] }
0x1550   :  { %16068 = vmatmul.mubr.msk.f32.gmra.mxu1 %vm625_vm1, %v3279_v10 }
0x1551   :  { %16070 = vmatprep.mubr.msk.f32.mxu1 %vm625_vm1, %v3280_v15  ;;  %v4163_v15 = vld [vmem:[%s21708_s2 + $0xa10] sm:$0xff] }
0x1554   :  { %16071 = vmatmul.mubr.msk.f32.gmra.mxu1 %vm625_vm1, %v3281_v16 }
0x1555   :  { %16073 = vmatprep.mubr.msk.f32.mxu1 %vm625_vm1, %v3282_v12  ;;  %v4162_v12 = vld [vmem:[%s21708_s2 + $0xa00] sm:$0xff] }
0x1558   :  { %16074 = vmatmul.mubr.msk.f32.gmra.mxu1 %vm625_vm1, %v3283_v18 }
0x1559   :  { %16076 = vmatprep.mubr.msk.f32.mxu1 %vm625_vm1, %v3284_v28  ;;  %v4270_v28 = vld [vmem:[%s21708_s2 + $0xa70] sm:$0xff] }
0x155c   :  { %16077 = vmatmul.mubr.msk.f32.gmra.mxu1 %vm625_vm1, %v3285_v19 }
0x155d   :  { %16079 = vmatprep.mubr.msk.f32.mxu1 %vm625_vm1, %v3286_v20  ;;  %v4269_v20 = vld [vmem:[%s21708_s2 + $0xa60] sm:$0xff] }
0x1560   :  { %16080 = vmatmul.mubr.msk.f32.gmra.mxu1 %vm625_vm1, %v3287_v27 }
0x1561   :  { %16082 = vmatprep.mubr.msk.f32.mxu1 %vm625_vm1, %v3288_v1  ;;  %v4268_v1 = vld [vmem:[%s21708_s2 + $0xa50] sm:$0xff] }
0x1564   :  { %16083 = vmatmul.mubr.msk.f32.gmra.mxu1 %vm625_vm1, %v3289_v26 }
0x1565   :  { %16085 = vmatprep.mubr.msk.f32.mxu1 %vm625_vm1, %v3290_v59  ;;  %v4267_v59 = vld [vmem:[%s21708_s2 + $0xa40] sm:$0xff] }
0x1568   :  { %16086 = vmatmul.mubr.msk.f32.gmra.mxu1 %vm625_vm1, %v3291_v24 }
0x15e4   :  { %v16036_v31 = vpop.f32.mrf.mxu1 }
0x15e6   :  { %v3466_v36 = vpop.f32.mrf.mxu1 }
0x15e8   :  { %v16039_v21 = vpop.f32.mrf.mxu1 }
0x15ea   :  { %v3476_v37 = vpop.f32.mrf.mxu1 }
0x15ec   :  { %v16042_v40 = vpop.f32.mrf.mxu1 }
0x15ee   :  { %v3486_v41 = vpop.f32.mrf.mxu1 }
0x15ef   :  { %16096 = vmatprep.mubr.msk.f32.mxu0 %vm625_vm1, %v3486_v41  ;;  %v4690_v41 = vld [vmem:[%s21709_s3 + $0x108] sm:$0xff] }
0x15f0   :  { %v16045_v0 = vpop.f32.mrf.mxu1  ;;  %16097 = vmatmul.mubr.msk.f32.vlgmr.msra.gmra.mxu0 %vm625_vm1, %v16042_v40  ;;  %v4691_v40 = vld [vmem:[%s21709_s3 + $0x110] sm:$0xff] }
0x15f1   :  { %16103 = vmatpush3.msra.mxu0 %v3648_v32  ;;  %v4373_v32 = vld [vmem:[%s21708_s2 + $0xa90] sm:$0xff] }
0x15f2   :  { %16104 = vmatprep.subr.mxu0 %v3647_v42  ;;  %v3496_v44 = vpop.f32.mrf.mxu1 }
0x15f3   :  { %16105 = vmatpush3.msra.mxu0 %v3647_v42  ;;  %16099 = vmatprep.mubr.msk.f32.mxu0 %vm625_vm1, %v3496_v44  ;;  %v4689_v42 = vld [vmem:[%s21709_s3 + $0x100] sm:$0xff]  ;;  %v4686_v44 = vld [vmem:[%s21709_s3 + $0xe8] sm:$0xff] }
0x15f4   :  { %16106 = vmatprep.subr.mxu0 %v3646_v43  ;;  %16100 = vmatmul.mubr.msk.f32.gmra.mxu0 %vm625_vm1, %v16045_v0  ;;  %v16048_v46 = vpop.f32.mrf.mxu1  ;;  %v4688_v0 = vld [vmem:[%s21709_s3 + $0xf8] sm:$0xff] }
0x15f5   :  { %16107 = vmatpush3.msra.mxu0 %v3646_v43  ;;  %16110 = vmatprep.mubr.msk.f32.mxu0 %vm625_vm1, %v3466_v36  ;;  %v4687_v43 = vld [vmem:[%s21709_s3 + $0xf0] sm:$0xff] }
0x15f6   :  { %16108 = vmatprep.subr.mxu0 %v3645_v56  ;;  %v3506_v50 = vpop.f32.mrf.mxu1 }
0x15f7   :  { %16109 = vmatpush3.msra.mxu0 %v3645_v56  ;;  %v4685_v56 = vld [vmem:[%s21709_s3 + $0xe0] sm:$0xff] }
0x15f8   :  { %16116 = vmatprep.subr.mxu0 %v3850_v49  ;;  %16111 = vmatmul.mubr.msk.f32.vlgmr.msra.gmra.mxu0 %vm625_vm1, %v16036_v31  ;;  %v16051_v11 = vpop.f32.mrf.mxu1  ;;  %v4693_v31 = vld [vmem:[%s21709_s3 + $0x120] sm:$0xff] }
0x15f9   :  { %16117 = vmatpush3.msra.mxu0 %v3850_v49  ;;  %16113 = vmatprep.mubr.msk.f32.mxu0 %vm625_vm1, %v3476_v37  ;;  %v14501_v49 = vld [vmem:[%s21709_s3 + $0x98] ss:$0 sm:$0xff] }
0x15fa   :  { %16118 = vmatprep.subr.mxu0 %v3849_v52  ;;  %v3516_v3 = vpop.f32.mrf.mxu1 }
0x15fb   :  { %16119 = vmatpush3.msra.mxu0 %v3849_v52  ;;  %v4683_v52 = vld [vmem:[%s21709_s3 + $0xd0] sm:$0xff] }
0x15fc   :  { %16120 = vmatprep.subr.mxu0 %v3848_v53  ;;  %16114 = vmatmul.mubr.msk.f32.gmra.mxu0 %vm625_vm1, %v16039_v21  ;;  %v16054_v58 = vpop.f32.mrf.mxu1  ;;  %v4692_v21 = vld [vmem:[%s21709_s3 + $0x118] sm:$0xff] }
0x15fd   :  { %16121 = vmatpush3.msra.mxu0 %v3848_v53  ;;  %16124 = vmatprep.mubr.msk.f32.mxu0 %vm625_vm1, %v3506_v50  ;;  %v4664_v50 = vpop.permute.xlu0 %4663 }
0x15fe   :  { %16122 = vmatprep.subr.mxu0 %v3847_v54  ;;  %v3526_v14 = vpop.f32.mrf.mxu1  ;;  %v4670_v53 = vmul.f32 %v14501_v49, %v4664_v50 }
0x15ff   :  { %16123 = vmatpush3.msra.mxu0 %v3847_v54  ;;  %v4681_v54 = vld [vmem:[%s21709_s3 + $0xc0] sm:$0xff] }
0x1600   :  { %16130 = vmatprep.subr.mxu0 %v3955_v57  ;;  %16125 = vmatmul.mubr.msk.f32.vlgmr.msra.gmra.mxu0 %vm625_vm1, %v16048_v46  ;;  %v16057_v61 = vpop.f32.mrf.mxu1  ;;  %v4684_v46 = vld [vmem:[%s21709_s3 + $0xd8] sm:$0xff] }
0x1601   :  { %16131 = vmatpush3.msra.mxu0 %v3955_v57  ;;  %16127 = vmatprep.mubr.msk.f32.mxu0 %vm625_vm1, %v3516_v3  ;;  %v14502_v3 = vld [vmem:[%s21709_s3 + $0x90] ss:$0 sm:$0xff]  ;;  %v4680_v57 = vld [vmem:[%s21709_s3 + $0xb8] sm:$0xff] }
0x1602   :  { %16132 = vmatprep.subr.mxu0 %v3954_v60  ;;  %v3536_v38 = vpop.f32.mrf.mxu1 }
0x1603   :  { %16133 = vmatpush3.msra.mxu0 %v3954_v60 }
0x1604   :  { %16134 = vmatprep.subr.mxu0 %v3953_v35  ;;  %16128 = vmatmul.mubr.msk.f32.gmra.mxu0 %vm625_vm1, %v16051_v11  ;;  %v16060_v39 = vpop.f32.mrf.mxu1  ;;  %v4682_v11 = vld [vmem:[%s21709_s3 + $0xc8] sm:$0xff] }
0x1605   :  { %16135 = vmatpush3.msra.mxu0 %v3953_v35  ;;  %16138 = vmatprep.mubr.msk.f32.mxu0 %vm625_vm1, %v3526_v14  ;;  %v4679_v14 = vld [vmem:[%s21709_s3 + $0xb0] sm:$0xff]  ;;  %v4769_v35 = vld [vmem:[%s21709_s3 + $0x498] sm:$0xff] }
0x1606   :  { %16136 = vmatprep.subr.mxu0 %v3952_v63  ;;  %v3546_v48 = vpop.f32.mrf.mxu1 }
0x1607   :  { %16137 = vmatpush3.msra.mxu0 %v3952_v63 }
0x1608   :  { %16144 = vmatprep.subr.mxu0 %v4060_v2  ;;  %16139 = vmatmul.mubr.msk.f32.vlgmr.msra.gmra.mxu0 %vm625_vm1, %v16054_v58  ;;  %v16063_v4 = vpop.f32.mrf.mxu1  ;;  %v4676_v58 = vadd.f32 %v14502_v3, %v4670_v53 }
0x1609   :  { %16145 = vmatpush3.msra.mxu0 %v4060_v2  ;;  %16141 = vmatprep.mubr.msk.f32.mxu0 %vm625_vm1, %v3536_v38 }
0x160a   :  { %16146 = vmatprep.subr.mxu0 %v4059_v45  ;;  %v3556_v30 = vpop.f32.mrf.mxu1  ;;  %v4677_v60 = vmax.f32 %v4676_v58, 0.0  ;;  %v4770_v58 = vld [vmem:[%s21709_s3 + $0x4a0] sm:$0xf] }
0x160b   :  { %16147 = vmatpush3.msra.mxu0 %v4059_v45 }
0x160c   :  { %16148 = vmatprep.subr.mxu0 %v4058_v51  ;;  %16142 = vmatmul.mubr.msk.f32.gmra.mxu0 %vm625_vm1, %v16057_v61  ;;  %v16066_v5 = vpop.f32.mrf.mxu1  ;;  %v4678_v61 = vld [vmem:[%s21709_s3 + $0xa8] sm:$0xff] }
0x160d   :  { %16149 = vmatpush3.msra.mxu0 %v4058_v51  ;;  %16152 = vmatprep.mubr.msk.f32.mxu0 %vm625_vm1, %v3546_v48 }
0x160e   :  { %16150 = vmatprep.subr.mxu0 %v4057_v47  ;;  %v3566_v8 = vpop.f32.mrf.mxu1 }
0x160f   :  { %16151 = vmatpush3.msra.mxu0 %v4057_v47 }
0x1610   :  { %16158 = vmatprep.subr.mxu0 %v4165_v7  ;;  %16153 = vmatmul.mubr.msk.f32.vlgmr.msra.gmra.mxu0 %vm625_vm1, %v16060_v39  ;;  %v16069_v10 = vpop.f32.mrf.mxu1 }
0x1611   :  { %16159 = vmatpush3.msra.mxu0 %v4165_v7  ;;  %16155 = vmatprep.mubr.msk.f32.mxu0 %vm625_vm1, %v3556_v30 }
0x1612   :  { %16160 = vmatprep.subr.mxu0 %v4164_v9  ;;  %v3576_v16 = vpop.f32.mrf.mxu1 }
0x1613   :  { %16161 = vmatpush3.msra.mxu0 %v4164_v9 }
0x1614   :  { %16162 = vmatprep.subr.mxu0 %v4163_v15  ;;  %16156 = vmatmul.mubr.msk.f32.gmra.mxu0 %vm625_vm1, %v16063_v4  ;;  %v16072_v18 = vpop.f32.mrf.mxu1 }
0x1615   :  { %16163 = vmatpush3.msra.mxu0 %v4163_v15  ;;  %16166 = vmatprep.mubr.msk.f32.mxu0 %vm625_vm1, %v3566_v8 }
0x1616   :  { %16164 = vmatprep.subr.mxu0 %v4162_v12  ;;  %v3586_v19 = vpop.f32.mrf.mxu1 }
0x1617   :  { %16165 = vmatpush3.msra.mxu0 %v4162_v12 }
0x1618   :  { %16172 = vmatprep.subr.mxu0 %v4270_v28  ;;  %16167 = vmatmul.mubr.msk.f32.vlgmr.msra.gmra.mxu0 %vm625_vm1, %v16066_v5  ;;  %v16075_v27 = vpop.f32.mrf.mxu1 }
0x1619   :  { %16173 = vmatpush3.msra.mxu0 %v4270_v28  ;;  %16169 = vmatprep.mubr.msk.f32.mxu0 %vm625_vm1, %v3576_v16 }
0x161a   :  { %16174 = vmatprep.subr.mxu0 %v4269_v20  ;;  %v3596_v26 = vpop.f32.mrf.mxu1 }
0x161b   :  { %16175 = vmatpush3.msra.mxu0 %v4269_v20 }
0x161c   :  { %16176 = vmatprep.subr.mxu0 %v4268_v1  ;;  %16170 = vmatmul.mubr.msk.f32.gmra.mxu0 %vm625_vm1, %v16069_v10  ;;  %v16078_v24 = vpop.f32.mrf.mxu1 }
0x161d   :  { %16177 = vmatpush3.msra.mxu0 %v4268_v1  ;;  %16180 = vmatprep.mubr.msk.f32.mxu0 %vm625_vm1, %v3586_v19 }
0x161e   :  { %16178 = vmatprep.subr.mxu0 %v4267_v59  ;;  %v3606_v23 = vpop.f32.mrf.mxu1 }
0x161f   :  { %16179 = vmatpush3.msra.mxu0 %v4267_v59 }
0x1620   :  { %16186 = vmatprep.subr.mxu0 %v4375_v55  ;;  %16181 = vmatmul.mubr.msk.f32.vlgmr.msra.gmra.mxu0 %vm625_vm1, %v16072_v18  ;;  %v16081_v29 = vpop.f32.mrf.mxu1 }
0x1621   :  { %16187 = vmatpush3.msra.mxu0 %v4375_v55  ;;  %16183 = vmatprep.mubr.msk.f32.mxu0 %vm625_vm1, %v3596_v26 }
0x1622   :  { %16188 = vmatprep.subr.mxu0 %v4374_v22  ;;  %v3616_v33 = vpop.f32.mrf.mxu1 }
0x1623   :  { %16189 = vmatpush3.msra.mxu0 %v4374_v22 }
0x1624   :  { %16190 = vmatprep.subr.mxu0 %v4373_v32  ;;  %16184 = vmatmul.mubr.msk.f32.gmra.mxu0 %vm625_vm1, %v16075_v27  ;;  %v16084_v6 = vpop.f32.mrf.mxu1 }
0x1625   :  { %16191 = vmatpush3.msra.mxu0 %v4373_v32  ;;  %16194 = vmatprep.mubr.msk.f32.mxu0 %vm625_vm1, %v3606_v23 }
0x1626   :  { %16192 = vmatprep.subr.mxu0 %v4372_v13  ;;  %v3626_v34 = vpop.f32.mrf.mxu1 }
0x1627   :  { %16193 = vmatpush3.msra.mxu0 %v4372_v13  ;;  %16208 = vmatprep.mubr.msk.f32.mxu1 %vm625_vm1, %v3626_v34 }
0x1628   :  { %16214 = vmatprep.subr.mxu0 %v17631_v25  ;;  %16195 = vmatmul.mubr.msk.f32.vlgmr.msra.gmra.mxu0 %vm625_vm1, %v16078_v24  ;;  %v16087_v36 = vpop.f32.mrf.mxu1 }
0x1629   :  { %16215 = vmatpush3.msra.mxu0 %v4693_v31  ;;  %16209 = vmatmul.mubr.msk.f32.vlgmr.msra.gmra.mxu1 %vm625_vm1, %v16084_v6 }
0x162a   :  { %16216 = vmatprep.subr.mxu0 %v17631_v25  ;;  %16197 = vmatprep.mubr.msk.f32.mxu0 %vm625_vm1, %v3616_v33  ;;  %v3636_v37 = vpop.f32.mrf.mxu1 }
0x162b   :  { %16217 = vmatpush3.msra.mxu0 %v4692_v21  ;;  %16211 = vmatprep.mubr.msk.f32.mxu1 %vm625_vm1, %v3636_v37 }
0x162c   :  { %16218 = vmatprep.subr.mxu0 %v17631_v25  ;;  %16198 = vmatmul.mubr.msk.f32.gmra.mxu0 %vm625_vm1, %v16081_v29 }
0x162d   :  { %16219 = vmatpush3.msra.mxu0 %v4691_v40  ;;  %16212 = vmatmul.mubr.msk.f32.gmra.mxu1 %vm625_vm1, %v16087_v36 }
0x162e   :  { %16220 = vmatprep.subr.mxu0 %v17631_v25  ;;  %16246 = vmatprep.mubr.msk.f32.mxu0 %vm17636_vm2, %v17631_v25 }
0x162f   :  { %16221 = vmatpush3.msra.mxu0 %v4690_v41  ;;  %16251 = vmatprep.mubr.msk.f32.mxu1 %vm4771_vm3, %v4769_v35  ;;  %v4960_v35 = vld [vmem:[%s21709_s3 + $0x870] sm:$0xff] }
0x1630   :  { %16222 = vmatprep.subr.mxu0 %v17631_v25 }
0x1631   :  { %16223 = vmatpush3.msra.mxu0 %v4689_v42 }
0x1632   :  { %16224 = vmatprep.subr.mxu0 %v17631_v25 }
0x1633   :  { %16225 = vmatpush3.msra.mxu0 %v4688_v0 }
0x1634   :  { %16226 = vmatprep.subr.mxu0 %v17631_v25 }
0x1635   :  { %16227 = vmatpush3.msra.mxu0 %v4687_v43 }
0x1636   :  { %16228 = vmatprep.subr.mxu0 %v17631_v25 }
0x1637   :  { %16229 = vmatpush3.msra.mxu0 %v4686_v44 }
0x1638   :  { %16230 = vmatprep.subr.mxu0 %v17631_v25 }
0x1639   :  { %16231 = vmatpush3.msra.mxu0 %v4685_v56 }
0x163a   :  { %16232 = vmatprep.subr.mxu0 %v17631_v25 }
0x163b   :  { %16233 = vmatpush3.msra.mxu0 %v4684_v46 }
0x163c   :  { %16234 = vmatprep.subr.mxu0 %v17631_v25 }
0x163d   :  { %16235 = vmatpush3.msra.mxu0 %v4683_v52 }
0x163e   :  { %16236 = vmatprep.subr.mxu0 %v17631_v25 }
0x163f   :  { %16237 = vmatpush3.msra.mxu0 %v4682_v11  ;;  %v14503_v11 = vld [vmem:[%s21709_s3 + $0xa0] ss:$0 sm:$0xff] }
0x1640   :  { %16238 = vmatprep.subr.mxu0 %v17631_v25 }
0x1641   :  { %16239 = vmatpush3.msra.mxu0 %v4681_v54 }
0x1642   :  { %16240 = vmatprep.subr.mxu0 %v17631_v25 }
0x1643   :  { %16241 = vmatpush3.msra.mxu0 %v4680_v57  ;;  %v4870_v57 = vld [vmem:[%s21709_s3 + $0x910] sm:$0xff] }
0x1644   :  { %16242 = vmatprep.subr.mxu0 %v17631_v25 }
0x1645   :  { %16243 = vmatpush3.msra.mxu0 %v4679_v14  ;;  %v4869_v14 = vld [vmem:[%s21709_s3 + $0x908] sm:$0xff] }
0x1646   :  { %16244 = vmatprep.subr.mxu0 %v17631_v25 }
0x1647   :  { %16245 = vmatpush3.msra.mxu0 %v4678_v61  ;;  %v4867_v61 = vld [vmem:[%s21709_s3 + $0x8f8] sm:$0xff] }
0x1648   :  { %16247 = vmatmul.mubr.f32.vlgmr.msra.gmra.mxu0 %v4677_v60  ;;  %v4868_v60 = vld [vmem:[%s21709_s3 + $0x900] sm:$0xff] }
0x16b0   :  { %v16098_v38 = vpop.f32.mrf.mxu0 }
0x16b2   :  { %v19503_v63 = vpop.f32.mrf.mxu0 }
0x16b4   :  { %v16101_v39 = vpop.f32.mrf.mxu0 }
0x16b6   :  { %v19505_v2 = vpop.f32.mrf.mxu0 }
0x16b8   :  { %v16112_v48 = vpop.f32.mrf.mxu0 }
0x16b9   :  { %v3834_v45 = vadd.f32 %v16112_v48, %v16098_v38  ;;  %v4657_v48 = vld [vmem:[%s21709_s3 + $0x488] sm:$0xff] }
0x16ba   :  { %v19507_v4 = vpop.f32.mrf.mxu0 }
0x16bc   :  { %v16115_v51 = vpop.f32.mrf.mxu0 }
0x16bd   :  { %v3844_v30 = vadd.f32 %v16115_v51, %v16101_v39 }
0x16be   :  { %v19509_v47 = vpop.f32.mrf.mxu0 }
0x16c0   :  { %v16126_v5 = vpop.f32.mrf.mxu0 }
0x16c1   :  { %v3949_v7 = vadd.f32 %v16126_v5, %v3834_v45  ;;  %v4658_v45 = vld [vmem:[%s21709_s3 + $0x490] sm:$0xf] }
0x16c2   :  { %v19511_v8 = vpop.f32.mrf.mxu0 }
0x16c4   :  { %v16129_v9 = vpop.f32.mrf.mxu0 }
0x16c5   :  { %v3951_v10 = vadd.f32 %v16129_v9, %v3844_v30  ;;  %v4958_v9 = vld [vmem:[%s21709_s3 + $0x860] sm:$0xff] }
0x16c6   :  { %v19513_v15 = vpop.f32.mrf.mxu0 }
0x16c8   :  { %v16140_v16 = vpop.f32.mrf.mxu0 }
0x16c9   :  { %v4054_v12 = vadd.f32 %v16140_v16, %v3949_v7  ;;  %v4959_v7 = vld [vmem:[%s21709_s3 + $0x868] sm:$0xff]  ;;  %v5044_v16 = vld [vmem:[%s21709_s3 + $0x960] sm:$0xff] }
0x16ca   :  { %v19515_v18 = vpop.f32.mrf.mxu0 }
0x16cc   :  { %v16143_v28 = vpop.f32.mrf.mxu0 }
0x16cd   :  { %v4056_v19 = vadd.f32 %v16143_v28, %v3951_v10  ;;  %v4957_v10 = vld [vmem:[%s21709_s3 + $0x858] sm:$0xff]  ;;  %v5042_v28 = vld [vmem:[%s21709_s3 + $0x950] sm:$0xff] }
0x16ce   :  { %v19517_v20 = vpop.f32.mrf.mxu0 }
0x16d0   :  { %v16154_v27 = vpop.f32.mrf.mxu0 }
0x16d1   :  { %v4159_v1 = vadd.f32 %v16154_v27, %v4054_v12  ;;  %v5043_v12 = vld [vmem:[%s21709_s3 + $0x958] sm:$0xff] }
0x16d2   :  { %v19519_v26 = vpop.f32.mrf.mxu0 }
0x16d4   :  { %v16157_v59 = vpop.f32.mrf.mxu0 }
0x16d5   :  { %v4161_v24 = vadd.f32 %v16157_v59, %v4056_v19  ;;  %v5041_v19 = vld [vmem:[%s21709_s3 + $0x948] sm:$0xff] }
0x16d6   :  { %v19521_v55 = vpop.f32.mrf.mxu0 }
0x16d8   :  { %v16168_v23 = vpop.f32.mrf.mxu0 }
0x16d9   :  { %v4264_v22 = vadd.f32 %v16168_v23, %v4159_v1  ;;  %v14507_v1 = vld [vmem:[%s21709_s3 + $0x8e8] ss:$0 sm:$0xff] }
0x16da   :  { %v19523_v29 = vpop.f32.mrf.mxu0  ;;  %v14510_v23 = vld [vmem:[%s21709_s3 + $0x848] ss:$0 sm:$0xff] }
0x16dc   :  { %v16171_v32 = vpop.f32.mrf.mxu0 }
0x16dd   :  { %v4266_v33 = vadd.f32 %v16171_v32, %v4161_v24 }
0x16de   :  { %v19525_v13 = vpop.f32.mrf.mxu0 }
0x16e0   :  { %v16182_v6 = vpop.f32.mrf.mxu0 }
0x16e1   :  { %v4369_v34 = vadd.f32 %v16182_v6, %v4264_v22 }
0x16e2   :  { %v19527_v31 = vpop.f32.mrf.mxu0 }
0x16e4   :  { %v16185_v36 = vpop.f32.mrf.mxu0 }
0x16e5   :  { %v4371_v21 = vadd.f32 %v16185_v36, %v4266_v33 }
0x16e6   :  { %v19529_v37 = vpop.f32.mrf.mxu0 }
0x16e8   :  { %v16196_v40 = vpop.f32.mrf.mxu0 }
0x16e9   :  { %v4474_v41 = vadd.f32 %v16196_v40, %v4369_v34  ;;  %v16210_v42 = vpop.f32.mrf.mxu1  ;;  %v14513_v34 = vld [vmem:[%s21709_s3 + $0x938] ss:$0 sm:$0xff] }
0x16ea   :  { %v19531_v0 = vpop.f32.mrf.mxu0 }
0x16eb   :  { %v19533_v43 = vadd.f32 %v16210_v42, %v4474_v41  ;;  %v19535_v44 = vpop.f32.mrf.mxu1 }
0x16ec   :  { %v16199_v56 = vpop.f32.mrf.mxu0 }
0x16ed   :  { %v4476_v46 = vadd.f32 %v16199_v56, %v4371_v21  ;;  %v16213_v49 = vpop.f32.mrf.mxu1 }
0x16ee   :  { %v19539_v52 = vpop.f32.mrf.mxu0 }
0x16ef   :  { %v19537_v50 = vadd.f32 %v16213_v49, %v4476_v46  ;;  %v19563_v38 = vpop.f32.mrf.mxu1  ;;  %v19636_v46 = vld [vmem:[%s21709_s3 + $0x450] sm:$0xff] }
0x1708   :  { %v4765_v53 = vpop.f32.mrf.mxu0 }
0x1709   :  { %v4766_v3 = vadd.f32 %v14503_v11, %v4765_v53 }
0x170a   :  { %v16248_v54 = vpop.f32.mrf.mxu0 }
0x170b   :  { %16249 = vmatprep.subr.msk.mxu1 %vm4778_vm4, %v4766_v3 }
0x170c   :  { %16250 = vmatpush3.msk.msra.mxu1 %vm4778_vm4, %v4766_v3  ;;  %v4860_v3 = vld [vmem:[%s21709_s3 + $0x458] sm:$0xf] }
0x170d   :  { %16252 = vmatmul.mubr.msk.f32.vlgmr.msra.gmra.mxu1 %vm4771_vm3, %v4770_v58  ;;  %16254 = vmatprep.subr.mxu1 %v4870_v57 }
0x170e   :  { %16255 = vmatpush3.msra.mxu1 %v4870_v57 }
0x170f   :  { %16256 = vmatprep.subr.mxu1 %v4869_v14 }
0x1710   :  { %16257 = vmatpush3.msra.mxu1 %v4869_v14 }
0x1711   :  { %16258 = vmatprep.subr.mxu1 %v4868_v60 }
0x1712   :  { %16259 = vmatpush3.msra.mxu1 %v4868_v60 }
0x1713   :  { %16260 = vmatprep.subr.mxu1 %v4867_v61 }
0x1714   :  { %16261 = vmatpush3.msra.mxu1 %v4867_v61 }
0x1715   :  { %16265 = vmatprep.subr.mxu1 %v4960_v35 }
0x17cd   :  { %v16253_v39 = vpop.f32.mrf.mxu1 }
0x17ce   :  { %v19573_v5 = vadd.f32 %v16253_v39, %v4658_v45 }
0x17cf   :  { %v4848_v51 = vpop.f32.mrf.mxu1 }
0x17d0   :  { %v19571_v30 = vadd.f32 %v4848_v51, %v4657_v48 }
0x17d2   :  { %16262 = vmatprep.mubr.msk.f32.mxu1 %vm625_vm1, %v19571_v30 }
0x17d3   :  { %16263 = vmatmul.mubr.msk.f32.vlgmr.msra.gmra.mxu1 %vm625_vm1, %v19573_v5 }
0x17d4   :  { %16266 = vmatpush3.msra.mxu1 %v4960_v35  ;;  %16273 = vmatprep.mubr.msk.f32.mxu1 %vm625_vm1, %v19571_v30 }
0x17d5   :  { %16267 = vmatprep.subr.mxu1 %v4959_v7 }
0x17d6   :  { %16268 = vmatpush3.msra.mxu1 %v4959_v7 }
0x17d7   :  { %16269 = vmatprep.subr.mxu1 %v4958_v9 }
0x17d8   :  { %16270 = vmatpush3.msra.mxu1 %v4958_v9 }
0x17d9   :  { %16271 = vmatprep.subr.mxu1 %v4957_v10 }
0x17da   :  { %16272 = vmatpush3.msra.mxu1 %v4957_v10 }
0x17db   :  { %16274 = vmatmul.mubr.msk.f32.vlgmr.msra.gmra.mxu1 %vm625_vm1, %v19573_v5  ;;  %16276 = vmatprep.subr.mxu1 %v5044_v16 }
0x17dc   :  { %16277 = vmatpush3.msra.mxu1 %v5044_v16  ;;  %16284 = vmatprep.mubr.msk.f32.mxu1 %vm625_vm1, %v19571_v30 }
0x17dd   :  { %16278 = vmatprep.subr.mxu1 %v5043_v12 }
0x17de   :  { %16279 = vmatpush3.msra.mxu1 %v5043_v12 }
0x17df   :  { %16280 = vmatprep.subr.mxu1 %v5042_v28 }
0x17e0   :  { %16281 = vmatpush3.msra.mxu1 %v5042_v28 }
0x17e1   :  { %16282 = vmatprep.subr.mxu1 %v5041_v19 }
0x17e2   :  { %16283 = vmatpush3.msra.mxu1 %v5041_v19 }
0x17e3   :  { %16285 = vmatmul.mubr.msk.f32.vlgmr.msra.gmra.mxu1 %vm625_vm1, %v19573_v5 }
0x1893   :  { %v16264_v27 = vpop.f32.mrf.mxu1 }
0x1894   :  { %v4954_v21 = vadd.f32 %v16264_v27, %v14507_v1 }
0x1895   :  { %v4948_v59 = vpop.f32.mrf.mxu1 }
0x1896   :  { %v4949_v24 = vadd.f32 %v14507_v1, %v4948_v59 }
0x1898   :  { %16291 = vmatprep.mubr.msk.f32.mxu0 %vm5129_vm5, %v4949_v24 }
0x189b   :  { %v16275_v22 = vpop.f32.mrf.mxu1 }
0x189c   :  { %v5038_v32 = vadd.f32 %v16275_v22, %v14510_v23 }
0x189d   :  { %v5032_v33 = vpop.f32.mrf.mxu1 }
0x189e   :  { %v5033_v6 = vadd.f32 %v14510_v23, %v5032_v33  ;;  %16287 = vmatprep.subr.msk.mxu0 %vm5129_vm5, %v5038_v32  ;;  %v5125_v33 = vld [vmem:[%s21709_s3 + $0x8a8] sm:$0xff] }
0x189f   :  { %16288 = vmatpush3.xpose.msk.msra.mxu0 %vm5129_vm5, %v5038_v32 }
0x18a0   :  { %16289 = vmatprep.subr.msk.mxu0 %vm5129_vm5, %v5033_v6 }
0x18a3   :  { %v16286_v36 = vpop.f32.mrf.mxu1  ;;  %16290 = vmatpush3.xpose.msk.msra.mxu0 %vm5129_vm5, %v5033_v6 }
0x18a4   :  { %v19622_v40 = vadd.f32 %v16286_v36, %v14513_v34 }
0x18a5   :  { %v5116_v41 = vpop.f32.mrf.mxu1 }
0x18a6   :  { %v19624_v42 = vadd.f32 %v14513_v34, %v5116_v41  ;;  %16292 = vmatmul.mubr.msk.f32.vlgmr.msra.gmra.mxu0 %vm5129_vm5, %v4954_v21  ;;  %16294 = vmatprep.subr.msk.mxu1 %vm5251_vm6, %v19622_v40 }
0x18a7   :  { %16295 = vmatpush3.msk.msra.mxu1 %vm5251_vm6, %v19622_v40 }
0x18a8   :  { %16296 = vmatprep.subr.mxu1 %v19624_v42 }
0x18a9   :  { %16297 = vmatpush3.msra.mxu1 %v19624_v42 }
0x1966   :  { %v16293_v56 = vpop.f32.mrf.mxu0 }
0x1967   :  { %v5218_v11 = vmul.f32 0.25, %v16293_v56 }
0x1968   :  { %v5208_v49 = vpop.f32.mrf.mxu0 }
0x1969   :  { %v5217_v53 = vmul.f32 0.25, %v5208_v49  ;;  %v5220_v58 = vadd.f32 %v5218_v11, %v4860_v3 }
0x196b   :  { %v5219_v54 = vadd.f32 %v5217_v53, %v19636_v46  ;;  %v5226_v14 = vsel %vm5225_vm8, %v5220_v58, -inf }
0x196d   :  { %v5222_v57 = vsel %vm5221_vm7, %v5219_v54, -inf }
0x196e   :  { %5223 = vmax.xlane.f32.xlu1 %v5222_v57 }
0x1972   :  { %5227 = vmax.xlane.f32.xlu1 %v5226_v14 }
0x1983   :  { %5336 = vrot.lane.b32.xlu1 %v5038_v32, %s17637_s15  ;;  %v5126_v32 = vld [vmem:[%s21709_s3 + $0x8b0] sm:$0xff] }
0x1987   :  { %5334 = vrot.lane.b32.xlu1 %v5033_v6, %s17637_s15 }
0x198b   :  { %5330 = vrot.lane.b32.xlu1 %v4949_v24, %s17637_s15 }
0x19f7   :  { %v5224_v60 = vpop.xlane.xlu1 %5223 }
0x19f8   :  { %v5229_v61 = vsub.f32 %v5219_v54, %v5224_v60 }
0x19fa   :  { %v5231_v48 = vmul.f32 1.442695, %v5229_v61 }
0x19fb   :  { %v5228_v35 = vpop.xlane.xlu1 %5227 }
0x19fc   :  { %v5230_v39 = vsub.f32 %v5220_v58, %v5228_v35  ;;  %v3829_v58 = vadd.f32 %v19507_v4, %v19503_v63 }
0x19fe   :  { %v5233_v45 = vmul.f32 1.442695, %v5230_v39  ;;  %v3948_v57 = vadd.f32 %v19511_v8, %v3829_v58 }
0x19ff   :  { %v5337_v51 = vpop.permute.xlu1 %5336 }
0x1a00   :  { %17367 = vpow2.f32 %v5233_v45  ;;  %16301 = vmatprep.subr.msk.mxu1 %vm5129_vm5, %v5337_v51  ;;  %v4053_v14 = vadd.f32 %v19515_v18, %v3948_v57  ;;  %v4587_v45 = vsel %vm625_vm1, %v19533_v43, 0.0 }
0x1a01   :  { %17369 = vpow2.f32 %v5231_v48 }
0x1a03   :  { %v5335_v12 = vpop.permute.xlu1 %5334 }
0x1a07   :  { %v5331_v28 = vpop.permute.xlu1 %5330 }
0x1a0d   :  { %v17368_v7 = vpop.eup %17367 }
0x1a0e   :  { %v5238_v9 = vsel %vm5225_vm8, %v17368_v7, 0.0  ;;  %v17370_v10 = vpop.eup %17369 }
0x1a0f   :  { %5239 = vadd.xlane.f32.xlu1 %v5238_v9  ;;  %v5235_v16 = vsel %vm5221_vm7, %v17370_v10, 0.0 }
0x1a13   :  { %5236 = vadd.xlane.f32.xlu1 %v5235_v16 }
0x1a24   :  { %5332 = vrot.lane.b32.xlu1 %v4954_v21, %s17637_s15 }
0x1a98   :  { %v5240_v19 = vpop.xlane.xlu1 %5239 }
0x1a99   :  { %17371 = vrcp.f32 %v5240_v19 }
0x1a9c   :  { %v5237_v27 = vpop.xlane.xlu1 %5236 }
0x1a9d   :  { %17373 = vrcp.f32 %v5237_v27  ;;  %v5127_v27 = vld [vmem:[%s21709_s3 + $0x8b8] sm:$0xff] }
0x1aa0   :  { %v5333_v22 = vpop.permute.xlu1 %5332 }
0x1aa6   :  { %v17372_v1 = vpop.eup %17371 }
0x1aa7   :  { %v5244_v23 = vmul.f32 %v17372_v1, %v17368_v7 }
0x1aaa   :  { %v17374_v59 = vpop.eup %17373 }
0x1aab   :  { %v5242_v24 = vmul.f32 %v17374_v59, %v17370_v10 }
0x1aad   :  { %16298 = vmatprep.mubr.msk.f32.mxu1 %vm5221_vm7, %v5242_v24 }
0x1aae   :  { %16299 = vmatmul.mubr.msk.f32.vlgmr.msra.gmra.mxu1 %vm5221_vm7, %v5244_v23 }
0x1aaf   :  { %16302 = vmatpush3.xpose.msk.msra.mxu1 %vm5129_vm5, %v5337_v51  ;;  %16305 = vmatprep.mubr.msk.f32.mxu1 %vm5129_vm5, %v5331_v28  ;;  %v4593_v51 = vsel %vm625_vm1, %v19537_v50, 0.0 }
0x1ab0   :  { %16303 = vmatprep.subr.msk.mxu1 %vm5129_vm5, %v5335_v12 }
0x1ab3   :  { %16304 = vmatpush3.xpose.msk.msra.mxu1 %vm5129_vm5, %v5335_v12 }
0x1ab4   :  { %16322 = vmatprep.subr.mxu1 %v5126_v32 }
0x1ab6   :  { %16306 = vmatmul.mubr.msk.f32.vlgmr.msra.gmra.mxu1 %vm5129_vm5, %v5333_v22 }
0x1ab7   :  { %16323 = vmatpush3.msra.mxu1 %v5126_v32 }
0x1ab8   :  { %16324 = vmatprep.subr.mxu1 %v5125_v33 }
0x1ab9   :  { %16325 = vmatpush3.msra.mxu1 %v5125_v33 }
0x1b6e   :  { %v16300_v6 = vpop.f32.mrf.mxu1 }
0x1b70   :  { %v5321_v34 = vpop.f32.mrf.mxu1 }
0x1b71   :  { %16326 = vmatprep.mubr.msk.f32.mxu1 %vm5129_vm5, %v5321_v34 }
0x1b72   :  { %16327 = vmatmul.mubr.msk.f32.vlgmr.msra.gmra.mxu1 %vm5129_vm5, %v16300_v6 }
0x1b76   :  { %v16307_v36 = vpop.f32.mrf.mxu1 }
0x1b77   :  { %v5422_v21 = vmul.f32 0.25, %v16307_v36 }
0x1b78   :  { %v5412_v41 = vpop.f32.mrf.mxu1 }
0x1b79   :  { %v5424_v56 = vadd.f32 %v5422_v21, %v4860_v3  ;;  %v5421_v49 = vmul.f32 0.25, %v5412_v41  ;;  %v3839_v3 = vadd.f32 %v19509_v47, %v19505_v2  ;;  %v14534_v21 = vld [vmem:[%s21709_s3 + $0x898] ss:$0 sm:$0xff] }
0x1b7b   :  { %v5428_v11 = vsel %vm5225_vm8, %v5424_v56, -inf  ;;  %v5423_v53 = vadd.f32 %v5421_v49, %v19636_v46  ;;  %v3950_v60 = vadd.f32 %v19513_v15, %v3839_v3  ;;  %v4158_v46 = vadd.f32 %v19519_v26, %v4053_v14 }
0x1b7c   :  { %5429 = vmax.xlane.f32.xlu1 %v5428_v11 }
0x1b7d   :  { %v5425_v54 = vsel %vm5221_vm7, %v5423_v53, -inf  ;;  %v4055_v61 = vadd.f32 %v19517_v20, %v3950_v60  ;;  %v4263_v35 = vadd.f32 %v19523_v29, %v4158_v46 }
0x1b7e   :  { %5426 = vmax.xlane.f32.xlu0 %v5425_v54 }
0x1b7f   :  { %v4368_v39 = vadd.f32 %v19527_v31, %v4263_v35 }
0x1b81   :  { %v4473_v4 = vadd.f32 %v19531_v0, %v4368_v39 }
0x1b83   :  { %v19687_v47 = vadd.f32 %v19535_v44, %v4473_v4 }
0x1b85   :  { %v4584_v18 = vsel %vm625_vm1, %v19687_v47, 0.0 }
0x1b8d   :  { %5450 = vrot.lane.b32.xlu1 %v19622_v40, %s17637_s15  ;;  %v4160_v40 = vadd.f32 %v19521_v55, %v4055_v61 }
0x1b8f   :  { %v4265_v63 = vadd.f32 %v19525_v13, %v4160_v40 }
0x1b91   :  { %v4370_v2 = vadd.f32 %v19529_v37, %v4265_v63 }
0x1b93   :  { %v4475_v8 = vadd.f32 %v19539_v52, %v4370_v2 }
0x1b95   :  { %v19691_v15 = vadd.f32 %v19563_v38, %v4475_v8  ;;  %v5845_v8 = vld [vmem:[%s21709_s3 + $0x5f0] sm:$0xff] }
0x1b96   :  { %16340 = vmatprep.subr.mxu1 %v5845_v8 }
0x1b97   :  { %v4590_v20 = vsel %vm625_vm1, %v19691_v15, 0.0  ;;  %16341 = vmatpush3.msra.mxu1 %v5845_v8 }
0x1bb1   :  { %4585 = vadd.xlane.f32.xlu1 %v4584_v18  ;;  %v5843_v18 = vld [vmem:[%s21709_s3 + $0x5e0] sm:$0xff] }
0x1bb5   :  { %4591 = vadd.xlane.f32.xlu1 %v4590_v20  ;;  %v5842_v20 = vld [vmem:[%s21709_s3 + $0x5d8] sm:$0xff] }
0x1c05   :  { %v5430_v26 = vpop.xlane.xlu1 %5429 }
0x1c06   :  { %v5432_v55 = vsub.f32 %v5424_v56, %v5430_v26 }
0x1c07   :  { %v5427_v29 = vpop.xlane.xlu0 %5426 }
0x1c08   :  { %v5435_v13 = vmul.f32 1.442695, %v5432_v55  ;;  %v5431_v31 = vsub.f32 %v5423_v53, %v5427_v29 }
0x1c09   :  { %v5451_v37 = vpop.permute.xlu1 %5450 }
0x1c0a   :  { %17375 = vpow2.f32 %v5435_v13  ;;  %v5433_v0 = vmul.f32 1.442695, %v5431_v31  ;;  %16308 = vmatprep.subr.msk.mxu0 %vm5251_vm6, %v5451_v37 }
0x1c0b   :  { %16309 = vmatpush3.msk.msra.mxu0 %vm5251_vm6, %v5451_v37 }
0x1c0c   :  { %17377 = vpow2.f32 %v5433_v0 }
0x1c17   :  { %v17376_v44 = vpop.eup %17375 }
0x1c18   :  { %v5440_v52 = vsel %vm5225_vm8, %v17376_v44, 0.0 }
0x1c19   :  { %v17378_v38 = vpop.eup %17377  ;;  %5441 = vadd.xlane.f32.xlu0 %v5440_v52 }
0x1c1a   :  { %v5437_v48 = vsel %vm5221_vm7, %v17378_v38, 0.0 }
0x1c1d   :  { %5438 = vadd.xlane.f32.xlu0 %v5437_v48 }
0x1c32   :  { %v16328_v32 = vpop.f32.mrf.mxu1 }
0x1c33   :  { %5448 = vrot.lane.b32.xlu0 %v19624_v42, %s17637_s15  ;;  %v5128_v42 = vld [vmem:[%s21709_s3 + $0x8c0] sm:$0xff] }
0x1c34   :  { %v5689_v11 = vpop.f32.mrf.mxu1 }
0x1c3a   :  { %v4586_v23 = vpop.xlane.xlu1 %4585 }
0x1c3b   :  { %v4596_v6 = vmul.f32 0.03125, %v4586_v23 }
0x1c3d   :  { %v19724_v54 = vsub.f32 %v19687_v47, %v4596_v6 }
0x1c3e   :  { %v4592_v34 = vpop.xlane.xlu1 %4591 }
0x1c3f   :  { %v4598_v58 = vmul.f32 0.03125, %v4592_v34  ;;  %v4604_v40 = vmul.f32 %v19724_v54, %v19724_v54 }
0x1c41   :  { %v19733_v61 = vsub.f32 %v19691_v15, %v4598_v58  ;;  %v4608_v63 = vsel %vm625_vm1, %v4604_v40, 0.0  ;;  %v5844_v15 = vld [vmem:[%s21709_s3 + $0x5e8] sm:$0xff] }
0x1c42   :  { %16342 = vmatprep.subr.mxu1 %v5844_v15 }
0x1c43   :  { %v4606_v4 = vmul.f32 %v19733_v61, %v19733_v61  ;;  %16343 = vmatpush3.msra.mxu1 %v5844_v15 }
0x1c44   :  { %16344 = vmatprep.subr.mxu1 %v5843_v18 }
0x1c45   :  { %v4614_v47 = vsel %vm625_vm1, %v4606_v4, 0.0  ;;  %16345 = vmatpush3.msra.mxu1 %v5843_v18  ;;  %v5951_v18 = vld [vmem:[%s21709_s3 + $0x6c0] sm:$0xff] }
0x1c46   :  { %16346 = vmatprep.subr.mxu1 %v5842_v20 }
0x1c47   :  { %16347 = vmatpush3.msra.mxu1 %v5842_v20 }
0x1c52   :  { %4588 = vadd.xlane.f32.xlu0 %v4587_v45 }
0x1c56   :  { %4594 = vadd.xlane.f32.xlu0 %v4593_v51 }
0x1ca2   :  { %v5442_v7 = vpop.xlane.xlu0 %5441 }
0x1ca3   :  { %17379 = vrcp.f32 %v5442_v7 }
0x1ca6   :  { %v5439_v9 = vpop.xlane.xlu0 %5438 }
0x1ca7   :  { %17381 = vrcp.f32 %v5439_v9 }
0x1caa   :  { %v5449_v10 = vpop.permute.xlu0 %5448 }
0x1cab   :  { %16310 = vmatprep.subr.mxu0 %v5449_v10 }
0x1cac   :  { %16311 = vmatpush3.msra.mxu0 %v5449_v10 }
0x1cad   :  { %16315 = vmatprep.subr.mxu0 %v5128_v42 }
0x1cb0   :  { %v17380_v16 = vpop.eup %17379 }
0x1cb1   :  { %v5446_v19 = vmul.f32 %v17380_v16, %v17376_v44 }
0x1cb4   :  { %v17382_v12 = vpop.eup %17381 }
0x1cb5   :  { %v5444_v28 = vmul.f32 %v17382_v12, %v17378_v38 }
0x1cb7   :  { %16312 = vmatprep.mubr.msk.f32.mxu0 %vm5221_vm7, %v5444_v28 }
0x1cb8   :  { %16313 = vmatmul.mubr.msk.f32.vlgmr.msra.gmra.mxu0 %vm5221_vm7, %v5446_v19 }
0x1cb9   :  { %16316 = vmatpush3.msra.mxu0 %v5128_v42 }
0x1cba   :  { %16317 = vmatprep.subr.mxu0 %v5127_v27 }
0x1cbb   :  { %16318 = vmatpush3.msra.mxu0 %v5127_v27 }
0x1cdb   :  { %v4589_v24 = vpop.xlane.xlu0 %4588 }
0x1cdc   :  { %v4597_v22 = vmul.f32 0.03125, %v4589_v24 }
0x1cde   :  { %v19721_v41 = vsub.f32 %v19533_v43, %v4597_v22  ;;  %v4583_v22 = vld [vmem:[%s21708_s2 + $0xb20] ss:$0 sm:$0xff] }
0x1cdf   :  { %v4595_v33 = vpop.xlane.xlu0 %4594 }
0x1ce0   :  { %v4599_v56 = vmul.f32 0.03125, %v4595_v33  ;;  %v4605_v43 = vmul.f32 %v19721_v41, %v19721_v41  ;;  %v5754_v33 = vld [vmem:[%s21709_s3 + $0x668] sm:$0xff] }
0x1ce2   :  { %v19727_v14 = vsub.f32 %v19537_v50, %v4599_v56  ;;  %v4611_v39 = vsel %vm625_vm1, %v4605_v43, 0.0  ;;  %v4645_v43 = vld [vmem:[%s21709_s3 + $0x470] sm:$0xff] }
0x1ce4   :  { %v4607_v50 = vmul.f32 %v19727_v14, %v19727_v14 }
0x1ce6   :  { %v4617_v2 = vsel %vm625_vm1, %v4607_v50, 0.0 }
0x1d78   :  { %v16314_v1 = vpop.f32.mrf.mxu0 }
0x1d7a   :  { %v5527_v59 = vpop.f32.mrf.mxu0 }
0x1d7b   :  { %16319 = vmatprep.mubr.msk.f32.mxu0 %vm5129_vm5, %v5527_v59  ;;  %v4582_v59 = vld [vmem:[%s21708_s2 + $0xb30] ss:$0 sm:$0xff] }
0x1d7c   :  { %16320 = vmatmul.mubr.msk.f32.vlgmr.msra.gmra.mxu0 %vm5129_vm5, %v16314_v1 }
0x1e3c   :  { %v16321_v36 = vpop.f32.mrf.mxu0 }
0x1e3d   :  { %v5695_v49 = vadd.f32 %v16328_v32, %v16321_v36  ;;  %v5755_v32 = vld [vmem:[%s21709_s3 + $0x670] sm:$0xff] }
0x1e3e   :  { %v5608_v53 = vpop.f32.mrf.mxu0  ;;  %16329 = vmatprep.subr.mxu0 %v5755_v32 }
0x1e3f   :  { %v5704_v57 = vadd.f32 %v14534_v21, %v5695_v49  ;;  %v5690_v3 = vadd.f32 %v5689_v11, %v5608_v53  ;;  %16330 = vmatpush3.msra.mxu0 %v5755_v32  ;;  %v14500_v11 = vld [vmem:[%s21709_s3 + $0x460] ss:$0 sm:$0xff] }
0x1e40   :  { %16331 = vmatprep.subr.mxu0 %v5754_v33 }
0x1e41   :  { %v5703_v60 = vadd.f32 %v14534_v21, %v5690_v3  ;;  %v5711_v46 = vsel %vm5710_vm9, %v5704_v57, 0.0  ;;  %v5753_v21 = vld [vmem:[%s21709_s3 + $0x660] sm:$0xff]  ;;  %16332 = vmatpush3.msra.mxu0 %v5754_v33 }
0x1e42   :  { %5712 = vadd.xlane.f32.xlu0 %v5711_v46  ;;  %16333 = vmatprep.subr.mxu0 %v5753_v21 }
0x1e43   :  { %v5707_v35 = vsel %vm625_vm1, %v5703_v60, 0.0  ;;  %16334 = vmatpush3.msra.mxu0 %v5753_v21 }
0x1e44   :  { %5708 = vadd.xlane.f32.xlu1 %v5707_v35 }
0x1e46   :  { %4612 = vadd.xlane.f32.xlu0 %v4611_v39 }
0x1e48   :  { %4609 = vadd.xlane.f32.xlu1 %v4608_v63  ;;  %v4646_v63 = vld [vmem:[%s21709_s3 + $0x478] sm:$0xff] }
0x1e4a   :  { %4618 = vadd.xlane.f32.xlu0 %v4617_v2 }
0x1e4c   :  { %4615 = vadd.xlane.f32.xlu1 %v4614_v47  ;;  %v4647_v47 = vld [vmem:[%s21709_s3 + $0x480] sm:$0xff] }
0x1ecb   :  { %v5713_v26 = vpop.xlane.xlu0 %5712 }
0x1ecc   :  { %v5715_v55 = vmul.f32 0.03125, %v5713_v26 }
0x1ecd   :  { %v5709_v29 = vpop.xlane.xlu1 %5708 }
0x1ece   :  { %v19758_v13 = vsub.f32 %v5704_v57, %v5715_v55  ;;  %v5714_v31 = vmul.f32 0.03125, %v5709_v29 }
0x1ecf   :  { %v4613_v37 = vpop.xlane.xlu0 %4612 }
0x1ed0   :  { %v19760_v0 = vsub.f32 %v5703_v60, %v5714_v31  ;;  %v4621_v44 = vmul.f32 0.03125, %v4613_v37  ;;  %v5719_v52 = vmul.f32 %v19758_v13, %v19758_v13 }
0x1ed1   :  { %v4610_v38 = vpop.xlane.xlu1 %4609 }
0x1ed2   :  { %v4625_v48 = vadd.f32 1e-06, %v4621_v44  ;;  %v4620_v45 = vmul.f32 0.03125, %v4610_v38  ;;  %v5723_v51 = vsel %vm5710_vm9, %v5719_v52, 0.0  ;;  %v5718_v7 = vmul.f32 %v19760_v0, %v19760_v0  ;;  %v14535_v52 = vld [vmem:[%s21709_s3 + $0x6f8] ss:$0 sm:$0xff] }
0x1ed3   :  { %5724 = vadd.xlane.f32.xlu0 %v5723_v51  ;;  %v4619_v9 = vpop.xlane.xlu0 %4618 }
0x1ed4   :  { %17383 = vrsqrt.f32 %v4625_v48  ;;  %v4624_v10 = vadd.f32 1e-06, %v4620_v45  ;;  %v4623_v16 = vmul.f32 0.03125, %v4619_v9  ;;  %v5720_v12 = vsel %vm625_vm1, %v5718_v7, 0.0  ;;  %v14536_v45 = vld [vmem:[%s21709_s3 + $0x6e8] ss:$0 sm:$0xff] }
0x1ed5   :  { %5721 = vadd.xlane.f32.xlu1 %v5720_v12  ;;  %v4616_v28 = vpop.xlane.xlu1 %4615 }
0x1ed6   :  { %17385 = vrsqrt.f32 %v4624_v10  ;;  %v4627_v19 = vadd.f32 1e-06, %v4623_v16  ;;  %v4622_v42 = vmul.f32 0.03125, %v4616_v28 }
0x1ed8   :  { %17387 = vrsqrt.f32 %v4627_v19  ;;  %v4626_v27 = vadd.f32 1e-06, %v4622_v42  ;;  %v5948_v19 = vld [vmem:[%s21709_s3 + $0x6a8] sm:$0xff] }
0x1eda   :  { %17389 = vrsqrt.f32 %v4626_v27 }
0x1ee1   :  { %v17384_v1 = vpop.eup %17383 }
0x1ee2   :  { %v4633_v24 = vmul.f32 %v17384_v1, %v19721_v41  ;;  %v14540_v1 = vld [vmem:[%s21709_s3 + $0x5c8] ss:$0 sm:$0xff] }
0x1ee3   :  { %v17386_v23 = vpop.eup %17385 }
0x1ee4   :  { %v4637_v6 = vmul.f32 %v4633_v24, %v4582_v59  ;;  %v4632_v34 = vmul.f32 %v17386_v23, %v19724_v54  ;;  %v5752_v54 = vld [vmem:[%s21709_s3 + $0x658] sm:$0xff] }
0x1ee5   :  { %v17388_v36 = vpop.eup %17387  ;;  %16335 = vmatprep.subr.mxu0 %v5752_v54 }
0x1ee6   :  { %v4635_v41 = vmul.f32 %v17388_v36, %v19727_v14  ;;  %v4636_v56 = vmul.f32 %v4632_v34, %v4582_v59  ;;  %v4641_v49 = vadd.f32 %v4637_v6, %v4583_v22  ;;  %v4644_v14 = vld [vmem:[%s21709_s3 + $0x468] sm:$0xff]  ;;  %16336 = vmatpush3.msra.mxu0 %v5752_v54 }
0x1ee7   :  { %v17390_v53 = vpop.eup %17389  ;;  %16354 = vmatprep.subr.mxu0 %v5951_v18  ;;  %v14537_v34 = vld [vmem:[%s21709_s3 + $0x648] ss:$0 sm:$0xff] }
0x1ee8   :  { %v4639_v58 = vmul.f32 %v4635_v41, %v4582_v59  ;;  %v4634_v57 = vmul.f32 %v17390_v53, %v19733_v61  ;;  %v4640_v3 = vadd.f32 %v4636_v56, %v4583_v22  ;;  %v19796_v60 = vadd.f32 %v14500_v11, %v4641_v49 }
0x1eea   :  { %v19798_v46 = vadd.f32 %v14500_v11, %v4640_v3  ;;  %v4638_v35 = vmul.f32 %v4634_v57, %v4582_v59  ;;  %v4643_v40 = vadd.f32 %v4639_v58, %v4583_v22  ;;  %v19807_v50 = vadd.f32 %v19796_v60, %v4645_v43  ;;  %v19913_v43 = vld [vmem:[%s21709_s3 + $0x448] sm:$0xf] }
0x1eec   :  { %v19804_v61 = vadd.f32 %v19798_v46, %v4644_v14  ;;  %v4642_v39 = vadd.f32 %v4638_v35, %v4583_v22  ;;  %v19812_v4 = vadd.f32 %v14500_v11, %v4643_v40 }
0x1eee   :  { %16348 = vmatprep.mubr.msk.f32.mxu1 %vm625_vm1, %v19804_v61  ;;  %v19816_v2 = vadd.f32 %v14500_v11, %v4642_v39  ;;  %v19827_v15 = vadd.f32 %v19812_v4, %v4647_v47  ;;  %v14545_v11 = vld [vmem:[%s21709_s3 + $0x698] ss:$0 sm:$0xff] }
0x1eef   :  { %16349 = vmatmul.mubr.msk.f32.vlgmr.msra.gmra.mxu1 %vm625_vm1, %v19807_v50 }
0x1ef0   :  { %v19824_v8 = vadd.f32 %v19816_v2, %v4646_v63  ;;  %v4861_v63 = vld [vmem:[%s21709_s3 + $0x440] sm:$0xff] }
0x1ef2   :  { %16351 = vmatprep.mubr.msk.f32.mxu1 %vm625_vm1, %v19824_v8 }
0x1ef3   :  { %16352 = vmatmul.mubr.msk.f32.gmra.mxu1 %vm625_vm1, %v19827_v15 }
0x1f5c   :  { %v5725_v20 = vpop.xlane.xlu0 %5724 }
0x1f5d   :  { %v5727_v26 = vmul.f32 0.03125, %v5725_v20 }
0x1f5e   :  { %v5722_v55 = vpop.xlane.xlu1 %5721 }
0x1f5f   :  { %v5729_v29 = vadd.f32 1e-05, %v5727_v26  ;;  %v5726_v31 = vmul.f32 0.03125, %v5722_v55 }
0x1f61   :  { %17391 = vrsqrt.f32 %v5729_v29  ;;  %v5728_v37 = vadd.f32 1e-05, %v5726_v31 }
0x1f63   :  { %17393 = vrsqrt.f32 %v5728_v37 }
0x1f6e   :  { %v17392_v44 = vpop.eup %17391 }
0x1f6f   :  { %v5733_v38 = vmul.f32 %v17392_v44, %v19758_v13  ;;  %v5950_v13 = vld [vmem:[%s21709_s3 + $0x6b8] sm:$0xff] }
0x1f70   :  { %v17394_v48 = vpop.eup %17393 }
0x1f71   :  { %v5732_v51 = vmul.f32 %v17394_v48, %v19760_v0  ;;  %v5739_v7 = vmul.f32 %v14535_v52, %v5733_v38  ;;  %v5949_v0 = vld [vmem:[%s21709_s3 + $0x6b0] sm:$0xff] }
0x1f73   :  { %v5738_v9 = vmul.f32 %v14535_v52, %v5732_v51  ;;  %v19844_v10 = vadd.f32 %v14536_v45, %v5739_v7 }
0x1f75   :  { %v19846_v16 = vadd.f32 %v14536_v45, %v5738_v9  ;;  %v5747_v28 = vadd.f32 %v19844_v10, %v19573_v5 }
0x1f77   :  { %v5746_v12 = vadd.f32 %v19846_v16, %v19571_v30 }
0x1f79   :  { %16337 = vmatprep.mubr.msk.f32.mxu0 %vm625_vm1, %v5746_v12 }
0x1f7a   :  { %16338 = vmatmul.mubr.msk.f32.vlgmr.msra.gmra.mxu0 %vm625_vm1, %v5747_v28 }
0x1f7b   :  { %16355 = vmatpush3.msra.mxu0 %v5951_v18  ;;  %16362 = vmatprep.mubr.msk.f32.mxu0 %vm625_vm1, %v19798_v46 }
0x1f7c   :  { %16356 = vmatprep.subr.mxu0 %v5950_v13 }
0x1f7d   :  { %16357 = vmatpush3.msra.mxu0 %v5950_v13 }
0x1f7e   :  { %16358 = vmatprep.subr.mxu0 %v5949_v0 }
0x1f7f   :  { %16359 = vmatpush3.msra.mxu0 %v5949_v0 }
0x1f80   :  { %16360 = vmatprep.subr.mxu0 %v5948_v19 }
0x1f81   :  { %16361 = vmatpush3.msra.mxu0 %v5948_v19 }
0x1f82   :  { %16363 = vmatmul.mubr.msk.f32.vlgmr.msra.gmra.mxu0 %vm625_vm1, %v19796_v60 }
0x1f83   :  { %16365 = vmatprep.mubr.msk.f32.mxu0 %vm625_vm1, %v19816_v2 }
0x1f86   :  { %16366 = vmatmul.mubr.msk.f32.gmra.mxu0 %vm625_vm1, %v19812_v4 }
0x1faf   :  { %v16350_v42 = vpop.f32.mrf.mxu1 }
0x1fb0   :  { %v5935_v32 = vadd.f32 %v16350_v42, %v14540_v1 }
0x1fb1   :  { %v5929_v27 = vpop.f32.mrf.mxu1 }
0x1fb2   :  { %v5930_v33 = vadd.f32 %v14540_v1, %v5929_v27 }
0x1fb3   :  { %v16353_v59 = vpop.f32.mrf.mxu1 }
0x1fb4   :  { %v5945_v24 = vadd.f32 %v16353_v59, %v14540_v1 }
0x1fb5   :  { %v5939_v23 = vpop.f32.mrf.mxu1 }
0x1fb6   :  { %v19874_v22 = vadd.f32 %v14540_v1, %v5939_v23  ;;  %16368 = vmatprep.subr.msk.mxu1 %vm6056_vm10, %v5945_v24 }
0x1fb7   :  { %16369 = vmatpush3.xpose.msk.msra.mxu1 %vm6056_vm10, %v5945_v24 }
0x1fb8   :  { %16370 = vmatprep.subr.msk.mxu1 %vm6056_vm10, %v19874_v22 }
0x1fbb   :  { %16371 = vmatpush3.xpose.msk.msra.mxu1 %vm6056_vm10, %v19874_v22 }
0x1fbc   :  { %16372 = vmatprep.subr.msk.mxu1 %vm6056_vm10, %v5935_v32 }
0x1fbf   :  { %16373 = vmatpush3.xpose.msk.msra.mxu1 %vm6056_vm10, %v5935_v32 }
0x1fc0   :  { %16374 = vmatprep.subr.msk.mxu1 %vm6056_vm10, %v5930_v33 }
0x1fc3   :  { %16375 = vmatpush3.xpose.msk.msra.mxu1 %vm6056_vm10, %v5930_v33 }
0x203a   :  { %v16339_v6 = vpop.f32.mrf.mxu0 }
0x203b   :  { %v5839_v41 = vadd.f32 %v16339_v6, %v14537_v34 }
0x203c   :  { %v5833_v36 = vpop.f32.mrf.mxu0 }
0x203d   :  { %v5834_v21 = vadd.f32 %v14537_v34, %v5833_v36 }
0x203f   :  { %16376 = vmatprep.mubr.msk.f32.mxu1 %vm6056_vm10, %v5834_v21 }
0x2040   :  { %16377 = vmatmul.mubr.msk.f32.vlgmr.msra.gmra.mxu1 %vm6056_vm10, %v5839_v41 }
0x2042   :  { %v16364_v56 = vpop.f32.mrf.mxu0 }
0x2043   :  { %v19900_v3 = vadd.f32 %v16364_v56, %v14545_v11 }
0x2044   :  { %v6035_v49 = vpop.f32.mrf.mxu0 }
0x2045   :  { %v19904_v14 = vadd.f32 %v14545_v11, %v6035_v49 }
0x2046   :  { %v16367_v53 = vpop.f32.mrf.mxu0 }
0x2047   :  { %v19894_v54 = vadd.f32 %v16367_v53, %v14545_v11 }
0x2048   :  { %v6045_v58 = vpop.f32.mrf.mxu0 }
0x2049   :  { %v19896_v57 = vadd.f32 %v14545_v11, %v6045_v58  ;;  %16379 = vmatprep.subr.mxu0 %v19894_v54 }
0x204a   :  { %16380 = vmatpush3.msra.mxu0 %v19894_v54 }
0x204b   :  { %16381 = vmatprep.subr.mxu0 %v19896_v57 }
0x204c   :  { %16382 = vmatpush3.msra.mxu0 %v19896_v57 }
0x204d   :  { %16383 = vmatprep.subr.mxu0 %v19900_v3 }
0x204e   :  { %16384 = vmatpush3.msra.mxu0 %v19900_v3 }
0x204f   :  { %16385 = vmatprep.subr.mxu0 %v19904_v14 }
0x2050   :  { %16386 = vmatpush3.msra.mxu0 %v19904_v14 }
0x2100   :  { %v16378_v35 = vpop.f32.mrf.mxu1 }
0x2101   :  { %v6151_v40 = vmul.f32 0.35355338, %v16378_v35 }
0x2102   :  { %v6141_v39 = vpop.f32.mrf.mxu1 }
0x2103   :  { %v6153_v47 = vadd.f32 %v6151_v40, %v19913_v43  ;;  %v6150_v18 = vmul.f32 0.35355338, %v6141_v39 }
0x2105   :  { %v6157_v20 = vsel %vm5710_vm9, %v6153_v47, -inf  ;;  %v6152_v26 = vadd.f32 %v6150_v18, %v4861_v63 }
0x2106   :  { %6158 = vmax.xlane.f32.xlu0 %v6157_v20 }
0x2107   :  { %v6154_v55 = vsel %vm625_vm1, %v6152_v26, -inf }
0x2108   :  { %6155 = vmax.xlane.f32.xlu1 %v6154_v55 }
0x2119   :  { %6267 = vrot.lane.b32.xlu1 %v5945_v24, %s17638_s26 }
0x218f   :  { %v6159_v29 = vpop.xlane.xlu0 %6158 }
0x2190   :  { %v6161_v31 = vsub.f32 %v6153_v47, %v6159_v29 }
0x2191   :  { %v6156_v37 = vpop.xlane.xlu1 %6155 }
0x2192   :  { %v6164_v44 = vmul.f32 1.442695, %v6161_v31  ;;  %v6160_v52 = vsub.f32 %v6152_v26, %v6156_v37 }
0x2194   :  { %17395 = vpow2.f32 %v6164_v44  ;;  %v6162_v38 = vmul.f32 1.442695, %v6160_v52  ;;  %v6054_v52 = vld [vmem:[%s21709_s3 + $0x628] sm:$0xff] }
0x2195   :  { %v6268_v48 = vpop.permute.xlu1 %6267 }
0x2196   :  { %17397 = vpow2.f32 %v6162_v38  ;;  %16390 = vmatprep.subr.msk.mxu0 %vm6056_vm10, %v6268_v48 }
0x21a1   :  { %v17396_v45 = vpop.eup %17395 }
0x21a2   :  { %v6169_v51 = vsel %vm5710_vm9, %v17396_v45, 0.0 }
0x21a3   :  { %v17398_v7 = vpop.eup %17397  ;;  %6170 = vadd.xlane.f32.xlu0 %v6169_v51 }
0x21a4   :  { %v6166_v9 = vsel %vm625_vm1, %v17398_v7, 0.0 }
0x21a5   :  { %6167 = vadd.xlane.f32.xlu1 %v6166_v9  ;;  %v14570_v9 = vld [vmem:[%s21709_s3 + $0x618] ss:$0 sm:$0xff] }
0x21b6   :  { %6263 = vrot.lane.b32.xlu1 %v5935_v32, %s17638_s26 }
0x21b9   :  { %6265 = vrot.lane.b32.xlu0 %v19874_v22, %s17638_s26 }
0x21ba   :  { %6261 = vrot.lane.b32.xlu1 %v5930_v33, %s17638_s26 }
0x21bd   :  { %6257 = vrot.lane.b32.xlu0 %v5834_v21, %s17638_s26 }
0x21be   :  { %6259 = vrot.lane.b32.xlu1 %v5839_v41, %s17638_s26 }
0x222c   :  { %v6171_v12 = vpop.xlane.xlu0 %6170 }
0x222d   :  { %17399 = vrcp.f32 %v6171_v12 }
0x222e   :  { %v6168_v28 = vpop.xlane.xlu1 %6167 }
0x222f   :  { %17401 = vrcp.f32 %v6168_v28 }
0x2230   :  { %v6266_v13 = vpop.permute.xlu0 %6265 }
0x2232   :  { %v6264_v59 = vpop.permute.xlu1 %6263 }
0x2234   :  { %v6258_v1 = vpop.permute.xlu0 %6257 }
0x2236   :  { %v6262_v24 = vpop.permute.xlu1 %6261 }
0x223a   :  { %v17400_v0 = vpop.eup %17399  ;;  %v6260_v23 = vpop.permute.xlu1 %6259 }
0x223b   :  { %v6175_v27 = vmul.f32 %v17400_v0, %v17396_v45 }
0x223c   :  { %v17402_v19 = vpop.eup %17401 }
0x223d   :  { %v6173_v42 = vmul.f32 %v17402_v19, %v17398_v7 }
0x223f   :  { %16387 = vmatprep.mubr.msk.f32.mxu0 %vm625_vm1, %v6173_v42 }
0x2240   :  { %16388 = vmatmul.mubr.msk.f32.vlgmr.msra.gmra.mxu0 %vm625_vm1, %v6175_v27 }
0x2241   :  { %16391 = vmatpush3.xpose.msk.msra.mxu0 %vm6056_vm10, %v6268_v48  ;;  %16398 = vmatprep.mubr.msk.f32.mxu0 %vm6056_vm10, %v6258_v1 }
0x2242   :  { %16392 = vmatprep.subr.msk.mxu0 %vm6056_vm10, %v6266_v13 }
0x2245   :  { %16393 = vmatpush3.xpose.msk.msra.mxu0 %vm6056_vm10, %v6266_v13 }
0x2246   :  { %16394 = vmatprep.subr.msk.mxu0 %vm6056_vm10, %v6264_v59 }
0x2249   :  { %16395 = vmatpush3.xpose.msk.msra.mxu0 %vm6056_vm10, %v6264_v59 }
0x224a   :  { %16396 = vmatprep.subr.msk.mxu0 %vm6056_vm10, %v6262_v24 }
0x224d   :  { %16397 = vmatpush3.xpose.msk.msra.mxu0 %vm6056_vm10, %v6262_v24 }
0x2250   :  { %16399 = vmatmul.mubr.msk.f32.vlgmr.msra.gmra.mxu0 %vm6056_vm10, %v6260_v23 }
0x2300   :  { %v19942_v22 = vpop.f32.mrf.mxu0 }
0x2302   :  { %v6248_v32 = vpop.f32.mrf.mxu0 }
0x2310   :  { %v16400_v33 = vpop.f32.mrf.mxu0 }
0x2311   :  { %v6357_v6 = vmul.f32 0.35355338, %v16400_v33 }
0x2312   :  { %v6347_v34 = vpop.f32.mrf.mxu0 }
0x2313   :  { %v6359_v36 = vadd.f32 %v6357_v6, %v19913_v43  ;;  %v6356_v21 = vmul.f32 0.35355338, %v6347_v34 }
0x2315   :  { %v6358_v41 = vadd.f32 %v6356_v21, %v4861_v63  ;;  %v6363_v56 = vsel %vm5710_vm9, %v6359_v36, -inf }
0x2316   :  { %6364 = vmax.xlane.f32.xlu1 %v6363_v56  ;;  %v6691_v56 = vld [vmem:[%s21709_s3 + $0x780] sm:$0xff] }
0x2317   :  { %v6360_v49 = vsel %vm625_vm1, %v6358_v41, -inf }
0x2318   :  { %6361 = vmax.xlane.f32.xlu0 %v6360_v49  ;;  %v6690_v49 = vld [vmem:[%s21709_s3 + $0x778] sm:$0xff] }
0x2327   :  { %6392 = vrot.lane.b32.xlu1 %v19894_v54, %s17638_s26 }
0x232b   :  { %6388 = vrot.lane.b32.xlu1 %v19900_v3, %s17638_s26 }
0x232f   :  { %6386 = vrot.lane.b32.xlu1 %v19904_v14, %s17638_s26 }
0x239f   :  { %v6365_v11 = vpop.xlane.xlu1 %6364 }
0x23a0   :  { %v6367_v53 = vsub.f32 %v6359_v36, %v6365_v11  ;;  %v6923_v11 = vld [vmem:[%s21709_s3 + $0x550] sm:$0xff] }
0x23a1   :  { %v6362_v58 = vpop.xlane.xlu0 %6361 }
0x23a2   :  { %v6370_v43 = vmul.f32 1.442695, %v6367_v53  ;;  %v6366_v35 = vsub.f32 %v6358_v41, %v6362_v58  ;;  %v6692_v41 = vld [vmem:[%s21709_s3 + $0x788] sm:$0xff]  ;;  %v6789_v53 = vld [vmem:[%s21709_s3 + $0x800] sm:$0xff]  ;;  %v6788_v58 = vld [vmem:[%s21709_s3 + $0x7f8] sm:$0xff] }
0x23a3   :  { %v6393_v40 = vpop.permute.xlu1 %6392 }
0x23a4   :  { %17403 = vpow2.f32 %v6370_v43  ;;  %v6368_v39 = vmul.f32 1.442695, %v6366_v35  ;;  %16401 = vmatprep.subr.mxu1 %v6393_v40  ;;  %v6787_v43 = vld [vmem:[%s21709_s3 + $0x7f0] sm:$0xff]  ;;  %v6786_v35 = vld [vmem:[%s21709_s3 + $0x7e8] sm:$0xff] }
0x23a5   :  { %16402 = vmatpush3.msra.mxu1 %v6393_v40 }
0x23a6   :  { %17405 = vpow2.f32 %v6368_v39 }
0x23a7   :  { %v6389_v20 = vpop.permute.xlu1 %6388 }
0x23ab   :  { %v6387_v55 = vpop.permute.xlu1 %6386 }
0x23b1   :  { %v17404_v63 = vpop.eup %17403 }
0x23b2   :  { %v6375_v54 = vsel %vm5710_vm9, %v17404_v63, 0.0 }
0x23b3   :  { %v17406_v47 = vpop.eup %17405  ;;  %6376 = vadd.xlane.f32.xlu0 %v6375_v54 }
0x23b4   :  { %v6372_v3 = vsel %vm625_vm1, %v17406_v47, 0.0 }
0x23b7   :  { %6373 = vadd.xlane.f32.xlu0 %v6372_v3 }
0x23cd   :  { %6390 = vrot.lane.b32.xlu0 %v19896_v57, %s17638_s26  ;;  %v6055_v57 = vld [vmem:[%s21709_s3 + $0x630] sm:$0xff] }
0x243c   :  { %v6377_v14 = vpop.xlane.xlu0 %6376 }
0x243d   :  { %17407 = vrcp.f32 %v6377_v14 }
0x2440   :  { %v6374_v18 = vpop.xlane.xlu0 %6373 }
0x2441   :  { %17409 = vrcp.f32 %v6374_v18  ;;  %v14571_v18 = vld [vmem:[%s21709_s3 + $0x718] ss:$0 sm:$0xff] }
0x2444   :  { %v6391_v26 = vpop.permute.xlu0 %6390 }
0x2445   :  { %16403 = vmatprep.subr.mxu1 %v6391_v26 }
0x2446   :  { %16404 = vmatpush3.msra.mxu1 %v6391_v26  ;;  %v14572_v26 = vld [vmem:[%s21709_s3 + $0x708] ss:$0 sm:$0xff] }
0x2447   :  { %16405 = vmatprep.subr.mxu1 %v6389_v20 }
0x2448   :  { %16406 = vmatpush3.msra.mxu1 %v6389_v20 }
0x2449   :  { %16407 = vmatprep.subr.mxu1 %v6387_v55 }
0x244a   :  { %16408 = vmatpush3.msra.mxu1 %v6387_v55  ;;  %v17408_v29 = vpop.eup %17407 }
0x244b   :  { %v6381_v44 = vmul.f32 %v17408_v29, %v17404_v63  ;;  %16412 = vmatprep.subr.mxu1 %v6055_v57 }
0x244e   :  { %v17410_v31 = vpop.eup %17409 }
0x244f   :  { %v6379_v37 = vmul.f32 %v17410_v31, %v17406_v47 }
0x2451   :  { %16409 = vmatprep.mubr.msk.f32.mxu1 %vm625_vm1, %v6379_v37 }
0x2452   :  { %16410 = vmatmul.mubr.msk.f32.vlgmr.msra.gmra.mxu1 %vm625_vm1, %v6381_v44 }
0x2453   :  { %16413 = vmatpush3.msra.mxu1 %v6055_v57 }
0x2454   :  { %16417 = vmatprep.subr.mxu1 %v6054_v52 }
0x2512   :  { %v16411_v38 = vpop.f32.mrf.mxu1 }
0x2514   :  { %v6470_v48 = vpop.f32.mrf.mxu1 }
0x2515   :  { %16414 = vmatprep.mubr.msk.f32.mxu1 %vm6056_vm10, %v6470_v48  ;;  %v6920_v48 = vld [vmem:[%s21709_s3 + $0x538] sm:$0xff] }
0x2516   :  { %16415 = vmatmul.mubr.msk.f32.vlgmr.msra.gmra.mxu1 %vm6056_vm10, %v16411_v38  ;;  %v6921_v38 = vld [vmem:[%s21709_s3 + $0x540] sm:$0xff] }
0x2517   :  { %16419 = vmatprep.mubr.msk.f32.mxu1 %vm6056_vm10, %v6248_v32  ;;  %16418 = vmatpush3.msra.mxu1 %v6054_v52  ;;  %v6922_v52 = vld [vmem:[%s21709_s3 + $0x548] sm:$0xff] }
0x2518   :  { %16433 = vmatprep.subr.mxu1 %v6789_v53 }
0x251a   :  { %16420 = vmatmul.mubr.msk.f32.vlgmr.msra.gmra.mxu1 %vm6056_vm10, %v19942_v22 }
0x251b   :  { %16434 = vmatpush3.msra.mxu1 %v6789_v53 }
0x251c   :  { %16435 = vmatprep.subr.mxu1 %v6788_v58 }
0x251d   :  { %16436 = vmatpush3.msra.mxu1 %v6788_v58  ;;  %v7107_v58 = vld [vmem:[%s21709_s3 + $0x5a0] sm:$0xff] }
0x251e   :  { %16437 = vmatprep.subr.mxu1 %v6787_v43 }
0x251f   :  { %16438 = vmatpush3.msra.mxu1 %v6787_v43  ;;  %v7017_v43 = vld [vmem:[%s21709_s3 + $0x4d0] sm:$0xff] }
0x2520   :  { %16439 = vmatprep.subr.mxu1 %v6786_v35 }
0x2521   :  { %16440 = vmatpush3.msra.mxu1 %v6786_v35  ;;  %v7106_v35 = vld [vmem:[%s21709_s3 + $0x598] sm:$0xff] }
0x25d6   :  { %v16416_v45 = vpop.f32.mrf.mxu1 }
0x25d8   :  { %v6551_v51 = vpop.f32.mrf.mxu1 }
0x25da   :  { %v16421_v7 = vpop.f32.mrf.mxu1 }
0x25db   :  { %v6638_v12 = vadd.f32 %v16421_v7, %v16416_v45  ;;  %v6784_v45 = vld [vmem:[%s21709_s3 + $0x7d8] sm:$0xff] }
0x25dc   :  { %v6632_v28 = vpop.f32.mrf.mxu1 }
0x25dd   :  { %v6647_v13 = vadd.f32 %v14570_v9, %v6638_v12  ;;  %v6633_v0 = vadd.f32 %v6632_v28, %v6551_v51 }
0x25df   :  { %v6646_v19 = vadd.f32 %v14570_v9, %v6633_v0  ;;  %v6649_v42 = vadd.f32 %v6647_v13, %v19844_v10  ;;  %v20049_v0 = vld [vmem:[%s21709_s3 + $0x528] ss:$0 sm:$0xff] }
0x25e1   :  { %v6655_v27 = vsel %vm5710_vm9, %v6649_v42, 0.0  ;;  %v6648_v1 = vadd.f32 %v6646_v19, %v19846_v16  ;;  %v6693_v16 = vld [vmem:[%s21709_s3 + $0x790] sm:$0xff] }
0x25e2   :  { %6656 = vadd.xlane.f32.xlu1 %v6655_v27  ;;  %16422 = vmatprep.subr.mxu0 %v6693_v16  ;;  %v14576_v27 = vld [vmem:[%s21709_s3 + $0x7b8] ss:$0 sm:$0xff] }
0x25e3   :  { %v6652_v59 = vsel %vm625_vm1, %v6648_v1, 0.0  ;;  %16423 = vmatpush3.msra.mxu0 %v6693_v16 }
0x25e4   :  { %6653 = vadd.xlane.f32.xlu0 %v6652_v59  ;;  %16424 = vmatprep.subr.mxu0 %v6692_v41 }
0x25e5   :  { %16425 = vmatpush3.msra.mxu0 %v6692_v41 }
0x25e6   :  { %16426 = vmatprep.subr.mxu0 %v6691_v56 }
0x25e7   :  { %16427 = vmatpush3.msra.mxu0 %v6691_v56 }
0x25e8   :  { %16428 = vmatprep.subr.mxu0 %v6690_v49 }
0x25e9   :  { %16429 = vmatpush3.msra.mxu0 %v6690_v49 }
0x25ea   :  { %16452 = vmatprep.subr.mxu0 %v6923_v11 }
0x266b   :  { %v6657_v24 = vpop.xlane.xlu1 %6656 }
0x266c   :  { %v6659_v23 = vmul.f32 0.03125, %v6657_v24 }
0x266d   :  { %v6654_v22 = vpop.xlane.xlu0 %6653 }
0x266e   :  { %v6658_v32 = vmul.f32 0.03125, %v6654_v22  ;;  %v6661_v33 = vsub.f32 %v6649_v42, %v6659_v23 }
0x2670   :  { %v6660_v6 = vsub.f32 %v6648_v1, %v6658_v32  ;;  %v6663_v21 = vmul.f32 %v6661_v33, %v6661_v33 }
0x2672   :  { %v6662_v34 = vmul.f32 %v6660_v6, %v6660_v6  ;;  %v6667_v10 = vsel %vm5710_vm9, %v6663_v21, 0.0 }
0x2674   :  { %v6664_v36 = vsel %vm625_vm1, %v6662_v34, 0.0 }
0x2675   :  { %6665 = vadd.xlane.f32.xlu0 %v6664_v36 }
0x2679   :  { %6668 = vadd.xlane.f32.xlu0 %v6667_v10 }
0x26fe   :  { %v6666_v40 = vpop.xlane.xlu0 %6665 }
0x26ff   :  { %v6670_v39 = vmul.f32 0.03125, %v6666_v40  ;;  %v7016_v40 = vld [vmem:[%s21709_s3 + $0x4c8] sm:$0xff] }
0x2701   :  { %v6672_v63 = vadd.f32 1e-05, %v6670_v39  ;;  %v7105_v39 = vld [vmem:[%s21709_s3 + $0x590] sm:$0xff] }
0x2702   :  { %v6669_v54 = vpop.xlane.xlu0 %6668 }
0x2703   :  { %17411 = vrsqrt.f32 %v6672_v63  ;;  %v6671_v47 = vmul.f32 0.03125, %v6669_v54  ;;  %v7015_v63 = vld [vmem:[%s21709_s3 + $0x4c0] sm:$0xff]  ;;  %v7104_v54 = vld [vmem:[%s21709_s3 + $0x588] sm:$0xff] }
0x2705   :  { %v6673_v3 = vadd.f32 1e-05, %v6671_v47  ;;  %v7014_v47 = vld [vmem:[%s21709_s3 + $0x4b8] sm:$0xff] }
0x2707   :  { %17413 = vrsqrt.f32 %v6673_v3 }
0x2710   :  { %v17412_v14 = vpop.eup %17411 }
0x2711   :  { %v6676_v20 = vmul.f32 %v17412_v14, %v6660_v6 }
0x2713   :  { %v6682_v55 = vmul.f32 %v14571_v18, %v6676_v20 }
0x2714   :  { %v17414_v29 = vpop.eup %17413 }
0x2715   :  { %v6677_v31 = vmul.f32 %v17414_v29, %v6661_v33  ;;  %v6688_v37 = vadd.f32 %v14572_v26, %v6682_v55 }
0x2717   :  { %v6683_v44 = vmul.f32 %v14571_v18, %v6677_v31  ;;  %16430 = vmatprep.mubr.msk.f32.mxu0 %vm625_vm1, %v6688_v37  ;;  %v14579_v31 = vld [vmem:[%s21709_s3 + $0x738] ss:$0 sm:$0xff] }
0x2719   :  { %v6689_v57 = vadd.f32 %v14572_v26, %v6683_v44 }
0x271b   :  { %16431 = vmatmul.mubr.msk.f32.vlgmr.msra.gmra.mxu0 %vm625_vm1, %v6689_v57 }
0x271c   :  { %16453 = vmatpush3.msra.mxu0 %v6923_v11  ;;  %16460 = vmatprep.mubr.msk.f32.mxu0 %vm625_vm1, %v19804_v61  ;;  %v6785_v61 = vld [vmem:[%s21709_s3 + $0x7e0] sm:$0xff] }
0x271d   :  { %16454 = vmatprep.subr.mxu0 %v6922_v52  ;;  %16441 = vmatprep.subr.mxu1 %v6785_v61 }
0x271e   :  { %16455 = vmatpush3.msra.mxu0 %v6922_v52  ;;  %16442 = vmatpush3.msra.mxu1 %v6785_v61 }
0x271f   :  { %16456 = vmatprep.subr.mxu0 %v6921_v38  ;;  %16443 = vmatprep.subr.mxu1 %v6784_v45 }
0x2720   :  { %16457 = vmatpush3.msra.mxu0 %v6921_v38  ;;  %16444 = vmatpush3.msra.mxu1 %v6784_v45 }
0x2721   :  { %16458 = vmatprep.subr.mxu0 %v6920_v48 }
0x2722   :  { %16459 = vmatpush3.msra.mxu0 %v6920_v48 }
0x2723   :  { %16461 = vmatmul.mubr.msk.f32.vlgmr.msra.gmra.mxu0 %vm625_vm1, %v19807_v50  ;;  %v6783_v50 = vld [vmem:[%s21709_s3 + $0x7d0] sm:$0xff]  ;;  %16466 = vmatprep.subr.mxu0 %v7017_v43 }
0x2724   :  { %16463 = vmatprep.mubr.msk.f32.mxu0 %vm625_vm1, %v19824_v8  ;;  %16445 = vmatprep.subr.mxu1 %v6783_v50  ;;  %v6782_v8 = vld [vmem:[%s21709_s3 + $0x7c8] sm:$0xff] }
0x2725   :  { %16446 = vmatpush3.msra.mxu1 %v6783_v50  ;;  %16467 = vmatpush3.msra.mxu0 %v7017_v43 }
0x2726   :  { %16447 = vmatprep.subr.mxu1 %v6782_v8  ;;  %16468 = vmatprep.subr.mxu0 %v7016_v40 }
0x2727   :  { %16464 = vmatmul.mubr.msk.f32.gmra.mxu0 %vm625_vm1, %v19827_v15  ;;  %16448 = vmatpush3.msra.mxu1 %v6782_v8  ;;  %v14573_v15 = vld [vmem:[%s21709_s3 + $0x768] ss:$0 sm:$0xff] }
0x2728   :  { %16477 = vmatprep.subr.mxu1 %v7107_v58  ;;  %16469 = vmatpush3.msra.mxu0 %v7016_v40 }
0x2729   :  { %16470 = vmatprep.subr.mxu0 %v7015_v63 }
0x272a   :  { %16471 = vmatpush3.msra.mxu0 %v7015_v63 }
0x272b   :  { %16472 = vmatprep.subr.mxu0 %v7014_v47 }
0x272c   :  { %16473 = vmatpush3.msra.mxu0 %v7014_v47 }
0x27db   :  { %v16432_v51 = vpop.f32.mrf.mxu0 }
0x27dc   :  { %v6777_v7 = vadd.f32 %v16432_v51, %v14573_v15 }
0x27dd   :  { %v6771_v9 = vpop.f32.mrf.mxu0 }
0x27de   :  { %v6772_v12 = vadd.f32 %v14573_v15, %v6771_v9  ;;  %v6781_v13 = vmax.f32 %v6777_v7, 0.0  ;;  %v14589_v9 = vld [vmem:[%s21709_s3 + $0x578] ss:$0 sm:$0xff] }
0x27e0   :  { %v6780_v28 = vmax.f32 %v6772_v12, 0.0 }
0x27e2   :  { %16449 = vmatprep.mubr.msk.f32.mxu1 %vm413_vm0, %v6780_v28 }
0x27e3   :  { %v16462_v19 = vpop.f32.mrf.mxu0  ;;  %16450 = vmatmul.mubr.msk.f32.vlgmr.msra.gmra.mxu1 %vm413_vm0, %v6781_v13  ;;  %v14586_v13 = vld [vmem:[%s21709_s3 + $0x4a8] ss:$0 sm:$0xff] }
0x27e4   :  { %v20054_v42 = vadd.f32 %v16462_v19, %v20049_v0  ;;  %16478 = vmatpush3.msra.mxu1 %v7107_v58  ;;  %v20165_v58 = vld [vmem:[%s21709_s3 + $0x430] sm:$0xff] }
0x27e5   :  { %16479 = vmatprep.subr.mxu1 %v7106_v35  ;;  %v6995_v50 = vpop.f32.mrf.mxu0 }
0x27e6   :  { %16480 = vmatpush3.msra.mxu1 %v7106_v35  ;;  %v20110_v51 = vadd.f32 %v20049_v0, %v6995_v50 }
0x27e7   :  { %16481 = vmatprep.subr.mxu1 %v7105_v39  ;;  %v16465_v7 = vpop.f32.mrf.mxu0 }
0x27e8   :  { %16482 = vmatpush3.msra.mxu1 %v7105_v39 }
0x27e9   :  { %16483 = vmatprep.subr.mxu1 %v7104_v54  ;;  %v7005_v12 = vpop.f32.mrf.mxu0 }
0x27ea   :  { %16484 = vmatpush3.msra.mxu1 %v7104_v54 }
0x28a3   :  { %v16451_v1 = vpop.f32.mrf.mxu1 }
0x28a4   :  { %v6873_v59 = vadd.f32 %v16451_v1, %v14576_v27 }
0x28a5   :  { %v6867_v24 = vpop.f32.mrf.mxu1 }
0x28a6   :  { %v6877_v23 = vadd.f32 %v6873_v59, %v6689_v57  ;;  %v6868_v22 = vadd.f32 %v14576_v27, %v6867_v24  ;;  %v14580_v57 = vld [vmem:[%s21709_s3 + $0x728] ss:$0 sm:$0xff] }
0x28a8   :  { %v6876_v32 = vadd.f32 %v6868_v22, %v6688_v37  ;;  %v6883_v33 = vsel %vm5710_vm9, %v6877_v23, 0.0 }
0x28a9   :  { %6884 = vadd.xlane.f32.xlu0 %v6883_v33  ;;  %v7011_v33 = vadd.f32 %v16465_v7, %v20049_v0 }
0x28aa   :  { %v6880_v6 = vsel %vm625_vm1, %v6876_v32, 0.0 }
0x28ab   :  { %6881 = vadd.xlane.f32.xlu1 %v6880_v6  ;;  %v20147_v6 = vld [vmem:[%s21709_s3 + $0x428] sm:$0xff] }
0x2932   :  { %v6885_v34 = vpop.xlane.xlu0 %6884 }
0x2933   :  { %v6887_v36 = vmul.f32 0.03125, %v6885_v34 }
0x2934   :  { %v6882_v21 = vpop.xlane.xlu1 %6881 }
0x2935   :  { %v6889_v10 = vsub.f32 %v6877_v23, %v6887_v36  ;;  %v6886_v16 = vmul.f32 0.03125, %v6882_v21  ;;  %v20152_v21 = vld [vmem:[%s21709_s3 + $0x420] sm:$0xff] }
0x2937   :  { %v6888_v41 = vsub.f32 %v6876_v32, %v6886_v16  ;;  %v6891_v56 = vmul.f32 %v6889_v10, %v6889_v10  ;;  %v7006_v32 = vadd.f32 %v20049_v0, %v7005_v12  ;;  %v20158_v0 = vld [vmem:[%s21709_s3 + $0x438] sm:$0xff] }
0x2939   :  { %v6895_v49 = vsel %vm5710_vm9, %v6891_v56, 0.0  ;;  %v6890_v11 = vmul.f32 %v6888_v41, %v6888_v41 }
0x293a   :  { %6896 = vadd.xlane.f32.xlu0 %v6895_v49 }
0x293b   :  { %v6892_v53 = vsel %vm625_vm1, %v6890_v11, 0.0 }
0x293c   :  { %6893 = vadd.xlane.f32.xlu1 %v6892_v53 }
0x29c3   :  { %v6897_v3 = vpop.xlane.xlu0 %6896 }
0x29c4   :  { %v6899_v14 = vmul.f32 0.03125, %v6897_v3 }
0x29c5   :  { %v6894_v18 = vpop.xlane.xlu1 %6893 }
0x29c6   :  { %v6901_v20 = vadd.f32 1e-05, %v6899_v14  ;;  %v6898_v26 = vmul.f32 0.03125, %v6894_v18 }
0x29c8   :  { %17415 = vrsqrt.f32 %v6901_v20  ;;  %v6900_v55 = vadd.f32 1e-05, %v6898_v26 }
0x29ca   :  { %17417 = vrsqrt.f32 %v6900_v55 }
0x29d5   :  { %v17416_v29 = vpop.eup %17415 }
0x29d6   :  { %v6905_v37 = vmul.f32 %v17416_v29, %v6889_v10 }
0x29d7   :  { %v17418_v44 = vpop.eup %17417 }
0x29d8   :  { %v6904_v52 = vmul.f32 %v17418_v44, %v6888_v41  ;;  %v6911_v38 = vmul.f32 %v14579_v31, %v6905_v37 }
0x29da   :  { %v6910_v48 = vmul.f32 %v14579_v31, %v6904_v52  ;;  %v20093_v61 = vadd.f32 %v14580_v57, %v6911_v38 }
0x29dc   :  { %v20095_v45 = vadd.f32 %v14580_v57, %v6910_v48  ;;  %v20105_v15 = vadd.f32 %v20093_v61, %v19573_v5 }
0x29de   :  { %16485 = vmatprep.mubr.msk.f32.mxu1 %vm625_vm1, %v20095_v45  ;;  %v20101_v8 = vadd.f32 %v20095_v45, %v19571_v30 }
0x29df   :  { %16486 = vmatmul.mubr.msk.f32.vlgmr.msra.gmra.mxu1 %vm625_vm1, %v20093_v61 }
0x29e0   :  { %16474 = vmatprep.mubr.msk.f32.mxu0 %vm625_vm1, %v20101_v8 }
0x29e1   :  { %16475 = vmatmul.mubr.msk.f32.vlgmr.msra.gmra.mxu0 %vm625_vm1, %v20105_v15 }
0x29e2   :  { %16492 = vmatprep.mubr.msk.f32.mxu0 %vm6056_vm10, %v20110_v51 }
0x2a9f   :  { %v16487_v28 = vpop.f32.mrf.mxu1 }
0x2aa0   :  { %v20124_v19 = vadd.f32 %v16487_v28, %v14589_v9 }
0x2aa1   :  { %v16476_v27 = vpop.f32.mrf.mxu0  ;;  %v7185_v1 = vpop.f32.mrf.mxu1 }
0x2aa2   :  { %v7101_v59 = vadd.f32 %v16476_v27, %v14586_v13  ;;  %v20126_v24 = vadd.f32 %v14589_v9, %v7185_v1  ;;  %16498 = vmatprep.subr.msk.mxu1 %vm5251_vm6, %v20124_v19 }
0x2aa3   :  { %v7095_v23 = vpop.f32.mrf.mxu0  ;;  %16499 = vmatpush3.msk.msra.mxu1 %vm5251_vm6, %v20124_v19 }
0x2aa4   :  { %v7096_v22 = vadd.f32 %v14586_v13, %v7095_v23  ;;  %16488 = vmatprep.subr.msk.mxu0 %vm6056_vm10, %v7101_v59  ;;  %16500 = vmatprep.subr.mxu1 %v20126_v24 }
0x2aa5   :  { %16489 = vmatpush3.xpose.msk.msra.mxu0 %vm6056_vm10, %v7101_v59  ;;  %16501 = vmatpush3.msra.mxu1 %v20126_v24 }
0x2aa6   :  { %16490 = vmatprep.subr.msk.mxu0 %vm6056_vm10, %v7096_v22 }
0x2aa9   :  { %16491 = vmatpush3.xpose.msk.msra.mxu0 %vm6056_vm10, %v7096_v22 }
0x2aac   :  { %16493 = vmatmul.mubr.msk.f32.vlgmr.msra.gmra.mxu0 %vm6056_vm10, %v20054_v42 }
0x2aad   :  { %16495 = vmatprep.mubr.msk.f32.mxu0 %vm6056_vm10, %v7006_v32 }
0x2ab0   :  { %16496 = vmatmul.mubr.msk.f32.gmra.mxu0 %vm6056_vm10, %v7011_v33 }
0x2b6c   :  { %v16494_v34 = vpop.f32.mrf.mxu0 }
0x2b6d   :  { %v7300_v36 = vmul.f32 0.35355338, %v16494_v34 }
0x2b6e   :  { %v7280_v10 = vpop.f32.mrf.mxu0 }
0x2b6f   :  { %v7304_v16 = vadd.f32 %v7300_v36, %v20147_v6  ;;  %v7299_v41 = vmul.f32 0.35355338, %v7280_v10 }
0x2b70   :  { %v16497_v56 = vpop.f32.mrf.mxu0 }
0x2b71   :  { %v7303_v49 = vadd.f32 %v7299_v41, %v20152_v21  ;;  %v7302_v11 = vmul.f32 0.35355338, %v16497_v56  ;;  %v7310_v53 = vsel %vm5221_vm7, %v7304_v16, -inf }
0x2b72   :  { %7311 = vmax.xlane.f32.xlu0 %v7310_v53  ;;  %v7290_v43 = vpop.f32.mrf.mxu0 }
0x2b73   :  { %v7306_v35 = vadd.f32 %v7302_v11, %v20158_v0  ;;  %v7301_v40 = vmul.f32 0.35355338, %v7290_v43  ;;  %v7307_v39 = vsel %vm5221_vm7, %v7303_v49, -inf }
0x2b74   :  { %7308 = vmax.xlane.f32.xlu1 %v7307_v39 }
0x2b75   :  { %v7305_v63 = vadd.f32 %v7301_v40, %v20165_v58  ;;  %v7316_v54 = vsel %vm5221_vm7, %v7306_v35, -inf }
0x2b76   :  { %7317 = vmax.xlane.f32.xlu0 %v7316_v54 }
0x2b77   :  { %v7313_v47 = vsel %vm5221_vm7, %v7305_v63, -inf }
0x2b78   :  { %7314 = vmax.xlane.f32.xlu1 %v7313_v47 }
0x2b89   :  { %7461 = vrot.lane.b32.xlu1 %v7101_v59, %s17638_s26 }
0x2bfb   :  { %v7312_v3 = vpop.xlane.xlu0 %7311 }
0x2bfc   :  { %v7320_v14 = vsub.f32 %v7304_v16, %v7312_v3 }
0x2bfd   :  { %v7309_v18 = vpop.xlane.xlu1 %7308 }
0x2bfe   :  { %v7325_v20 = vmul.f32 1.442695, %v7320_v14  ;;  %v7319_v26 = vsub.f32 %v7303_v49, %v7309_v18 }
0x2bff   :  { %v7318_v55 = vpop.xlane.xlu0 %7317 }
0x2c00   :  { %17419 = vpow2.f32 %v7325_v20  ;;  %v7323_v29 = vmul.f32 1.442695, %v7319_v26  ;;  %v7322_v31 = vsub.f32 %v7306_v35, %v7318_v55 }
0x2c01   :  { %v7315_v37 = vpop.xlane.xlu1 %7314 }
0x2c02   :  { %17421 = vpow2.f32 %v7323_v29  ;;  %v7329_v44 = vmul.f32 1.442695, %v7322_v31  ;;  %v7321_v12 = vsub.f32 %v7305_v63, %v7315_v37 }
0x2c04   :  { %17423 = vpow2.f32 %v7329_v44  ;;  %v7327_v28 = vmul.f32 1.442695, %v7321_v12 }
0x2c05   :  { %v7462_v57 = vpop.permute.xlu1 %7461 }
0x2c06   :  { %16508 = vmatprep.subr.msk.mxu1 %vm6056_vm10, %v7462_v57  ;;  %17425 = vpow2.f32 %v7327_v28 }
0x2c0d   :  { %v17420_v52 = vpop.eup %17419 }
0x2c0e   :  { %v7334_v38 = vsel %vm5221_vm7, %v17420_v52, 0.0 }
0x2c0f   :  { %v17422_v48 = vpop.eup %17421  ;;  %7335 = vadd.xlane.f32.xlu0 %v7334_v38 }
0x2c10   :  { %v7331_v50 = vsel %vm5221_vm7, %v17422_v48, 0.0 }
0x2c11   :  { %v17424_v7 = vpop.eup %17423  ;;  %7332 = vadd.xlane.f32.xlu1 %v7331_v50 }
0x2c12   :  { %v7340_v9 = vsel %vm5221_vm7, %v17424_v7, 0.0 }
0x2c13   :  { %7341 = vadd.xlane.f32.xlu0 %v7340_v9  ;;  %v17426_v13 = vpop.eup %17425 }
0x2c14   :  { %v7337_v27 = vsel %vm5221_vm7, %v17426_v13, 0.0 }
0x2c22   :  { %7451 = vrot.lane.b32.xlu1 %v20110_v51, %s17638_s26 }
0x2c29   :  { %7459 = vrot.lane.b32.xlu0 %v7096_v22, %s17638_s26 }
0x2c2d   :  { %7455 = vrot.lane.b32.xlu0 %v7006_v32, %s17638_s26 }
0x2c46   :  { %7338 = vadd.xlane.f32.xlu1 %v7337_v27 }
0x2c57   :  { %7453 = vrot.lane.b32.xlu1 %v20054_v42, %s17638_s26 }
0x2c5b   :  { %7457 = vrot.lane.b32.xlu1 %v7011_v33, %s17638_s26 }
0x2c98   :  { %v7336_v1 = vpop.xlane.xlu0 %7335 }
0x2c99   :  { %17427 = vrcp.f32 %v7336_v1 }
0x2c9a   :  { %v7333_v59 = vpop.xlane.xlu1 %7332 }
0x2c9b   :  { %17429 = vrcp.f32 %v7333_v59 }
0x2c9c   :  { %v7342_v23 = vpop.xlane.xlu0 %7341 }
0x2c9d   :  { %17431 = vrcp.f32 %v7342_v23 }
0x2c9e   :  { %v7452_v42 = vpop.permute.xlu1 %7451 }
0x2ca0   :  { %v7460_v36 = vpop.permute.xlu0 %7459 }
0x2ca4   :  { %v7456_v11 = vpop.permute.xlu0 %7455 }
0x2ca6   :  { %v17428_v51 = vpop.eup %17427 }
0x2ca7   :  { %v7346_v32 = vmul.f32 %v17428_v51, %v17420_v52 }
0x2ca8   :  { %v17430_v22 = vpop.eup %17429 }
0x2ca9   :  { %v7344_v34 = vmul.f32 %v17430_v22, %v17422_v48 }
0x2caa   :  { %v17432_v10 = vpop.eup %17431 }
0x2cab   :  { %16502 = vmatprep.mubr.msk.f32.mxu1 %vm5221_vm7, %v7344_v34  ;;  %v7350_v56 = vmul.f32 %v17432_v10, %v17424_v7 }
0x2cac   :  { %16503 = vmatmul.mubr.msk.f32.vlgmr.msra.gmra.mxu1 %vm5221_vm7, %v7346_v32 }
0x2cad   :  { %16509 = vmatpush3.xpose.msk.msra.mxu1 %vm6056_vm10, %v7462_v57 }
0x2cae   :  { %16510 = vmatprep.subr.msk.mxu1 %vm6056_vm10, %v7460_v36 }
0x2cb1   :  { %16511 = vmatpush3.xpose.msk.msra.mxu1 %vm6056_vm10, %v7460_v36 }
0x2ccf   :  { %v7339_v33 = vpop.xlane.xlu1 %7338 }
0x2cd0   :  { %17433 = vrcp.f32 %v7339_v33 }
0x2cd3   :  { %v7454_v49 = vpop.permute.xlu1 %7453 }
0x2cd7   :  { %v7458_v53 = vpop.permute.xlu1 %7457 }
0x2cdd   :  { %v17434_v16 = vpop.eup %17433 }
0x2cde   :  { %v7348_v41 = vmul.f32 %v17434_v16, %v17426_v13 }
0x2ce0   :  { %16505 = vmatprep.mubr.msk.f32.mxu1 %vm5221_vm7, %v7348_v41 }
0x2ce1   :  { %16506 = vmatmul.mubr.msk.f32.gmra.mxu1 %vm5221_vm7, %v7350_v56 }
0x2ce2   :  { %16512 = vmatprep.mubr.msk.f32.mxu1 %vm6056_vm10, %v7452_v42 }
0x2ce5   :  { %16513 = vmatmul.mubr.msk.f32.vlgmr.msra.gmra.mxu1 %vm6056_vm10, %v7454_v49 }
0x2ce6   :  { %16515 = vmatprep.mubr.msk.f32.mxu1 %vm6056_vm10, %v7456_v11 }
0x2ce9   :  { %16516 = vmatmul.mubr.msk.f32.gmra.mxu1 %vm6056_vm10, %v7458_v53 }
0x2d6c   :  { %v20196_v43 = vpop.f32.mrf.mxu1 }
0x2d6e   :  { %v20198_v35 = vpop.f32.mrf.mxu1 }
0x2da1   :  { %v20200_v40 = vpop.f32.mrf.mxu1 }
0x2da3   :  { %v20202_v39 = vpop.f32.mrf.mxu1 }
0x2da5   :  { %v16514_v63 = vpop.f32.mrf.mxu1 }
0x2da6   :  { %v7561_v54 = vmul.f32 0.35355338, %v16514_v63  ;;  %v8081_v63 = vld [vmem:[%s21709_s3 + $0x890] sm:$0xff] }
0x2da7   :  { %v7541_v47 = vpop.f32.mrf.mxu1 }
0x2da8   :  { %v7565_v3 = vadd.f32 %v7561_v54, %v20147_v6  ;;  %v7560_v14 = vmul.f32 0.35355338, %v7541_v47 }
0x2da9   :  { %v16517_v18 = vpop.f32.mrf.mxu1 }
0x2daa   :  { %v7564_v20 = vadd.f32 %v7560_v14, %v20152_v21  ;;  %v7571_v26 = vsel %vm5221_vm7, %v7565_v3, -inf  ;;  %v7563_v29 = vmul.f32 0.35355338, %v16517_v18  ;;  %v8080_v18 = vld [vmem:[%s21709_s3 + $0x888] sm:$0xff] }
0x2dab   :  { %7572 = vmax.xlane.f32.xlu1 %v7571_v26  ;;  %v7551_v55 = vpop.f32.mrf.mxu1 }
0x2dac   :  { %v7562_v31 = vmul.f32 0.35355338, %v7551_v55  ;;  %v7568_v37 = vsel %vm5221_vm7, %v7564_v20, -inf  ;;  %v7567_v57 = vadd.f32 %v7563_v29, %v20158_v0  ;;  %v7996_v55 = vld [vmem:[%s21709_s3 + $0x928] sm:$0xff]  ;;  %v7995_v29 = vld [vmem:[%s21709_s3 + $0x920] sm:$0xff] }
0x2dad   :  { %7569 = vmax.xlane.f32.xlu0 %v7568_v37  ;;  %v7994_v37 = vld [vmem:[%s21709_s3 + $0x918] sm:$0xff] }
0x2dae   :  { %v7566_v44 = vadd.f32 %v7562_v31, %v20165_v58  ;;  %v7577_v6 = vsel %vm5221_vm7, %v7567_v57, -inf }
0x2db0   :  { %v7574_v52 = vsel %vm5221_vm7, %v7566_v44, -inf }
0x2db1   :  { %7575 = vmax.xlane.f32.xlu0 %v7574_v52 }
0x2db5   :  { %7578 = vmax.xlane.f32.xlu0 %v7577_v6 }
0x2e34   :  { %v7573_v21 = vpop.xlane.xlu1 %7572 }
0x2e35   :  { %v7581_v38 = vsub.f32 %v7565_v3, %v7573_v21  ;;  %v8164_v21 = vld [vmem:[%s21709_s3 + $0x978] sm:$0xff] }
0x2e36   :  { %v7570_v48 = vpop.xlane.xlu0 %7569 }
0x2e37   :  { %v7586_v50 = vmul.f32 1.442695, %v7581_v38  ;;  %v7580_v7 = vsub.f32 %v7564_v20, %v7570_v48  ;;  %v8079_v20 = vld [vmem:[%s21709_s3 + $0x880] sm:$0xff] }
0x2e39   :  { %17435 = vpow2.f32 %v7586_v50  ;;  %v7584_v9 = vmul.f32 1.442695, %v7580_v7  ;;  %v14628_v50 = vld [vmem:[%s21709_s3 + $0x850] ss:$0 sm:$0xff] }
0x2e3a   :  { %v7576_v12 = vpop.xlane.xlu0 %7575 }
0x2e3b   :  { %17437 = vpow2.f32 %v7584_v9  ;;  %v7582_v28 = vsub.f32 %v7566_v44, %v7576_v12 }
0x2e3d   :  { %v7588_v13 = vmul.f32 1.442695, %v7582_v28 }
0x2e3e   :  { %v7579_v58 = vpop.xlane.xlu0 %7578 }
0x2e3f   :  { %17439 = vpow2.f32 %v7588_v13  ;;  %v7583_v0 = vsub.f32 %v7567_v57, %v7579_v58  ;;  %v8165_v57 = vld [vmem:[%s21709_s3 + $0x980] sm:$0xff] }
0x2e41   :  { %v7590_v27 = vmul.f32 1.442695, %v7583_v0 }
0x2e43   :  { %17441 = vpow2.f32 %v7590_v27 }
0x2e46   :  { %v17436_v1 = vpop.eup %17435 }
0x2e47   :  { %v7595_v59 = vsel %vm5221_vm7, %v17436_v1, 0.0 }
0x2e48   :  { %v17438_v51 = vpop.eup %17437  ;;  %7596 = vadd.xlane.f32.xlu0 %v7595_v59  ;;  %v14625_v59 = vld [vmem:[%s21709_s3 + $0x8f0] ss:$0 sm:$0xff] }
0x2e49   :  { %v7592_v23 = vsel %vm5221_vm7, %v17438_v51, 0.0 }
0x2e4a   :  { %7593 = vadd.xlane.f32.xlu1 %v7592_v23 }
0x2e4c   :  { %v17440_v22 = vpop.eup %17439 }
0x2e4d   :  { %v7598_v34 = vsel %vm5221_vm7, %v17440_v22, 0.0 }
0x2e4e   :  { %7599 = vadd.xlane.f32.xlu1 %v7598_v34 }
0x2e50   :  { %v17442_v32 = vpop.eup %17441 }
0x2e51   :  { %v7601_v36 = vsel %vm5221_vm7, %v17442_v32, 0.0 }
0x2e52   :  { %7602 = vadd.xlane.f32.xlu0 %v7601_v36 }
0x2e5f   :  { %7615 = vrot.lane.b32.xlu1 %v20124_v19, %s17638_s26  ;;  %v7194_v19 = vld [vmem:[%s21709_s3 + $0x508] sm:$0xff] }
0x2e68   :  { %7613 = vrot.lane.b32.xlu0 %v20126_v24, %s17638_s26 }
0x2ed1   :  { %v7597_v42 = vpop.xlane.xlu0 %7596 }
0x2ed2   :  { %17443 = vrcp.f32 %v7597_v42 }
0x2ed3   :  { %v7594_v33 = vpop.xlane.xlu1 %7593 }
0x2ed4   :  { %17445 = vrcp.f32 %v7594_v33 }
0x2ed7   :  { %v7600_v10 = vpop.xlane.xlu1 %7599 }
0x2ed8   :  { %17447 = vrcp.f32 %v7600_v10 }
0x2edb   :  { %v7603_v16 = vpop.xlane.xlu0 %7602  ;;  %v7616_v41 = vpop.permute.xlu1 %7615 }
0x2edc   :  { %17449 = vrcp.f32 %v7603_v16  ;;  %16518 = vmatprep.subr.msk.mxu0 %vm5251_vm6, %v7616_v41 }
0x2edd   :  { %16519 = vmatpush3.msk.msra.mxu0 %vm5251_vm6, %v7616_v41 }
0x2edf   :  { %v7614_v56 = vpop.permute.xlu0 %7613  ;;  %v17444_v49 = vpop.eup %17443 }
0x2ee0   :  { %16520 = vmatprep.subr.mxu0 %v7614_v56  ;;  %v7607_v53 = vmul.f32 %v17444_v49, %v17436_v1 }
0x2ee1   :  { %v17446_v24 = vpop.eup %17445  ;;  %16521 = vmatpush3.msra.mxu0 %v7614_v56 }
0x2ee2   :  { %v7605_v11 = vmul.f32 %v17446_v24, %v17438_v51  ;;  %16536 = vmatprep.subr.mxu0 %v7194_v19 }
0x2ee4   :  { %16522 = vmatprep.mubr.msk.f32.mxu0 %vm5221_vm7, %v7605_v11  ;;  %v17591_v11 = vld [vmem:[%s21709_s3 + $0x458] sm:$0xf] }
0x2ee5   :  { %v17448_v54 = vpop.eup %17447  ;;  %16523 = vmatmul.mubr.msk.f32.vlgmr.msra.gmra.mxu0 %vm5221_vm7, %v7607_v53 }
0x2ee6   :  { %v7609_v47 = vmul.f32 %v17448_v54, %v17440_v22  ;;  %16537 = vmatpush3.msra.mxu0 %v7194_v19  ;;  %v17592_v54 = vld [vmem:[%s21709_s3 + $0x450] sm:$0xff] }
0x2ee7   :  { %16555 = vmatprep.subr.mxu0 %v8081_v63 }
0x2ee8   :  { %16525 = vmatprep.mubr.msk.f32.mxu0 %vm5221_vm7, %v7609_v47 }
0x2ee9   :  { %v17450_v3 = vpop.eup %17449 }
0x2eea   :  { %v7611_v14 = vmul.f32 %v17450_v3, %v17442_v32  ;;  %v14631_v32 = vld [vmem:[%s21709_s3 + $0x940] ss:$0 sm:$0xff] }
0x2eec   :  { %16526 = vmatmul.mubr.msk.f32.gmra.mxu0 %vm5221_vm7, %v7611_v14 }
0x2eed   :  { %16538 = vmatprep.mubr.msk.f32.mxu0 %vm6056_vm10, %v20198_v35  ;;  %v8078_v35 = vld [vmem:[%s21709_s3 + $0x878] sm:$0xff] }
0x2ef0   :  { %16539 = vmatmul.mubr.msk.f32.vlgmr.msra.gmra.mxu0 %vm6056_vm10, %v20196_v43  ;;  %v7195_v43 = vld [vmem:[%s21709_s3 + $0x510] sm:$0xff] }
0x2ef1   :  { %16541 = vmatprep.mubr.msk.f32.mxu0 %vm6056_vm10, %v20202_v39  ;;  %16556 = vmatpush3.msra.mxu0 %v8081_v63 }
0x2ef2   :  { %16557 = vmatprep.subr.mxu0 %v8080_v18  ;;  %16528 = vmatprep.subr.mxu1 %v7195_v43 }
0x2ef3   :  { %16558 = vmatpush3.msra.mxu0 %v8080_v18  ;;  %16529 = vmatpush3.msra.mxu1 %v7195_v43 }
0x2ef4   :  { %16542 = vmatmul.mubr.msk.f32.gmra.mxu0 %vm6056_vm10, %v20200_v40  ;;  %16559 = vmatprep.subr.mxu0 %v8079_v20  ;;  %v7997_v40 = vld [vmem:[%s21709_s3 + $0x930] sm:$0xff] }
0x2ef5   :  { %16560 = vmatpush3.msra.mxu0 %v8079_v20  ;;  %16563 = vmatprep.mubr.msk.f32.mxu0 %vm625_vm1, %v20101_v8 }
0x2ef6   :  { %16561 = vmatprep.subr.mxu0 %v8078_v35  ;;  %16544 = vmatprep.subr.mxu1 %v7997_v40 }
0x2ef7   :  { %16562 = vmatpush3.msra.mxu0 %v8078_v35 }
0x2ef8   :  { %16564 = vmatmul.mubr.msk.f32.vlgmr.msra.gmra.mxu0 %vm625_vm1, %v20105_v15 }
0x2fa5   :  { %v16524_v39 = vpop.f32.mrf.mxu0 }
0x2fa7   :  { %v7698_v26 = vpop.f32.mrf.mxu0 }
0x2fa8   :  { %16530 = vmatprep.mubr.msk.f32.mxu1 %vm6056_vm10, %v7698_v26 }
0x2fa9   :  { %16531 = vmatmul.mubr.msk.f32.vlgmr.msra.gmra.mxu1 %vm6056_vm10, %v16524_v39 }
0x2faa   :  { %16545 = vmatpush3.msra.mxu1 %v7997_v40 }
0x2fab   :  { %16546 = vmatprep.subr.mxu1 %v7996_v55 }
0x2fac   :  { %v16527_v31 = vpop.f32.mrf.mxu0  ;;  %16547 = vmatpush3.msra.mxu1 %v7996_v55 }
0x2fad   :  { %16548 = vmatprep.subr.mxu1 %v7995_v29 }
0x2fae   :  { %v7708_v44 = vpop.f32.mrf.mxu0  ;;  %16549 = vmatpush3.msra.mxu1 %v7995_v29 }
0x2faf   :  { %16533 = vmatprep.mubr.msk.f32.mxu1 %vm6056_vm10, %v7708_v44  ;;  %16550 = vmatprep.subr.mxu1 %v7994_v37 }
0x2fb0   :  { %16534 = vmatmul.mubr.msk.f32.gmra.mxu1 %vm6056_vm10, %v16527_v31  ;;  %v20275_v52 = vpop.f32.mrf.mxu0 }
0x2fb1   :  { %16552 = vmatprep.mubr.msk.f32.mxu1 %vm625_vm1, %v20101_v8  ;;  %16551 = vmatpush3.msra.mxu1 %v7994_v37  ;;  %v8163_v8 = vld [vmem:[%s21709_s3 + $0x970] sm:$0xff] }
0x2fb2   :  { %v20279_v6 = vpop.f32.mrf.mxu0  ;;  %16566 = vmatprep.subr.mxu1 %v8165_v57 }
0x2fb4   :  { %v20284_v38 = vpop.f32.mrf.mxu0  ;;  %16553 = vmatmul.mubr.msk.f32.vlgmr.msra.gmra.mxu1 %vm625_vm1, %v20105_v15  ;;  %v8162_v15 = vld [vmem:[%s21709_s3 + $0x968] sm:$0xff] }
0x2fb5   :  { %16567 = vmatpush3.msra.mxu1 %v8165_v57  ;;  %16574 = vmatprep.mubr.msk.f32.mxu1 %vm625_vm1, %v20095_v45 }
0x2fb6   :  { %16568 = vmatprep.subr.mxu1 %v8164_v21  ;;  %v20293_v48 = vpop.f32.mrf.mxu0 }
0x2fb7   :  { %16569 = vmatpush3.msra.mxu1 %v8164_v21 }
0x2fb8   :  { %16570 = vmatprep.subr.mxu1 %v8163_v8  ;;  %v16565_v7 = vpop.f32.mrf.mxu0 }
0x2fb9   :  { %v8159_v9 = vadd.f32 %v16565_v7, %v14628_v50  ;;  %16571 = vmatpush3.msra.mxu1 %v8163_v8 }
0x2fba   :  { %16572 = vmatprep.subr.mxu1 %v8162_v15  ;;  %v8153_v12 = vpop.f32.mrf.mxu0 }
0x2fbb   :  { %v8154_v28 = vadd.f32 %v14628_v50, %v8153_v12  ;;  %16573 = vmatpush3.msra.mxu1 %v8162_v15  ;;  %8453 = vrot.lane.b32.xlu1 %v8159_v9, %s17637_s15 }
0x2fbc   :  { %16575 = vmatmul.mubr.msk.f32.vlgmr.msra.gmra.mxu1 %vm625_vm1, %v20093_v61  ;;  %16577 = vmatprep.subr.msk.mxu0 %vm5129_vm5, %v8159_v9 }
0x2fbd   :  { %16578 = vmatpush3.xpose.msk.msra.mxu0 %vm5129_vm5, %v8159_v9 }
0x2fbe   :  { %16579 = vmatprep.subr.msk.mxu0 %vm5129_vm5, %v8154_v28 }
0x2fbf   :  { %8451 = vrot.lane.b32.xlu1 %v8154_v28, %s17637_s15 }
0x2fc1   :  { %16580 = vmatpush3.xpose.msk.msra.mxu0 %vm5129_vm5, %v8154_v28 }
0x302d   :  { %v8454_v13 = vpop.permute.xlu1 %8453 }
0x302e   :  { %16591 = vmatprep.subr.msk.mxu0 %vm5129_vm5, %v8454_v13 }
0x3031   :  { %v8452_v36 = vpop.permute.xlu1 %8451 }
0x3069   :  { %v20310_v58 = vpop.f32.mrf.mxu1 }
0x306b   :  { %v20312_v0 = vpop.f32.mrf.mxu1 }
0x3070   :  { %v20314_v27 = vpop.f32.mrf.mxu1 }
0x3072   :  { %v20316_v1 = vpop.f32.mrf.mxu1 }
0x3074   :  { %v16554_v51 = vpop.f32.mrf.mxu1 }
0x3075   :  { %v8075_v23 = vadd.f32 %v16554_v51, %v14625_v59 }
0x3076   :  { %v8069_v22 = vpop.f32.mrf.mxu1 }
0x3077   :  { %v8070_v34 = vadd.f32 %v14625_v59, %v8069_v22  ;;  %8449 = vrot.lane.b32.xlu1 %v8075_v23, %s17637_s15 }
0x3079   :  { %8447 = vrot.lane.b32.xlu0 %v8070_v34, %s17637_s15  ;;  %16581 = vmatprep.mubr.msk.f32.mxu0 %vm5129_vm5, %v8070_v34 }
0x307a   :  { %16582 = vmatmul.mubr.msk.f32.vlgmr.msra.gmra.mxu0 %vm5129_vm5, %v8075_v23 }
0x307b   :  { %16592 = vmatpush3.xpose.msk.msra.mxu0 %vm5129_vm5, %v8454_v13 }
0x307c   :  { %v16576_v42 = vpop.f32.mrf.mxu1  ;;  %16593 = vmatprep.subr.msk.mxu0 %vm5129_vm5, %v8452_v36 }
0x307d   :  { %v8243_v33 = vadd.f32 %v16576_v42, %v14631_v32 }
0x307e   :  { %v8237_v10 = vpop.f32.mrf.mxu1 }
0x307f   :  { %v20330_v16 = vadd.f32 %v14631_v32, %v8237_v10  ;;  %16584 = vmatprep.subr.msk.mxu1 %vm5251_vm6, %v8243_v33  ;;  %16594 = vmatpush3.xpose.msk.msra.mxu0 %vm5129_vm5, %v8452_v36 }
0x3080   :  { %16585 = vmatpush3.msk.msra.mxu1 %vm5251_vm6, %v8243_v33 }
0x3081   :  { %16586 = vmatprep.subr.mxu1 %v20330_v16 }
0x3082   :  { %16587 = vmatpush3.msra.mxu1 %v20330_v16 }
0x30e9   :  { %v8450_v56 = vpop.permute.xlu1 %8449 }
0x30eb   :  { %v8448_v41 = vpop.permute.xlu0 %8447 }
0x30ec   :  { %16595 = vmatprep.mubr.msk.f32.mxu0 %vm5129_vm5, %v8448_v41 }
0x30ed   :  { %16596 = vmatmul.mubr.msk.f32.vlgmr.msra.gmra.mxu0 %vm5129_vm5, %v8450_v56 }
0x313a   :  { %v16583_v19 = vpop.f32.mrf.mxu0 }
0x313b   :  { %v8338_v49 = vmul.f32 0.25, %v16583_v19 }
0x313c   :  { %v8328_v24 = vpop.f32.mrf.mxu0 }
0x313d   :  { %v8340_v53 = vadd.f32 %v17591_v11, %v8338_v49  ;;  %v8337_v63 = vmul.f32 0.25, %v8328_v24  ;;  %v7893_v49 = vadd.f32 %v20279_v6, %v20312_v0  ;;  %v7898_v24 = vadd.f32 %v20275_v52, %v20310_v58 }
0x313f   :  { %v8339_v47 = vadd.f32 %v17592_v54, %v8337_v63  ;;  %v8344_v3 = vsel %vm5225_vm8, %v8340_v53, -inf  ;;  %v7908_v63 = vadd.f32 %v20284_v38, %v20314_v27 }
0x3140   :  { %8345 = vmax.xlane.f32.xlu1 %v8344_v3 }
0x3141   :  { %v8341_v14 = vsel %vm5221_vm7, %v8339_v47, -inf }
0x3142   :  { %8342 = vmax.xlane.f32.xlu0 %v8341_v14 }
0x31ad   :  { %v16597_v18 = vpop.f32.mrf.mxu0 }
0x31ae   :  { %v8539_v35 = vmul.f32 0.25, %v16597_v18 }
0x31af   :  { %v8529_v20 = vpop.f32.mrf.mxu0 }
0x31b0   :  { %v8538_v43 = vmul.f32 0.25, %v8529_v20  ;;  %v8541_v39 = vadd.f32 %v17591_v11, %v8539_v35 }
0x31b2   :  { %v8540_v40 = vadd.f32 %v17592_v54, %v8538_v43  ;;  %v8545_v55 = vsel %vm5225_vm8, %v8541_v39, -inf }
0x31b4   :  { %v8542_v26 = vsel %vm5221_vm7, %v8540_v40, -inf }
0x31b5   :  { %8543 = vmax.xlane.f32.xlu0 %v8542_v26 }
0x31b9   :  { %8546 = vmax.xlane.f32.xlu0 %v8545_v55 }
0x31c9   :  { %v8346_v29 = vpop.xlane.xlu1 %8345 }
0x31ca   :  { %v8348_v31 = vsub.f32 %v8340_v53, %v8346_v29 }
0x31cb   :  { %v8343_v37 = vpop.xlane.xlu0 %8342 }
0x31cc   :  { %v8351_v44 = vmul.f32 1.442695, %v8348_v31  ;;  %v8347_v57 = vsub.f32 %v8339_v47, %v8343_v37 }
0x31ce   :  { %17451 = vpow2.f32 %v8351_v44  ;;  %v8349_v21 = vmul.f32 1.442695, %v8347_v57 }
0x31d0   :  { %17453 = vpow2.f32 %v8349_v21 }
0x31db   :  { %v17452_v8 = vpop.eup %17451 }
0x31dc   :  { %v8356_v50 = vsel %vm5225_vm8, %v17452_v8, 0.0 }
0x31dd   :  { %v17454_v15 = vpop.eup %17453  ;;  %8357 = vadd.xlane.f32.xlu0 %v8356_v50 }
0x31de   :  { %v8353_v7 = vsel %vm5221_vm7, %v17454_v15, 0.0 }
0x31df   :  { %8354 = vadd.xlane.f32.xlu1 %v8353_v7 }
0x323e   :  { %v8544_v9 = vpop.xlane.xlu0 %8543 }
0x323f   :  { %v8548_v12 = vsub.f32 %v8540_v40, %v8544_v9  ;;  %v8249_v40 = vld [vmem:[%s21709_s3 + $0x8e0] sm:$0xff] }
0x3241   :  { %v8550_v28 = vmul.f32 1.442695, %v8548_v12 }
0x3242   :  { %v8547_v13 = vpop.xlane.xlu0 %8546 }
0x3243   :  { %17455 = vpow2.f32 %v8550_v28  ;;  %v8549_v59 = vsub.f32 %v8541_v39, %v8547_v13  ;;  %v8248_v39 = vld [vmem:[%s21709_s3 + $0x8d8] sm:$0xff] }
0x3245   :  { %v8552_v51 = vmul.f32 1.442695, %v8549_v59 }
0x3247   :  { %17457 = vpow2.f32 %v8552_v51 }
0x3250   :  { %v17456_v23 = vpop.eup %17455 }
0x3251   :  { %v8554_v22 = vsel %vm5221_vm7, %v17456_v23, 0.0 }
0x3252   :  { %8555 = vadd.xlane.f32.xlu1 %v8554_v22 }
0x3254   :  { %v17458_v34 = vpop.eup %17457 }
0x3255   :  { %v8557_v32 = vsel %vm5225_vm8, %v17458_v34, 0.0 }
0x3256   :  { %8558 = vadd.xlane.f32.xlu0 %v8557_v32 }
0x3263   :  { %8567 = vrot.lane.b32.xlu1 %v8243_v33, %s17637_s15  ;;  %v14622_v33 = vld [vmem:[%s21709_s3 + $0x4f8] ss:$0 sm:$0xff] }
0x3264   :  { %v7916_v11 = vadd.f32 %v14622_v33, %v7893_v49  ;;  %v7917_v53 = vadd.f32 %v14622_v33, %v7898_v24  ;;  %v7919_v0 = vadd.f32 %v14622_v33, %v7908_v63 }
0x3266   :  { %v8358_v36 = vpop.xlane.xlu0 %8357  ;;  %v20370_v6 = vadd.f32 %v7916_v11, %v19798_v46  ;;  %v7921_v3 = vadd.f32 %v7917_v53, %v19796_v60  ;;  %v7923_v38 = vadd.f32 %v7919_v0, %v19812_v4  ;;  %v8247_v60 = vld [vmem:[%s21709_s3 + $0x8d0] sm:$0xff]  ;;  %v8961_v0 = vld [vmem:[%s21709_s3 + $0x600] sm:$0xff] }
0x3267   :  { %17459 = vrcp.f32 %v8358_v36  ;;  %16612 = vmatprep.subr.mxu0 %v8247_v60 }
0x3268   :  { %v8355_v42 = vpop.xlane.xlu1 %8354  ;;  %v7926_v47 = vsel %vm625_vm1, %v20370_v6, 0.0  ;;  %v7935_v46 = vsel %vm625_vm1, %v7923_v38, 0.0  ;;  %16613 = vmatpush3.msra.mxu0 %v8247_v60 }
0x3269   :  { %17461 = vrcp.f32 %v8355_v42 }
0x326c   :  { %8565 = vrot.lane.b32.xlu0 %v20330_v16, %s17637_s15  ;;  %v7903_v16 = vadd.f32 %v20293_v48, %v20316_v1  ;;  %v7929_v48 = vsel %vm625_vm1, %v7921_v3, 0.0 }
0x326e   :  { %v7918_v54 = vadd.f32 %v14622_v33, %v7903_v16 }
0x3270   :  { %v20376_v52 = vadd.f32 %v7918_v54, %v19816_v2  ;;  %v8246_v2 = vld [vmem:[%s21709_s3 + $0x8c8] sm:$0xff]  ;;  %v8963_v54 = vld [vmem:[%s21709_s3 + $0x610] sm:$0xff] }
0x3271   :  { %16614 = vmatprep.subr.mxu0 %v8246_v2 }
0x3272   :  { %v7932_v58 = vsel %vm625_vm1, %v20376_v52, 0.0  ;;  %16615 = vmatpush3.msra.mxu0 %v8246_v2 }
0x3273   :  { %16630 = vmatprep.subr.mxu0 %v8963_v54 }
0x3274   :  { %v17460_v10 = vpop.eup %17459 }
0x3275   :  { %v8362_v19 = vmul.f32 %v17460_v10, %v17452_v8 }
0x3276   :  { %v17462_v41 = vpop.eup %17461 }
0x3277   :  { %v8360_v56 = vmul.f32 %v17462_v41, %v17454_v15  ;;  %v14652_v15 = vld [vmem:[%s21709_s3 + $0x8a0] ss:$0 sm:$0xff] }
0x3279   :  { %16588 = vmatprep.mubr.msk.f32.mxu1 %vm5221_vm7, %v8360_v56 }
0x327a   :  { %16589 = vmatmul.mubr.msk.f32.vlgmr.msra.gmra.mxu1 %vm5221_vm7, %v8362_v19 }
0x3287   :  { %7927 = vadd.xlane.f32.xlu1 %v7926_v47  ;;  %v8960_v47 = vld [vmem:[%s21709_s3 + $0x5f8] sm:$0xff] }
0x328b   :  { %7930 = vadd.xlane.f32.xlu0 %v7929_v48  ;;  %7933 = vadd.xlane.f32.xlu1 %v7932_v58 }
0x328f   :  { %7936 = vadd.xlane.f32.xlu0 %v7935_v46 }
0x32db   :  { %v8556_v27 = vpop.xlane.xlu1 %8555 }
0x32dc   :  { %17463 = vrcp.f32 %v8556_v27 }
0x32df   :  { %v8568_v4 = vpop.permute.xlu1 %8567  ;;  %v8559_v1 = vpop.xlane.xlu0 %8558 }
0x32e0   :  { %17465 = vrcp.f32 %v8559_v1  ;;  %16598 = vmatprep.subr.msk.mxu1 %vm5251_vm6, %v8568_v4 }
0x32e1   :  { %16599 = vmatpush3.msk.msra.mxu1 %vm5251_vm6, %v8568_v4 }
0x32e3   :  { %v8566_v14 = vpop.permute.xlu0 %8565 }
0x32e4   :  { %16600 = vmatprep.subr.mxu1 %v8566_v14 }
0x32e5   :  { %16601 = vmatpush3.msra.mxu1 %v8566_v14 }
0x32e6   :  { %16605 = vmatprep.subr.mxu1 %v8249_v40 }
0x32e9   :  { %v17464_v18 = vpop.eup %17463 }
0x32ea   :  { %v8561_v20 = vmul.f32 %v17464_v18, %v17456_v23 }
0x32ec   :  { %16602 = vmatprep.mubr.msk.f32.mxu1 %vm5221_vm7, %v8561_v20 }
0x32ed   :  { %v17466_v35 = vpop.eup %17465 }
0x32ee   :  { %v8563_v43 = vmul.f32 %v17466_v35, %v17458_v34 }
0x32f0   :  { %16603 = vmatmul.mubr.msk.f32.vlgmr.msra.gmra.mxu1 %vm5221_vm7, %v8563_v43 }
0x32f1   :  { %16606 = vmatpush3.msra.mxu1 %v8249_v40 }
0x32f2   :  { %16607 = vmatprep.subr.mxu1 %v8248_v39 }
0x32f3   :  { %16608 = vmatpush3.msra.mxu1 %v8248_v39 }
0x3310   :  { %v7928_v44 = vpop.xlane.xlu1 %7927 }
0x3311   :  { %v7938_v7 = vmul.f32 0.03125, %v7928_v44  ;;  %v14623_v44 = vld [vmem:[%s21709_s3 + $0x758] ss:$0 sm:$0xff] }
0x3313   :  { %v20409_v34 = vsub.f32 %v20370_v6, %v7938_v7  ;;  %v8962_v6 = vld [vmem:[%s21709_s3 + $0x608] sm:$0xff] }
0x3314   :  { %v7931_v37 = vpop.xlane.xlu0 %7930  ;;  %v7934_v9 = vpop.xlane.xlu1 %7933 }
0x3315   :  { %v7939_v21 = vmul.f32 0.03125, %v7931_v37  ;;  %v7940_v32 = vmul.f32 0.03125, %v7934_v9  ;;  %v7946_v24 = vmul.f32 %v20409_v34, %v20409_v34  ;;  %v14624_v9 = vld [vmem:[%s21709_s3 + $0x748] ss:$0 sm:$0xff] }
0x3317   :  { %v20406_v59 = vsub.f32 %v7921_v3, %v7939_v21  ;;  %v20419_v49 = vsub.f32 %v20376_v52, %v7940_v32 }
0x3318   :  { %v7937_v8 = vpop.xlane.xlu0 %7936 }
0x3319   :  { %v7941_v51 = vmul.f32 0.03125, %v7937_v8  ;;  %v7947_v19 = vmul.f32 %v20406_v59, %v20406_v59  ;;  %v7948_v16 = vmul.f32 %v20419_v49, %v20419_v49  ;;  %v8873_v8 = vld [vmem:[%s21709_s3 + $0x690] sm:$0xff] }
0x331a   :  { %16619 = vmatprep.subr.mxu1 %v8873_v8 }
0x331b   :  { %v20412_v10 = vsub.f32 %v7923_v38, %v7941_v51  ;;  %v7956_v63 = vsel %vm625_vm1, %v7948_v16, 0.0  ;;  %v9069_v16 = vld [vmem:[%s21709_s3 + $0x6e0] sm:$0xff] }
0x331d   :  { %v7949_v11 = vmul.f32 %v20412_v10, %v20412_v10 }
0x331f   :  { %v7959_v53 = vsel %vm625_vm1, %v7949_v11, 0.0  ;;  %v17596_v11 = vld [vmem:[%s21709_s3 + $0x480] sm:$0xff] }
0x333a   :  { %v16590_v26 = vpop.f32.mrf.mxu1 }
0x333c   :  { %v8438_v55 = vpop.f32.mrf.mxu1 }
0x333d   :  { %16616 = vmatprep.mubr.msk.f32.mxu0 %vm5129_vm5, %v8438_v55 }
0x333e   :  { %16617 = vmatmul.mubr.msk.f32.vlgmr.msra.gmra.mxu0 %vm5129_vm5, %v16590_v26 }
0x333f   :  { %16631 = vmatpush3.msra.mxu0 %v8963_v54 }
0x3340   :  { %16632 = vmatprep.subr.mxu0 %v8962_v6 }
0x3341   :  { %16633 = vmatpush3.msra.mxu0 %v8962_v6 }
0x3342   :  { %16634 = vmatprep.subr.mxu0 %v8961_v0 }
0x3343   :  { %16635 = vmatpush3.msra.mxu0 %v8961_v0 }
0x3344   :  { %16636 = vmatprep.subr.mxu0 %v8960_v47 }
0x3345   :  { %16637 = vmatpush3.msra.mxu0 %v8960_v47 }
0x33b0   :  { %v16604_v29 = vpop.f32.mrf.mxu1 }
0x33b2   :  { %v8644_v31 = vpop.f32.mrf.mxu1 }
0x33b3   :  { %16609 = vmatprep.mubr.msk.f32.mxu1 %vm5129_vm5, %v8644_v31 }
0x33b4   :  { %16610 = vmatmul.mubr.msk.f32.vlgmr.msra.gmra.mxu1 %vm5129_vm5, %v16604_v29 }
0x33b5   :  { %16620 = vmatpush3.msra.mxu1 %v8873_v8 }
0x33fe   :  { %v16618_v57 = vpop.f32.mrf.mxu0 }
0x3400   :  { %v8806_v28 = vpop.f32.mrf.mxu0 }
0x3474   :  { %v16611_v50 = vpop.f32.mrf.mxu1 }
0x3475   :  { %v8812_v12 = vadd.f32 %v16618_v57, %v16611_v50  ;;  %v8872_v50 = vld [vmem:[%s21709_s3 + $0x688] sm:$0xff] }
0x3476   :  { %v8725_v13 = vpop.f32.mrf.mxu1  ;;  %16621 = vmatprep.subr.mxu1 %v8872_v50 }
0x3477   :  { %v8821_v23 = vadd.f32 %v14652_v15, %v8812_v12  ;;  %v8807_v22 = vadd.f32 %v8806_v28, %v8725_v13  ;;  %v8871_v28 = vld [vmem:[%s21709_s3 + $0x680] sm:$0xff]  ;;  %16622 = vmatpush3.msra.mxu1 %v8872_v50 }
0x3478   :  { %16623 = vmatprep.subr.mxu1 %v8871_v28 }
0x3479   :  { %v8820_v36 = vadd.f32 %v14652_v15, %v8807_v22  ;;  %v8823_v42 = vadd.f32 %v8821_v23, %v20093_v61  ;;  %v7953_v61 = vsel %vm625_vm1, %v7947_v19, 0.0  ;;  %v8870_v22 = vld [vmem:[%s21709_s3 + $0x678] sm:$0xff]  ;;  %16624 = vmatpush3.msra.mxu1 %v8871_v28 }
0x347a   :  { %16625 = vmatprep.subr.mxu1 %v8870_v22 }
0x347b   :  { %v8829_v41 = vsel %vm5710_vm9, %v8823_v42, 0.0  ;;  %v8822_v56 = vadd.f32 %v8820_v36, %v20095_v45  ;;  %v7950_v45 = vsel %vm625_vm1, %v7946_v24, 0.0  ;;  %16626 = vmatpush3.msra.mxu1 %v8870_v22  ;;  %v17595_v24 = vld [vmem:[%s21709_s3 + $0x478] sm:$0xff] }
0x347c   :  { %8830 = vadd.xlane.f32.xlu0 %v8829_v41  ;;  %16644 = vmatprep.subr.mxu1 %v9069_v16 }
0x347d   :  { %v8826_v33 = vsel %vm625_vm1, %v8822_v56, 0.0 }
0x347e   :  { %8827 = vadd.xlane.f32.xlu1 %v8826_v33 }
0x3480   :  { %7954 = vadd.xlane.f32.xlu0 %v7953_v61 }
0x3482   :  { %7951 = vadd.xlane.f32.xlu1 %v7950_v45 }
0x3484   :  { %7960 = vadd.xlane.f32.xlu0 %v7959_v53 }
0x3486   :  { %7957 = vadd.xlane.f32.xlu1 %v7956_v63 }
0x3505   :  { %v8831_v3 = vpop.xlane.xlu0 %8830 }
0x3506   :  { %v8833_v52 = vmul.f32 0.03125, %v8831_v3 }
0x3507   :  { %v8828_v48 = vpop.xlane.xlu1 %8827 }
0x3508   :  { %v20444_v58 = vsub.f32 %v8823_v42, %v8833_v52  ;;  %v8832_v38 = vmul.f32 0.03125, %v8828_v48  ;;  %v17593_v42 = vld [vmem:[%s21709_s3 + $0x468] sm:$0xff]  ;;  %v14653_v52 = vld [vmem:[%s21709_s3 + $0x700] ss:$0 sm:$0xff] }
0x3509   :  { %v7955_v46 = vpop.xlane.xlu0 %7954 }
0x350a   :  { %v20446_v60 = vsub.f32 %v8822_v56, %v8832_v38  ;;  %v7963_v2 = vmul.f32 0.03125, %v7955_v46  ;;  %v8837_v27 = vmul.f32 %v20444_v58, %v20444_v58  ;;  %v17594_v56 = vld [vmem:[%s21709_s3 + $0x470] sm:$0xff] }
0x350b   :  { %v7952_v4 = vpop.xlane.xlu1 %7951  ;;  %v14654_v46 = vld [vmem:[%s21709_s3 + $0x6f0] ss:$0 sm:$0xff] }
0x350c   :  { %v7967_v1 = vadd.f32 1e-05, %v7963_v2  ;;  %v7962_v14 = vmul.f32 0.03125, %v7952_v4  ;;  %v8841_v18 = vsel %vm5710_vm9, %v8837_v27, 0.0  ;;  %v8836_v20 = vmul.f32 %v20446_v60, %v20446_v60 }
0x350d   :  { %8842 = vadd.xlane.f32.xlu0 %v8841_v18  ;;  %v7961_v35 = vpop.xlane.xlu0 %7960 }
0x350e   :  { %17467 = vrsqrt.f32 %v7967_v1  ;;  %v7966_v43 = vadd.f32 1e-05, %v7962_v14  ;;  %v7965_v40 = vmul.f32 0.03125, %v7961_v35  ;;  %v8838_v39 = vsel %vm625_vm1, %v8836_v20, 0.0  ;;  %v9066_v35 = vld [vmem:[%s21709_s3 + $0x6c8] sm:$0xff] }
0x350f   :  { %8839 = vadd.xlane.f32.xlu1 %v8838_v39  ;;  %v7958_v26 = vpop.xlane.xlu1 %7957  ;;  %v14658_v39 = vld [vmem:[%s21709_s3 + $0x5d0] ss:$0 sm:$0xff] }
0x3510   :  { %17469 = vrsqrt.f32 %v7966_v43  ;;  %v7969_v55 = vadd.f32 1e-05, %v7965_v40  ;;  %v7964_v29 = vmul.f32 0.03125, %v7958_v26 }
0x3512   :  { %17471 = vrsqrt.f32 %v7969_v55  ;;  %v7968_v31 = vadd.f32 1e-05, %v7964_v29 }
0x3514   :  { %17473 = vrsqrt.f32 %v7968_v31 }
0x351b   :  { %v17468_v37 = vpop.eup %17467 }
0x351c   :  { %v7975_v57 = vmul.f32 %v17468_v37, %v20406_v59 }
0x351d   :  { %v17470_v21 = vpop.eup %17469 }
0x351e   :  { %v7983_v15 = vmul.f32 %v14623_v44, %v7975_v57  ;;  %v7974_v7 = vmul.f32 %v17470_v21, %v20409_v34  ;;  %v14655_v21 = vld [vmem:[%s21709_s3 + $0x650] ss:$0 sm:$0xff] }
0x351f   :  { %v17472_v12 = vpop.eup %17471 }
0x3520   :  { %v7977_v13 = vmul.f32 %v17472_v12, %v20412_v10  ;;  %v7982_v59 = vmul.f32 %v14623_v44, %v7974_v7  ;;  %v20472_v23 = vadd.f32 %v14624_v9, %v7983_v15  ;;  %v14663_v12 = vld [vmem:[%s21709_s3 + $0x6a0] ss:$0 sm:$0xff] }
0x3521   :  { %v17474_v51 = vpop.eup %17473 }
0x3522   :  { %v7985_v34 = vmul.f32 %v14623_v44, %v7977_v13  ;;  %v7976_v32 = vmul.f32 %v17474_v51, %v20419_v49  ;;  %v20478_v36 = vadd.f32 %v14624_v9, %v7982_v59  ;;  %v20490_v19 = vadd.f32 %v17594_v56, %v20472_v23  ;;  %v17597_v56 = vld [vmem:[%s21709_s3 + $0x448] sm:$0xf] }
0x3524   :  { %v20484_v10 = vadd.f32 %v17593_v42, %v20478_v36  ;;  %v7984_v41 = vmul.f32 %v14623_v44, %v7976_v32  ;;  %v20492_v49 = vadd.f32 %v14624_v9, %v7985_v34 }
0x3526   :  { %16638 = vmatprep.mubr.msk.f32.mxu0 %vm625_vm1, %v20484_v10  ;;  %v20496_v33 = vadd.f32 %v14624_v9, %v7984_v41  ;;  %v20510_v45 = vadd.f32 %v17596_v11, %v20492_v49 }
0x3527   :  { %16639 = vmatmul.mubr.msk.f32.vlgmr.msra.gmra.mxu0 %vm625_vm1, %v20490_v19 }
0x3528   :  { %v20504_v61 = vadd.f32 %v17595_v24, %v20496_v33 }
0x352a   :  { %16641 = vmatprep.mubr.msk.f32.mxu0 %vm625_vm1, %v20504_v61 }
0x352b   :  { %16642 = vmatmul.mubr.msk.f32.gmra.mxu0 %vm625_vm1, %v20510_v45 }
0x3596   :  { %v8843_v53 = vpop.xlane.xlu0 %8842 }
0x3597   :  { %v8845_v63 = vmul.f32 0.03125, %v8843_v53 }
0x3598   :  { %v8840_v54 = vpop.xlane.xlu1 %8839 }
0x3599   :  { %v8847_v6 = vadd.f32 1e-05, %v8845_v63  ;;  %v8844_v0 = vmul.f32 0.03125, %v8840_v54 }
0x359b   :  { %17475 = vrsqrt.f32 %v8847_v6  ;;  %v8846_v47 = vadd.f32 1e-05, %v8844_v0 }
0x359d   :  { %17477 = vrsqrt.f32 %v8846_v47 }
0x35a8   :  { %v17476_v3 = vpop.eup %17475 }
0x35a9   :  { %v8851_v48 = vmul.f32 %v17476_v3, %v20444_v58  ;;  %v9068_v58 = vld [vmem:[%s21709_s3 + $0x6d8] sm:$0xff] }
0x35aa   :  { %v17478_v38 = vpop.eup %17477 }
0x35ab   :  { %v8850_v2 = vmul.f32 %v17478_v38, %v20446_v60  ;;  %v8857_v27 = vmul.f32 %v14653_v52, %v8851_v48  ;;  %v9067_v60 = vld [vmem:[%s21709_s3 + $0x6d0] sm:$0xff] }
0x35ad   :  { %v8856_v4 = vmul.f32 %v14653_v52, %v8850_v2  ;;  %v20527_v1 = vadd.f32 %v14654_v46, %v8857_v27 }
0x35af   :  { %v20529_v14 = vadd.f32 %v14654_v46, %v8856_v4  ;;  %v8865_v20 = vadd.f32 %v20527_v1, %v19573_v5 }
0x35b1   :  { %v8864_v18 = vadd.f32 %v20529_v14, %v19571_v30 }
0x35b3   :  { %16627 = vmatprep.mubr.msk.f32.mxu1 %vm625_vm1, %v8864_v18 }
0x35b4   :  { %16628 = vmatmul.mubr.msk.f32.vlgmr.msra.gmra.mxu1 %vm625_vm1, %v8865_v20 }
0x35b5   :  { %16645 = vmatpush3.msra.mxu1 %v9069_v16  ;;  %16652 = vmatprep.mubr.msk.f32.mxu1 %vm625_vm1, %v20478_v36  ;;  %v17598_v16 = vld [vmem:[%s21709_s3 + $0x440] sm:$0xff] }
0x35b6   :  { %16646 = vmatprep.subr.mxu1 %v9068_v58 }
0x35b7   :  { %16647 = vmatpush3.msra.mxu1 %v9068_v58 }
0x35b8   :  { %16648 = vmatprep.subr.mxu1 %v9067_v60 }
0x35b9   :  { %16649 = vmatpush3.msra.mxu1 %v9067_v60 }
0x35ba   :  { %16650 = vmatprep.subr.mxu1 %v9066_v35 }
0x35bb   :  { %16651 = vmatpush3.msra.mxu1 %v9066_v35 }
0x35bc   :  { %16653 = vmatmul.mubr.msk.f32.vlgmr.msra.gmra.mxu1 %vm625_vm1, %v20472_v23 }
0x35bd   :  { %16655 = vmatprep.mubr.msk.f32.mxu1 %vm625_vm1, %v20496_v33 }
0x35c0   :  { %16656 = vmatmul.mubr.msk.f32.gmra.mxu1 %vm625_vm1, %v20492_v49 }
0x35e7   :  { %v16640_v43 = vpop.f32.mrf.mxu0 }
0x35e8   :  { %v9053_v37 = vadd.f32 %v16640_v43, %v14658_v39 }
0x35e9   :  { %v9047_v40 = vpop.f32.mrf.mxu0 }
0x35ea   :  { %v9048_v44 = vadd.f32 %v14658_v39, %v9047_v40 }
0x35eb   :  { %v16643_v26 = vpop.f32.mrf.mxu0 }
0x35ec   :  { %v9063_v55 = vadd.f32 %v16643_v26, %v14658_v39 }
0x35ed   :  { %v9057_v29 = vpop.f32.mrf.mxu0 }
0x35ee   :  { %v20557_v31 = vadd.f32 %v14658_v39, %v9057_v29  ;;  %16658 = vmatprep.subr.msk.mxu0 %vm6056_vm10, %v9063_v55 }
0x35ef   :  { %16659 = vmatpush3.xpose.msk.msra.mxu0 %vm6056_vm10, %v9063_v55 }
0x35f0   :  { %16660 = vmatprep.subr.msk.mxu0 %vm6056_vm10, %v20557_v31 }
0x35f3   :  { %16661 = vmatpush3.xpose.msk.msra.mxu0 %vm6056_vm10, %v20557_v31 }
0x35f4   :  { %16662 = vmatprep.subr.msk.mxu0 %vm6056_vm10, %v9053_v37 }
0x35f7   :  { %16663 = vmatpush3.xpose.msk.msra.mxu0 %vm6056_vm10, %v9053_v37 }
0x35f8   :  { %16664 = vmatprep.subr.msk.mxu0 %vm6056_vm10, %v9048_v44 }
0x35fb   :  { %16665 = vmatpush3.xpose.msk.msra.mxu0 %vm6056_vm10, %v9048_v44 }
0x3674   :  { %v16629_v57 = vpop.f32.mrf.mxu1 }
0x3675   :  { %v8957_v15 = vadd.f32 %v16629_v57, %v14655_v21 }
0x3676   :  { %v8951_v8 = vpop.f32.mrf.mxu1 }
0x3677   :  { %v8952_v50 = vadd.f32 %v14655_v21, %v8951_v8 }
0x3679   :  { %16666 = vmatprep.mubr.msk.f32.mxu0 %vm6056_vm10, %v8952_v50 }
0x367a   :  { %16667 = vmatmul.mubr.msk.f32.vlgmr.msra.gmra.mxu0 %vm6056_vm10, %v8957_v15 }
0x367c   :  { %v16654_v7 = vpop.f32.mrf.mxu1 }
0x367d   :  { %v20583_v22 = vadd.f32 %v16654_v7, %v14663_v12 }
0x367e   :  { %v9153_v9 = vpop.f32.mrf.mxu1 }
0x367f   :  { %v20587_v34 = vadd.f32 %v14663_v12, %v9153_v9 }
0x3680   :  { %v16657_v28 = vpop.f32.mrf.mxu1 }
0x3681   :  { %v20577_v13 = vadd.f32 %v16657_v28, %v14663_v12 }
0x3682   :  { %v9163_v59 = vpop.f32.mrf.mxu1 }
0x3683   :  { %v20579_v51 = vadd.f32 %v14663_v12, %v9163_v59  ;;  %16669 = vmatprep.subr.mxu1 %v20577_v13 }
0x3684   :  { %16670 = vmatpush3.msra.mxu1 %v20577_v13 }
0x3685   :  { %16671 = vmatprep.subr.mxu1 %v20579_v51 }
0x3686   :  { %16672 = vmatpush3.msra.mxu1 %v20579_v51 }
0x3687   :  { %16673 = vmatprep.subr.mxu1 %v20583_v22 }
0x3688   :  { %16674 = vmatpush3.msra.mxu1 %v20583_v22 }
0x3689   :  { %16675 = vmatprep.subr.mxu1 %v20587_v34 }
0x368a   :  { %16676 = vmatpush3.msra.mxu1 %v20587_v34 }
0x373a   :  { %v16668_v32 = vpop.f32.mrf.mxu0 }
0x373b   :  { %v9268_v42 = vmul.f32 0.35355338, %v16668_v32 }
0x373c   :  { %v9258_v41 = vpop.f32.mrf.mxu0 }
0x373d   :  { %v9270_v24 = vadd.f32 %v17597_v56, %v9268_v42  ;;  %v9267_v11 = vmul.f32 0.35355338, %v9258_v41 }
0x373f   :  { %v9269_v53 = vadd.f32 %v17598_v16, %v9267_v11  ;;  %v9274_v63 = vsel %vm5710_vm9, %v9270_v24, -inf }
0x3740   :  { %9275 = vmax.xlane.f32.xlu0 %v9274_v63 }
0x3741   :  { %v9271_v54 = vsel %vm625_vm1, %v9269_v53, -inf }
0x3742   :  { %9272 = vmax.xlane.f32.xlu1 %v9271_v54 }
0x3753   :  { %9384 = vrot.lane.b32.xlu1 %v9063_v55, %s17638_s26 }
0x37c9   :  { %v9276_v6 = vpop.xlane.xlu0 %9275 }
0x37ca   :  { %v9278_v0 = vsub.f32 %v9270_v24, %v9276_v6 }
0x37cb   :  { %v9273_v47 = vpop.xlane.xlu1 %9272 }
0x37cc   :  { %v9281_v3 = vmul.f32 1.442695, %v9278_v0  ;;  %v9277_v52 = vsub.f32 %v9269_v53, %v9273_v47 }
0x37ce   :  { %17479 = vpow2.f32 %v9281_v3  ;;  %v9279_v48 = vmul.f32 1.442695, %v9277_v52  ;;  %v9172_v52 = vld [vmem:[%s21709_s3 + $0x638] sm:$0xff] }
0x37cf   :  { %v9385_v38 = vpop.permute.xlu1 %9384 }
0x37d0   :  { %17481 = vpow2.f32 %v9279_v48  ;;  %16680 = vmatprep.subr.msk.mxu1 %vm6056_vm10, %v9385_v38 }
0x37db   :  { %v17480_v46 = vpop.eup %17479 }
0x37dc   :  { %v9286_v2 = vsel %vm5710_vm9, %v17480_v46, 0.0 }
0x37dd   :  { %v17482_v27 = vpop.eup %17481  ;;  %9287 = vadd.xlane.f32.xlu0 %v9286_v2 }
0x37de   :  { %v9283_v4 = vsel %vm625_vm1, %v17482_v27, 0.0 }
0x37df   :  { %9284 = vadd.xlane.f32.xlu1 %v9283_v4  ;;  %v14688_v4 = vld [vmem:[%s21709_s3 + $0x620] ss:$0 sm:$0xff] }
0x37f0   :  { %9380 = vrot.lane.b32.xlu1 %v9053_v37, %s17638_s26 }
0x37f3   :  { %9382 = vrot.lane.b32.xlu0 %v20557_v31, %s17638_s26 }
0x37f4   :  { %9378 = vrot.lane.b32.xlu1 %v9048_v44, %s17638_s26 }
0x37f7   :  { %9374 = vrot.lane.b32.xlu0 %v8952_v50, %s17638_s26 }
0x37f8   :  { %9376 = vrot.lane.b32.xlu1 %v8957_v15, %s17638_s26 }
0x3866   :  { %v9288_v18 = vpop.xlane.xlu0 %9287 }
0x3867   :  { %17483 = vrcp.f32 %v9288_v18 }
0x3868   :  { %v9285_v20 = vpop.xlane.xlu1 %9284 }
0x3869   :  { %17485 = vrcp.f32 %v9285_v20 }
0x386a   :  { %v9383_v58 = vpop.permute.xlu0 %9382 }
0x386c   :  { %v9381_v26 = vpop.permute.xlu1 %9380 }
0x386e   :  { %v9375_v39 = vpop.permute.xlu0 %9374 }
0x3870   :  { %v9379_v55 = vpop.permute.xlu1 %9378 }
0x3874   :  { %v17484_v60 = vpop.eup %17483  ;;  %v9377_v29 = vpop.permute.xlu1 %9376 }
0x3875   :  { %v9292_v40 = vmul.f32 %v17484_v60, %v17480_v46 }
0x3876   :  { %v17486_v35 = vpop.eup %17485 }
0x3877   :  { %v9290_v43 = vmul.f32 %v17486_v35, %v17482_v27 }
0x3879   :  { %16677 = vmatprep.mubr.msk.f32.mxu1 %vm625_vm1, %v9290_v43 }
0x387a   :  { %16678 = vmatmul.mubr.msk.f32.vlgmr.msra.gmra.mxu1 %vm625_vm1, %v9292_v40 }
0x387b   :  { %16681 = vmatpush3.xpose.msk.msra.mxu1 %vm6056_vm10, %v9385_v38  ;;  %16688 = vmatprep.mubr.msk.f32.mxu1 %vm6056_vm10, %v9375_v39 }
0x387c   :  { %16682 = vmatprep.subr.msk.mxu1 %vm6056_vm10, %v9383_v58 }
0x387f   :  { %16683 = vmatpush3.xpose.msk.msra.mxu1 %vm6056_vm10, %v9383_v58 }
0x3880   :  { %16684 = vmatprep.subr.msk.mxu1 %vm6056_vm10, %v9381_v26 }
0x3883   :  { %16685 = vmatpush3.xpose.msk.msra.mxu1 %vm6056_vm10, %v9381_v26 }
0x3884   :  { %16686 = vmatprep.subr.msk.mxu1 %vm6056_vm10, %v9379_v55 }
0x3887   :  { %16687 = vmatpush3.xpose.msk.msra.mxu1 %vm6056_vm10, %v9379_v55 }
0x388a   :  { %16689 = vmatmul.mubr.msk.f32.vlgmr.msra.gmra.mxu1 %vm6056_vm10, %v9377_v29 }
0x393a   :  { %v20622_v31 = vpop.f32.mrf.mxu1 }
0x393c   :  { %v9365_v37 = vpop.f32.mrf.mxu1 }
0x394a   :  { %v16690_v44 = vpop.f32.mrf.mxu1 }
0x394b   :  { %v9474_v57 = vmul.f32 0.35355338, %v16690_v44 }
0x394c   :  { %v9464_v21 = vpop.f32.mrf.mxu1 }
0x394d   :  { %v9476_v8 = vadd.f32 %v17597_v56, %v9474_v57  ;;  %v9473_v50 = vmul.f32 0.35355338, %v9464_v21 }
0x394f   :  { %v9475_v15 = vadd.f32 %v17598_v16, %v9473_v50  ;;  %v9480_v7 = vsel %vm5710_vm9, %v9476_v8, -inf }
0x3950   :  { %9481 = vmax.xlane.f32.xlu1 %v9480_v7  ;;  %v9808_v7 = vld [vmem:[%s21709_s3 + $0x7a0] sm:$0xff] }
0x3951   :  { %v9477_v9 = vsel %vm625_vm1, %v9475_v15, -inf }
0x3952   :  { %9478 = vmax.xlane.f32.xlu0 %v9477_v9  ;;  %v9807_v9 = vld [vmem:[%s21709_s3 + $0x798] sm:$0xff] }
0x3961   :  { %9509 = vrot.lane.b32.xlu1 %v20577_v13, %s17638_s26 }
0x3965   :  { %9505 = vrot.lane.b32.xlu1 %v20583_v22, %s17638_s26 }
0x3969   :  { %9503 = vrot.lane.b32.xlu1 %v20587_v34, %s17638_s26 }
0x39d9   :  { %v9482_v12 = vpop.xlane.xlu1 %9481 }
0x39da   :  { %v9484_v28 = vsub.f32 %v9476_v8, %v9482_v12  ;;  %v10040_v12 = vld [vmem:[%s21709_s3 + $0x570] sm:$0xff] }
0x39db   :  { %v9479_v59 = vpop.xlane.xlu0 %9478 }
0x39dc   :  { %v9487_v32 = vmul.f32 1.442695, %v9484_v28  ;;  %v9483_v42 = vsub.f32 %v9475_v15, %v9479_v59  ;;  %v9809_v15 = vld [vmem:[%s21709_s3 + $0x7a8] sm:$0xff]  ;;  %v9906_v28 = vld [vmem:[%s21709_s3 + $0x840] sm:$0xff]  ;;  %v9905_v59 = vld [vmem:[%s21709_s3 + $0x838] sm:$0xff] }
0x39dd   :  { %v9510_v41 = vpop.permute.xlu1 %9509 }
0x39de   :  { %17487 = vpow2.f32 %v9487_v32  ;;  %v9485_v56 = vmul.f32 1.442695, %v9483_v42  ;;  %16691 = vmatprep.subr.mxu0 %v9510_v41  ;;  %v9904_v32 = vld [vmem:[%s21709_s3 + $0x830] sm:$0xff]  ;;  %v9903_v42 = vld [vmem:[%s21709_s3 + $0x828] sm:$0xff] }
0x39df   :  { %16692 = vmatpush3.msra.mxu0 %v9510_v41 }
0x39e0   :  { %17489 = vpow2.f32 %v9485_v56 }
0x39e1   :  { %v9506_v53 = vpop.permute.xlu1 %9505 }
0x39e5   :  { %v9504_v54 = vpop.permute.xlu1 %9503 }
0x39eb   :  { %v17488_v24 = vpop.eup %17487 }
0x39ec   :  { %v9492_v13 = vsel %vm5710_vm9, %v17488_v24, 0.0 }
0x39ed   :  { %v17490_v11 = vpop.eup %17489  ;;  %9493 = vadd.xlane.f32.xlu0 %v9492_v13 }
0x39ee   :  { %v9489_v22 = vsel %vm625_vm1, %v17490_v11, 0.0 }
0x39f1   :  { %9490 = vadd.xlane.f32.xlu0 %v9489_v22 }
0x3a07   :  { %9507 = vrot.lane.b32.xlu0 %v20579_v51, %s17638_s26  ;;  %v9173_v51 = vld [vmem:[%s21709_s3 + $0x640] sm:$0xff] }
0x3a76   :  { %v9494_v34 = vpop.xlane.xlu0 %9493 }
0x3a77   :  { %17491 = vrcp.f32 %v9494_v34 }
0x3a7a   :  { %v9491_v16 = vpop.xlane.xlu0 %9490 }
0x3a7b   :  { %17493 = vrcp.f32 %v9491_v16  ;;  %v14689_v16 = vld [vmem:[%s21709_s3 + $0x720] ss:$0 sm:$0xff] }
0x3a7e   :  { %v9508_v63 = vpop.permute.xlu0 %9507 }
0x3a7f   :  { %16693 = vmatprep.subr.mxu0 %v9508_v63 }
0x3a80   :  { %16694 = vmatpush3.msra.mxu0 %v9508_v63  ;;  %v14690_v63 = vld [vmem:[%s21709_s3 + $0x710] ss:$0 sm:$0xff] }
0x3a81   :  { %16695 = vmatprep.subr.mxu0 %v9506_v53 }
0x3a82   :  { %16696 = vmatpush3.msra.mxu0 %v9506_v53 }
0x3a83   :  { %16697 = vmatprep.subr.mxu0 %v9504_v54 }
0x3a84   :  { %16698 = vmatpush3.msra.mxu0 %v9504_v54  ;;  %v17492_v6 = vpop.eup %17491 }
0x3a85   :  { %v9498_v3 = vmul.f32 %v17492_v6, %v17488_v24  ;;  %16702 = vmatprep.subr.mxu0 %v9173_v51 }
0x3a88   :  { %v17494_v0 = vpop.eup %17493 }
0x3a89   :  { %v9496_v47 = vmul.f32 %v17494_v0, %v17490_v11 }
0x3a8b   :  { %16699 = vmatprep.mubr.msk.f32.mxu0 %vm625_vm1, %v9496_v47 }
0x3a8c   :  { %16700 = vmatmul.mubr.msk.f32.vlgmr.msra.gmra.mxu0 %vm625_vm1, %v9498_v3 }
0x3a8d   :  { %16703 = vmatpush3.msra.mxu0 %v9173_v51 }
0x3a8e   :  { %16707 = vmatprep.subr.mxu0 %v9172_v52 }
0x3b4c   :  { %v16701_v48 = vpop.f32.mrf.mxu0 }
0x3b4e   :  { %v9587_v38 = vpop.f32.mrf.mxu0 }
0x3b4f   :  { %16704 = vmatprep.mubr.msk.f32.mxu0 %vm6056_vm10, %v9587_v38  ;;  %v10037_v38 = vld [vmem:[%s21709_s3 + $0x558] sm:$0xff] }
0x3b50   :  { %16705 = vmatmul.mubr.msk.f32.vlgmr.msra.gmra.mxu0 %vm6056_vm10, %v16701_v48  ;;  %v10038_v48 = vld [vmem:[%s21709_s3 + $0x560] sm:$0xff] }
0x3b51   :  { %16709 = vmatprep.mubr.msk.f32.mxu0 %vm6056_vm10, %v9365_v37  ;;  %16708 = vmatpush3.msra.mxu0 %v9172_v52  ;;  %v10039_v52 = vld [vmem:[%s21709_s3 + $0x568] sm:$0xff] }
0x3b52   :  { %16723 = vmatprep.subr.mxu0 %v9906_v28 }
0x3b54   :  { %16710 = vmatmul.mubr.msk.f32.vlgmr.msra.gmra.mxu0 %vm6056_vm10, %v20622_v31 }
0x3b55   :  { %16724 = vmatpush3.msra.mxu0 %v9906_v28 }
0x3b56   :  { %16725 = vmatprep.subr.mxu0 %v9905_v59 }
0x3b57   :  { %16726 = vmatpush3.msra.mxu0 %v9905_v59  ;;  %v10224_v59 = vld [vmem:[%s21709_s3 + $0x5c0] sm:$0xff] }
0x3b58   :  { %16727 = vmatprep.subr.mxu0 %v9904_v32 }
0x3b59   :  { %16728 = vmatpush3.msra.mxu0 %v9904_v32  ;;  %v10134_v32 = vld [vmem:[%s21709_s3 + $0x4f0] sm:$0xff] }
0x3b5a   :  { %16729 = vmatprep.subr.mxu0 %v9903_v42 }
0x3b5b   :  { %16730 = vmatpush3.msra.mxu0 %v9903_v42  ;;  %v10223_v42 = vld [vmem:[%s21709_s3 + $0x5b8] sm:$0xff] }
0x3c10   :  { %v16706_v46 = vpop.f32.mrf.mxu0 }
0x3c12   :  { %v9668_v2 = vpop.f32.mrf.mxu0 }
0x3c14   :  { %v16711_v27 = vpop.f32.mrf.mxu0 }
0x3c15   :  { %v9755_v18 = vadd.f32 %v16711_v27, %v16706_v46  ;;  %v9901_v46 = vld [vmem:[%s21709_s3 + $0x818] sm:$0xff] }
0x3c16   :  { %v9749_v20 = vpop.f32.mrf.mxu0 }
0x3c17   :  { %v9764_v58 = vadd.f32 %v14688_v4, %v9755_v18  ;;  %v9750_v60 = vadd.f32 %v9749_v20, %v9668_v2 }
0x3c19   :  { %v9763_v35 = vadd.f32 %v14688_v4, %v9750_v60  ;;  %v9766_v43 = vadd.f32 %v9764_v58, %v20527_v1  ;;  %v20728_v60 = vld [vmem:[%s21709_s3 + $0x530] ss:$0 sm:$0xff] }
0x3c1b   :  { %v9772_v40 = vsel %vm5710_vm9, %v9766_v43, 0.0  ;;  %v9765_v39 = vadd.f32 %v9763_v35, %v20529_v14  ;;  %v9810_v14 = vld [vmem:[%s21709_s3 + $0x7b0] sm:$0xff] }
0x3c1c   :  { %9773 = vadd.xlane.f32.xlu1 %v9772_v40  ;;  %16712 = vmatprep.subr.mxu1 %v9810_v14  ;;  %v14694_v40 = vld [vmem:[%s21709_s3 + $0x7c0] ss:$0 sm:$0xff] }
0x3c1d   :  { %v9769_v26 = vsel %vm625_vm1, %v9765_v39, 0.0  ;;  %16713 = vmatpush3.msra.mxu1 %v9810_v14 }
0x3c1e   :  { %9770 = vadd.xlane.f32.xlu0 %v9769_v26  ;;  %16714 = vmatprep.subr.mxu1 %v9809_v15 }
0x3c1f   :  { %16715 = vmatpush3.msra.mxu1 %v9809_v15 }
0x3c20   :  { %16716 = vmatprep.subr.mxu1 %v9808_v7 }
0x3c21   :  { %16717 = vmatpush3.msra.mxu1 %v9808_v7 }
0x3c22   :  { %16718 = vmatprep.subr.mxu1 %v9807_v9 }
0x3c23   :  { %16719 = vmatpush3.msra.mxu1 %v9807_v9 }
0x3c24   :  { %16742 = vmatprep.subr.mxu1 %v10040_v12 }
0x3ca5   :  { %v9774_v55 = vpop.xlane.xlu1 %9773 }
0x3ca6   :  { %v9776_v29 = vmul.f32 0.03125, %v9774_v55 }
0x3ca7   :  { %v9771_v31 = vpop.xlane.xlu0 %9770 }
0x3ca8   :  { %v9775_v37 = vmul.f32 0.03125, %v9771_v31  ;;  %v9778_v44 = vsub.f32 %v9766_v43, %v9776_v29 }
0x3caa   :  { %v9777_v57 = vsub.f32 %v9765_v39, %v9775_v37  ;;  %v9780_v50 = vmul.f32 %v9778_v44, %v9778_v44 }
0x3cac   :  { %v9779_v21 = vmul.f32 %v9777_v57, %v9777_v57  ;;  %v9784_v1 = vsel %vm5710_vm9, %v9780_v50, 0.0 }
0x3cae   :  { %v9781_v8 = vsel %vm625_vm1, %v9779_v21, 0.0 }
0x3caf   :  { %9782 = vadd.xlane.f32.xlu0 %v9781_v8 }
0x3cb3   :  { %9785 = vadd.xlane.f32.xlu0 %v9784_v1 }
0x3d38   :  { %v9783_v41 = vpop.xlane.xlu0 %9782 }
0x3d39   :  { %v9787_v56 = vmul.f32 0.03125, %v9783_v41  ;;  %v10133_v41 = vld [vmem:[%s21709_s3 + $0x4e8] sm:$0xff] }
0x3d3b   :  { %v9789_v24 = vadd.f32 1e-05, %v9787_v56  ;;  %v10222_v56 = vld [vmem:[%s21709_s3 + $0x5b0] sm:$0xff] }
0x3d3c   :  { %v9786_v13 = vpop.xlane.xlu0 %9785 }
0x3d3d   :  { %17495 = vrsqrt.f32 %v9789_v24  ;;  %v9788_v11 = vmul.f32 0.03125, %v9786_v13  ;;  %v10132_v24 = vld [vmem:[%s21709_s3 + $0x4e0] sm:$0xff]  ;;  %v10221_v13 = vld [vmem:[%s21709_s3 + $0x5a8] sm:$0xff] }
0x3d3f   :  { %v9790_v22 = vadd.f32 1e-05, %v9788_v11  ;;  %v10131_v11 = vld [vmem:[%s21709_s3 + $0x4d8] sm:$0xff] }
0x3d41   :  { %17497 = vrsqrt.f32 %v9790_v22 }
0x3d4a   :  { %v17496_v34 = vpop.eup %17495 }
0x3d4b   :  { %v9793_v53 = vmul.f32 %v17496_v34, %v9777_v57 }
0x3d4d   :  { %v9799_v54 = vmul.f32 %v14689_v16, %v9793_v53 }
0x3d4e   :  { %v17498_v6 = vpop.eup %17497 }
0x3d4f   :  { %v9794_v0 = vmul.f32 %v17498_v6, %v9778_v44  ;;  %v9805_v47 = vadd.f32 %v14690_v63, %v9799_v54 }
0x3d51   :  { %v9800_v3 = vmul.f32 %v14689_v16, %v9794_v0  ;;  %16720 = vmatprep.mubr.msk.f32.mxu1 %vm625_vm1, %v9805_v47  ;;  %v14697_v0 = vld [vmem:[%s21709_s3 + $0x740] ss:$0 sm:$0xff] }
0x3d53   :  { %v9806_v51 = vadd.f32 %v14690_v63, %v9800_v3 }
0x3d55   :  { %16721 = vmatmul.mubr.msk.f32.vlgmr.msra.gmra.mxu1 %vm625_vm1, %v9806_v51 }
0x3d56   :  { %16743 = vmatpush3.msra.mxu1 %v10040_v12  ;;  %16750 = vmatprep.mubr.msk.f32.mxu1 %vm625_vm1, %v20484_v10  ;;  %v9902_v10 = vld [vmem:[%s21709_s3 + $0x820] sm:$0xff] }
0x3d57   :  { %16744 = vmatprep.subr.mxu1 %v10039_v52  ;;  %16731 = vmatprep.subr.mxu0 %v9902_v10 }
0x3d58   :  { %16745 = vmatpush3.msra.mxu1 %v10039_v52  ;;  %16732 = vmatpush3.msra.mxu0 %v9902_v10 }
0x3d59   :  { %16746 = vmatprep.subr.mxu1 %v10038_v48  ;;  %16733 = vmatprep.subr.mxu0 %v9901_v46 }
0x3d5a   :  { %16747 = vmatpush3.msra.mxu1 %v10038_v48  ;;  %16734 = vmatpush3.msra.mxu0 %v9901_v46 }
0x3d5b   :  { %16748 = vmatprep.subr.mxu1 %v10037_v38 }
0x3d5c   :  { %16749 = vmatpush3.msra.mxu1 %v10037_v38 }
0x3d5d   :  { %16751 = vmatmul.mubr.msk.f32.vlgmr.msra.gmra.mxu1 %vm625_vm1, %v20490_v19  ;;  %v9900_v19 = vld [vmem:[%s21709_s3 + $0x810] sm:$0xff]  ;;  %16756 = vmatprep.subr.mxu1 %v10134_v32 }
0x3d5e   :  { %16753 = vmatprep.mubr.msk.f32.mxu1 %vm625_vm1, %v20504_v61  ;;  %16735 = vmatprep.subr.mxu0 %v9900_v19  ;;  %v9899_v61 = vld [vmem:[%s21709_s3 + $0x808] sm:$0xff] }
0x3d5f   :  { %16736 = vmatpush3.msra.mxu0 %v9900_v19  ;;  %16757 = vmatpush3.msra.mxu1 %v10134_v32 }
0x3d60   :  { %16737 = vmatprep.subr.mxu0 %v9899_v61  ;;  %16758 = vmatprep.subr.mxu1 %v10133_v41 }
0x3d61   :  { %16754 = vmatmul.mubr.msk.f32.gmra.mxu1 %vm625_vm1, %v20510_v45  ;;  %16738 = vmatpush3.msra.mxu0 %v9899_v61  ;;  %v14691_v45 = vld [vmem:[%s21709_s3 + $0x770] ss:$0 sm:$0xff] }
0x3d62   :  { %16767 = vmatprep.subr.mxu0 %v10224_v59  ;;  %16759 = vmatpush3.msra.mxu1 %v10133_v41 }
0x3d63   :  { %16760 = vmatprep.subr.mxu1 %v10132_v24 }
0x3d64   :  { %16761 = vmatpush3.msra.mxu1 %v10132_v24 }
0x3d65   :  { %16762 = vmatprep.subr.mxu1 %v10131_v11 }
0x3d66   :  { %16763 = vmatpush3.msra.mxu1 %v10131_v11 }
0x3e15   :  { %v16722_v2 = vpop.f32.mrf.mxu1 }
0x3e16   :  { %v9894_v27 = vadd.f32 %v16722_v2, %v14691_v45 }
0x3e17   :  { %v9888_v4 = vpop.f32.mrf.mxu1 }
0x3e18   :  { %v9889_v18 = vadd.f32 %v14691_v45, %v9888_v4  ;;  %v9898_v58 = vmax.f32 %v9894_v27, 0.0 }
0x3e1a   :  { %v9897_v20 = vmax.f32 %v9889_v18, 0.0  ;;  %v14704_v18 = vld [vmem:[%s21709_s3 + $0x4b0] ss:$0 sm:$0xff] }
0x3e1c   :  { %16739 = vmatprep.mubr.msk.f32.mxu0 %vm413_vm0, %v9897_v20 }
0x3e1d   :  { %v16752_v35 = vpop.f32.mrf.mxu1  ;;  %16740 = vmatmul.mubr.msk.f32.vlgmr.msra.gmra.mxu0 %vm413_vm0, %v9898_v58 }
0x3e1e   :  { %v20733_v43 = vadd.f32 %v16752_v35, %v20728_v60  ;;  %16768 = vmatpush3.msra.mxu0 %v10224_v59 }
0x3e1f   :  { %16769 = vmatprep.subr.mxu0 %v10223_v42  ;;  %v10112_v19 = vpop.f32.mrf.mxu1 }
0x3e20   :  { %16770 = vmatpush3.msra.mxu0 %v10223_v42  ;;  %v20789_v2 = vadd.f32 %v20728_v60, %v10112_v19  ;;  %v20846_v42 = vld [vmem:[%s21709_s3 + $0x430] sm:$0xff] }
0x3e21   :  { %16771 = vmatprep.subr.mxu0 %v10222_v56 }
0x3e22   :  { %16772 = vmatpush3.msra.mxu0 %v10222_v56 }
0x3e23   :  { %16773 = vmatprep.subr.mxu0 %v10221_v13 }
0x3e24   :  { %16774 = vmatpush3.msra.mxu0 %v10221_v13 }
0x3edd   :  { %v16741_v39 = vpop.f32.mrf.mxu0 }
0x3ede   :  { %v9990_v26 = vadd.f32 %v16741_v39, %v14694_v40 }
0x3edf   :  { %v9984_v55 = vpop.f32.mrf.mxu0 }
0x3ee0   :  { %v9994_v29 = vadd.f32 %v9990_v26, %v9806_v51  ;;  %v9985_v31 = vadd.f32 %v14694_v40, %v9984_v55  ;;  %v14698_v51 = vld [vmem:[%s21709_s3 + $0x730] ss:$0 sm:$0xff] }
0x3ee2   :  { %v9993_v37 = vadd.f32 %v9985_v31, %v9805_v47  ;;  %v10000_v44 = vsel %vm5710_vm9, %v9994_v29, 0.0 }
0x3ee3   :  { %10001 = vadd.xlane.f32.xlu0 %v10000_v44 }
0x3ee4   :  { %v9997_v57 = vsel %vm625_vm1, %v9993_v37, 0.0 }
0x3ee5   :  { %9998 = vadd.xlane.f32.xlu1 %v9997_v57 }
0x3f6c   :  { %v10002_v21 = vpop.xlane.xlu0 %10001 }
0x3f6d   :  { %v10004_v8 = vmul.f32 0.03125, %v10002_v21  ;;  %v20826_v21 = vld [vmem:[%s21709_s3 + $0x428] sm:$0xff] }
0x3f6e   :  { %v9999_v50 = vpop.xlane.xlu1 %9998 }
0x3f6f   :  { %v10006_v1 = vsub.f32 %v9994_v29, %v10004_v8  ;;  %v10003_v14 = vmul.f32 0.03125, %v9999_v50 }
0x3f71   :  { %v10005_v15 = vsub.f32 %v9993_v37, %v10003_v14  ;;  %v10008_v7 = vmul.f32 %v10006_v1, %v10006_v1  ;;  %v20832_v14 = vld [vmem:[%s21709_s3 + $0x420] sm:$0xff] }
0x3f73   :  { %v10012_v9 = vsel %vm5710_vm9, %v10008_v7, 0.0  ;;  %v10007_v12 = vmul.f32 %v10005_v15, %v10005_v15 }
0x3f74   :  { %10013 = vadd.xlane.f32.xlu0 %v10012_v9 }
0x3f75   :  { %v10009_v28 = vsel %vm625_vm1, %v10007_v12, 0.0  ;;  %v20839_v12 = vld [vmem:[%s21709_s3 + $0x438] sm:$0xff] }
0x3f76   :  { %10010 = vadd.xlane.f32.xlu1 %v10009_v28 }
0x3ffd   :  { %v10014_v22 = vpop.xlane.xlu0 %10013 }
0x3ffe   :  { %v10016_v34 = vmul.f32 0.03125, %v10014_v22 }
0x3fff   :  { %v10011_v16 = vpop.xlane.xlu1 %10010 }
0x4000   :  { %v10018_v53 = vadd.f32 1e-05, %v10016_v34  ;;  %v10015_v63 = vmul.f32 0.03125, %v10011_v16 }
0x4002   :  { %17499 = vrsqrt.f32 %v10018_v53  ;;  %v10017_v54 = vadd.f32 1e-05, %v10015_v63 }
0x4004   :  { %17501 = vrsqrt.f32 %v10017_v54 }
0x400f   :  { %v17500_v6 = vpop.eup %17499 }
0x4010   :  { %v10022_v47 = vmul.f32 %v17500_v6, %v10006_v1 }
0x4011   :  { %v17502_v3 = vpop.eup %17501 }
0x4012   :  { %v10021_v52 = vmul.f32 %v17502_v3, %v10005_v15  ;;  %v10028_v48 = vmul.f32 %v14697_v0, %v10022_v47 }
0x4014   :  { %v10027_v38 = vmul.f32 %v14697_v0, %v10021_v52  ;;  %v20772_v10 = vadd.f32 %v14698_v51, %v10028_v48 }
0x4016   :  { %v20774_v46 = vadd.f32 %v14698_v51, %v10027_v38  ;;  %v20784_v45 = vadd.f32 %v20772_v10, %v19573_v5  ;;  %v14707_v5 = vld [vmem:[%s21709_s3 + $0x580] ss:$0 sm:$0xff] }
0x4018   :  { %16775 = vmatprep.mubr.msk.f32.mxu0 %vm625_vm1, %v20774_v46  ;;  %v20780_v61 = vadd.f32 %v20774_v46, %v19571_v30  ;;  %v16755_v30 = vpop.f32.mrf.mxu1 }
0x4019   :  { %16776 = vmatmul.mubr.msk.f32.vlgmr.msra.gmra.mxu0 %vm625_vm1, %v20772_v10  ;;  %v10128_v31 = vadd.f32 %v16755_v30, %v20728_v60 }
0x401a   :  { %16764 = vmatprep.mubr.msk.f32.mxu1 %vm625_vm1, %v20780_v61  ;;  %v10122_v27 = vpop.f32.mrf.mxu1 }
0x401b   :  { %16765 = vmatmul.mubr.msk.f32.vlgmr.msra.gmra.mxu1 %vm625_vm1, %v20784_v45  ;;  %v10123_v29 = vadd.f32 %v20728_v60, %v10122_v27 }
0x401c   :  { %16782 = vmatprep.mubr.msk.f32.mxu1 %vm6056_vm10, %v20789_v2 }
0x40d9   :  { %v16777_v4 = vpop.f32.mrf.mxu0 }
0x40da   :  { %v20803_v20 = vadd.f32 %v16777_v4, %v14707_v5 }
0x40db   :  { %v16766_v58 = vpop.f32.mrf.mxu1  ;;  %v10302_v35 = vpop.f32.mrf.mxu0 }
0x40dc   :  { %v10218_v40 = vadd.f32 %v16766_v58, %v14704_v18  ;;  %v20805_v39 = vadd.f32 %v14707_v5, %v10302_v35  ;;  %16788 = vmatprep.subr.msk.mxu0 %vm5251_vm6, %v20803_v20 }
0x40dd   :  { %v10212_v26 = vpop.f32.mrf.mxu1  ;;  %16789 = vmatpush3.msk.msra.mxu0 %vm5251_vm6, %v20803_v20 }
0x40de   :  { %v10213_v55 = vadd.f32 %v14704_v18, %v10212_v26  ;;  %16778 = vmatprep.subr.msk.mxu1 %vm6056_vm10, %v10218_v40  ;;  %16790 = vmatprep.subr.mxu0 %v20805_v39 }
0x40df   :  { %16779 = vmatpush3.xpose.msk.msra.mxu1 %vm6056_vm10, %v10218_v40  ;;  %16791 = vmatpush3.msra.mxu0 %v20805_v39 }
0x40e0   :  { %16780 = vmatprep.subr.msk.mxu1 %vm6056_vm10, %v10213_v55 }
0x40e3   :  { %16781 = vmatpush3.xpose.msk.msra.mxu1 %vm6056_vm10, %v10213_v55 }
0x40e6   :  { %16783 = vmatmul.mubr.msk.f32.vlgmr.msra.gmra.mxu1 %vm6056_vm10, %v20733_v43 }
0x40e7   :  { %16785 = vmatprep.mubr.msk.f32.mxu1 %vm6056_vm10, %v10123_v29 }
0x40ea   :  { %16786 = vmatmul.mubr.msk.f32.gmra.mxu1 %vm6056_vm10, %v10128_v31 }
0x41a6   :  { %v16784_v37 = vpop.f32.mrf.mxu1 }
0x41a7   :  { %v10417_v44 = vmul.f32 0.35355338, %v16784_v37 }
0x41a8   :  { %v10397_v57 = vpop.f32.mrf.mxu1 }
0x41a9   :  { %v10421_v8 = vadd.f32 %v20826_v21, %v10417_v44  ;;  %v10416_v50 = vmul.f32 0.35355338, %v10397_v57 }
0x41aa   :  { %v16787_v1 = vpop.f32.mrf.mxu1 }
0x41ab   :  { %v10420_v60 = vadd.f32 %v20832_v14, %v10416_v50  ;;  %v10419_v15 = vmul.f32 0.35355338, %v16787_v1  ;;  %v10427_v7 = vsel %vm5221_vm7, %v10421_v8, -inf }
0x41ac   :  { %10428 = vmax.xlane.f32.xlu0 %v10427_v7  ;;  %v10407_v9 = vpop.f32.mrf.mxu1 }
0x41ad   :  { %v10423_v28 = vadd.f32 %v20839_v12, %v10419_v15  ;;  %v10418_v59 = vmul.f32 0.35355338, %v10407_v9  ;;  %v10424_v32 = vsel %vm5221_vm7, %v10420_v60, -inf }
0x41ae   :  { %10425 = vmax.xlane.f32.xlu1 %v10424_v32 }
0x41af   :  { %v10422_v41 = vadd.f32 %v20846_v42, %v10418_v59  ;;  %v10433_v56 = vsel %vm5221_vm7, %v10423_v28, -inf }
0x41b0   :  { %10434 = vmax.xlane.f32.xlu0 %v10433_v56 }
0x41b1   :  { %v10430_v24 = vsel %vm5221_vm7, %v10422_v41, -inf }
0x41b2   :  { %10431 = vmax.xlane.f32.xlu1 %v10430_v24 }
0x41c3   :  { %10578 = vrot.lane.b32.xlu1 %v10218_v40, %s17638_s26 }
0x4235   :  { %v10429_v13 = vpop.xlane.xlu0 %10428 }
0x4236   :  { %v10437_v11 = vsub.f32 %v10421_v8, %v10429_v13 }
0x4237   :  { %v10426_v22 = vpop.xlane.xlu1 %10425 }
0x4238   :  { %v10442_v34 = vmul.f32 1.442695, %v10437_v11  ;;  %v10436_v16 = vsub.f32 %v10420_v60, %v10426_v22 }
0x4239   :  { %v10435_v53 = vpop.xlane.xlu0 %10434 }
0x423a   :  { %17503 = vpow2.f32 %v10442_v34  ;;  %v10440_v63 = vmul.f32 1.442695, %v10436_v16  ;;  %v10439_v54 = vsub.f32 %v10423_v28, %v10435_v53 }
0x423b   :  { %v10432_v6 = vpop.xlane.xlu1 %10431 }
0x423c   :  { %17505 = vpow2.f32 %v10440_v63  ;;  %v10446_v0 = vmul.f32 1.442695, %v10439_v54  ;;  %v10438_v30 = vsub.f32 %v10422_v41, %v10432_v6 }
0x423e   :  { %17507 = vpow2.f32 %v10446_v0  ;;  %v10444_v5 = vmul.f32 1.442695, %v10438_v30 }
0x423f   :  { %v10579_v47 = vpop.permute.xlu1 %10578 }
0x4240   :  { %16798 = vmatprep.subr.msk.mxu0 %vm6056_vm10, %v10579_v47  ;;  %17509 = vpow2.f32 %v10444_v5 }
0x4247   :  { %v17504_v3 = vpop.eup %17503 }
0x4248   :  { %v10451_v51 = vsel %vm5221_vm7, %v17504_v3, 0.0 }
0x4249   :  { %v17506_v52 = vpop.eup %17505  ;;  %10452 = vadd.xlane.f32.xlu0 %v10451_v51 }
0x424a   :  { %v10448_v48 = vsel %vm5221_vm7, %v17506_v52, 0.0 }
0x424b   :  { %v17508_v38 = vpop.eup %17507  ;;  %10449 = vadd.xlane.f32.xlu1 %v10448_v48 }
0x424c   :  { %v10457_v19 = vsel %vm5221_vm7, %v17508_v38, 0.0 }
0x424d   :  { %10458 = vadd.xlane.f32.xlu0 %v10457_v19  ;;  %v17510_v27 = vpop.eup %17509 }
0x424e   :  { %v10454_v4 = vsel %vm5221_vm7, %v17510_v27, 0.0 }
0x425c   :  { %10568 = vrot.lane.b32.xlu1 %v20789_v2, %s17638_s26 }
0x4263   :  { %10576 = vrot.lane.b32.xlu0 %v10213_v55, %s17638_s26 }
0x4267   :  { %10572 = vrot.lane.b32.xlu0 %v10123_v29, %s17638_s26 }
0x4280   :  { %10455 = vadd.xlane.f32.xlu1 %v10454_v4 }
0x4291   :  { %10570 = vrot.lane.b32.xlu1 %v20733_v43, %s17638_s26 }
0x4295   :  { %10574 = vrot.lane.b32.xlu1 %v10128_v31, %s17638_s26 }
0x42d2   :  { %v10453_v18 = vpop.xlane.xlu0 %10452 }
0x42d3   :  { %17511 = vrcp.f32 %v10453_v18 }
0x42d4   :  { %v10450_v58 = vpop.xlane.xlu1 %10449 }
0x42d5   :  { %17513 = vrcp.f32 %v10450_v58 }
0x42d6   :  { %v10459_v35 = vpop.xlane.xlu0 %10458 }
0x42d7   :  { %17515 = vrcp.f32 %v10459_v35 }
0x42d8   :  { %v10569_v43 = vpop.permute.xlu1 %10568 }
0x42da   :  { %v10577_v29 = vpop.permute.xlu0 %10576 }
0x42de   :  { %v10573_v1 = vpop.permute.xlu0 %10572 }
0x42e0   :  { %v17512_v2 = vpop.eup %17511 }
0x42e1   :  { %v10463_v55 = vmul.f32 %v17512_v2, %v17504_v3 }
0x42e2   :  { %v17514_v40 = vpop.eup %17513 }
0x42e3   :  { %v10461_v26 = vmul.f32 %v17514_v40, %v17506_v52 }
0x42e4   :  { %v17516_v37 = vpop.eup %17515 }
0x42e5   :  { %16792 = vmatprep.mubr.msk.f32.mxu0 %vm5221_vm7, %v10461_v26  ;;  %v10467_v8 = vmul.f32 %v17516_v37, %v17508_v38 }
0x42e6   :  { %16793 = vmatmul.mubr.msk.f32.vlgmr.msra.gmra.mxu0 %vm5221_vm7, %v10463_v55 }
0x42e7   :  { %16799 = vmatpush3.xpose.msk.msra.mxu0 %vm6056_vm10, %v10579_v47 }
0x42e8   :  { %16800 = vmatprep.subr.msk.mxu0 %vm6056_vm10, %v10577_v29 }
0x42eb   :  { %16801 = vmatpush3.xpose.msk.msra.mxu0 %vm6056_vm10, %v10577_v29 }
0x4309   :  { %v10456_v31 = vpop.xlane.xlu1 %10455 }
0x430a   :  { %17517 = vrcp.f32 %v10456_v31 }
0x430d   :  { %v10571_v50 = vpop.permute.xlu1 %10570 }
0x4311   :  { %v10575_v60 = vpop.permute.xlu1 %10574 }
0x4317   :  { %v17518_v44 = vpop.eup %17517 }
0x4318   :  { %v10465_v57 = vmul.f32 %v17518_v44, %v17510_v27 }
0x431a   :  { %16795 = vmatprep.mubr.msk.f32.mxu0 %vm5221_vm7, %v10465_v57 }
0x431b   :  { %16796 = vmatmul.mubr.msk.f32.gmra.mxu0 %vm5221_vm7, %v10467_v8 }
0x431c   :  { %16802 = vmatprep.mubr.msk.f32.mxu0 %vm6056_vm10, %v10569_v43 }
0x431f   :  { %16803 = vmatmul.mubr.msk.f32.vlgmr.msra.gmra.mxu0 %vm6056_vm10, %v10571_v50 }
0x4320   :  { %16805 = vmatprep.mubr.msk.f32.mxu0 %vm6056_vm10, %v10573_v1 }
0x4323   :  { %16806 = vmatmul.mubr.msk.f32.gmra.mxu0 %vm6056_vm10, %v10575_v60 }
0x43a6   :  { %v20875_v15 = vpop.f32.mrf.mxu0 }
0x43a8   :  { %v20877_v7 = vpop.f32.mrf.mxu0 }
0x43db   :  { %v20879_v9 = vpop.f32.mrf.mxu0 }
0x43dd   :  { %v20881_v28 = vpop.f32.mrf.mxu0 }
0x43df   :  { %v16804_v59 = vpop.f32.mrf.mxu0 }
0x43e0   :  { %v10678_v32 = vmul.f32 0.35355338, %v16804_v59 }
0x43e1   :  { %v10658_v41 = vpop.f32.mrf.mxu0 }
0x43e2   :  { %v10682_v56 = vadd.f32 %v20826_v21, %v10678_v32  ;;  %v10677_v24 = vmul.f32 0.35355338, %v10658_v41  ;;  %v10312_v41 = vld [vmem:[%s21709_s3 + $0x520] sm:$0xff] }
0x43e3   :  { %v16807_v13 = vpop.f32.mrf.mxu0  ;;  %16818 = vmatprep.subr.mxu0 %v10312_v41 }
0x43e4   :  { %v10681_v11 = vadd.f32 %v20832_v14, %v10677_v24  ;;  %v10688_v22 = vsel %vm5221_vm7, %v10682_v56, -inf  ;;  %v10680_v16 = vmul.f32 0.35355338, %v16807_v13  ;;  %16819 = vmatpush3.msra.mxu0 %v10312_v41  ;;  %v11115_v13 = vld [vmem:[%s21709_s3 + $0x48] sm:$0xff]  ;;  %v11307_v41 = vld [vmem:[%s21709_s3 + $0x80] sm:$0xff] }
0x43e5   :  { %10689 = vmax.xlane.f32.xlu1 %v10688_v22  ;;  %v10668_v34 = vpop.f32.mrf.mxu0 }
0x43e6   :  { %v10679_v53 = vmul.f32 0.35355338, %v10668_v34  ;;  %v10685_v63 = vsel %vm5221_vm7, %v10681_v11, -inf  ;;  %v10684_v6 = vadd.f32 %v20839_v12, %v10680_v16  ;;  %v14740_v16 = vld [vmem:[%s21709_s3 + $0x500] ss:$0 sm:$0xff] }
0x43e7   :  { %10686 = vmax.xlane.f32.xlu0 %v10685_v63 }
0x43e8   :  { %v10683_v54 = vadd.f32 %v20846_v42, %v10679_v53  ;;  %v10694_v21 = vsel %vm5221_vm7, %v10684_v6, -inf }
0x43ea   :  { %v10691_v0 = vsel %vm5221_vm7, %v10683_v54, -inf }
0x43eb   :  { %10692 = vmax.xlane.f32.xlu0 %v10691_v0 }
0x43ef   :  { %10695 = vmax.xlane.f32.xlu0 %v10694_v21 }
0x446e   :  { %v10690_v14 = vpop.xlane.xlu1 %10689 }
0x446f   :  { %v10698_v47 = vsub.f32 %v10682_v56, %v10690_v14  ;;  %v11118_v56 = vld [vmem:[%s21709_s3 + $0x60] sm:$0xff] }
0x4470   :  { %v10687_v3 = vpop.xlane.xlu0 %10686  ;;  %16834 = vmatprep.subr.mxu0 %v11118_v56 }
0x4471   :  { %v10703_v51 = vmul.f32 1.442695, %v10698_v47  ;;  %v10697_v52 = vsub.f32 %v10681_v11, %v10687_v3 }
0x4473   :  { %17519 = vpow2.f32 %v10703_v51  ;;  %v10701_v48 = vmul.f32 1.442695, %v10697_v52 }
0x4474   :  { %v10693_v38 = vpop.xlane.xlu0 %10692 }
0x4475   :  { %17521 = vpow2.f32 %v10701_v48  ;;  %v10699_v19 = vsub.f32 %v10683_v54, %v10693_v38 }
0x4477   :  { %v10705_v30 = vmul.f32 1.442695, %v10699_v19  ;;  %v20949_v19 = vld [vmem:[%s21709_s3 + $0x40] ss:$0 sm:$0xff] }
0x4478   :  { %v10696_v42 = vpop.xlane.xlu0 %10695 }
0x4479   :  { %17523 = vpow2.f32 %v10705_v30  ;;  %v10700_v12 = vsub.f32 %v10684_v6, %v10696_v42 }
0x447b   :  { %v10707_v5 = vmul.f32 1.442695, %v10700_v12 }
0x447d   :  { %17525 = vpow2.f32 %v10707_v5 }
0x4480   :  { %v17520_v27 = vpop.eup %17519 }
0x4481   :  { %v10712_v4 = vsel %vm5221_vm7, %v17520_v27, 0.0 }
0x4482   :  { %v17522_v18 = vpop.eup %17521  ;;  %10713 = vadd.xlane.f32.xlu0 %v10712_v4 }
0x4483   :  { %v10709_v58 = vsel %vm5221_vm7, %v17522_v18, 0.0 }
0x4484   :  { %10710 = vadd.xlane.f32.xlu1 %v10709_v58 }
0x4486   :  { %v17524_v2 = vpop.eup %17523 }
0x4487   :  { %v10715_v35 = vsel %vm5221_vm7, %v17524_v2, 0.0 }
0x4488   :  { %10716 = vadd.xlane.f32.xlu1 %v10715_v35 }
0x448a   :  { %v17526_v40 = vpop.eup %17525 }
0x448b   :  { %v10718_v26 = vsel %vm5221_vm7, %v17526_v40, 0.0 }
0x448c   :  { %10719 = vadd.xlane.f32.xlu0 %v10718_v26 }
0x4499   :  { %10732 = vrot.lane.b32.xlu1 %v20803_v20, %s17638_s26  ;;  %v10311_v20 = vld [vmem:[%s21709_s3 + $0x518] sm:$0xff] }
0x44a2   :  { %10730 = vrot.lane.b32.xlu0 %v20805_v39, %s17638_s26 }
0x450b   :  { %v10714_v55 = vpop.xlane.xlu0 %10713 }
0x450c   :  { %17527 = vrcp.f32 %v10714_v55 }
0x450d   :  { %v10711_v29 = vpop.xlane.xlu1 %10710 }
0x450e   :  { %17529 = vrcp.f32 %v10711_v29 }
0x4511   :  { %v10717_v43 = vpop.xlane.xlu1 %10716 }
0x4512   :  { %17531 = vrcp.f32 %v10717_v43 }
0x4515   :  { %v10720_v31 = vpop.xlane.xlu0 %10719  ;;  %v10733_v37 = vpop.permute.xlu1 %10732 }
0x4516   :  { %17533 = vrcp.f32 %v10720_v31  ;;  %16808 = vmatprep.subr.msk.mxu1 %vm5251_vm6, %v10733_v37 }
0x4517   :  { %16809 = vmatpush3.msk.msra.mxu1 %vm5251_vm6, %v10733_v37 }
0x4519   :  { %v10731_v44 = vpop.permute.xlu0 %10730  ;;  %v17528_v57 = vpop.eup %17527 }
0x451a   :  { %16810 = vmatprep.subr.mxu1 %v10731_v44  ;;  %v10724_v50 = vmul.f32 %v17528_v57, %v17520_v27 }
0x451b   :  { %v17530_v39 = vpop.eup %17529  ;;  %16811 = vmatpush3.msra.mxu1 %v10731_v44 }
0x451c   :  { %v10722_v8 = vmul.f32 %v17530_v39, %v17522_v18  ;;  %16826 = vmatprep.subr.mxu1 %v10311_v20 }
0x451e   :  { %16812 = vmatprep.mubr.msk.f32.mxu1 %vm5221_vm7, %v10722_v8 }
0x451f   :  { %v17532_v1 = vpop.eup %17531  ;;  %16813 = vmatmul.mubr.msk.f32.vlgmr.msra.gmra.mxu1 %vm5221_vm7, %v10724_v50 }
0x4520   :  { %v10726_v60 = vmul.f32 %v17532_v1, %v17524_v2  ;;  %16827 = vmatpush3.msra.mxu1 %v10311_v20 }
0x4522   :  { %16815 = vmatprep.mubr.msk.f32.mxu1 %vm5221_vm7, %v10726_v60 }
0x4523   :  { %v17534_v59 = vpop.eup %17533 }
0x4524   :  { %v10728_v32 = vmul.f32 %v17534_v59, %v17526_v40  ;;  %v11308_v59 = vld [vmem:[%s21709_s3 + $0x88] sm:$0xff] }
0x4526   :  { %16816 = vmatmul.mubr.msk.f32.gmra.mxu1 %vm5221_vm7, %v10728_v32  ;;  %v11202_v32 = vld [vmem:[%s21709_s3 + $0x20] sm:$0xff] }
0x4527   :  { %16828 = vmatprep.mubr.msk.f32.mxu1 %vm6056_vm10, %v20877_v7  ;;  %16845 = vmatprep.subr.mxu1 %v11202_v32 }
0x452a   :  { %16829 = vmatmul.mubr.msk.f32.vlgmr.msra.gmra.mxu1 %vm6056_vm10, %v20875_v15  ;;  %v11117_v15 = vld [vmem:[%s21709_s3 + $0x58] sm:$0xff] }
0x452b   :  { %16831 = vmatprep.mubr.msk.f32.mxu1 %vm6056_vm10, %v20881_v28  ;;  %16846 = vmatpush3.msra.mxu1 %v11202_v32 }
0x452e   :  { %16832 = vmatmul.mubr.msk.f32.gmra.mxu1 %vm6056_vm10, %v20879_v9  ;;  %v11116_v9 = vld [vmem:[%s21709_s3 + $0x50] sm:$0xff] }
0x45df   :  { %v16814_v7 = vpop.f32.mrf.mxu1 }
0x45e1   :  { %v10815_v24 = vpop.f32.mrf.mxu1 }
0x45e2   :  { %16820 = vmatprep.mubr.msk.f32.mxu0 %vm6056_vm10, %v10815_v24  ;;  %v11200_v24 = vld [vmem:[%s21709_s3 + $0x10] sm:$0xff] }
0x45e3   :  { %16821 = vmatmul.mubr.msk.f32.vlgmr.msra.gmra.mxu0 %vm6056_vm10, %v16814_v7  ;;  %v11306_v7 = vld [vmem:[%s21709_s3 + $0x78] sm:$0xff] }
0x45e4   :  { %16835 = vmatpush3.msra.mxu0 %v11118_v56  ;;  %v11201_v56 = vld [vmem:[%s21709_s3 + $0x18] sm:$0xff] }
0x45e5   :  { %16836 = vmatprep.subr.mxu0 %v11117_v15  ;;  %16847 = vmatprep.subr.mxu1 %v11201_v56 }
0x45e6   :  { %v16817_v28 = vpop.f32.mrf.mxu1  ;;  %16837 = vmatpush3.msra.mxu0 %v11117_v15  ;;  %16848 = vmatpush3.msra.mxu1 %v11201_v56  ;;  %v11305_v15 = vld [vmem:[%s21709_s3 + $0x70] sm:$0xff] }
0x45e7   :  { %16838 = vmatprep.subr.mxu0 %v11116_v9  ;;  %16849 = vmatprep.subr.mxu1 %v11200_v24 }
0x45e8   :  { %v10825_v11 = vpop.f32.mrf.mxu1  ;;  %16839 = vmatpush3.msra.mxu0 %v11116_v9  ;;  %v11199_v9 = vld [vmem:[%s21709_s3 + $0x8] sm:$0xff]  ;;  %16850 = vmatpush3.msra.mxu1 %v11200_v24 }
0x45e9   :  { %16823 = vmatprep.mubr.msk.f32.mxu0 %vm6056_vm10, %v10825_v11  ;;  %16840 = vmatprep.subr.mxu0 %v11115_v13 }
0x45ea   :  { %16824 = vmatmul.mubr.msk.f32.gmra.mxu0 %vm6056_vm10, %v16817_v28  ;;  %v16830_v22 = vpop.f32.mrf.mxu1  ;;  %16851 = vmatprep.subr.mxu1 %v11199_v9 }
0x45eb   :  { %16842 = vmatprep.mubr.msk.f32.mxu0 %vm625_vm1, %v20780_v61  ;;  %16841 = vmatpush3.msra.mxu0 %v11115_v13 }
0x45ec   :  { %v11009_v53 = vpop.f32.mrf.mxu1  ;;  %16859 = vmatprep.subr.mxu0 %v11308_v59  ;;  %16852 = vmatpush3.msra.mxu1 %v11199_v9 }
0x45ee   :  { %16843 = vmatmul.mubr.msk.f32.vlgmr.msra.gmra.mxu0 %vm625_vm1, %v20784_v45  ;;  %v16833_v21 = vpop.f32.mrf.mxu1 }
0x45ef   :  { %16860 = vmatpush3.msra.mxu0 %v11308_v59 }
0x45f0   :  { %v11019_v52 = vpop.f32.mrf.mxu1  ;;  %16861 = vmatprep.subr.mxu0 %v11307_v41 }
0x45f1   :  { %16862 = vmatpush3.msra.mxu0 %v11307_v41 }
0x45f2   :  { %16863 = vmatprep.subr.mxu0 %v11306_v7 }
0x45f3   :  { %16864 = vmatpush3.msra.mxu0 %v11306_v7 }
0x45f4   :  { %16865 = vmatprep.subr.mxu0 %v11305_v15 }
0x45f5   :  { %16866 = vmatpush3.msra.mxu0 %v11305_v15 }
0x46a3   :  { %v16822_v34 = vpop.f32.mrf.mxu0 }
0x46a4   :  { %v11015_v63 = vadd.f32 %v16830_v22, %v16822_v34 }
0x46a5   :  { %v10912_v54 = vpop.f32.mrf.mxu0 }
0x46a6   :  { %v11034_v6 = vadd.f32 %v14740_v16, %v11015_v63  ;;  %v11010_v0 = vadd.f32 %v11009_v53, %v10912_v54 }
0x46a8   :  { %v11033_v14 = vadd.f32 %v14740_v16, %v11010_v0  ;;  %v11038_v47 = vadd.f32 %v11034_v6, %v20472_v23 }
0x46aa   :  { %v16825_v61 = vpop.f32.mrf.mxu0  ;;  %v11046_v3 = vsel %vm625_vm1, %v11038_v47, 0.0  ;;  %v11037_v45 = vadd.f32 %v11033_v14, %v20478_v36 }
0x46ab   :  { %v11025_v51 = vadd.f32 %v16833_v21, %v16825_v61  ;;  %11047 = vadd.xlane.f32.xlu0 %v11046_v3 }
0x46ac   :  { %v10922_v48 = vpop.f32.mrf.mxu0  ;;  %v11043_v38 = vsel %vm625_vm1, %v11037_v45, 0.0 }
0x46ad   :  { %v11036_v30 = vadd.f32 %v14740_v16, %v11025_v51  ;;  %v11020_v42 = vadd.f32 %v11019_v52, %v10922_v48  ;;  %11044 = vadd.xlane.f32.xlu1 %v11043_v38 }
0x46ae   :  { %v16844_v23 = vpop.f32.mrf.mxu0 }
0x46af   :  { %v11035_v12 = vadd.f32 %v14740_v16, %v11020_v42  ;;  %v20952_v5 = vadd.f32 %v16844_v23, %v20949_v19  ;;  %v11040_v36 = vadd.f32 %v11036_v30, %v20492_v49 }
0x46b1   :  { %v11052_v27 = vsel %vm625_vm1, %v11040_v36, 0.0  ;;  %v11039_v4 = vadd.f32 %v11035_v12, %v20496_v33 }
0x46b2   :  { %11053 = vadd.xlane.f32.xlu0 %v11052_v27 }
0x46b3   :  { %v11049_v18 = vsel %vm625_vm1, %v11039_v4, 0.0 }
0x46b4   :  { %11050 = vadd.xlane.f32.xlu1 %v11049_v18 }
0x4734   :  { %v11048_v58 = vpop.xlane.xlu0 %11047 }
0x4735   :  { %v11056_v2 = vmul.f32 0.03125, %v11048_v58 }
0x4736   :  { %v11045_v35 = vpop.xlane.xlu1 %11044 }
0x4737   :  { %v20958_v40 = vsub.f32 %v11038_v47, %v11056_v2  ;;  %v11055_v26 = vmul.f32 0.03125, %v11045_v35  ;;  %v14741_v47 = vld [vmem:[%s21709_s3 + $0x760] ss:$0 sm:$0xff] }
0x4739   :  { %v20960_v55 = vsub.f32 %v11037_v45, %v11055_v26  ;;  %v11064_v29 = vmul.f32 %v20958_v40, %v20958_v40  ;;  %v14742_v45 = vld [vmem:[%s21709_s3 + $0x750] ss:$0 sm:$0xff] }
0x473b   :  { %v11054_v49 = vpop.xlane.xlu0 %11053  ;;  %v11070_v43 = vsel %vm625_vm1, %v11064_v29, 0.0  ;;  %v11063_v33 = vmul.f32 %v20960_v55, %v20960_v55  ;;  %v17605_v29 = vld [vmem:[%s21709_s3 + $0x478] sm:$0xff] }
0x473c   :  { %v11058_v31 = vmul.f32 0.03125, %v11054_v49  ;;  %11071 = vadd.xlane.f32.xlu0 %v11070_v43  ;;  %v17606_v43 = vld [vmem:[%s21709_s3 + $0x480] sm:$0xff] }
0x473d   :  { %v11051_v37 = vpop.xlane.xlu1 %11050  ;;  %v11067_v44 = vsel %vm625_vm1, %v11063_v33, 0.0 }
0x473e   :  { %v11062_v20 = vsub.f32 %v11040_v36, %v11058_v31  ;;  %v11057_v57 = vmul.f32 0.03125, %v11051_v37  ;;  %11068 = vadd.xlane.f32.xlu1 %v11067_v44  ;;  %v17603_v36 = vld [vmem:[%s21709_s3 + $0x468] sm:$0xff] }
0x4740   :  { %v20968_v39 = vsub.f32 %v11039_v4, %v11057_v57  ;;  %v11066_v8 = vmul.f32 %v11062_v20, %v11062_v20  ;;  %v17604_v4 = vld [vmem:[%s21709_s3 + $0x470] sm:$0xff]  ;;  %v14751_v57 = vld [vmem:[%s21709_s3 + $0x68] ss:$0 sm:$0xff] }
0x4742   :  { %v11076_v50 = vsel %vm625_vm1, %v11066_v8, 0.0  ;;  %v11065_v1 = vmul.f32 %v20968_v39, %v20968_v39 }
0x4743   :  { %11077 = vadd.xlane.f32.xlu0 %v11076_v50 }
0x4744   :  { %v11073_v60 = vsel %vm625_vm1, %v11065_v1, 0.0 }
0x4745   :  { %11074 = vadd.xlane.f32.xlu1 %v11073_v60 }
0x47c5   :  { %v11072_v28 = vpop.xlane.xlu0 %11071 }
0x47c6   :  { %v11080_v13 = vmul.f32 0.03125, %v11072_v28 }
0x47c7   :  { %v11069_v11 = vpop.xlane.xlu1 %11068 }
0x47c8   :  { %v11084_v22 = vadd.f32 1e-05, %v11080_v13  ;;  %v11079_v34 = vmul.f32 0.03125, %v11069_v11 }
0x47ca   :  { %17535 = vrsqrt.f32 %v11084_v22  ;;  %v11083_v16 = vadd.f32 1e-05, %v11079_v34  ;;  %v17607_v22 = vld [vmem:[%s21709_s3 + $0x448] sm:$0xf] }
0x47cc   :  { %17537 = vrsqrt.f32 %v11083_v16  ;;  %v11078_v53 = vpop.xlane.xlu0 %11077 }
0x47cd   :  { %v11082_v63 = vmul.f32 0.03125, %v11078_v53  ;;  %v17608_v53 = vld [vmem:[%s21709_s3 + $0x440] sm:$0xff] }
0x47ce   :  { %v11075_v54 = vpop.xlane.xlu1 %11074 }
0x47cf   :  { %v11086_v6 = vadd.f32 1e-05, %v11082_v63  ;;  %v11081_v0 = vmul.f32 0.03125, %v11075_v54 }
0x47d1   :  { %17539 = vrsqrt.f32 %v11086_v6  ;;  %v11085_v21 = vadd.f32 1e-05, %v11081_v0 }
0x47d3   :  { %17541 = vrsqrt.f32 %v11085_v21 }
0x47d7   :  { %v17536_v14 = vpop.eup %17535 }
0x47d8   :  { %v11092_v61 = vmul.f32 %v17536_v14, %v20958_v40 }
0x47d9   :  { %v17538_v3 = vpop.eup %17537 }
0x47da   :  { %v11091_v51 = vmul.f32 %v17538_v3, %v20960_v55  ;;  %v11100_v52 = vmul.f32 %v14741_v47, %v11092_v61  ;;  %v11190_v55 = vpop.f32.mrf.mxu0 }
0x47db   :  { %v21042_v31 = vadd.f32 %v20949_v19, %v11190_v55  ;;  %v14746_v19 = vld [vmem:[%s21709_s3] ss:$0 sm:$0xff] }
0x47dc   :  { %v11099_v48 = vmul.f32 %v14741_v47, %v11091_v51  ;;  %v21006_v38 = vadd.f32 %v14742_v45, %v11100_v52 }
0x47de   :  { %v17540_v30 = vpop.eup %17539  ;;  %v21008_v42 = vadd.f32 %v14742_v45, %v11099_v48  ;;  %v11112_v18 = vadd.f32 %v17604_v4, %v21006_v38 }
0x47df   :  { %v11094_v23 = vmul.f32 %v17540_v30, %v11062_v20 }
0x47e0   :  { %v17542_v12 = vpop.eup %17541  ;;  %16867 = vmatprep.mubr.msk.f32.mxu0 %vm625_vm1, %v21008_v42  ;;  %v11111_v27 = vadd.f32 %v17603_v36, %v21008_v42 }
0x47e1   :  { %16868 = vmatmul.mubr.msk.f32.vlgmr.msra.gmra.mxu0 %vm625_vm1, %v21006_v38  ;;  %v11093_v58 = vmul.f32 %v17542_v12, %v20968_v39  ;;  %v11102_v2 = vmul.f32 %v14741_v47, %v11094_v23 }
0x47e2   :  { %16853 = vmatprep.mubr.msk.f32.mxu1 %vm625_vm1, %v11111_v27 }
0x47e3   :  { %16854 = vmatmul.mubr.msk.f32.vlgmr.msra.gmra.mxu1 %vm625_vm1, %v11112_v18  ;;  %v11101_v35 = vmul.f32 %v14741_v47, %v11093_v58  ;;  %v21025_v40 = vadd.f32 %v14742_v45, %v11102_v2 }
0x47e5   :  { %v21027_v26 = vadd.f32 %v14742_v45, %v11101_v35  ;;  %v11114_v33 = vadd.f32 %v17606_v43, %v21025_v40 }
0x47e7   :  { %16870 = vmatprep.mubr.msk.f32.mxu0 %vm625_vm1, %v21027_v26  ;;  %v11113_v49 = vadd.f32 %v17605_v29, %v21027_v26 }
0x47e8   :  { %16871 = vmatmul.mubr.msk.f32.gmra.mxu0 %vm625_vm1, %v21025_v40 }
0x47e9   :  { %16856 = vmatprep.mubr.msk.f32.mxu1 %vm625_vm1, %v11113_v49 }
0x47ea   :  { %16857 = vmatmul.mubr.msk.f32.gmra.mxu1 %vm625_vm1, %v11114_v33 }
0x47eb   :  { %16881 = vmatprep.mubr.msk.f32.mxu1 %vm6056_vm10, %v21042_v31 }
0x48a1   :  { %v16869_v37 = vpop.f32.mrf.mxu0 }
0x48a2   :  { %v21060_v56 = vadd.f32 %v16869_v37, %v14751_v57 }
0x48a3   :  { %v16855_v44 = vpop.f32.mrf.mxu1  ;;  %v11392_v20 = vpop.f32.mrf.mxu0 }
0x48a4   :  { %v21066_v24 = vadd.f32 %v14751_v57, %v11392_v20  ;;  %v11292_v15 = vadd.f32 %v16855_v44, %v14746_v19 }
0x48a5   :  { %v11286_v39 = vpop.f32.mrf.mxu1 }
0x48a6   :  { %v11287_v9 = vadd.f32 %v14746_v19, %v11286_v39 }
0x48a8   :  { %v16872_v8 = vpop.f32.mrf.mxu0 }
0x48a9   :  { %v21051_v50 = vadd.f32 %v16872_v8, %v14751_v57 }
0x48aa   :  { %v16858_v1 = vpop.f32.mrf.mxu1  ;;  %v11402_v60 = vpop.f32.mrf.mxu0 }
0x48ab   :  { %v11302_v59 = vadd.f32 %v16858_v1, %v14746_v19  ;;  %v21056_v32 = vadd.f32 %v14751_v57, %v11402_v60  ;;  %16884 = vmatprep.subr.mxu0 %v21051_v50 }
0x48ac   :  { %v11296_v41 = vpop.f32.mrf.mxu1  ;;  %16885 = vmatpush3.msra.mxu0 %v21051_v50 }
0x48ad   :  { %v11297_v7 = vadd.f32 %v14746_v19, %v11296_v41  ;;  %16873 = vmatprep.subr.msk.mxu1 %vm6056_vm10, %v11302_v59  ;;  %16886 = vmatprep.subr.mxu0 %v21056_v32 }
0x48ae   :  { %16874 = vmatpush3.xpose.msk.msra.mxu1 %vm6056_vm10, %v11302_v59  ;;  %16887 = vmatpush3.msra.mxu0 %v21056_v32 }
0x48af   :  { %16875 = vmatprep.subr.msk.mxu1 %vm6056_vm10, %v11297_v7  ;;  %16888 = vmatprep.subr.mxu0 %v21060_v56 }
0x48b0   :  { %16889 = vmatpush3.msra.mxu0 %v21060_v56 }
0x48b1   :  { %16890 = vmatprep.subr.mxu0 %v21066_v24 }
0x48b2   :  { %16876 = vmatpush3.xpose.msk.msra.mxu1 %vm6056_vm10, %v11297_v7  ;;  %16891 = vmatpush3.msra.mxu0 %v21066_v24 }
0x48b3   :  { %16877 = vmatprep.subr.msk.mxu1 %vm6056_vm10, %v11292_v15 }
0x48b6   :  { %16878 = vmatpush3.xpose.msk.msra.mxu1 %vm6056_vm10, %v11292_v15 }
0x48b7   :  { %16879 = vmatprep.subr.msk.mxu1 %vm6056_vm10, %v11287_v9 }
0x48ba   :  { %16880 = vmatpush3.xpose.msk.msra.mxu1 %vm6056_vm10, %v11287_v9 }
0x48bd   :  { %16882 = vmatmul.mubr.msk.f32.vlgmr.msra.gmra.mxu1 %vm6056_vm10, %v20952_v5 }
0x497d   :  { %v16883_v28 = vpop.f32.mrf.mxu1 }
0x497e   :  { %v11507_v13 = vmul.f32 0.35355338, %v16883_v28 }
0x497f   :  { %v11497_v11 = vpop.f32.mrf.mxu1 }
0x4980   :  { %v11509_v34 = vadd.f32 %v17607_v22, %v11507_v13  ;;  %v11506_v16 = vmul.f32 0.35355338, %v11497_v11 }
0x4982   :  { %v11508_v63 = vadd.f32 %v17608_v53, %v11506_v16  ;;  %v11513_v54 = vsel %vm5710_vm9, %v11509_v34, -inf }
0x4983   :  { %11514 = vmax.xlane.f32.xlu0 %v11513_v54  ;;  %v11411_v54 = vld [vmem:[%s21709_s3 + $0x30] sm:$0xff] }
0x4984   :  { %v11510_v6 = vsel %vm625_vm1, %v11508_v63, -inf }
0x4985   :  { %11511 = vmax.xlane.f32.xlu1 %v11510_v6 }
0x4996   :  { %11623 = vrot.lane.b32.xlu1 %v11302_v59, %s17638_s26 }
0x4a0c   :  { %v11515_v0 = vpop.xlane.xlu0 %11514 }
0x4a0d   :  { %v11517_v21 = vsub.f32 %v11509_v34, %v11515_v0 }
0x4a0e   :  { %v11512_v14 = vpop.xlane.xlu1 %11511 }
0x4a0f   :  { %v11520_v47 = vmul.f32 1.442695, %v11517_v21  ;;  %v11516_v61 = vsub.f32 %v11508_v63, %v11512_v14 }
0x4a11   :  { %17543 = vpow2.f32 %v11520_v47  ;;  %v11518_v3 = vmul.f32 1.442695, %v11516_v61 }
0x4a12   :  { %v11624_v45 = vpop.permute.xlu1 %11623 }
0x4a13   :  { %17545 = vpow2.f32 %v11518_v3  ;;  %16895 = vmatprep.subr.msk.mxu0 %vm6056_vm10, %v11624_v45  ;;  %v14776_v3 = vld [vmem:[%s21709_s3 + $0x28] ss:$0 sm:$0xff] }
0x4a1e   :  { %v17544_v51 = vpop.eup %17543 }
0x4a1f   :  { %v11525_v52 = vsel %vm5710_vm9, %v17544_v51, 0.0 }
0x4a20   :  { %v17546_v48 = vpop.eup %17545  ;;  %11526 = vadd.xlane.f32.xlu0 %v11525_v52 }
0x4a21   :  { %v11522_v30 = vsel %vm625_vm1, %v17546_v48, 0.0 }
0x4a22   :  { %11523 = vadd.xlane.f32.xlu1 %v11522_v30 }
0x4a33   :  { %11619 = vrot.lane.b32.xlu1 %v11292_v15, %s17638_s26 }
0x4a36   :  { %11621 = vrot.lane.b32.xlu0 %v11297_v7, %s17638_s26 }
0x4a37   :  { %11617 = vrot.lane.b32.xlu1 %v11287_v9, %s17638_s26 }
0x4a3a   :  { %11613 = vrot.lane.b32.xlu0 %v21042_v31, %s17638_s26 }
0x4a3b   :  { %11615 = vrot.lane.b32.xlu1 %v20952_v5, %s17638_s26 }
0x4aa9   :  { %v11527_v23 = vpop.xlane.xlu0 %11526 }
0x4aaa   :  { %17547 = vrcp.f32 %v11527_v23 }
0x4aab   :  { %v11524_v12 = vpop.xlane.xlu1 %11523 }
0x4aac   :  { %17549 = vrcp.f32 %v11524_v12 }
0x4aad   :  { %v11622_v36 = vpop.permute.xlu0 %11621 }
0x4aaf   :  { %v11620_v5 = vpop.permute.xlu1 %11619 }
0x4ab1   :  { %v11614_v2 = vpop.permute.xlu0 %11613 }
0x4ab3   :  { %v11618_v35 = vpop.permute.xlu1 %11617 }
0x4ab7   :  { %v17548_v27 = vpop.eup %17547  ;;  %v11616_v55 = vpop.permute.xlu1 %11615 }
0x4ab8   :  { %v11531_v58 = vmul.f32 %v17548_v27, %v17544_v51 }
0x4ab9   :  { %v17550_v4 = vpop.eup %17549 }
0x4aba   :  { %v11529_v18 = vmul.f32 %v17550_v4, %v17546_v48 }
0x4abc   :  { %16892 = vmatprep.mubr.msk.f32.mxu0 %vm625_vm1, %v11529_v18 }
0x4abd   :  { %16893 = vmatmul.mubr.msk.f32.vlgmr.msra.gmra.mxu0 %vm625_vm1, %v11531_v58 }
0x4abe   :  { %16896 = vmatpush3.xpose.msk.msra.mxu0 %vm6056_vm10, %v11624_v45  ;;  %16903 = vmatprep.mubr.msk.f32.mxu0 %vm6056_vm10, %v11614_v2 }
0x4abf   :  { %16897 = vmatprep.subr.msk.mxu0 %vm6056_vm10, %v11622_v36 }
0x4ac2   :  { %16898 = vmatpush3.xpose.msk.msra.mxu0 %vm6056_vm10, %v11622_v36 }
0x4ac3   :  { %16899 = vmatprep.subr.msk.mxu0 %vm6056_vm10, %v11620_v5 }
0x4ac6   :  { %16900 = vmatpush3.xpose.msk.msra.mxu0 %vm6056_vm10, %v11620_v5 }
0x4ac7   :  { %16901 = vmatprep.subr.msk.mxu0 %vm6056_vm10, %v11618_v35 }
0x4aca   :  { %16902 = vmatpush3.xpose.msk.msra.mxu0 %vm6056_vm10, %v11618_v35 }
0x4acb   :  { %16927 = vmatprep.subr.mxu0 %v17631_v25 }
0x4acd   :  { %16904 = vmatmul.mubr.msk.f32.vlgmr.msra.gmra.mxu0 %vm6056_vm10, %v11616_v55 }
0x4ace   :  { %16935 = vmatprep.mubr.msk.f32.mxu0 %vm17636_vm2, %v17631_v25 }
0x4b7d   :  { %v21113_v29 = vpop.f32.mrf.mxu0 }
0x4b7f   :  { %v11604_v49 = vpop.f32.mrf.mxu0 }
0x4b8d   :  { %v16905_v43 = vpop.f32.mrf.mxu0 }
0x4b8e   :  { %v11713_v33 = vmul.f32 0.35355338, %v16905_v43  ;;  %v12052_v43 = vld [vmem:[%s21709_s3 + $0x3b8] sm:$0xff] }
0x4b8f   :  { %v11703_v31 = vpop.f32.mrf.mxu0 }
0x4b90   :  { %v11715_v37 = vadd.f32 %v17607_v22, %v11713_v33  ;;  %v11712_v44 = vmul.f32 0.35355338, %v11703_v31  ;;  %v12051_v33 = vld [vmem:[%s21709_s3 + $0x3b0] sm:$0xff]  ;;  %v12137_v31 = vld [vmem:[%s21709_s3 + $0x3e8] sm:$0xff] }
0x4b92   :  { %v11714_v20 = vadd.f32 %v17608_v53, %v11712_v44  ;;  %v11719_v57 = vsel %vm5710_vm9, %v11715_v37, -inf }
0x4b93   :  { %11720 = vmax.xlane.f32.xlu1 %v11719_v57 }
0x4b94   :  { %v11716_v39 = vsel %vm625_vm1, %v11714_v20, -inf }
0x4b95   :  { %11717 = vmax.xlane.f32.xlu0 %v11716_v39 }
0x4ba4   :  { %11748 = vrot.lane.b32.xlu1 %v21051_v50, %s17638_s26 }
0x4ba8   :  { %11744 = vrot.lane.b32.xlu1 %v21060_v56, %s17638_s26 }
0x4bac   :  { %11742 = vrot.lane.b32.xlu1 %v21066_v24, %s17638_s26 }
0x4c1c   :  { %v11721_v8 = vpop.xlane.xlu1 %11720 }
0x4c1d   :  { %v11723_v19 = vsub.f32 %v11715_v37, %v11721_v8  ;;  %v12136_v37 = vld [vmem:[%s21709_s3 + $0x3e0] sm:$0xff] }
0x4c1e   :  { %v11718_v1 = vpop.xlane.xlu0 %11717 }
0x4c1f   :  { %v11726_v60 = vmul.f32 1.442695, %v11723_v19  ;;  %v11722_v59 = vsub.f32 %v11714_v20, %v11718_v1 }
0x4c20   :  { %v11749_v41 = vpop.permute.xlu1 %11748 }
0x4c21   :  { %17551 = vpow2.f32 %v11726_v60  ;;  %v11724_v7 = vmul.f32 1.442695, %v11722_v59  ;;  %16906 = vmatprep.subr.mxu1 %v11749_v41  ;;  %v14777_v60 = vld [vmem:[%s21709_s3 + $0x418] ss:$0 sm:$0xff] }
0x4c22   :  { %16907 = vmatpush3.msra.mxu1 %v11749_v41  ;;  %v14778_v41 = vld [vmem:[%s21709_s3 + $0x410] ss:$0 sm:$0xff] }
0x4c23   :  { %17553 = vpow2.f32 %v11724_v7 }
0x4c24   :  { %v11745_v13 = vpop.permute.xlu1 %11744 }
0x4c28   :  { %v11743_v22 = vpop.permute.xlu1 %11742 }
0x4c2e   :  { %v17552_v15 = vpop.eup %17551 }
0x4c2f   :  { %v11731_v50 = vsel %vm5710_vm9, %v17552_v15, 0.0 }
0x4c30   :  { %v17554_v9 = vpop.eup %17553  ;;  %11732 = vadd.xlane.f32.xlu0 %v11731_v50 }
0x4c31   :  { %v11728_v56 = vsel %vm625_vm1, %v17554_v9, 0.0 }
0x4c34   :  { %11729 = vadd.xlane.f32.xlu0 %v11728_v56 }
0x4c4a   :  { %11746 = vrot.lane.b32.xlu0 %v21056_v32, %s17638_s26  ;;  %v11412_v32 = vld [vmem:[%s21709_s3 + $0x38] sm:$0xff] }
0x4cb9   :  { %v11733_v24 = vpop.xlane.xlu0 %11732 }
0x4cba   :  { %17555 = vrcp.f32 %v11733_v24 }
0x4cbd   :  { %v11730_v28 = vpop.xlane.xlu0 %11729 }
0x4cbe   :  { %17557 = vrcp.f32 %v11730_v28 }
0x4cc1   :  { %v11747_v11 = vpop.permute.xlu0 %11746 }
0x4cc2   :  { %16908 = vmatprep.subr.mxu1 %v11747_v11 }
0x4cc3   :  { %16909 = vmatpush3.msra.mxu1 %v11747_v11 }
0x4cc4   :  { %16910 = vmatprep.subr.mxu1 %v11745_v13 }
0x4cc5   :  { %16911 = vmatpush3.msra.mxu1 %v11745_v13 }
0x4cc6   :  { %16912 = vmatprep.subr.mxu1 %v11743_v22 }
0x4cc7   :  { %16913 = vmatpush3.msra.mxu1 %v11743_v22  ;;  %v17556_v34 = vpop.eup %17555 }
0x4cc8   :  { %v11737_v63 = vmul.f32 %v17556_v34, %v17552_v15  ;;  %16917 = vmatprep.subr.mxu1 %v11412_v32 }
0x4ccb   :  { %v17558_v16 = vpop.eup %17557 }
0x4ccc   :  { %v11735_v53 = vmul.f32 %v17558_v16, %v17554_v9 }
0x4cce   :  { %16914 = vmatprep.mubr.msk.f32.mxu1 %vm625_vm1, %v11735_v53 }
0x4ccf   :  { %16915 = vmatmul.mubr.msk.f32.vlgmr.msra.gmra.mxu1 %vm625_vm1, %v11737_v63 }
0x4cd0   :  { %16918 = vmatpush3.msra.mxu1 %v11412_v32 }
0x4cd1   :  { %16922 = vmatprep.subr.mxu1 %v11411_v54 }
0x4d8f   :  { %v16916_v6 = vpop.f32.mrf.mxu1 }
0x4d91   :  { %v11826_v0 = vpop.f32.mrf.mxu1 }
0x4d92   :  { %16919 = vmatprep.mubr.msk.f32.mxu1 %vm6056_vm10, %v11826_v0 }
0x4d93   :  { %16920 = vmatmul.mubr.msk.f32.vlgmr.msra.gmra.mxu1 %vm6056_vm10, %v16916_v6 }
0x4d94   :  { %16924 = vmatprep.mubr.msk.f32.mxu1 %vm6056_vm10, %v11604_v49  ;;  %16923 = vmatpush3.msra.mxu1 %v11411_v54  ;;  %v12053_v49 = vld [vmem:[%s21709_s3 + $0x3c0] sm:$0xff] }
0x4d95   :  { %16938 = vmatprep.subr.mxu1 %v17631_v25 }
0x4d97   :  { %16925 = vmatmul.mubr.msk.f32.vlgmr.msra.gmra.mxu1 %vm6056_vm10, %v21113_v29 }
0x4d98   :  { %16946 = vmatprep.mubr.msk.f32.mxu1 %vm17636_vm2, %v17631_v25  ;;  %16939 = vmatpush3.msra.mxu1 %v12137_v31  ;;  %v12389_v31 = vld [vmem:[%s21709_s3 + $0x298] sm:$0xff] }
0x4d99   :  { %16940 = vmatprep.subr.mxu1 %v17631_v25 }
0x4d9a   :  { %16941 = vmatpush3.msra.mxu1 %v12136_v37 }
0x4d9b   :  { %16942 = vmatprep.subr.mxu1 %v17631_v25 }
0x4e53   :  { %v16921_v21 = vpop.f32.mrf.mxu1 }
0x4e55   :  { %v11907_v14 = vpop.f32.mrf.mxu1 }
0x4e57   :  { %v16926_v47 = vpop.f32.mrf.mxu1 }
0x4e58   :  { %v11994_v61 = vadd.f32 %v16926_v47, %v16921_v21  ;;  %v12134_v47 = vld [vmem:[%s21709_s3 + $0x3d0] sm:$0xff] }
0x4e59   :  { %v11988_v45 = vpop.f32.mrf.mxu1 }
0x4e5a   :  { %v11989_v51 = vadd.f32 %v11988_v45, %v11907_v14  ;;  %v12003_v52 = vadd.f32 %v14776_v3, %v11994_v61  ;;  %v12135_v14 = vld [vmem:[%s21709_s3 + $0x3d8] sm:$0xff]  ;;  %v12220_v61 = vld [vmem:[%s21709_s3 + $0x408] sm:$0xff] }
0x4e5b   :  { %16943 = vmatpush3.msra.mxu1 %v12135_v14  ;;  %v14779_v45 = vld [vmem:[%s21709_s3 + $0x398] ss:$0 sm:$0xff]  ;;  %v12814_v14 = vld [vmem:[%s21709_s3 + $0x270] sm:$0xff] }
0x4e5c   :  { %v12002_v48 = vadd.f32 %v14776_v3, %v11989_v51  ;;  %v12005_v12 = vadd.f32 %v12003_v52, %v20772_v10  ;;  %v12054_v10 = vld [vmem:[%s21709_s3 + $0x3c8] sm:$0xff]  ;;  %16944 = vmatprep.subr.mxu1 %v17631_v25  ;;  %v12219_v3 = vld [vmem:[%s21709_s3 + $0x400] sm:$0xff] }
0x4e5d   :  { %16928 = vmatpush3.msra.mxu0 %v12054_v10  ;;  %16945 = vmatpush3.msra.mxu1 %v12134_v47  ;;  %v14785_v10 = vld [vmem:[%s21709_s3 + $0x1b8] ss:$0 sm:$0xff]  ;;  %v12813_v47 = vld [vmem:[%s21709_s3 + $0x268] sm:$0xff] }
0x4e5e   :  { %v12004_v30 = vadd.f32 %v12002_v48, %v20774_v46  ;;  %v12011_v36 = vsel %vm5710_vm9, %v12005_v12, 0.0  ;;  %16929 = vmatprep.subr.mxu0 %v17631_v25  ;;  %16960 = vmatprep.subr.mxu1 %v17631_v25 }
0x4e5f   :  { %16930 = vmatpush3.msra.mxu0 %v12053_v49  ;;  %v12390_v49 = vld [vmem:[%s21709_s3 + $0x2a0] sm:$0xff] }
0x4e60   :  { %v12008_v23 = vsel %vm625_vm1, %v12004_v30, 0.0  ;;  %16931 = vmatprep.subr.mxu0 %v17631_v25 }
0x4e61   :  { %12009 = vadd.xlane.f32.xlu0 %v12008_v23  ;;  %16932 = vmatpush3.msra.mxu0 %v12052_v43  ;;  %v12309_v23 = vld [vmem:[%s21709_s3 + $0x230] sm:$0xff] }
0x4e62   :  { %16933 = vmatprep.subr.mxu0 %v17631_v25 }
0x4e63   :  { %16934 = vmatpush3.msra.mxu0 %v12051_v33 }
0x4e64   :  { %16949 = vmatprep.subr.mxu0 %v17631_v25 }
0x4e65   :  { %12012 = vadd.xlane.f32.xlu0 %v12011_v36  ;;  %v12307_v36 = vld [vmem:[%s21709_s3 + $0x220] sm:$0xff] }
0x4eea   :  { %v12010_v27 = vpop.xlane.xlu0 %12009 }
0x4eeb   :  { %v12014_v4 = vmul.f32 0.03125, %v12010_v27  ;;  %v12306_v27 = vld [vmem:[%s21709_s3 + $0x218] sm:$0xff] }
0x4eed   :  { %v12016_v18 = vsub.f32 %v12004_v30, %v12014_v4  ;;  %v12218_v4 = vld [vmem:[%s21709_s3 + $0x3f8] sm:$0xff] }
0x4eee   :  { %v12013_v58 = vpop.xlane.xlu0 %12012 }
0x4eef   :  { %v12015_v2 = vmul.f32 0.03125, %v12013_v58  ;;  %v12018_v5 = vmul.f32 %v12016_v18, %v12016_v18  ;;  %v14781_v58 = vld [vmem:[%s21709_s3 + $0x3a0] ss:$0 sm:$0xff] }
0x4ef1   :  { %v12017_v35 = vsub.f32 %v12005_v12, %v12015_v2  ;;  %v12020_v55 = vsel %vm625_vm1, %v12018_v5, 0.0  ;;  %v12308_v12 = vld [vmem:[%s21709_s3 + $0x228] sm:$0xff] }
0x4ef2   :  { %12021 = vadd.xlane.f32.xlu1 %v12020_v55 }
0x4ef3   :  { %v12019_v29 = vmul.f32 %v12017_v35, %v12017_v35 }
0x4ef5   :  { %v12023_v46 = vsel %vm5710_vm9, %v12019_v29, 0.0  ;;  %v12392_v29 = vld [vmem:[%s21709_s3 + $0x2b0] sm:$0xff] }
0x4ef6   :  { %12024 = vadd.xlane.f32.xlu0 %v12023_v46  ;;  %v12391_v46 = vld [vmem:[%s21709_s3 + $0x2a8] sm:$0xff] }
0x4f7b   :  { %v12022_v44 = vpop.xlane.xlu1 %12021 }
0x4f7c   :  { %v12026_v20 = vmul.f32 0.03125, %v12022_v44 }
0x4f7e   :  { %v12028_v57 = vadd.f32 1e-05, %v12026_v20  ;;  %v12563_v20 = vld [vmem:[%s21709_s3 + $0x250] sm:$0xff] }
0x4f7f   :  { %v12025_v39 = vpop.xlane.xlu0 %12024 }
0x4f80   :  { %17559 = vrsqrt.f32 %v12028_v57  ;;  %v12027_v8 = vmul.f32 0.03125, %v12025_v39  ;;  %v12562_v57 = vld [vmem:[%s21709_s3 + $0x248] sm:$0xff]  ;;  %v12561_v39 = vld [vmem:[%s21709_s3 + $0x240] sm:$0xff] }
0x4f82   :  { %v12029_v19 = vadd.f32 1e-05, %v12027_v8  ;;  %v12560_v8 = vld [vmem:[%s21709_s3 + $0x238] sm:$0xff] }
0x4f84   :  { %17561 = vrsqrt.f32 %v12029_v19  ;;  %v12475_v19 = vld [vmem:[%s21709_s3 + $0x330] sm:$0xff] }
0x4f8d   :  { %v17560_v1 = vpop.eup %17559 }
0x4f8e   :  { %v12032_v59 = vmul.f32 %v17560_v1, %v12016_v18  ;;  %v12217_v18 = vld [vmem:[%s21709_s3 + $0x3f0] sm:$0xff]  ;;  %v12474_v1 = vld [vmem:[%s21709_s3 + $0x328] sm:$0xff] }
0x4f90   :  { %v12038_v7 = vmul.f32 %v14777_v60, %v12032_v59  ;;  %v12472_v59 = vld [vmem:[%s21709_s3 + $0x318] sm:$0xff] }
0x4f91   :  { %v17562_v15 = vpop.eup %17561 }
0x4f92   :  { %v12044_v50 = vadd.f32 %v14778_v41, %v12038_v7  ;;  %v12033_v9 = vmul.f32 %v17562_v15, %v12017_v35 }
0x4f94   :  { %v12039_v56 = vmul.f32 %v14777_v60, %v12033_v9  ;;  %v12047_v24 = vrot.slane %v12044_v50, 5  ;;  %v12301_v28 = vrot.slane %v12044_v50, 1  ;;  %v12303_v13 = vrot.slane %v12044_v50, 6  ;;  %v12473_v60 = vld [vmem:[%s21709_s3 + $0x320] sm:$0xff]  ;;  %v14787_v9 = vld [vmem:[%s21709_s3 + $0x1d8] ss:$0 sm:$0xff] }
0x4f95   :  { %v12808_v16 = vrot.slane %v12044_v50, 3  ;;  %v12554_v53 = vrot.slane %v12044_v50, 2  ;;  %v13059_v54 = vrot.slane %v12044_v50, 4 }
0x4f96   :  { %v12050_v11 = vsel %vm12049_vm11, %v12044_v50, %v12047_v24  ;;  %v12305_v22 = vsel %vm12049_vm11, %v12301_v28, %v12303_v13  ;;  %v12045_v34 = vadd.f32 %v14778_v41, %v12039_v56  ;;  %v14783_v41 = vld [vmem:[%s21709_s3 + $0x3a8] ss:$0 sm:$0xff] }
0x4f97   :  { %16936 = vmatmul.mubr.msk.f32.vlgmr.msra.gmra.mxu0 %vm625_vm1, %v12050_v11  ;;  %v12646_v11 = vld [vmem:[%s21709_s3 + $0x2d0] sm:$0xff] }
0x4f98   :  { %16957 = vmatprep.mubr.msk.f32.mxu0 %vm17636_vm2, %v17631_v25  ;;  %v12557_v63 = vrot.slane %v12045_v34, 7  ;;  %v21188_v32 = vsel %vm12049_vm11, %v12808_v16, %v12045_v34  ;;  %v13061_v6 = vrot.slane %v12045_v34, 1  ;;  %16950 = vmatpush3.msra.mxu0 %v12220_v61  ;;  %v14791_v34 = vld [vmem:[%s21709_s3 + $0x1c0] ss:$0 sm:$0xff] }
0x4f99   :  { %16951 = vmatprep.subr.mxu0 %v17631_v25  ;;  %v12644_v16 = vld [vmem:[%s21709_s3 + $0x2c0] sm:$0xff] }
0x4f9a   :  { %v21191_v0 = vsel %vm12049_vm11, %v12554_v53, %v12557_v63  ;;  %v21194_v21 = vsel %vm12049_vm11, %v13059_v54, %v13061_v6  ;;  %16952 = vmatpush3.msra.mxu0 %v12219_v3  ;;  %v12643_v54 = vld [vmem:[%s21709_s3 + $0x2b8] sm:$0xff]  ;;  %v12812_v61 = vld [vmem:[%s21709_s3 + $0x260] sm:$0xff] }
0x4f9b   :  { %16953 = vmatprep.subr.mxu0 %v17631_v25  ;;  %v12811_v3 = vld [vmem:[%s21709_s3 + $0x258] sm:$0xff] }
0x4f9c   :  { %16954 = vmatpush3.msra.mxu0 %v12218_v4 }
0x4f9d   :  { %16955 = vmatprep.subr.mxu0 %v17631_v25 }
0x4f9e   :  { %16956 = vmatpush3.msra.mxu0 %v12217_v18  ;;  %v12897_v18 = vld [vmem:[%s21709_s3 + $0x2f0] sm:$0xff] }
0x4f9f   :  { %16971 = vmatprep.subr.mxu0 %v17631_v25 }
0x5057   :  { %v12129_v51 = vpop.f32.mrf.mxu0 }
0x5058   :  { %v12130_v52 = vadd.f32 %v14779_v45, %v12129_v51  ;;  %v12729_v45 = vld [vmem:[%s21709_s3 + $0x350] sm:$0xff]  ;;  %v12728_v51 = vld [vmem:[%s21709_s3 + $0x348] sm:$0xff] }
0x5059   :  { %v16937_v48 = vpop.f32.mrf.mxu0 }
0x505a   :  { %v12133_v30 = vmax.f32 %v12130_v52, 0.0  ;;  %v12726_v52 = vld [vmem:[%s21709_s3 + $0x338] sm:$0xff] }
0x505c   :  { %16947 = vmatmul.mubr.msk.f32.vlgmr.msra.gmra.mxu1 %vm625_vm1, %v12133_v30 }
0x505d   :  { %16961 = vmatpush3.msra.mxu1 %v12309_v23  ;;  %16968 = vmatprep.mubr.msk.f32.mxu1 %vm17636_vm2, %v17631_v25  ;;  %v14793_v23 = vld [vmem:[%s21709_s3 + $0x1e0] ss:$0 sm:$0xff] }
0x505e   :  { %16962 = vmatprep.subr.mxu1 %v17631_v25 }
0x505f   :  { %16963 = vmatpush3.msra.mxu1 %v12308_v12 }
0x5060   :  { %16964 = vmatprep.subr.mxu1 %v17631_v25 }
0x5061   :  { %16965 = vmatpush3.msra.mxu1 %v12307_v36 }
0x5062   :  { %16966 = vmatprep.subr.mxu1 %v17631_v25 }
0x5063   :  { %16967 = vmatpush3.msra.mxu1 %v12306_v27 }
0x5064   :  { %16969 = vmatmul.mubr.msk.f32.vlgmr.msra.gmra.mxu1 %vm625_vm1, %v12305_v22  ;;  %16982 = vmatprep.subr.mxu1 %v17631_v25  ;;  %v12645_v22 = vld [vmem:[%s21709_s3 + $0x2c8] sm:$0xff] }
0x5065   :  { %16990 = vmatprep.mubr.msk.f32.mxu1 %vm17636_vm2, %v17631_v25  ;;  %16983 = vmatpush3.msra.mxu1 %v12475_v19 }
0x5066   :  { %16984 = vmatprep.subr.mxu1 %v17631_v25 }
0x5067   :  { %16985 = vmatpush3.msra.mxu1 %v12474_v1  ;;  %v14799_v1 = vld [vmem:[%s21709_s3 + $0x1e8] ss:$0 sm:$0xff] }
0x5068   :  { %16986 = vmatprep.subr.mxu1 %v17631_v25 }
0x5069   :  { %16987 = vmatpush3.msra.mxu1 %v12473_v60 }
0x506a   :  { %16988 = vmatprep.subr.mxu1 %v17631_v25 }
0x506b   :  { %16989 = vmatpush3.msra.mxu1 %v12472_v59 }
0x506c   :  { %17004 = vmatprep.subr.mxu1 %v17631_v25 }
0x511c   :  { %v12212_v2 = vpop.f32.mrf.mxu1 }
0x511d   :  { %v12213_v5 = vadd.f32 %v14781_v58, %v12212_v2  ;;  %v12896_v58 = vld [vmem:[%s21709_s3 + $0x2e8] sm:$0xff] }
0x511e   :  { %v16948_v35 = vpop.f32.mrf.mxu1  ;;  %v14797_v2 = vld [vmem:[%s21709_s3 + $0x1c8] ss:$0 sm:$0xff] }
0x511f   :  { %v12216_v55 = vmax.f32 %v12213_v5, 0.0  ;;  %v12895_v5 = vld [vmem:[%s21709_s3 + $0x2e0] sm:$0xff] }
0x5121   :  { %16958 = vmatmul.mubr.msk.f32.vlgmr.msra.gmra.mxu0 %vm625_vm1, %v12216_v55 }
0x5122   :  { %16972 = vmatpush3.msra.mxu0 %v12392_v29  ;;  %16979 = vmatprep.mubr.msk.f32.mxu0 %vm17636_vm2, %v17631_v25  ;;  %v12894_v29 = vld [vmem:[%s21709_s3 + $0x2d8] sm:$0xff] }
0x5123   :  { %16973 = vmatprep.subr.mxu0 %v17631_v25 }
0x5124   :  { %v12384_v43 = vpop.f32.mrf.mxu1  ;;  %16974 = vmatpush3.msra.mxu0 %v12391_v46 }
0x5125   :  { %v12385_v33 = vadd.f32 %v14785_v10, %v12384_v43  ;;  %16975 = vmatprep.subr.mxu0 %v17631_v25  ;;  %v13066_v43 = vld [vmem:[%s21709_s3 + $0x288] sm:$0xff] }
0x5126   :  { %v16970_v37 = vpop.f32.mrf.mxu1  ;;  %16976 = vmatpush3.msra.mxu0 %v12390_v49  ;;  %v13067_v49 = vld [vmem:[%s21709_s3 + $0x290] sm:$0xff] }
0x5127   :  { %v12388_v44 = vmax.f32 %v12385_v33, 0.0  ;;  %16977 = vmatprep.subr.mxu0 %v17631_v25  ;;  %v13065_v33 = vld [vmem:[%s21709_s3 + $0x280] sm:$0xff]  ;;  %v12980_v37 = vld [vmem:[%s21709_s3 + $0x370] sm:$0xff] }
0x5128   :  { %16978 = vmatpush3.msra.mxu0 %v12389_v31  ;;  %v13064_v31 = vld [vmem:[%s21709_s3 + $0x278] sm:$0xff] }
0x5129   :  { %16980 = vmatmul.mubr.msk.f32.vlgmr.msra.gmra.mxu0 %vm625_vm1, %v12388_v44  ;;  %16993 = vmatprep.subr.mxu0 %v17631_v25  ;;  %v12979_v44 = vld [vmem:[%s21709_s3 + $0x368] sm:$0xff] }
0x512a   :  { %16994 = vmatpush3.msra.mxu0 %v12563_v20  ;;  %17001 = vmatprep.mubr.msk.f32.mxu0 %vm17636_vm2, %v17631_v25  ;;  %v12977_v20 = vld [vmem:[%s21709_s3 + $0x358] sm:$0xff] }
0x512b   :  { %16995 = vmatprep.subr.mxu0 %v17631_v25 }
0x512c   :  { %16996 = vmatpush3.msra.mxu0 %v12562_v57  ;;  %v14795_v57 = vld [vmem:[%s21709_s3 + $0x200] ss:$0 sm:$0xff] }
0x512d   :  { %16997 = vmatprep.subr.mxu0 %v17631_v25 }
0x512e   :  { %16998 = vmatpush3.msra.mxu0 %v12561_v39 }
0x512f   :  { %16999 = vmatprep.subr.mxu0 %v17631_v25 }
0x5130   :  { %17000 = vmatpush3.msra.mxu0 %v12560_v8 }
0x5131   :  { %17002 = vmatmul.mubr.msk.f32.vlgmr.msra.gmra.mxu0 %vm625_vm1, %v21191_v0  ;;  %17015 = vmatprep.subr.mxu0 %v17631_v25 }
0x5132   :  { %17023 = vmatprep.mubr.msk.f32.mxu0 %vm17636_vm2, %v17631_v25  ;;  %17016 = vmatpush3.msra.mxu0 %v12729_v45  ;;  %v14805_v45 = vld [vmem:[%s21709_s3 + $0x1f0] ss:$0 sm:$0xff] }
0x5133   :  { %17017 = vmatprep.subr.mxu0 %v17631_v25 }
0x5134   :  { %17018 = vmatpush3.msra.mxu0 %v12728_v51 }
0x5135   :  { %17019 = vmatprep.subr.mxu0 %v17631_v25 }
0x51e1   :  { %v12295_v7 = vpop.f32.mrf.mxu0 }
0x51e2   :  { %v12296_v15 = vadd.f32 %v14783_v41, %v12295_v7 }
0x51e3   :  { %v16959_v50 = vpop.f32.mrf.mxu0 }
0x51e4   :  { %12300 = vst.msk [vmem:[#allocation2] sm:$0x3] %vm12299_vm12, %v12296_v15  ;;  %v13150_v15 = vld [vmem:[%s21709_s3 + $0x310] sm:$0xff]  ;;  %v13149_v50 = vld [vmem:[%s21709_s3 + $0x308] sm:$0xff] }
0x51e9   :  { %v12467_v56 = vpop.f32.mrf.mxu0 }
0x51ea   :  { %v12468_v24 = vadd.f32 %v14787_v9, %v12467_v56  ;;  %v14803_v9 = vld [vmem:[%s21709_s3 + $0x1d0] ss:$0 sm:$0xff]  ;;  %v13148_v56 = vld [vmem:[%s21709_s3 + $0x300] sm:$0xff] }
0x51eb   :  { %v16981_v28 = vpop.f32.mrf.mxu0 }
0x51ec   :  { %v12471_v13 = vmax.f32 %v12468_v24, 0.0 }
0x51ee   :  { %16991 = vmatmul.mubr.msk.f32.vlgmr.msra.gmra.mxu1 %vm625_vm1, %v12471_v13  ;;  %v13147_v13 = vld [vmem:[%s21709_s3 + $0x2f8] sm:$0xff] }
0x51ef   :  { %17005 = vmatpush3.msra.mxu1 %v12646_v11  ;;  %17012 = vmatprep.mubr.msk.f32.mxu1 %vm17636_vm2, %v17631_v25 }
0x51f0   :  { %17006 = vmatprep.subr.mxu1 %v17631_v25 }
0x51f1   :  { %17007 = vmatpush3.msra.mxu1 %v12645_v22  ;;  %v12638_v53 = vpop.f32.mrf.mxu0  ;;  %v13331_v22 = vld [vmem:[%s21709_s3 + $0x9a8] sm:$0xff] }
0x51f2   :  { %v12639_v63 = vadd.f32 %v14791_v34, %v12638_v53  ;;  %17008 = vmatprep.subr.mxu1 %v17631_v25  ;;  %v13329_v53 = vld [vmem:[%s21709_s3 + $0x998] sm:$0xff] }
0x51f3   :  { %17009 = vmatpush3.msra.mxu1 %v12644_v16  ;;  %v17003_v6 = vpop.f32.mrf.mxu0  ;;  %v13330_v16 = vld [vmem:[%s21709_s3 + $0x9a0] sm:$0xff] }
0x51f4   :  { %v12642_v0 = vmax.f32 %v12639_v63, 0.0  ;;  %17010 = vmatprep.subr.mxu1 %v17631_v25  ;;  %v13328_v63 = vld [vmem:[%s21709_s3 + $0x990] sm:$0xff]  ;;  %v13424_v6 = vld [vmem:[%s21709_s3 + $0x9e8] sm:$0xff] }
0x51f5   :  { %17011 = vmatpush3.msra.mxu1 %v12643_v54  ;;  %v13232_v54 = vld [vmem:[%s21709_s3 + $0x388] sm:$0xff] }
0x51f6   :  { %17026 = vmatprep.subr.mxu1 %v17631_v25  ;;  %17013 = vmatmul.mubr.msk.f32.vlgmr.msra.gmra.mxu1 %vm625_vm1, %v12642_v0  ;;  %v13423_v0 = vld [vmem:[%s21709_s3 + $0x9e0] sm:$0xff] }
0x51f7   :  { %17027 = vmatpush3.msra.mxu1 %v12814_v14  ;;  %17034 = vmatprep.mubr.msk.f32.mxu1 %vm17636_vm2, %v17631_v25  ;;  %v14801_v14 = vld [vmem:[%s21709_s3 + $0x208] ss:$0 sm:$0xff] }
0x51f8   :  { %17028 = vmatprep.subr.mxu1 %v17631_v25 }
0x51f9   :  { %17029 = vmatpush3.msra.mxu1 %v12813_v47 }
0x51fa   :  { %17030 = vmatprep.subr.mxu1 %v17631_v25 }
0x51fb   :  { %17031 = vmatpush3.msra.mxu1 %v12812_v61 }
0x51fc   :  { %17032 = vmatprep.subr.mxu1 %v17631_v25 }
0x51fd   :  { %17033 = vmatpush3.msra.mxu1 %v12811_v3 }
0x51fe   :  { %17035 = vmatmul.mubr.msk.f32.vlgmr.msra.gmra.mxu1 %vm625_vm1, %v21188_v32  ;;  %17048 = vmatprep.subr.mxu1 %v17631_v25  ;;  %v12727_v32 = vld [vmem:[%s21709_s3 + $0x340] sm:$0xff] }
0x51ff   :  { %17056 = vmatprep.mubr.msk.f32.mxu1 %vm17636_vm2, %v17631_v25  ;;  %17020 = vmatpush3.msra.mxu0 %v12727_v32 }
0x5200   :  { %17021 = vmatprep.subr.mxu0 %v17631_v25  ;;  %17049 = vmatpush3.msra.mxu1 %v12980_v37 }
0x5201   :  { %17022 = vmatpush3.msra.mxu0 %v12726_v52  ;;  %17050 = vmatprep.subr.mxu1 %v17631_v25 }
0x5202   :  { %17037 = vmatprep.subr.mxu0 %v17631_v25  ;;  %17051 = vmatpush3.msra.mxu1 %v12979_v44 }
0x5203   :  { %17052 = vmatprep.subr.mxu1 %v17631_v25 }
0x52ae   :  { %v21376_v48 = vpop.f32.mrf.mxu1 }
0x52b0   :  { %v16992_v30 = vpop.f32.mrf.mxu1 }
0x52b6   :  { %v12721_v12 = vpop.f32.mrf.mxu1 }
0x52b7   :  { %v12722_v36 = vadd.f32 %v14793_v23, %v12721_v12  ;;  %v14809_v12 = vld [vmem:[%s21709_s3 + $0x988] ss:$0 sm:$0xff] }
0x52b8   :  { %v17014_v27 = vpop.f32.mrf.mxu1 }
0x52b9   :  { %v12725_v4 = vmax.f32 %v12722_v36, 0.0 }
0x52bb   :  { %17024 = vmatmul.mubr.msk.f32.vlgmr.msra.gmra.mxu0 %vm625_vm1, %v12725_v4 }
0x52bc   :  { %17038 = vmatpush3.msra.mxu0 %v12897_v18  ;;  %17045 = vmatprep.mubr.msk.f32.mxu0 %vm17636_vm2, %v17631_v25 }
0x52bd   :  { %17039 = vmatprep.subr.mxu0 %v17631_v25 }
0x52be   :  { %v12889_v35 = vpop.f32.mrf.mxu1  ;;  %17040 = vmatpush3.msra.mxu0 %v12896_v58 }
0x52bf   :  { %v12890_v55 = vadd.f32 %v14797_v2, %v12889_v35  ;;  %17041 = vmatprep.subr.mxu0 %v17631_v25  ;;  %v13841_v35 = vld [vmem:[%s21709_s3 + $0x1b0] sm:$0xff] }
0x52c0   :  { %v17036_v46 = vpop.f32.mrf.mxu1  ;;  %17042 = vmatpush3.msra.mxu0 %v12895_v5 }
0x52c1   :  { %v12893_v10 = vmax.f32 %v12890_v55, 0.0  ;;  %17043 = vmatprep.subr.mxu0 %v17631_v25  ;;  %v14807_v55 = vld [vmem:[%s21709_s3 + $0x210] ss:$0 sm:$0xff] }
0x52c2   :  { %17044 = vmatpush3.msra.mxu0 %v12894_v29 }
0x52c3   :  { %17046 = vmatmul.mubr.msk.f32.vlgmr.msra.gmra.mxu0 %vm625_vm1, %v12893_v10  ;;  %17059 = vmatprep.subr.mxu0 %v17631_v25 }
0x52c4   :  { %17060 = vmatpush3.msra.mxu0 %v13067_v49  ;;  %17067 = vmatprep.mubr.msk.f32.mxu0 %vm17636_vm2, %v17631_v25 }
0x52c5   :  { %17061 = vmatprep.subr.mxu0 %v17631_v25 }
0x52c6   :  { %17062 = vmatpush3.msra.mxu0 %v13066_v43 }
0x52c7   :  { %17063 = vmatprep.subr.mxu0 %v17631_v25 }
0x52c8   :  { %17064 = vmatpush3.msra.mxu0 %v13065_v33 }
0x52c9   :  { %17065 = vmatprep.subr.mxu0 %v17631_v25 }
0x52ca   :  { %17066 = vmatpush3.msra.mxu0 %v13064_v31 }
0x52cb   :  { %17068 = vmatmul.mubr.msk.f32.vlgmr.msra.gmra.mxu0 %vm625_vm1, %v21194_v21  ;;  %17081 = vmatprep.subr.mxu0 %v17631_v25  ;;  %v12978_v21 = vld [vmem:[%s21709_s3 + $0x360] sm:$0xff] }
0x52cc   :  { %17089 = vmatprep.mubr.msk.f32.mxu0 %vm17636_vm2, %v17631_v25  ;;  %17053 = vmatpush3.msra.mxu1 %v12978_v21 }
0x52cd   :  { %17054 = vmatprep.subr.mxu1 %v17631_v25 }
0x52ce   :  { %17055 = vmatpush3.msra.mxu1 %v12977_v20 }
0x52cf   :  { %17070 = vmatprep.subr.mxu1 %v17631_v25 }
0x537b   :  { %v12804_v39 = vpop.f32.mrf.mxu0 }
0x537c   :  { %v12805_v8 = vadd.f32 %v14795_v57, %v12804_v39 }
0x537d   :  { %v17025_v19 = vpop.f32.mrf.mxu0 }
0x537e   :  { %13313 = vrot.lane.b32.xlu1 %v12805_v8, %s17639_s28  ;;  %v13840_v8 = vld [vmem:[%s21709_s3 + $0x1a8] sm:$0xff] }
0x5383   :  { %v12972_v60 = vpop.f32.mrf.mxu0 }
0x5384   :  { %v12973_v59 = vadd.f32 %v14799_v1, %v12972_v60  ;;  %v14789_v60 = vld [vmem:[%s21709_s3 + $0x1f8] ss:$0 sm:$0xff] }
0x5385   :  { %v17047_v41 = vpop.f32.mrf.mxu0 }
0x5386   :  { %v12976_v7 = vmax.f32 %v12973_v59, 0.0  ;;  %v12551_v41 = vadd.f32 %v14789_v60, %v21376_v48 }
0x5388   :  { %17057 = vmatmul.mubr.msk.f32.vlgmr.msra.gmra.mxu1 %vm625_vm1, %v12976_v7 }
0x5389   :  { %17071 = vmatpush3.msra.mxu1 %v13150_v15  ;;  %17078 = vmatprep.mubr.msk.f32.mxu1 %vm17636_vm2, %v17631_v25  ;;  %v13693_v15 = vld [vmem:[%s21709_s3 + $0x9d0] sm:$0xff] }
0x538a   :  { %17072 = vmatprep.subr.mxu1 %v17631_v25 }
0x538b   :  { %17073 = vmatpush3.msra.mxu1 %v13149_v50  ;;  %v13142_v24 = vpop.f32.mrf.mxu0  ;;  %v13692_v50 = vld [vmem:[%s21709_s3 + $0x9c8] sm:$0xff] }
0x538c   :  { %v13143_v28 = vadd.f32 %v14803_v9, %v13142_v24  ;;  %17074 = vmatprep.subr.mxu1 %v17631_v25 }
0x538d   :  { %17075 = vmatpush3.msra.mxu1 %v13148_v56  ;;  %v17069_v11 = vpop.f32.mrf.mxu0  ;;  %v13691_v56 = vld [vmem:[%s21709_s3 + $0x9c0] sm:$0xff] }
0x538e   :  { %v13146_v34 = vmax.f32 %v13143_v28, 0.0  ;;  %17076 = vmatprep.subr.mxu1 %v17631_v25  ;;  %v13833_v11 = vld [vmem:[%s21709_s3 + $0x130] sm:$0xff] }
0x538f   :  { %17077 = vmatpush3.msra.mxu1 %v13147_v13  ;;  %v13832_v13 = vld [vmem:[%s21709_s3 + $0x128] sm:$0xff] }
0x5390   :  { %17092 = vmatprep.subr.mxu1 %v13331_v22  ;;  %17079 = vmatmul.mubr.msk.f32.vlgmr.msra.gmra.mxu1 %vm625_vm1, %v13146_v34 }
0x5391   :  { %17093 = vmatpush3.msra.mxu1 %v13331_v22  ;;  %17100 = vmatprep.mubr.msk.f32.mxu1 %vm625_vm1, %v21008_v42  ;;  %v13233_v42 = vld [vmem:[%s21709_s3 + $0x390] sm:$0xff]  ;;  %v13690_v22 = vld [vmem:[%s21709_s3 + $0x9b8] sm:$0xff] }
0x5392   :  { %17094 = vmatprep.subr.mxu1 %v13330_v16  ;;  %17082 = vmatpush3.msra.mxu0 %v13233_v42 }
0x5393   :  { %17095 = vmatpush3.msra.mxu1 %v13330_v16  ;;  %17083 = vmatprep.subr.mxu0 %v17631_v25  ;;  %v13834_v16 = vld [vmem:[%s21709_s3 + $0x138] sm:$0xff] }
0x5394   :  { %17096 = vmatprep.subr.mxu1 %v13329_v53  ;;  %17084 = vmatpush3.msra.mxu0 %v13232_v54  ;;  %v13835_v54 = vld [vmem:[%s21709_s3 + $0x140] sm:$0xff] }
0x5395   :  { %17097 = vmatpush3.msra.mxu1 %v13329_v53  ;;  %17085 = vmatprep.subr.mxu0 %v17631_v25 }
0x5396   :  { %17098 = vmatprep.subr.mxu1 %v13328_v63 }
0x5397   :  { %17099 = vmatpush3.msra.mxu1 %v13328_v63 }
0x5398   :  { %17101 = vmatmul.mubr.msk.f32.vlgmr.msra.gmra.mxu1 %vm625_vm1, %v21006_v38  ;;  %v13231_v38 = vld [vmem:[%s21709_s3 + $0x380] sm:$0xff] }
0x5399   :  { %17103 = vmatprep.mubr.msk.f32.mxu1 %vm625_vm1, %v21027_v26  ;;  %17086 = vmatpush3.msra.mxu0 %v13231_v38  ;;  %v13425_v26 = vld [vmem:[%s21709_s3 + $0x9f0] sm:$0xff] }
0x539a   :  { %17087 = vmatprep.subr.mxu0 %v17631_v25  ;;  %17120 = vmatprep.subr.mxu1 %v13425_v26  ;;  %v13422_v25 = vld [vmem:[%s21709_s3 + $0x9d8] sm:$0xff] }
0x539b   :  { %17121 = vmatpush3.msra.mxu1 %v13425_v26 }
0x539c   :  { %17104 = vmatmul.mubr.msk.f32.gmra.mxu1 %vm625_vm1, %v21025_v40  ;;  %v13230_v40 = vld [vmem:[%s21709_s3 + $0x378] sm:$0xff]  ;;  %17122 = vmatprep.subr.mxu1 %v13424_v6 }
0x539d   :  { %17088 = vmatpush3.msra.mxu0 %v13230_v40  ;;  %17123 = vmatpush3.msra.mxu1 %v13424_v6 }
0x539e   :  { %17106 = vmatprep.subr.mxu0 %v13425_v26  ;;  %17124 = vmatprep.subr.mxu1 %v13423_v0 }
0x539f   :  { %17125 = vmatpush3.msra.mxu1 %v13423_v0 }
0x53a0   :  { %17126 = vmatprep.subr.mxu1 %v13422_v25 }
0x53a1   :  { %17127 = vmatpush3.msra.mxu1 %v13422_v25 }
0x53a2   :  { %17148 = vmatprep.subr.mxu1 %v13841_v35 }
0x53f0   :  { %v13314_v59 = vpop.permute.xlu1 %13313 }
0x53f1   :  { %v13325_v9 = vsel %vm13324_vm13, %v12551_v41, %v13314_v59 }
0x5448   :  { %v13055_v47 = vpop.f32.mrf.mxu1 }
0x5449   :  { %v13056_v61 = vadd.f32 %v14801_v14, %v13055_v47  ;;  %v13839_v47 = vld [vmem:[%s21709_s3 + $0x160] sm:$0xff] }
0x544a   :  { %v17058_v3 = vpop.f32.mrf.mxu1 }
0x544b   :  { %13317 = vrot.lane.b32.xlu0 %v13056_v61, %s17640_s14 }
0x5450   :  { %v13225_v51 = vpop.f32.mrf.mxu1 }
0x5451   :  { %v13226_v32 = vadd.f32 %v14805_v45, %v13225_v51 }
0x5452   :  { %v17080_v52 = vpop.f32.mrf.mxu1 }
0x5453   :  { %v13229_v30 = vmax.f32 %v13226_v32, 0.0 }
0x5455   :  { %17090 = vmatmul.mubr.msk.f32.vlgmr.msra.gmra.mxu0 %vm625_vm1, %v13229_v30 }
0x5456   :  { %17107 = vmatpush3.msra.mxu0 %v13425_v26  ;;  %v13837_v26 = vld [vmem:[%s21709_s3 + $0x150] sm:$0xff] }
0x5457   :  { %17108 = vmatprep.subr.mxu0 %v13424_v6 }
0x5458   :  { %v17102_v23 = vpop.f32.mrf.mxu1  ;;  %17109 = vmatpush3.msra.mxu0 %v13424_v6  ;;  %v13838_v6 = vld [vmem:[%s21709_s3 + $0x158] sm:$0xff] }
0x5459   :  { %17110 = vmatprep.subr.mxu0 %v13423_v0  ;;  %v13409_v4 = vadd.f32 %v17102_v23, %v14809_v12 }
0x545a   :  { %v13403_v36 = vpop.f32.mrf.mxu1  ;;  %17111 = vmatpush3.msra.mxu0 %v13423_v0 }
0x545b   :  { %v13404_v27 = vadd.f32 %v14809_v12, %v13403_v36  ;;  %17112 = vmatprep.subr.mxu0 %v13422_v25 }
0x545c   :  { %v17105_v18 = vpop.f32.mrf.mxu1  ;;  %17113 = vmatpush3.msra.mxu0 %v13422_v25 }
0x545d   :  { %17114 = vmatprep.mubr.msk.f32.mxu0 %vm625_vm1, %v13404_v27  ;;  %v13419_v5 = vadd.f32 %v17105_v18, %v14809_v12  ;;  %17134 = vmatprep.subr.mxu0 %v13693_v15 }
0x545e   :  { %v13413_v58 = vpop.f32.mrf.mxu1  ;;  %17115 = vmatmul.mubr.msk.f32.vlgmr.msra.gmra.mxu0 %vm625_vm1, %v13409_v4 }
0x545f   :  { %v13414_v2 = vadd.f32 %v14809_v12, %v13413_v58  ;;  %17135 = vmatpush3.msra.mxu0 %v13693_v15 }
0x5460   :  { %17136 = vmatprep.subr.mxu0 %v13692_v50 }
0x5461   :  { %17117 = vmatprep.mubr.msk.f32.mxu0 %vm625_vm1, %v13414_v2  ;;  %17137 = vmatpush3.msra.mxu0 %v13692_v50 }
0x5462   :  { %17118 = vmatmul.mubr.msk.f32.gmra.mxu0 %vm625_vm1, %v13419_v5  ;;  %17138 = vmatprep.subr.mxu0 %v13691_v56 }
0x5463   :  { %17139 = vmatpush3.msra.mxu0 %v13691_v56 }
0x5464   :  { %17140 = vmatprep.subr.mxu0 %v13690_v22 }
0x5465   :  { %17141 = vmatpush3.msra.mxu0 %v13690_v22 }
0x54bd   :  { %v13318_v7 = vpop.permute.xlu0 %13317 }
0x54be   :  { %v13326_v24 = vsel %vm6056_vm10, %v13325_v9, %v13318_v7 }
0x5515   :  { %v13308_v29 = vpop.f32.mrf.mxu0 }
0x5516   :  { %v13309_v46 = vadd.f32 %v14807_v55, %v13308_v29  ;;  %v14822_v55 = vld [vmem:[%s21709_s3 + $0xa00] ss:$0 sm:$0xff] }
0x5517   :  { %v17091_v10 = vpop.f32.mrf.mxu0 }
0x5518   :  { %13321 = vrot.lane.b32.xlu1 %v13309_v46, %s17641_s23  ;;  %v14823_v10 = vld [vmem:[%s21709_s3 + $0x9f8] ss:$0 sm:$0xff] }
0x551e   :  { %v17116_v49 = vpop.f32.mrf.mxu0 }
0x551f   :  { %v21537_v43 = vsub.f32 %v13409_v4, %v17116_v49 }
0x5520   :  { %v13504_v33 = vpop.f32.mrf.mxu0 }
0x5521   :  { %v21539_v31 = vsub.f32 %v13404_v27, %v13504_v33  ;;  %v13528_v21 = vmul.f32 %v21537_v43, %v21537_v43 }
0x5522   :  { %v17119_v37 = vpop.f32.mrf.mxu0 }
0x5523   :  { %v13527_v44 = vmul.f32 %v21539_v31, %v21539_v31  ;;  %v21545_v20 = vsub.f32 %v13419_v5, %v17119_v37 }
0x5524   :  { %v13514_v57 = vpop.f32.mrf.mxu0 }
0x5525   :  { %v21547_v39 = vsub.f32 %v13414_v2, %v13514_v57  ;;  %17128 = vmatprep.mubr.msk.f32.mxu1 %vm625_vm1, %v13527_v44  ;;  %v13530_v1 = vmul.f32 %v21545_v20, %v21545_v20 }
0x5526   :  { %17129 = vmatmul.mubr.msk.f32.vlgmr.msra.gmra.mxu1 %vm625_vm1, %v13528_v21 }
0x5527   :  { %v13529_v19 = vmul.f32 %v21547_v39, %v21547_v39  ;;  %17149 = vmatpush3.msra.mxu1 %v13841_v35 }
0x5528   :  { %17150 = vmatprep.subr.mxu1 %v13840_v8 }
0x5529   :  { %17131 = vmatprep.mubr.msk.f32.mxu1 %vm625_vm1, %v13529_v19  ;;  %17151 = vmatpush3.msra.mxu1 %v13840_v8 }
0x552a   :  { %17132 = vmatmul.mubr.msk.f32.gmra.mxu1 %vm625_vm1, %v13530_v1  ;;  %17183 = vmatprep.subr.mxu1 %v13841_v35 }
0x558a   :  { %v13322_v28 = vpop.permute.xlu1 %13321 }
0x558b   :  { %v13327_v48 = vsel %vm5221_vm7, %v13326_v24, %v13322_v28 }
0x558c   :  { %v13853_v34 = vrot.slane %v13327_v48, %v18159_v62  ;;  %v13836_v62 = vld [vmem:[%s21709_s3 + $0x148] sm:$0xff]  ;;  %v14083_v25 = vrot.slane %v13327_v48, %v18186_v17 }
0x558e   :  { %v13854_v53 = vmul.f32 %v13853_v34, %v13832_v13  ;;  %v13855_v63 = vmul.f32 %v13853_v34, %v13833_v11  ;;  %v13856_v42 = vmul.f32 %v13853_v34, %v13834_v16  ;;  %v13857_v38 = vmul.f32 %v13853_v34, %v13835_v54 }
0x558f   :  { %v13858_v40 = vmul.f32 %v13853_v34, %v13836_v62  ;;  %v13859_v0 = vmul.f32 %v13853_v34, %v13837_v26  ;;  %v13860_v14 = vmul.f32 %v13853_v34, %v13838_v6  ;;  %v13861_v61 = vmul.f32 %v13853_v34, %v13839_v47 }
0x5590   :  { %17152 = vmatprep.mubr.msk.f32.mxu1 %vm5129_vm5, %v13854_v53  ;;  %v14084_v3 = vmul.f32 %v14083_v25, %v13832_v13  ;;  %v14085_v45 = vmul.f32 %v14083_v25, %v13833_v11  ;;  %v14086_v51 = vmul.f32 %v14083_v25, %v13834_v16  ;;  %v14087_v17 = vmul.f32 %v14083_v25, %v13835_v54 }
0x5591   :  { %17153 = vmatmul.mubr.msk.f32.vlgmr.msra.gmra.mxu1 %vm5129_vm5, %v13855_v63  ;;  %v14088_v32 = vmul.f32 %v14083_v25, %v13836_v62  ;;  %v14089_v52 = vmul.f32 %v14083_v25, %v13837_v26  ;;  %v14090_v30 = vmul.f32 %v14083_v25, %v13838_v6  ;;  %v14091_v23 = vmul.f32 %v14083_v25, %v13839_v47 }
0x5592   :  { %17155 = vmatprep.mubr.msk.f32.mxu1 %vm5129_vm5, %v13856_v42  ;;  %17184 = vmatpush3.msra.mxu1 %v13841_v35 }
0x5593   :  { %17185 = vmatprep.subr.mxu1 %v13840_v8 }
0x5594   :  { %17186 = vmatpush3.msra.mxu1 %v13840_v8 }
0x5595   :  { %17156 = vmatmul.mubr.msk.f32.gmra.mxu1 %vm5129_vm5, %v13857_v38 }
0x5596   :  { %17158 = vmatprep.mubr.msk.f32.mxu1 %vm5129_vm5, %v13858_v40 }
0x5599   :  { %17159 = vmatmul.mubr.msk.f32.gmra.mxu1 %vm5129_vm5, %v13859_v0 }
0x559a   :  { %17161 = vmatprep.mubr.msk.f32.mxu1 %vm5129_vm5, %v13860_v14 }
0x559d   :  { %17162 = vmatmul.mubr.msk.f32.gmra.mxu1 %vm5129_vm5, %v13861_v61 }
0x559e   :  { %17187 = vmatprep.mubr.msk.f32.mxu1 %vm5129_vm5, %v14084_v3 }
0x55a1   :  { %17188 = vmatmul.mubr.msk.f32.vlgmr.msra.gmra.mxu1 %vm5129_vm5, %v14085_v45 }
0x55a2   :  { %17190 = vmatprep.mubr.msk.f32.mxu1 %vm5129_vm5, %v14086_v51 }
0x55a5   :  { %17191 = vmatmul.mubr.msk.f32.gmra.mxu1 %vm5129_vm5, %v14087_v17 }
0x55a6   :  { %17193 = vmatprep.mubr.msk.f32.mxu1 %vm5129_vm5, %v14088_v32 }
0x55a9   :  { %17194 = vmatmul.mubr.msk.f32.gmra.mxu1 %vm5129_vm5, %v14089_v52 }
0x55aa   :  { %17196 = vmatprep.mubr.msk.f32.mxu1 %vm5129_vm5, %v14090_v30 }
0x55ad   :  { %17197 = vmatmul.mubr.msk.f32.gmra.mxu1 %vm5129_vm5, %v14091_v23 }
0x55e6   :  { %v17130_v12 = vpop.f32.mrf.mxu1 }
0x55e7   :  { %v13615_v36 = vadd.f32 1e-06, %v17130_v12 }
0x55e8   :  { %v13609_v27 = vpop.f32.mrf.mxu1 }
0x55e9   :  { %17563 = vrsqrt.f32 %v13615_v36  ;;  %v13610_v4 = vadd.f32 1e-06, %v13609_v27 }
0x55ea   :  { %v17133_v18 = vpop.f32.mrf.mxu1 }
0x55eb   :  { %17565 = vrsqrt.f32 %v13610_v4  ;;  %v13625_v58 = vadd.f32 1e-06, %v17133_v18  ;;  %v13849_v18 = vld [vmem:[%s21709_s3 + $0x1a0] sm:$0xff] }
0x55ec   :  { %v13619_v2 = vpop.f32.mrf.mxu1 }
0x55ed   :  { %17567 = vrsqrt.f32 %v13625_v58  ;;  %v13620_v5 = vadd.f32 1e-06, %v13619_v2  ;;  %v21640_v2 = vld [vmem:[%s21709_s3 + $0x198] sm:$0xff] }
0x55ef   :  { %17569 = vrsqrt.f32 %v13620_v5 }
0x55f6   :  { %v17564_v35 = vpop.eup %17563 }
0x55f7   :  { %v13633_v29 = vmul.f32 %v17564_v35, %v21537_v43  ;;  %v13847_v35 = vld [vmem:[%s21709_s3 + $0x190] sm:$0xff] }
0x55f8   :  { %v17566_v46 = vpop.eup %17565 }
0x55f9   :  { %v13642_v49 = vmul.f32 %v14822_v55, %v13633_v29  ;;  %v13632_v33 = vmul.f32 %v17566_v46, %v21539_v31  ;;  %v13843_v46 = vld [vmem:[%s21709_s3 + $0x170] sm:$0xff] }
0x55fa   :  { %v17568_v37 = vpop.eup %17567 }
0x55fb   :  { %v13651_v44 = vadd.f32 %v14823_v10, %v13642_v49  ;;  %v13641_v21 = vmul.f32 %v14822_v55, %v13632_v33  ;;  %v13635_v57 = vmul.f32 %v17568_v37, %v21545_v20 }
0x55fc   :  { %v17570_v8 = vpop.eup %17569 }
0x55fd   :  { %v13655_v19 = vmul.f32 %v13651_v44, %v13651_v44  ;;  %v13644_v1 = vmul.f32 %v14822_v55, %v13635_v57  ;;  %v13634_v60 = vmul.f32 %v17570_v8, %v21547_v39  ;;  %v13650_v59 = vadd.f32 %v14823_v10, %v13641_v21  ;;  %v13845_v21 = vld [vmem:[%s21709_s3 + $0x180] sm:$0xff] }
0x55ff   :  { %v13659_v43 = vmul.f32 %v13655_v19, %v13651_v44  ;;  %v13653_v41 = vadd.f32 %v14823_v10, %v13644_v1  ;;  %v13643_v7 = vmul.f32 %v14822_v55, %v13634_v60  ;;  %v13654_v15 = vmul.f32 %v13650_v59, %v13650_v59  ;;  %v13844_v1 = vld [vmem:[%s21709_s3 + $0x178] sm:$0xff] }
0x5601   :  { %v13663_v50 = vmul.f32 0.044715, %v13659_v43  ;;  %v13658_v9 = vmul.f32 %v13654_v15, %v13650_v59  ;;  %v13652_v56 = vadd.f32 %v14823_v10, %v13643_v7  ;;  %v13657_v24 = vmul.f32 %v13653_v41, %v13653_v41  ;;  %v13846_v10 = vld [vmem:[%s21709_s3 + $0x188] sm:$0xff] }
0x5603   :  { %v13667_v31 = vadd.f32 %v13663_v50, %v13651_v44  ;;  %v13662_v28 = vmul.f32 0.044715, %v13658_v9  ;;  %v13656_v48 = vmul.f32 %v13652_v56, %v13652_v56  ;;  %v13661_v13 = vmul.f32 %v13657_v24, %v13653_v41 }
0x5605   :  { %v13671_v11 = vmul.f32 0.7978846, %v13667_v31  ;;  %v13666_v20 = vadd.f32 %v13662_v28, %v13650_v59  ;;  %v13660_v22 = vmul.f32 %v13656_v48, %v13652_v56  ;;  %v13665_v34 = vmul.f32 0.044715, %v13661_v13 }
0x5607   :  { %17571 = vtanh.f32 %v13671_v11  ;;  %v13670_v16 = vmul.f32 0.7978846, %v13666_v20  ;;  %v13664_v39 = vmul.f32 0.044715, %v13660_v22  ;;  %v13669_v53 = vadd.f32 %v13665_v34, %v13653_v41  ;;  %v14824_v11 = vld [vmem:[%s21709_s3 + $0x9b0] ss:$0 sm:$0xff] }
0x5609   :  { %17573 = vtanh.f32 %v13670_v16  ;;  %v13668_v63 = vadd.f32 %v13664_v39, %v13652_v56  ;;  %v13673_v42 = vmul.f32 0.7978846, %v13669_v53 }
0x560b   :  { %v13672_v54 = vmul.f32 0.7978846, %v13668_v63  ;;  %17575 = vtanh.f32 %v13673_v42 }
0x560d   :  { %17577 = vtanh.f32 %v13672_v54 }
0x5614   :  { %v17572_v62 = vpop.eup %17571 }
0x5615   :  { %v13679_v38 = vadd.f32 1.0, %v17572_v62 }
0x5616   :  { %v17574_v40 = vpop.eup %17573 }
0x5617   :  { %v13678_v26 = vadd.f32 1.0, %v17574_v40  ;;  %v13683_v0 = vmul.f32 0.5, %v13679_v38 }
0x5618   :  { %v17576_v6 = vpop.eup %17575 }
0x5619   :  { %v13682_v25 = vmul.f32 0.5, %v13678_v26  ;;  %v13681_v14 = vadd.f32 1.0, %v17576_v6  ;;  %v13687_v45 = vmul.f32 %v13683_v0, %v13651_v44  ;;  %v13842_v44 = vld [vmem:[%s21709_s3 + $0x168] sm:$0xff]  ;;  %s17642_s3 = smov [#allocation2]  }
0x561a   :  { %v17578_v47 = vpop.eup %17577  ;;  %s14330_s0 = sshll.u32 %s17642_s3, 4  ;;  %s14331_s0 = int_to_ptr.vmem [resolvable:$true] %s14330_s0 }
0x561b   :  { %v13686_v61 = vmul.f32 %v13682_v25, %v13650_v59  ;;  %v13680_v3 = vadd.f32 1.0, %v17578_v47  ;;  %v13685_v51 = vmul.f32 0.5, %v13681_v14  ;;  %s17609_s22 = scalar_lea.vmem %s14331_s0, 32  ;;  %p17614_p1 = scmp.lt.s32.totalorder %s14331_s0, %s14331_s0 }
0x561c   :  { %p17610_p0 = scmp.ne.s32.totalorder %s14331_s0, %s17609_s22  ;;  %p17615_p2 = scmp.lt.s32.totalorder %s17609_s22, %s17609_s22 }
0x561d   :  { %17142 = vmatprep.mubr.msk.f32.mxu0 %vm625_vm1, %v13686_v61  ;;  %v13684_v17 = vmul.f32 0.5, %v13680_v3  ;;  %v13689_v52 = vmul.f32 %v13685_v51, %v13653_v41 }
0x561e   :  { %17143 = vmatmul.mubr.msk.f32.vlgmr.msra.gmra.mxu0 %vm625_vm1, %v13687_v45  ;;  %p17616_p3 = por %p17615_p2, %p17614_p1 }
0x561f   :  { %v13688_v32 = vmul.f32 %v13684_v17, %v13652_v56 }
0x5620   :  { %p17617_p4 = pnand %p17616_p3, %p17610_p0 }
0x5621   :  { %17145 = vmatprep.mubr.msk.f32.mxu0 %vm625_vm1, %v13688_v32 }
0x5622   :  { %17146 = vmatmul.mubr.msk.f32.gmra.mxu0 %vm625_vm1, %v13689_v52 }
0x5651   :  { %v17154_v30 = vpop.f32.mrf.mxu1 }
0x5652   :  { %v13992_v9 = vmul.f32 %v17154_v30, %v13843_v46 }
0x5653   :  { %v13952_v23 = vpop.f32.mrf.mxu1 }
0x5654   :  { %v13991_v31 = vmul.f32 %v13952_v23, %v13842_v44 }
0x5655   :  { %v17157_v12 = vpop.f32.mrf.mxu1 }
0x5656   :  { %v13994_v59 = vmul.f32 %v17157_v12, %v13845_v21 }
0x5657   :  { %v13962_v36 = vpop.f32.mrf.mxu1 }
0x5658   :  { %v13993_v7 = vmul.f32 %v13962_v36, %v13844_v1 }
0x5659   :  { %v17160_v27 = vpop.f32.mrf.mxu1 }
0x565a   :  { %v13996_v33 = vmul.f32 %v17160_v27, %v13847_v35 }
0x565b   :  { %v13972_v4 = vpop.f32.mrf.mxu1 }
0x565c   :  { %v13995_v8 = vmul.f32 %v13972_v4, %v13846_v10 }
0x565d   :  { %v17163_v58 = vpop.f32.mrf.mxu1 }
0x565e   :  { %v13998_v5 = vmul.f32 %v17163_v58, %v13849_v18 }
0x565f   :  { %v13982_v55 = vpop.f32.mrf.mxu1 }
0x5660   :  { %v13997_v29 = vmul.f32 %v13982_v55, %v21640_v2  ;;  %17164 = vmatprep.subr.mxu0 %v13998_v5 }
0x5661   :  { %17165 = vmatpush3.msra.mxu0 %v13998_v5  ;;  %v17189_v49 = vpop.f32.mrf.mxu1 }
0x5662   :  { %v21652_v37 = vmul.f32 %v17189_v49, %v13843_v46  ;;  %17166 = vmatprep.subr.mxu0 %v13997_v29 }
0x5663   :  { %17167 = vmatpush3.msra.mxu0 %v13997_v29  ;;  %v14182_v57 = vpop.f32.mrf.mxu1 }
0x5664   :  { %v21660_v19 = vmul.f32 %v14182_v57, %v13842_v44  ;;  %17168 = vmatprep.subr.mxu0 %v13996_v33 }
0x5665   :  { %17169 = vmatpush3.msra.mxu0 %v13996_v33  ;;  %v17192_v60 = vpop.f32.mrf.mxu1 }
0x5666   :  { %v21665_v43 = vmul.f32 %v17192_v60, %v13845_v21  ;;  %17170 = vmatprep.subr.mxu0 %v13995_v8 }
0x5667   :  { %17171 = vmatpush3.msra.mxu0 %v13995_v8  ;;  %v14192_v41 = vpop.f32.mrf.mxu1 }
0x5668   :  { %v21667_v15 = vmul.f32 %v14192_v41, %v13844_v1  ;;  %17172 = vmatprep.subr.mxu0 %v13994_v59 }
0x5669   :  { %17173 = vmatpush3.msra.mxu0 %v13994_v59  ;;  %v17195_v50 = vpop.f32.mrf.mxu1 }
0x566a   :  { %v21669_v56 = vmul.f32 %v17195_v50, %v13847_v35  ;;  %17174 = vmatprep.subr.mxu0 %v13993_v7 }
0x566b   :  { %17175 = vmatpush3.msra.mxu0 %v13993_v7  ;;  %v14202_v24 = vpop.f32.mrf.mxu1 }
0x566c   :  { %v21671_v28 = vmul.f32 %v14202_v24, %v13846_v10  ;;  %17176 = vmatprep.subr.mxu0 %v13992_v9 }
0x566d   :  { %17177 = vmatpush3.msra.mxu0 %v13992_v9  ;;  %v17198_v48 = vpop.f32.mrf.mxu1 }
0x566e   :  { %v14228_v13 = vmul.f32 %v17198_v48, %v13849_v18  ;;  %17178 = vmatprep.subr.mxu0 %v13991_v31 }
0x566f   :  { %17179 = vmatpush3.msra.mxu0 %v13991_v31  ;;  %v14212_v55 = vpop.f32.mrf.mxu1 }
0x5670   :  { %17199 = vmatprep.subr.mxu0 %v14228_v13  ;;  %v14227_v33 = vmul.f32 %v14212_v55, %v21640_v2 }
0x56de   :  { %v17144_v20 = vpop.f32.mrf.mxu0 }
0x56df   :  { %v13783_v22 = vadd.f32 %v17144_v20, %v14824_v11 }
0x56e0   :  { %v13777_v34 = vpop.f32.mrf.mxu0 }
0x56e1   :  { %v13797_v16 = vmul.f32 %v13783_v22, %v13783_v22  ;;  %v13778_v39 = vadd.f32 %v14824_v11, %v13777_v34 }
0x56e2   :  { %v17147_v53 = vpop.f32.mrf.mxu0 }
0x56e3   :  { %v13801_v63 = vmul.f32 %v13797_v16, %v13783_v22  ;;  %v13796_v42 = vmul.f32 %v13778_v39, %v13778_v39  ;;  %v13793_v54 = vadd.f32 %v17147_v53, %v14824_v11 }
0x56e4   :  { %v13787_v62 = vpop.f32.mrf.mxu0 }
0x56e5   :  { %v13805_v38 = vmul.f32 0.044715, %v13801_v63  ;;  %v13800_v40 = vmul.f32 %v13796_v42, %v13778_v39  ;;  %v13799_v26 = vmul.f32 %v13793_v54, %v13793_v54  ;;  %v13788_v6 = vadd.f32 %v14824_v11, %v13787_v62 }
0x56e7   :  { %v13809_v0 = vadd.f32 %v13805_v38, %v13783_v22  ;;  %v13804_v25 = vmul.f32 0.044715, %v13800_v40  ;;  %v13798_v14 = vmul.f32 %v13788_v6, %v13788_v6  ;;  %v13803_v47 = vmul.f32 %v13799_v26, %v13793_v54 }
0x56e9   :  { %v13813_v61 = vmul.f32 0.7978846, %v13809_v0  ;;  %v13808_v3 = vadd.f32 %v13804_v25, %v13778_v39  ;;  %v13802_v45 = vmul.f32 %v13798_v14, %v13788_v6  ;;  %v13807_v32 = vmul.f32 0.044715, %v13803_v47 }
0x56eb   :  { %17579 = vtanh.f32 %v13813_v61  ;;  %v13812_v51 = vmul.f32 0.7978846, %v13808_v3  ;;  %v13806_v17 = vmul.f32 0.044715, %v13802_v45  ;;  %v13811_v23 = vadd.f32 %v13807_v32, %v13793_v54 }
0x56ed   :  { %17581 = vtanh.f32 %v13812_v51  ;;  %v13810_v52 = vadd.f32 %v13806_v17, %v13788_v6  ;;  %v13815_v12 = vmul.f32 0.7978846, %v13811_v23 }
0x56ef   :  { %v13814_v30 = vmul.f32 0.7978846, %v13810_v52 }
0x56f1   :  { %17583 = vtanh.f32 %v13814_v30 }
0x56f2   :  { %17585 = vtanh.f32 %v13815_v12 }
0x56f8   :  { %v17580_v36 = vpop.eup %17579 }
0x56f9   :  { %v13821_v27 = vadd.f32 1.0, %v17580_v36 }
0x56fa   :  { %v17582_v4 = vpop.eup %17581 }
0x56fb   :  { %v13820_v18 = vadd.f32 1.0, %v17582_v4  ;;  %v13825_v58 = vmul.f32 0.5, %v13821_v27 }
0x56fd   :  { %v13824_v5 = vmul.f32 0.5, %v13820_v18  ;;  %v13829_v10 = vmul.f32 %v13825_v58, %v13783_v22 }
0x56fe   :  { %v17584_v35 = vpop.eup %17583 }
0x56ff   :  { %v13828_v29 = vmul.f32 %v13824_v5, %v13778_v39  ;;  %v13822_v46 = vadd.f32 1.0, %v17584_v35  ;;  %v17586_v21 = vpop.eup %17585 }
0x5700   :  { %v13823_v57 = vadd.f32 1.0, %v17586_v21 }
0x5701   :  { %17180 = vmatprep.mubr.msk.f32.mxu0 %vm413_vm0, %v13828_v29  ;;  %v13826_v49 = vmul.f32 0.5, %v13822_v46 }
0x5702   :  { %17181 = vmatmul.mubr.msk.f32.vlgmr.msra.gmra.mxu0 %vm413_vm0, %v13829_v10  ;;  %v13827_v2 = vmul.f32 0.5, %v13823_v57 }
0x5703   :  { %17200 = vmatpush3.msra.mxu0 %v14228_v13  ;;  %v13830_v44 = vmul.f32 %v13826_v49, %v13788_v6 }
0x5704   :  { %17201 = vmatprep.subr.mxu0 %v14227_v33  ;;  %v13831_v8 = vmul.f32 %v13827_v2, %v13793_v54 }
0x5705   :  { %17202 = vmatpush3.msra.mxu0 %v14227_v33  ;;  %17215 = vmatprep.mubr.msk.f32.mxu0 %vm413_vm0, %v13830_v44 }
0x5706   :  { %17203 = vmatprep.subr.mxu0 %v21669_v56 }
0x5707   :  { %17204 = vmatpush3.msra.mxu0 %v21669_v56 }
0x5708   :  { %17205 = vmatprep.subr.mxu0 %v21671_v28 }
0x5709   :  { %17206 = vmatpush3.msra.mxu0 %v21671_v28 }
0x570a   :  { %17207 = vmatprep.subr.mxu0 %v21665_v43 }
0x570b   :  { %17208 = vmatpush3.msra.mxu0 %v21665_v43 }
0x570c   :  { %17209 = vmatprep.subr.mxu0 %v21667_v15 }
0x570d   :  { %17210 = vmatpush3.msra.mxu0 %v21667_v15 }
0x570e   :  { %17211 = vmatprep.subr.mxu0 %v21652_v37 }
0x570f   :  { %17212 = vmatpush3.msra.mxu0 %v21652_v37 }
0x5710   :  { %17213 = vmatprep.subr.mxu0 %v21660_v19 }
0x5711   :  { %17214 = vmatpush3.msra.mxu0 %v21660_v19 }
0x5712   :  { %17216 = vmatmul.mubr.msk.f32.vlgmr.msra.gmra.mxu0 %vm413_vm0, %v13831_v8 }
0x5713   :  { %17620 = shalt.err (!%p17617_p4)
}
0x5714   :  { %14333 = dma.vmem_to_hbm [thread:$0]  %s14331_s0, 32, %s21712_s6, [#allocation3]  }
0x57c2   :  { %v17182_v37 = vpop.f32.mrf.mxu0 }
0x57c4   :  { %v14071_v1 = vpop.f32.mrf.mxu0 }
0x57d2   :  { %v17217_v60 = vpop.f32.mrf.mxu0 }
0x57d3   :  { %14314 = vrot.lane.b32.xlu0 %v17217_v60, %s17632_s16 }
0x57d4   :  { %v14301_v19 = vpop.f32.mrf.mxu0 }
0x57d5   :  { %14312 = vrot.lane.b32.xlu1 %v14301_v19, %s17632_s16 }
0x5845   :  { %v14315_v59 = vpop.permute.xlu0 %14314 }
0x5846   :  { %v14319_v43 = vsel %vm413_vm0, %v17182_v37, %v14315_v59 }
0x5847   :  { %14321 = vst [vmem:[%s21711_s5 + $0x8] sm:$0xff] %v14319_v43  ;;  %v14313_v41 = vpop.permute.xlu1 %14312 }
0x5848   :  { %v14318_v7 = vsel %vm413_vm0, %v14071_v1, %v14313_v41 }
0x5849   :  { %14320 = vst [vmem:[%s21711_s5] sm:$0xff] %v14318_v7 }
0x584a   :  { %17629 = dma.done.wait [#allocation3], 32  }
0x584b   :  { %17630 = vsyncadd [#allocation3], 4294967264 }
0x584c   :  { %14339 = vsyncpa [#allocation3], 1 }

</bundles_post_ra>
